<compile_context>
chip_gen: v5e
topology: v5e:2x2
jax: 0.10.0
libtpu: 0.0.40
codegen_flags: <defaults>
</compile_context>

<pallas_src>
import jax
import jax.numpy as jnp
from jax.experimental import pallas as pl
from jax.experimental.pallas import tpu as pltpu

HP, WP = 16, 16                 # padded spatial grid per image
P = HP * WP                     # 256 flattened padded positions per image
BT = 8                          # images per grid step (batch folded into lanes)
LB = BT * P                     # valid lanes per grid step
GUARD = 128                     # zero guard lanes each side (>= 17, lane aligned)
GIN = LB + 2 * GUARD            # extended lane width of input / h1 / h2 buffers
TAP_OFFS = tuple((dy - 1) * WP + (dx - 1) for dy in range(3) for dx in range(3))


def _conv_block_kernel(x_ref, mask_ref, w1_ref, b1_ref, w2_ref, b2_ref,
                       out_ref, col_scr, h1_scr, h2_scr):
    """conv1+BN+ReLU -> conv2+BN+ReLU -> 2x2 max combine; BT images per grid step."""
    # Zero only the guard lanes of the shifted-read scratches; their interiors are
    # fully overwritten below (no full-buffer zero fill).
    h1_scr[:, pl.ds(0, GUARD)] = jnp.zeros((16, GUARD), jnp.bfloat16)
    h1_scr[:, pl.ds(GUARD + LB, GUARD)] = jnp.zeros((16, GUARD), jnp.bfloat16)
    h2_scr[:, pl.ds(0, GUARD)] = jnp.zeros((32, GUARD), jnp.float32)
    h2_scr[:, pl.ds(GUARD + LB, GUARD)] = jnp.zeros((32, GUARD), jnp.float32)

    # conv1: stack the 9 taps along K in the im2col scratch -> one MXU matmul.
    for k, off in enumerate(TAP_OFFS):
        col_scr[pl.ds(16 * k, 16), :] = x_ref[:, pl.ds(GUARD + off, LB)]
    acc1 = jnp.dot(w1_ref[...], col_scr[...], preferred_element_type=jnp.float32)
    h1 = jnp.maximum(acc1 + b1_ref[...], 0.0) * mask_ref[...]     # zero image borders
    h1_scr[:, pl.ds(GUARD, LB)] = h1.astype(jnp.bfloat16)

    # conv2: same im2col scratch reused.
    for k, off in enumerate(TAP_OFFS):
        col_scr[pl.ds(16 * k, 16), :] = h1_scr[:, pl.ds(GUARD + off, LB)]
    acc2 = jnp.dot(w2_ref[...], col_scr[...], preferred_element_type=jnp.float32)
    h2 = jnp.maximum(acc2 + b2_ref[...], 0.0)                     # (32, LB) f32
    h2_scr[:, pl.ds(GUARD, LB)] = h2

    # 2x2 max combine (the stride-2 subsampling happens in the wrapper glue)
    a1 = h2_scr[:, pl.ds(GUARD + 1, LB)]
    a2 = h2_scr[:, pl.ds(GUARD + WP, LB)]
    a3 = h2_scr[:, pl.ds(GUARD + WP + 1, LB)]
    out_ref[...] = jnp.maximum(jnp.maximum(h2, a1), jnp.maximum(a2, a3))


def mod_eight_forward(x, params):
    """x: (N, 16, 14, 14) float32 NCHW. Returns (features (N, 1568), logits (N, 3))."""
    n = x.shape[0]
    nb = -(-n // BT)
    n_pad = nb * BT

    # zero-pad 14x14 -> 16x16, flatten spatial, fold BT images into the lane axis,
    # add the zero lane guards, cast to bf16 for the MXU.
    xp = jnp.pad(x, ((0, n_pad - n), (0, 0), (1, 1), (1, 1)))        # (n_pad,16,16,16)
    xb = (xp.reshape(nb, BT, 16, P)
            .transpose(0, 2, 1, 3)
            .reshape(nb, 16, LB))
    x_ext = jnp.pad(xb, ((0, 0), (0, 0), (GUARD, GUARD))).astype(jnp.bfloat16)

    # interior mask of each padded 16x16 grid (valid rows/cols 1..14), tiled over BT
    v = (jnp.arange(HP) >= 1) & (jnp.arange(HP) <= 14)
    m_img = (v[:, None] & v[None, :]).reshape(P)
    mask = jnp.tile(m_img, (BT,)).astype(jnp.float32).reshape(1, LB)

    pooled_pad = pl.pallas_call(
        _conv_block_kernel,
        out_shape=jax.ShapeDtypeStruct((nb, 32, LB), jnp.float32),
        grid_spec=pltpu.PrefetchScalarGridSpec(
            num_scalar_prefetch=0,
            grid=(nb,),
            in_specs=[
                pl.BlockSpec((None, 16, GIN), lambda i: (i, 0, 0)),
                pl.BlockSpec((1, LB), lambda i: (0, 0)),
                pl.BlockSpec((16, 144), lambda i: (0, 0)),
                pl.BlockSpec((16, 1), lambda i: (0, 0)),
                pl.BlockSpec((32, 144), lambda i: (0, 0)),
                pl.BlockSpec((32, 1), lambda i: (0, 0)),
            ],
            out_specs=pl.BlockSpec((None, 32, LB), lambda i: (i, 0, 0)),
            scratch_shapes=[
                pltpu.VMEM((144, LB), jnp.bfloat16),   # im2col (reused by both convs)
                pltpu.VMEM((16, GIN), jnp.bfloat16),   # h1, guarded for shifted reads
                pltpu.VMEM((32, GIN), jnp.float32),    # h2, guarded for shifted reads
            ],
        ),
        compiler_params=pltpu.CompilerParams(dimension_semantics=("parallel",)),
    )(x_ext, mask, params["w1p"], params["b1"], params["w2p"], params["b2"])

    # MaxPool2d(2,2) = stride-2 subsample of the 2x2-max map; NCHW flatten order
    pooled = (pooled_pad.reshape(nb, 32, BT, HP, WP)
                        .transpose(0, 2, 1, 3, 4)
                        .reshape(n_pad, 32, HP, WP)[:n, :, 1:15:2, 1:15:2])
    feat = pooled.reshape(n, 32 * 7 * 7)

    # classifier: tiny (N,1568)@(1568,3) GEMV in plain jnp (perf review: drop the
    # separate Pallas call and its 3-lane-wide masked stores).
    out = feat @ params["wfc_t"] + params["bfc"]
    return feat, out


def init_params(key):
    ks = jax.random.split(key, 14)
    eps = 1e-5
    # conv1 (PyTorch OIHW) + BN1
    w1 = 0.1 * jax.random.normal(ks[0], (16, 16, 3, 3), jnp.float32)
    b1 = 0.1 * jax.random.normal(ks[1], (16,), jnp.float32)
    g1 = 1.0 + 0.1 * jax.random.normal(ks[2], (16,), jnp.float32)
    be1 = 0.1 * jax.random.normal(ks[3], (16,), jnp.float32)
    m1 = 0.1 * jax.random.normal(ks[4], (16,), jnp.float32)
    v1 = 0.5 + jnp.abs(jax.random.normal(ks[5], (16,), jnp.float32))
    # conv2 + BN2
    w2 = 0.1 * jax.random.normal(ks[6], (32, 16, 3, 3), jnp.float32)
    b2 = 0.1 * jax.random.normal(ks[7], (32,), jnp.float32)
    g2 = 1.0 + 0.1 * jax.random.normal(ks[8], (32,), jnp.float32)
    be2 = 0.1 * jax.random.normal(ks[9], (32,), jnp.float32)
    m2 = 0.1 * jax.random.normal(ks[10], (32,), jnp.float32)
    v2 = 0.5 + jnp.abs(jax.random.normal(ks[11], (32,), jnp.float32))
    # classifier
    wfc = 0.05 * jax.random.normal(ks[12], (3, 32 * 7 * 7), jnp.float32)
    bfc = 0.05 * jax.random.normal(ks[13], (3,), jnp.float32)

    raw = dict(w1=w1, b1=b1, g1=g1, be1=be1, m1=m1, v1=v1,
               w2=w2, b2=b2, g2=g2, be2=be2, m2=m2, v2=v2,
               wfc=wfc, bfc=bfc, eps=eps)

    def fold(w, b, g, be, m, v):          # eval-mode BN folded into conv
        s = g / jnp.sqrt(v + eps)
        return w * s[:, None, None, None], (b - m) * s + be

    w1f, b1f = fold(w1, b1, g1, be1, m1, v1)
    w2f, b2f = fold(w2, b2, g2, be2, m2, v2)
    # taps stacked along K: packed[o, (3*dy+dx)*16 + i] = w[o, i, dy, dx]
    kernel_params = dict(
        w1p=jnp.transpose(w1f, (0, 2, 3, 1)).reshape(16, 144).astype(jnp.bfloat16),
        b1=b1f.reshape(16, 1),
        w2p=jnp.transpose(w2f, (0, 2, 3, 1)).reshape(32, 144).astype(jnp.bfloat16),
        b2=b2f.reshape(32, 1),
        wfc_t=wfc.T,
        bfc=bfc.reshape(1, 3),
    )
    return kernel_params, raw


def reference_forward(x, raw):
    eps = raw["eps"]

    def block(x, w, b, g, be, m, v):
        y = jax.lax.conv_general_dilated(
            x, w, window_strides=(1, 1), padding=((1, 1), (1, 1)),
            dimension_numbers=("NCHW", "OIHW", "NCHW"))
        y = y + b[None, :, None, None]
        y = g[None, :, None, None] * (y - m[None, :, None, None]) \
            / jnp.sqrt(v[None, :, None, None] + eps) + be[None, :, None, None]
        return jnp.maximum(y, 0.0)

    h = block(x, raw["w1"], raw["b1"], raw["g1"], raw["be1"], raw["m1"], raw["v1"])
    h = block(h, raw["w2"], raw["b2"], raw["g2"], raw["be2"], raw["m2"], raw["v2"])
    n = x.shape[0]
    h = h.reshape(n, 32, 7, 2, 7, 2).max(axis=(3, 5))
    feat = h.reshape(n, 32 * 7 * 7)
    out = feat @ raw["wfc"].T + raw["bfc"]
    return feat, out


if __name__ == "__main__":
    key = jax.random.PRNGKey(0)
    kx, kp = jax.random.split(key)
    x = jax.random.normal(kx, (2, 16, 14, 14), jnp.float32)
    kernel_params, raw = init_params(kp)

    feat, out = jax.jit(mod_eight_forward)(x, kernel_params)
    jax.block_until_ready((feat, out))

    feat_ref, out_ref = reference_forward(x, raw)
    assert feat.shape == (2, 32 * 7 * 7) and out.shape == (2, 3)
    if not (jnp.allclose(feat, feat_ref, rtol=2e-2, atol=2e-2)
            and jnp.allclose(out, out_ref, rtol=2e-2, atol=2e-2)):
        raise AssertionError("Pallas output mismatch vs reference")
    print("KERNEL_OK")
</pallas_src>

<mosaic_0001>
module attributes {stable_mosaic.version = 11 : i64} {
  func.func @_conv_block_kernel(%arg0: i32, %arg1: memref<1x16x2304xbf16, #tpu.memory_space<vmem>>, %arg2: memref<1x2048xf32, #tpu.memory_space<vmem>>, %arg3: memref<16x144xbf16, #tpu.memory_space<vmem>>, %arg4: memref<16x1xf32, #tpu.memory_space<vmem>>, %arg5: memref<32x144xbf16, #tpu.memory_space<vmem>>, %arg6: memref<32x1xf32, #tpu.memory_space<vmem>>, %arg7: memref<1x32x2048xf32, #tpu.memory_space<vmem>>, %arg8: memref<144x2048xbf16, #tpu.memory_space<vmem>>, %arg9: memref<16x2304xbf16, #tpu.memory_space<vmem>>, %arg10: memref<32x2304xf32, #tpu.memory_space<vmem>>) attributes {dimension_semantics = [#tpu.dimension_semantics<parallel>], iteration_bounds = array<i64: 1>, scalar_prefetch = 0 : i64, scratch_operands = 3 : i64, tpu.core_type = #tpu.core_type<tc>, window_params = [{transform_indices = @transform_0, window_bounds = array<i64: 1, 16, 2304>}, {pipeline_mode = #tpu.pipeline_mode<synchronous>, transform_indices = @transform_1, window_bounds = array<i64: 1, 2048>}, {pipeline_mode = #tpu.pipeline_mode<synchronous>, transform_indices = @transform_2, window_bounds = array<i64: 16, 144>}, {pipeline_mode = #tpu.pipeline_mode<synchronous>, transform_indices = @transform_3, window_bounds = array<i64: 16, 1>}, {pipeline_mode = #tpu.pipeline_mode<synchronous>, transform_indices = @transform_4, window_bounds = array<i64: 32, 144>}, {pipeline_mode = #tpu.pipeline_mode<synchronous>, transform_indices = @transform_5, window_bounds = array<i64: 32, 1>}, {transform_indices = @transform_6, window_bounds = array<i64: 1, 32, 2048>}]} {
    %cst = arith.constant 0.000000e+00 : bf16
    %0 = vector.broadcast %cst : bf16 to vector<16x128xbf16>
    %c0 = arith.constant 0 : index
    %c0_0 = arith.constant 0 : index
    %1 = vector.load %arg9[%c0, %c0_0] : memref<16x2304xbf16, #tpu.memory_space<vmem>>, vector<16x128xbf16>
    tpu.vector_store %arg9[%c0, %c0_0], %0 {strides = array<i32>} : memref<16x2304xbf16, #tpu.memory_space<vmem>>, vector<16x128xbf16>,
    %cst_1 = arith.constant 0.000000e+00 : bf16
    %2 = vector.broadcast %cst_1 : bf16 to vector<16x128xbf16>
    %c0_2 = arith.constant 0 : index
    %c2176 = arith.constant 2176 : index
    %3 = vector.load %arg9[%c0_2, %c2176] : memref<16x2304xbf16, #tpu.memory_space<vmem>>, vector<16x128xbf16>
    tpu.vector_store %arg9[%c0_2, %c2176], %2 {strides = array<i32>} : memref<16x2304xbf16, #tpu.memory_space<vmem>>, vector<16x128xbf16>,
    %cst_3 = arith.constant 0.000000e+00 : f32
    %4 = vector.broadcast %cst_3 : f32 to vector<32x128xf32>
    %c0_4 = arith.constant 0 : index
    %c0_5 = arith.constant 0 : index
    %5 = vector.load %arg10[%c0_4, %c0_5] : memref<32x2304xf32, #tpu.memory_space<vmem>>, vector<32x128xf32>
    tpu.vector_store %arg10[%c0_4, %c0_5], %4 {strides = array<i32>} : memref<32x2304xf32, #tpu.memory_space<vmem>>, vector<32x128xf32>,
    %cst_6 = arith.constant 0.000000e+00 : f32
    %6 = vector.broadcast %cst_6 : f32 to vector<32x128xf32>
    %c0_7 = arith.constant 0 : index
    %c2176_8 = arith.constant 2176 : index
    %7 = vector.load %arg10[%c0_7, %c2176_8] : memref<32x2304xf32, #tpu.memory_space<vmem>>, vector<32x128xf32>
    tpu.vector_store %arg10[%c0_7, %c2176_8], %6 {strides = array<i32>} : memref<32x2304xf32, #tpu.memory_space<vmem>>, vector<32x128xf32>,
    %c0_9 = arith.constant 0 : index
    %c0_10 = arith.constant 0 : index
    %c111 = arith.constant 111 : index
    %8 = vector.load %arg1[%c0_9, %c0_10, %c111] : memref<1x16x2304xbf16, #tpu.memory_space<vmem>>, vector<1x16x2048xbf16>
    %9 = vector.shape_cast %8 : vector<1x16x2048xbf16> to vector<16x2048xbf16>
    %c0_11 = arith.constant 0 : index
    %c0_12 = arith.constant 0 : index
    %10 = vector.load %arg8[%c0_11, %c0_12] : memref<144x2048xbf16, #tpu.memory_space<vmem>>, vector<16x2048xbf16>
    tpu.vector_store %arg8[%c0_11, %c0_12], %9 {strides = array<i32>} : memref<144x2048xbf16, #tpu.memory_space<vmem>>, vector<16x2048xbf16>,
    %c0_13 = arith.constant 0 : index
    %c0_14 = arith.constant 0 : index
    %c112 = arith.constant 112 : index
    %11 = vector.load %arg1[%c0_13, %c0_14, %c112] : memref<1x16x2304xbf16, #tpu.memory_space<vmem>>, vector<1x16x2048xbf16>
    %12 = vector.shape_cast %11 : vector<1x16x2048xbf16> to vector<16x2048xbf16>
    %c16 = arith.constant 16 : index
    %c0_15 = arith.constant 0 : index
    %13 = vector.load %arg8[%c16, %c0_15] : memref<144x2048xbf16, #tpu.memory_space<vmem>>, vector<16x2048xbf16>
    tpu.vector_store %arg8[%c16, %c0_15], %12 {strides = array<i32>} : memref<144x2048xbf16, #tpu.memory_space<vmem>>, vector<16x2048xbf16>,
    %c0_16 = arith.constant 0 : index
    %c0_17 = arith.constant 0 : index
    %c113 = arith.constant 113 : index
    %14 = vector.load %arg1[%c0_16, %c0_17, %c113] : memref<1x16x2304xbf16, #tpu.memory_space<vmem>>, vector<1x16x2048xbf16>
    %15 = vector.shape_cast %14 : vector<1x16x2048xbf16> to vector<16x2048xbf16>
    %c32 = arith.constant 32 : index
    %c0_18 = arith.constant 0 : index
    %16 = vector.load %arg8[%c32, %c0_18] : memref<144x2048xbf16, #tpu.memory_space<vmem>>, vector<16x2048xbf16>
    tpu.vector_store %arg8[%c32, %c0_18], %15 {strides = array<i32>} : memref<144x2048xbf16, #tpu.memory_space<vmem>>, vector<16x2048xbf16>,
    %c0_19 = arith.constant 0 : index
    %c0_20 = arith.constant 0 : index
    %c127 = arith.constant 127 : index
    %17 = vector.load %arg1[%c0_19, %c0_20, %c127] : memref<1x16x2304xbf16, #tpu.memory_space<vmem>>, vector<1x16x2048xbf16>
    %18 = vector.shape_cast %17 : vector<1x16x2048xbf16> to vector<16x2048xbf16>
    %c48 = arith.constant 48 : index
    %c0_21 = arith.constant 0 : index
    %19 = vector.load %arg8[%c48, %c0_21] : memref<144x2048xbf16, #tpu.memory_space<vmem>>, vector<16x2048xbf16>
    tpu.vector_store %arg8[%c48, %c0_21], %18 {strides = array<i32>} : memref<144x2048xbf16, #tpu.memory_space<vmem>>, vector<16x2048xbf16>,
    %c0_22 = arith.constant 0 : index
    %c0_23 = arith.constant 0 : index
    %c128 = arith.constant 128 : index
    %20 = vector.load %arg1[%c0_22, %c0_23, %c128] : memref<1x16x2304xbf16, #tpu.memory_space<vmem>>, vector<1x16x2048xbf16>
    %21 = vector.shape_cast %20 : vector<1x16x2048xbf16> to vector<16x2048xbf16>
    %c64 = arith.constant 64 : index
    %c0_24 = arith.constant 0 : index
    %22 = vector.load %arg8[%c64, %c0_24] : memref<144x2048xbf16, #tpu.memory_space<vmem>>, vector<16x2048xbf16>
    tpu.vector_store %arg8[%c64, %c0_24], %21 {strides = array<i32>} : memref<144x2048xbf16, #tpu.memory_space<vmem>>, vector<16x2048xbf16>,
    %c0_25 = arith.constant 0 : index
    %c0_26 = arith.constant 0 : index
    %c129 = arith.constant 129 : index
    %23 = vector.load %arg1[%c0_25, %c0_26, %c129] : memref<1x16x2304xbf16, #tpu.memory_space<vmem>>, vector<1x16x2048xbf16>
    %24 = vector.shape_cast %23 : vector<1x16x2048xbf16> to vector<16x2048xbf16>
    %c80 = arith.constant 80 : index
    %c0_27 = arith.constant 0 : index
    %25 = vector.load %arg8[%c80, %c0_27] : memref<144x2048xbf16, #tpu.memory_space<vmem>>, vector<16x2048xbf16>
    tpu.vector_store %arg8[%c80, %c0_27], %24 {strides = array<i32>} : memref<144x2048xbf16, #tpu.memory_space<vmem>>, vector<16x2048xbf16>,
    %c0_28 = arith.constant 0 : index
    %c0_29 = arith.constant 0 : index
    %c143 = arith.constant 143 : index
    %26 = vector.load %arg1[%c0_28, %c0_29, %c143] : memref<1x16x2304xbf16, #tpu.memory_space<vmem>>, vector<1x16x2048xbf16>
    %27 = vector.shape_cast %26 : vector<1x16x2048xbf16> to vector<16x2048xbf16>
    %c96 = arith.constant 96 : index
    %c0_30 = arith.constant 0 : index
    %28 = vector.load %arg8[%c96, %c0_30] : memref<144x2048xbf16, #tpu.memory_space<vmem>>, vector<16x2048xbf16>
    tpu.vector_store %arg8[%c96, %c0_30], %27 {strides = array<i32>} : memref<144x2048xbf16, #tpu.memory_space<vmem>>, vector<16x2048xbf16>,
    %c0_31 = arith.constant 0 : index
    %c0_32 = arith.constant 0 : index
    %c144 = arith.constant 144 : index
    %29 = vector.load %arg1[%c0_31, %c0_32, %c144] : memref<1x16x2304xbf16, #tpu.memory_space<vmem>>, vector<1x16x2048xbf16>
    %30 = vector.shape_cast %29 : vector<1x16x2048xbf16> to vector<16x2048xbf16>
    %c112_33 = arith.constant 112 : index
    %c0_34 = arith.constant 0 : index
    %31 = vector.load %arg8[%c112_33, %c0_34] : memref<144x2048xbf16, #tpu.memory_space<vmem>>, vector<16x2048xbf16>
    tpu.vector_store %arg8[%c112_33, %c0_34], %30 {strides = array<i32>} : memref<144x2048xbf16, #tpu.memory_space<vmem>>, vector<16x2048xbf16>,
    %c0_35 = arith.constant 0 : index
    %c0_36 = arith.constant 0 : index
    %c145 = arith.constant 145 : index
    %32 = vector.load %arg1[%c0_35, %c0_36, %c145] : memref<1x16x2304xbf16, #tpu.memory_space<vmem>>, vector<1x16x2048xbf16>
    %33 = vector.shape_cast %32 : vector<1x16x2048xbf16> to vector<16x2048xbf16>
    %c128_37 = arith.constant 128 : index
    %c0_38 = arith.constant 0 : index
    %34 = vector.load %arg8[%c128_37, %c0_38] : memref<144x2048xbf16, #tpu.memory_space<vmem>>, vector<16x2048xbf16>
    tpu.vector_store %arg8[%c128_37, %c0_38], %33 {strides = array<i32>} : memref<144x2048xbf16, #tpu.memory_space<vmem>>, vector<16x2048xbf16>,
    %c0_39 = arith.constant 0 : index
    %c0_40 = arith.constant 0 : index
    %35 = vector.load %arg3[%c0_39, %c0_40] : memref<16x144xbf16, #tpu.memory_space<vmem>>, vector<16x144xbf16>
    %c0_41 = arith.constant 0 : index
    %c0_42 = arith.constant 0 : index
    %36 = vector.load %arg8[%c0_41, %c0_42] : memref<144x2048xbf16, #tpu.memory_space<vmem>>, vector<144x2048xbf16>
    %cst_43 = arith.constant dense<0.000000e+00> : vector<16x2048xf32>
    %37 = tpu.matmul %35, %36, %cst_43 {dimension_numbers = #tpu.dot_dimension_numbers<[1], [0], [0], [1], [0, 0, 1, 1], [], []>} : vector<16x144xbf16>, vector<144x2048xbf16>, vector<16x2048xf32> -> vector<16x2048xf32>
    %c0_44 = arith.constant 0 : index
    %c0_45 = arith.constant 0 : index
    %38 = vector.load %arg4[%c0_44, %c0_45] : memref<16x1xf32, #tpu.memory_space<vmem>>, vector<16x1xf32>
    %39 = vector.broadcast %38 : vector<16x1xf32> to vector<16x2048xf32>
    %40 = arith.addf %37, %39 : vector<16x2048xf32>
    %cst_46 = arith.constant 0.000000e+00 : f32
    %41 = vector.broadcast %cst_46 : f32 to vector<16x2048xf32>
    %42 = arith.maximumf %40, %41 : vector<16x2048xf32>
    %c0_47 = arith.constant 0 : index
    %c0_48 = arith.constant 0 : index
    %43 = vector.load %arg2[%c0_47, %c0_48] : memref<1x2048xf32, #tpu.memory_space<vmem>>, vector<1x2048xf32>
    %44 = vector.broadcast %43 : vector<1x2048xf32> to vector<16x2048xf32>
    %45 = arith.mulf %42, %44 : vector<16x2048xf32>
    %46 = arith.truncf %45 : vector<16x2048xf32> to vector<16x2048xbf16>
    %c0_49 = arith.constant 0 : index
    %c128_50 = arith.constant 128 : index
    %47 = vector.load %arg9[%c0_49, %c128_50] : memref<16x2304xbf16, #tpu.memory_space<vmem>>, vector<16x2048xbf16>
    tpu.vector_store %arg9[%c0_49, %c128_50], %46 {strides = array<i32>} : memref<16x2304xbf16, #tpu.memory_space<vmem>>, vector<16x2048xbf16>,
    %c0_51 = arith.constant 0 : index
    %c111_52 = arith.constant 111 : index
    %48 = vector.load %arg9[%c0_51, %c111_52] : memref<16x2304xbf16, #tpu.memory_space<vmem>>, vector<16x2048xbf16>
    %c0_53 = arith.constant 0 : index
    %c0_54 = arith.constant 0 : index
    %49 = vector.load %arg8[%c0_53, %c0_54] : memref<144x2048xbf16, #tpu.memory_space<vmem>>, vector<16x2048xbf16>
    tpu.vector_store %arg8[%c0_53, %c0_54], %48 {strides = array<i32>} : memref<144x2048xbf16, #tpu.memory_space<vmem>>, vector<16x2048xbf16>,
    %c0_55 = arith.constant 0 : index
    %c112_56 = arith.constant 112 : index
    %50 = vector.load %arg9[%c0_55, %c112_56] : memref<16x2304xbf16, #tpu.memory_space<vmem>>, vector<16x2048xbf16>
    %c16_57 = arith.constant 16 : index
    %c0_58 = arith.constant 0 : index
    %51 = vector.load %arg8[%c16_57, %c0_58] : memref<144x2048xbf16, #tpu.memory_space<vmem>>, vector<16x2048xbf16>
    tpu.vector_store %arg8[%c16_57, %c0_58], %50 {strides = array<i32>} : memref<144x2048xbf16, #tpu.memory_space<vmem>>, vector<16x2048xbf16>,
    %c0_59 = arith.constant 0 : index
    %c113_60 = arith.constant 113 : index
    %52 = vector.load %arg9[%c0_59, %c113_60] : memref<16x2304xbf16, #tpu.memory_space<vmem>>, vector<16x2048xbf16>
    %c32_61 = arith.constant 32 : index
    %c0_62 = arith.constant 0 : index
    %53 = vector.load %arg8[%c32_61, %c0_62] : memref<144x2048xbf16, #tpu.memory_space<vmem>>, vector<16x2048xbf16>
    tpu.vector_store %arg8[%c32_61, %c0_62], %52 {strides = array<i32>} : memref<144x2048xbf16, #tpu.memory_space<vmem>>, vector<16x2048xbf16>,
    %c0_63 = arith.constant 0 : index
    %c127_64 = arith.constant 127 : index
    %54 = vector.load %arg9[%c0_63, %c127_64] : memref<16x2304xbf16, #tpu.memory_space<vmem>>, vector<16x2048xbf16>
    %c48_65 = arith.constant 48 : index
    %c0_66 = arith.constant 0 : index
    %55 = vector.load %arg8[%c48_65, %c0_66] : memref<144x2048xbf16, #tpu.memory_space<vmem>>, vector<16x2048xbf16>
    tpu.vector_store %arg8[%c48_65, %c0_66], %54 {strides = array<i32>} : memref<144x2048xbf16, #tpu.memory_space<vmem>>, vector<16x2048xbf16>,
    %c0_67 = arith.constant 0 : index
    %c128_68 = arith.constant 128 : index
    %56 = vector.load %arg9[%c0_67, %c128_68] : memref<16x2304xbf16, #tpu.memory_space<vmem>>, vector<16x2048xbf16>
    %c64_69 = arith.constant 64 : index
    %c0_70 = arith.constant 0 : index
    %57 = vector.load %arg8[%c64_69, %c0_70] : memref<144x2048xbf16, #tpu.memory_space<vmem>>, vector<16x2048xbf16>
    tpu.vector_store %arg8[%c64_69, %c0_70], %56 {strides = array<i32>} : memref<144x2048xbf16, #tpu.memory_space<vmem>>, vector<16x2048xbf16>,
    %c0_71 = arith.constant 0 : index
    %c129_72 = arith.constant 129 : index
    %58 = vector.load %arg9[%c0_71, %c129_72] : memref<16x2304xbf16, #tpu.memory_space<vmem>>, vector<16x2048xbf16>
    %c80_73 = arith.constant 80 : index
    %c0_74 = arith.constant 0 : index
    %59 = vector.load %arg8[%c80_73, %c0_74] : memref<144x2048xbf16, #tpu.memory_space<vmem>>, vector<16x2048xbf16>
    tpu.vector_store %arg8[%c80_73, %c0_74], %58 {strides = array<i32>} : memref<144x2048xbf16, #tpu.memory_space<vmem>>, vector<16x2048xbf16>,
    %c0_75 = arith.constant 0 : index
    %c143_76 = arith.constant 143 : index
    %60 = vector.load %arg9[%c0_75, %c143_76] : memref<16x2304xbf16, #tpu.memory_space<vmem>>, vector<16x2048xbf16>
    %c96_77 = arith.constant 96 : index
    %c0_78 = arith.constant 0 : index
    %61 = vector.load %arg8[%c96_77, %c0_78] : memref<144x2048xbf16, #tpu.memory_space<vmem>>, vector<16x2048xbf16>
    tpu.vector_store %arg8[%c96_77, %c0_78], %60 {strides = array<i32>} : memref<144x2048xbf16, #tpu.memory_space<vmem>>, vector<16x2048xbf16>,
    %c0_79 = arith.constant 0 : index
    %c144_80 = arith.constant 144 : index
    %62 = vector.load %arg9[%c0_79, %c144_80] : memref<16x2304xbf16, #tpu.memory_space<vmem>>, vector<16x2048xbf16>
    %c112_81 = arith.constant 112 : index
    %c0_82 = arith.constant 0 : index
    %63 = vector.load %arg8[%c112_81, %c0_82] : memref<144x2048xbf16, #tpu.memory_space<vmem>>, vector<16x2048xbf16>
    tpu.vector_store %arg8[%c112_81, %c0_82], %62 {strides = array<i32>} : memref<144x2048xbf16, #tpu.memory_space<vmem>>, vector<16x2048xbf16>,
    %c0_83 = arith.constant 0 : index
    %c145_84 = arith.constant 145 : index
    %64 = vector.load %arg9[%c0_83, %c145_84] : memref<16x2304xbf16, #tpu.memory_space<vmem>>, vector<16x2048xbf16>
    %c128_85 = arith.constant 128 : index
    %c0_86 = arith.constant 0 : index
    %65 = vector.load %arg8[%c128_85, %c0_86] : memref<144x2048xbf16, #tpu.memory_space<vmem>>, vector<16x2048xbf16>
    tpu.vector_store %arg8[%c128_85, %c0_86], %64 {strides = array<i32>} : memref<144x2048xbf16, #tpu.memory_space<vmem>>, vector<16x2048xbf16>,
    %c0_87 = arith.constant 0 : index
    %c0_88 = arith.constant 0 : index
    %66 = vector.load %arg5[%c0_87, %c0_88] : memref<32x144xbf16, #tpu.memory_space<vmem>>, vector<32x144xbf16>
    %c0_89 = arith.constant 0 : index
    %c0_90 = arith.constant 0 : index
    %67 = vector.load %arg8[%c0_89, %c0_90] : memref<144x2048xbf16, #tpu.memory_space<vmem>>, vector<144x2048xbf16>
    %cst_91 = arith.constant dense<0.000000e+00> : vector<32x2048xf32>
    %68 = tpu.matmul %66, %67, %cst_91 {dimension_numbers = #tpu.dot_dimension_numbers<[1], [0], [0], [1], [0, 0, 1, 1], [], []>} : vector<32x144xbf16>, vector<144x2048xbf16>, vector<32x2048xf32> -> vector<32x2048xf32>
    %c0_92 = arith.constant 0 : index
    %c0_93 = arith.constant 0 : index
    %69 = vector.load %arg6[%c0_92, %c0_93] : memref<32x1xf32, #tpu.memory_space<vmem>>, vector<32x1xf32>
    %70 = vector.broadcast %69 : vector<32x1xf32> to vector<32x2048xf32>
    %71 = arith.addf %68, %70 : vector<32x2048xf32>
    %cst_94 = arith.constant 0.000000e+00 : f32
    %72 = vector.broadcast %cst_94 : f32 to vector<32x2048xf32>
    %73 = arith.maximumf %71, %72 : vector<32x2048xf32>
    %c0_95 = arith.constant 0 : index
    %c128_96 = arith.constant 128 : index
    %74 = vector.load %arg10[%c0_95, %c128_96] : memref<32x2304xf32, #tpu.memory_space<vmem>>, vector<32x2048xf32>
    tpu.vector_store %arg10[%c0_95, %c128_96], %73 {strides = array<i32>} : memref<32x2304xf32, #tpu.memory_space<vmem>>, vector<32x2048xf32>,
    %c0_97 = arith.constant 0 : index
    %c129_98 = arith.constant 129 : index
    %75 = vector.load %arg10[%c0_97, %c129_98] : memref<32x2304xf32, #tpu.memory_space<vmem>>, vector<32x2048xf32>
    %c0_99 = arith.constant 0 : index
    %c144_100 = arith.constant 144 : index
    %76 = vector.load %arg10[%c0_99, %c144_100] : memref<32x2304xf32, #tpu.memory_space<vmem>>, vector<32x2048xf32>
    %c0_101 = arith.constant 0 : index
    %c145_102 = arith.constant 145 : index
    %77 = vector.load %arg10[%c0_101, %c145_102] : memref<32x2304xf32, #tpu.memory_space<vmem>>, vector<32x2048xf32>
    %78 = arith.maximumf %73, %75 : vector<32x2048xf32>
    %79 = arith.maximumf %76, %77 : vector<32x2048xf32>
    %80 = arith.maximumf %78, %79 : vector<32x2048xf32>
    %c0_103 = arith.constant 0 : index
    %c0_104 = arith.constant 0 : index
    %c0_105 = arith.constant 0 : index
    %81 = vector.load %arg7[%c0_103, %c0_104, %c0_105] : memref<1x32x2048xf32, #tpu.memory_space<vmem>>, vector<1x32x2048xf32>
    %82 = vector.shape_cast %81 : vector<1x32x2048xf32> to vector<32x2048xf32>
    %83 = vector.shape_cast %80 : vector<32x2048xf32> to vector<1x32x2048xf32>
    tpu.vector_store %arg7[%c0_103, %c0_104, %c0_105], %83 {strides = array<i32>} : memref<1x32x2048xf32, #tpu.memory_space<vmem>>, vector<1x32x2048xf32>,
    return
  }
  func.func @transform_0(%arg0: i32) -> (i32, i32, i32) {
    %c0_i32 = arith.constant 0 : i32
    %c0_i32_0 = arith.constant 0 : i32
    %c0_i32_1 = arith.constant 0 : i32
    return %arg0, %c0_i32, %c0_i32_0 : i32, i32, i32
  }
  func.func @transform_1(%arg0: i32) -> (i32, i32) {
    %c0_i32 = arith.constant 0 : i32
    %c0_i32_0 = arith.constant 0 : i32
    %c0_i32_1 = arith.constant 0 : i32
    return %c0_i32, %c0_i32_0 : i32, i32
  }
  func.func @transform_2(%arg0: i32) -> (i32, i32) {
    %c0_i32 = arith.constant 0 : i32
    %c0_i32_0 = arith.constant 0 : i32
    %c0_i32_1 = arith.constant 0 : i32
    return %c0_i32, %c0_i32_0 : i32, i32
  }
  func.func @transform_3(%arg0: i32) -> (i32, i32) {
    %c0_i32 = arith.constant 0 : i32
    %c0_i32_0 = arith.constant 0 : i32
    %c0_i32_1 = arith.constant 0 : i32
    return %c0_i32, %c0_i32_0 : i32, i32
  }
  func.func @transform_4(%arg0: i32) -> (i32, i32) {
    %c0_i32 = arith.constant 0 : i32
    %c0_i32_0 = arith.constant 0 : i32
    %c0_i32_1 = arith.constant 0 : i32
    return %c0_i32, %c0_i32_0 : i32, i32
  }
  func.func @transform_5(%arg0: i32) -> (i32, i32) {
    %c0_i32 = arith.constant 0 : i32
    %c0_i32_0 = arith.constant 0 : i32
    %c0_i32_1 = arith.constant 0 : i32
    return %c0_i32, %c0_i32_0 : i32, i32
  }
  func.func @transform_6(%arg0: i32) -> (i32, i32, i32) {
    %c0_i32 = arith.constant 0 : i32
    %c0_i32_0 = arith.constant 0 : i32
    %c0_i32_1 = arith.constant 0 : i32
    return %arg0, %c0_i32, %c0_i32_0 : i32, i32, i32
  }
}

</mosaic_0001>

<bundles_post_ra>
// kernel: mod_eight_forward.1
= control target key start
LH: loop header
LB: loop body
LE: loop exit
PB: predicated region body
PF: predicated region fallthrough
CT: control target
= control target key end

     0   :  { %s8269_s25 = smov 17   ;;  %s8270_s11 = smov 16   ;;  %vm126_vm0 = vcmask 1043456   ;;  %vm128_vm1 = vcmask 138240   ;;  %vm283_vm2 = vcmask 130048   ;;  %vm438_vm3 = vcmask 121856   ;;  %s11840_s0 = inlined_call_operand.vmem [shape: bf16[1,16,2304], index: 0, kind: input, shape index: {}]   ;;  %s11841_s2 = inlined_call_operand.vmem [shape: bf16[16,144], index: 2, kind: input, shape index: {}]   ;;  %s11842_s3 = inlined_call_operand.vmem [shape: f32[16,1], index: 3, kind: input, shape index: {}]   ;;  %s11843_s1 = inlined_call_operand.vmem [shape: f32[1,2048], index: 1, kind: input, shape index: {}]   ;;  %s11844_s5 = inlined_call_operand.vmem [shape: f32[32,1], index: 5, kind: input, shape index: {}]   ;;  %s11845_s4 = inlined_call_operand.vmem [shape: bf16[32,144], index: 4, kind: input, shape index: {}]   ;;  %s11846_s6 = inlined_call_operand.vmem [shape: f32[1,32,2048], index: 6, kind: output, shape index: {}]  }
   0x1   :  { %v8317_v0 = vld [vmem:[%s11840_s0 + $0x10] sm:$0xff]  ;;  %v8322_v1 = vld [vmem:[%s11840_s0] sm:$0xff]  ;;  %v8338_v3 = vld [vmem:[%s11840_s0 + $0x18] sm:$0xff]  ;;  %s8271_s16 = smov 15   ;;  %s8272_s21 = smov 1   ;;  %vm593_vm4 = vcmask 7168  }
   0x2   :  { %76 = vrot.lane.b32.xlu1 %v8317_v0, %s8269_s25  ;;  %72 = vrot.lane.b32.xlu0 %v8322_v1, %s8269_s25  ;;  %v8331_v2 = vld [vmem:[%s11840_s0 + $0x20] sm:$0xff]  ;;  %v8343_v4 = vld [vmem:[%s11840_s0 + $0x8] sm:$0xff]  ;;  %s8273_s9 = smov 127   ;;  %s8274_s24 = smov 113   ;;  %vm780_vm5 = vcmask 1039360   ;;  %vm935_vm6 = vcmask 924672  }
   0x3   :  { %80 = vrot.lane.b32.xlu2 %v8331_v2, %s8269_s25  ;;  %v8348_v5 = vld [vmem:[%s11840_s0 + $0x28] sm:$0xff]  ;;  %v8359_v6 = vld [vmem:[%s11840_s0 + $0x38] sm:$0xff]  ;;  %v8364_v7 = vld [vmem:[%s11840_s0 + $0x30] sm:$0xff]  ;;  %s8275_s30 = smov 112   ;;  %s8276_s13 = smov 111   ;;  %vm1090_vm7 = vcmask 916480  }
   0x4   :  { %v44_v8 = vld [vmem:[%s11840_s0 + $0x40] sm:$0xf]  ;;  %v8377_v9 = vld [vmem:[%s11840_s0 + $0x50] sm:$0xff]  ;;  %v8382_v10 = vld [vmem:[%s11840_s0 + $0x48] sm:$0xff]  ;;  %vm1245_vm8 = vcmask 908288  }
   0x5   :  { %v8387_v11 = vld [vmem:[%s11840_s0 + $0x58] sm:$0xff]  ;;  %v8398_v12 = vld [vmem:[%s11840_s0 + $0x68] sm:$0xff]  ;;  %v8403_v13 = vld [vmem:[%s11840_s0 + $0x60] sm:$0xff] }
   0x6   :  { %v8408_v14 = vld [vmem:[%s11840_s0 + $0x70] sm:$0xff]  ;;  %v8419_v15 = vld [vmem:[%s11840_s0 + $0x80] sm:$0xff]  ;;  %v8424_v16 = vld [vmem:[%s11840_s0 + $0x78] sm:$0xff] }
   0x7   :  { %v53_v17 = vld [vmem:[%s11840_s0 + $0x88] sm:$0xf]  ;;  %v200_v18 = vld [vmem:[%s11840_s0 + $0x40] sm:$0xf] }
   0x8   :  { %v209_v19 = vld [vmem:[%s11840_s0 + $0x88] sm:$0xf]  ;;  %v355_v27 = vld [vmem:[%s11840_s0 + $0x40] sm:$0xf] }
   0x9   :  { %v364_v58 = vld [vmem:[%s11840_s0 + $0x88] sm:$0xf] }
   0xa   :  { %78 = vrot.lane.b32.xlu1 %v8338_v3, %s8269_s25  ;;  %74 = vrot.lane.b32.xlu0 %v8343_v4, %s8269_s25 }
   0xb   :  { %82 = vrot.lane.b32.xlu2 %v8348_v5, %s8269_s25 }
  0x12   :  { %86 = vrot.lane.b32.xlu1 %v8359_v6, %s8269_s25  ;;  %84 = vrot.lane.b32.xlu0 %v8364_v7, %s8269_s25 }
  0x13   :  { %88 = vrot.lane.b32.xlu2 %v44_v8, %s8269_s25 }
  0x1a   :  { %92 = vrot.lane.b32.xlu1 %v8377_v9, %s8269_s25  ;;  %90 = vrot.lane.b32.xlu0 %v8382_v10, %s8269_s25 }
  0x1b   :  { %94 = vrot.lane.b32.xlu2 %v8387_v11, %s8269_s25 }
  0x22   :  { %98 = vrot.lane.b32.xlu1 %v8398_v12, %s8269_s25  ;;  %96 = vrot.lane.b32.xlu0 %v8403_v13, %s8269_s25 }
  0x23   :  { %100 = vrot.lane.b32.xlu2 %v8408_v14, %s8269_s25 }
  0x2a   :  { %104 = vrot.lane.b32.xlu1 %v8419_v15, %s8269_s25  ;;  %102 = vrot.lane.b32.xlu0 %v8424_v16, %s8269_s25 }
  0x2b   :  { %106 = vrot.lane.b32.xlu2 %v53_v17, %s8269_s25 }
  0x32   :  { %230 = vrot.lane.b32.xlu1 %v8343_v4, %s8270_s11  ;;  %228 = vrot.lane.b32.xlu0 %v8322_v1, %s8270_s11 }
  0x33   :  { %232 = vrot.lane.b32.xlu2 %v8317_v0, %s8270_s11 }
  0x3a   :  { %236 = vrot.lane.b32.xlu1 %v8331_v2, %s8270_s11  ;;  %234 = vrot.lane.b32.xlu0 %v8338_v3, %s8270_s11 }
  0x3b   :  { %238 = vrot.lane.b32.xlu2 %v8348_v5, %s8270_s11 }
  0x42   :  { %242 = vrot.lane.b32.xlu1 %v8359_v6, %s8270_s11  ;;  %240 = vrot.lane.b32.xlu0 %v8364_v7, %s8270_s11 }
  0x43   :  { %244 = vrot.lane.b32.xlu2 %v200_v18, %s8270_s11 }
  0x4a   :  { %248 = vrot.lane.b32.xlu1 %v8377_v9, %s8270_s11  ;;  %246 = vrot.lane.b32.xlu0 %v8382_v10, %s8270_s11 }
  0x4b   :  { %250 = vrot.lane.b32.xlu2 %v8387_v11, %s8270_s11 }
  0x52   :  { %254 = vrot.lane.b32.xlu1 %v8398_v12, %s8270_s11  ;;  %252 = vrot.lane.b32.xlu0 %v8403_v13, %s8270_s11 }
  0x53   :  { %256 = vrot.lane.b32.xlu2 %v8408_v14, %s8270_s11 }
  0x5a   :  { %260 = vrot.lane.b32.xlu1 %v8419_v15, %s8270_s11  ;;  %258 = vrot.lane.b32.xlu0 %v8424_v16, %s8270_s11 }
  0x5b   :  { %262 = vrot.lane.b32.xlu2 %v209_v19, %s8270_s11 }
  0x5d   :  { %v81_v20 = vpop.permute.xlu2 %80 }
  0x5e   :  { %v112_v21 = vrot.slane %v81_v20, 4 }
  0x62   :  { %385 = vrot.lane.b32.xlu1 %v8343_v4, %s8271_s16  ;;  %383 = vrot.lane.b32.xlu0 %v8322_v1, %s8271_s16 }
  0x63   :  { %387 = vrot.lane.b32.xlu2 %v8317_v0, %s8271_s16 }
  0x65   :  { %v83_v22 = vpop.permute.xlu2 %82 }
  0x66   :  { %v113_v23 = vrot.slane %v83_v22, 4 }
  0x68   :  { %v136_v24 = vsel %vm126_vm0, %v112_v21, %v113_v23 }
  0x69   :  { %v137_v25 = vsel %vm128_vm1, %v81_v20, %v136_v24 }
  0x6a   :  { %391 = vrot.lane.b32.xlu1 %v8331_v2, %s8271_s16  ;;  %389 = vrot.lane.b32.xlu0 %v8338_v3, %s8271_s16  ;;  %180 = vst [vmem:[#allocation2 + $0x20] sm:$0xff] %v137_v25 }
  0x6b   :  { %393 = vrot.lane.b32.xlu2 %v8348_v5, %s8271_s16 }
  0x6d   :  { %v89_v26 = vpop.permute.xlu2 %88 }
  0x6e   :  { %v116_v46 = vrot.slane %v89_v26, 4 }
  0x72   :  { %397 = vrot.lane.b32.xlu1 %v8359_v6, %s8271_s16  ;;  %395 = vrot.lane.b32.xlu0 %v8364_v7, %s8271_s16 }
  0x73   :  { %399 = vrot.lane.b32.xlu2 %v355_v27, %s8271_s16 }
  0x74   :  { %v77_v28 = vpop.permute.xlu1 %76  ;;  %v73_v29 = vpop.permute.xlu0 %72 }
  0x75   :  { %v8496_v30 = vpop.permute.xlu2 %94  ;;  %v110_v33 = vrot.slane %v77_v28, 4  ;;  %v108_v34 = vrot.slane %v73_v29, 4 }
  0x76   :  { %v119_v59 = vrot.slane %v8496_v30, 4 }
  0x7a   :  { %403 = vrot.lane.b32.xlu1 %v8377_v9, %s8271_s16  ;;  %401 = vrot.lane.b32.xlu0 %v8382_v10, %s8271_s16 }
  0x7b   :  { %405 = vrot.lane.b32.xlu2 %v8387_v11, %s8271_s16 }
  0x7c   :  { %v79_v31 = vpop.permute.xlu1 %78  ;;  %v75_v32 = vpop.permute.xlu0 %74 }
  0x7d   :  { %v111_v35 = vrot.slane %v79_v31, 4  ;;  %v109_v36 = vrot.slane %v75_v32, 4  ;;  %v8504_v37 = vpop.permute.xlu2 %100 }
  0x7f   :  { %v132_v38 = vsel %vm126_vm0, %v110_v33, %v111_v35  ;;  %v134_v39 = vsel %vm126_vm0, %v111_v35, %v112_v21  ;;  %v127_v40 = vsel %vm126_vm0, %v108_v34, %v109_v36  ;;  %v130_v41 = vsel %vm126_vm0, %v109_v36, %v110_v33 }
  0x80   :  { %v133_v42 = vsel %vm128_vm1, %v77_v28, %v132_v38  ;;  %v135_v43 = vsel %vm128_vm1, %v79_v31, %v134_v39  ;;  %v129_v44 = vsel %vm128_vm1, %v73_v29, %v127_v40  ;;  %v131_v45 = vsel %vm128_vm1, %v75_v32, %v130_v41 }
  0x81   :  { %178 = vst [vmem:[#allocation2 + $0x10] sm:$0xff] %v133_v42  ;;  %v122_v21 = vrot.slane %v8504_v37, 4 }
  0x82   :  { %179 = vst [vmem:[#allocation2 + $0x18] sm:$0xff] %v135_v43  ;;  %409 = vrot.lane.b32.xlu1 %v8398_v12, %s8271_s16  ;;  %407 = vrot.lane.b32.xlu0 %v8403_v13, %s8271_s16 }
  0x83   :  { %176 = vst [vmem:[#allocation2] sm:$0xff] %v129_v44  ;;  %411 = vrot.lane.b32.xlu2 %v8408_v14, %s8271_s16 }
  0x84   :  { %177 = vst [vmem:[#allocation2 + $0x8] sm:$0xff] %v131_v45  ;;  %v87_v47 = vpop.permute.xlu1 %86  ;;  %v85_v48 = vpop.permute.xlu0 %84 }
  0x85   :  { %v115_v49 = vrot.slane %v87_v47, 4  ;;  %v114_v50 = vrot.slane %v85_v48, 4  ;;  %v107_v51 = vpop.permute.xlu2 %106 }
  0x87   :  { %v142_v52 = vsel %vm126_vm0, %v115_v49, %v116_v46  ;;  %v138_v53 = vsel %vm126_vm0, %v113_v23, %v114_v50  ;;  %v140_v54 = vsel %vm126_vm0, %v114_v50, %v115_v49 }
  0x88   :  { %v143_v55 = vsel %vm128_vm1, %v87_v47, %v142_v52  ;;  %v139_v56 = vsel %vm128_vm1, %v83_v22, %v138_v53  ;;  %v141_v57 = vsel %vm128_vm1, %v85_v48, %v140_v54 }
  0x89   :  { %183 = vst [vmem:[#allocation2 + $0x38] sm:$0xff] %v143_v55 }
  0x8a   :  { %181 = vst [vmem:[#allocation2 + $0x28] sm:$0xff] %v139_v56  ;;  %415 = vrot.lane.b32.xlu1 %v8419_v15, %s8271_s16  ;;  %413 = vrot.lane.b32.xlu0 %v8424_v16, %s8271_s16 }
  0x8b   :  { %182 = vst [vmem:[#allocation2 + $0x30] sm:$0xff] %v141_v57  ;;  %417 = vrot.lane.b32.xlu2 %v364_v58, %s8271_s16 }
  0x8c   :  { %v93_v60 = vpop.permute.xlu1 %92  ;;  %v91_v61 = vpop.permute.xlu0 %90 }
  0x8d   :  { %v118_v62 = vrot.slane %v93_v60, 4  ;;  %v117_v63 = vrot.slane %v91_v61, 4  ;;  %v8535_v8 = vpop.permute.xlu2 %232 }
  0x8e   :  { %v266_v41 = vrot.slane %v8535_v8, 4 }
  0x8f   :  { %v146_v17 = vsel %vm126_vm0, %v118_v62, %v119_v59  ;;  %v144_v18 = vsel %vm126_vm0, %v117_v63, %v118_v62 }
  0x90   :  { %v147_v19 = vsel %vm128_vm1, %v93_v60, %v146_v17  ;;  %v145_v20 = vsel %vm128_vm1, %v91_v61, %v144_v18 }
  0x91   :  { %185 = vst [vmem:[#allocation2 + $0x48] sm:$0xff] %v147_v19 }
  0x92   :  { %184 = vst [vmem:[#allocation2 + $0x40] sm:$0xff] %v145_v20  ;;  %540 = vrot.lane.b32.xlu1 %v8343_v4, %s8272_s21  ;;  %538 = vrot.lane.b32.xlu0 %v8322_v1, %s8272_s21 }
  0x93   :  { %542 = vrot.lane.b32.xlu2 %v8317_v0, %s8272_s21  ;;  %v125_v0 = vrot.slane %v107_v51, 4 }
  0x94   :  { %v99_v22 = vpop.permute.xlu1 %98  ;;  %v97_v23 = vpop.permute.xlu0 %96 }
  0x95   :  { %v121_v24 = vrot.slane %v99_v22, 4  ;;  %v120_v25 = vrot.slane %v97_v23, 4  ;;  %v8548_v26 = vpop.permute.xlu2 %238 }
  0x96   :  { %v269_v48 = vrot.slane %v8548_v26, 4 }
  0x97   :  { %v152_v27 = vsel %vm126_vm0, %v121_v24, %v122_v21  ;;  %v148_v28 = vsel %vm126_vm0, %v119_v59, %v120_v25  ;;  %v150_v4 = vsel %vm126_vm0, %v120_v25, %v121_v24 }
  0x98   :  { %v153_v29 = vsel %vm128_vm1, %v99_v22, %v152_v27  ;;  %v149_v1 = vsel %vm128_vm1, %v8496_v30, %v148_v28  ;;  %v151_v31 = vsel %vm128_vm1, %v97_v23, %v150_v4  ;;  %v8642_v4 = vld [vmem:[%s11840_s0 + $0x14] sm:$0xff] }
  0x99   :  { %188 = vst [vmem:[#allocation2 + $0x60] sm:$0xff] %v153_v29 }
  0x9a   :  { %186 = vst [vmem:[#allocation2 + $0x50] sm:$0xff] %v149_v1  ;;  %546 = vrot.lane.b32.xlu1 %v8331_v2, %s8272_s21  ;;  %544 = vrot.lane.b32.xlu0 %v8338_v3, %s8272_s21 }
  0x9b   :  { %187 = vst [vmem:[#allocation2 + $0x58] sm:$0xff] %v151_v31  ;;  %548 = vrot.lane.b32.xlu2 %v8348_v5, %s8272_s21  ;;  %v510_v5 = vld [vmem:[%s11840_s0 + $0x40] sm:$0xf] }
  0x9c   :  { %v105_v32 = vpop.permute.xlu1 %104  ;;  %v103_v33 = vpop.permute.xlu0 %102 }
  0x9d   :  { %v124_v34 = vrot.slane %v105_v32, 4  ;;  %v123_v35 = vrot.slane %v103_v33, 4  ;;  %v245_v30 = vpop.permute.xlu2 %244 }
  0x9f   :  { %v158_v36 = vsel %vm126_vm0, %v124_v34, %v125_v0  ;;  %v154_v38 = vsel %vm126_vm0, %v122_v21, %v123_v35  ;;  %v156_v39 = vsel %vm126_vm0, %v123_v35, %v124_v34 }
  0xa0   :  { %v159_v2 = vsel %vm128_vm1, %v105_v32, %v158_v36  ;;  %v155_v3 = vsel %vm128_vm1, %v8504_v37, %v154_v38  ;;  %v157_v40 = vsel %vm128_vm1, %v103_v33, %v156_v39  ;;  %v8659_v36 = vld [vmem:[%s11840_s0 + $0x24] sm:$0xff]  ;;  %v8664_v38 = vld [vmem:[%s11840_s0 + $0x1c] sm:$0xff] }
  0xa1   :  { %191 = vst [vmem:[#allocation2 + $0x78] sm:$0xff] %v159_v2 }
  0xa2   :  { %189 = vst [vmem:[#allocation2 + $0x68] sm:$0xff] %v155_v3  ;;  %552 = vrot.lane.b32.xlu1 %v8359_v6, %s8272_s21  ;;  %550 = vrot.lane.b32.xlu0 %v8364_v7, %s8272_s21 }
  0xa3   :  { %190 = vst [vmem:[#allocation2 + $0x70] sm:$0xff] %v157_v40  ;;  %554 = vrot.lane.b32.xlu2 %v510_v5, %s8272_s21  ;;  %v8673_v40 = vld [vmem:[%s11840_s0 + $0x2c] sm:$0xff] }
  0xa4   :  { %v231_v42 = vpop.permute.xlu1 %230  ;;  %v229_v43 = vpop.permute.xlu0 %228 }
  0xa5   :  { %v265_v37 = vrot.slane %v231_v42, 4  ;;  %v264_v44 = vrot.slane %v229_v43, 4  ;;  %v8579_v45 = vpop.permute.xlu2 %250 }
  0xa6   :  { %v275_v19 = vrot.slane %v8579_v45, 4 }
  0xa7   :  { %v285_v46 = vsel %vm126_vm0, %v265_v37, %v266_v41  ;;  %v282_v47 = vsel %vm126_vm0, %v264_v44, %v265_v37 }
  0xa8   :  { %v286_v6 = vsel %vm283_vm2, %v231_v42, %v285_v46  ;;  %v284_v7 = vsel %vm283_vm2, %v229_v43, %v282_v47 }
  0xa9   :  { %332 = vst [vmem:[#allocation2 + $0x88] sm:$0xff] %v286_v6  ;;  %v8689_v6 = vld [vmem:[%s11840_s0 + $0x3c] sm:$0xff] }
  0xaa   :  { %331 = vst [vmem:[#allocation2 + $0x80] sm:$0xff] %v284_v7  ;;  %558 = vrot.lane.b32.xlu1 %v8377_v9, %s8272_s21  ;;  %556 = vrot.lane.b32.xlu0 %v8382_v10, %s8272_s21  ;;  %v8694_v7 = vld [vmem:[%s11840_s0 + $0x34] sm:$0xff] }
  0xab   :  { %560 = vrot.lane.b32.xlu2 %v8387_v11, %s8272_s21  ;;  %v272_v11 = vrot.slane %v245_v30, 4 }
  0xac   :  { %v237_v49 = vpop.permute.xlu1 %236  ;;  %v235_v50 = vpop.permute.xlu0 %234 }
  0xad   :  { %v268_v51 = vrot.slane %v237_v49, 4  ;;  %v267_v52 = vrot.slane %v235_v50, 4  ;;  %v8592_v53 = vpop.permute.xlu2 %256 }
  0xae   :  { %v278_v29 = vrot.slane %v8592_v53, 4 }
  0xaf   :  { %v291_v54 = vsel %vm126_vm0, %v268_v51, %v269_v48  ;;  %v287_v55 = vsel %vm126_vm0, %v266_v41, %v267_v52  ;;  %v289_v9 = vsel %vm126_vm0, %v267_v52, %v268_v51  ;;  %v697_v51 = vld [vmem:[%s11840_s0 + $0x44] sm:$0xf] }
  0xb0   :  { %v292_v56 = vsel %vm283_vm2, %v237_v49, %v291_v54  ;;  %v288_v10 = vsel %vm283_vm2, %v8535_v8, %v287_v55  ;;  %v290_v57 = vsel %vm283_vm2, %v235_v50, %v289_v9 }
  0xb1   :  { %335 = vst [vmem:[#allocation2 + $0xa0] sm:$0xff] %v292_v56 }
  0xb2   :  { %333 = vst [vmem:[#allocation2 + $0x90] sm:$0xff] %v288_v10  ;;  %564 = vrot.lane.b32.xlu1 %v8398_v12, %s8272_s21  ;;  %562 = vrot.lane.b32.xlu0 %v8403_v13, %s8272_s21 }
  0xb3   :  { %334 = vst [vmem:[#allocation2 + $0x98] sm:$0xff] %v290_v57  ;;  %566 = vrot.lane.b32.xlu2 %v8408_v14, %s8272_s21  ;;  %v519_v14 = vld [vmem:[%s11840_s0 + $0x88] sm:$0xf] }
  0xb4   :  { %v243_v58 = vpop.permute.xlu1 %242  ;;  %v241_v59 = vpop.permute.xlu0 %240 }
  0xb5   :  { %v271_v60 = vrot.slane %v243_v58, 4  ;;  %v270_v61 = vrot.slane %v241_v59, 4  ;;  %v263_v62 = vpop.permute.xlu2 %262 }
  0xb6   :  { %v281_v5 = vrot.slane %v263_v62, 4 }
  0xb7   :  { %v297_v63 = vsel %vm126_vm0, %v271_v60, %v272_v11  ;;  %v293_v8 = vsel %vm126_vm0, %v269_v48, %v270_v61  ;;  %v295_v17 = vsel %vm126_vm0, %v270_v61, %v271_v60  ;;  %v8716_v11 = vld [vmem:[%s11840_s0 + $0x54] sm:$0xff]  ;;  %v8728_v61 = vld [vmem:[%s11840_s0 + $0x5c] sm:$0xff] }
  0xb8   :  { %v298_v12 = vsel %vm283_vm2, %v243_v58, %v297_v63  ;;  %v294_v13 = vsel %vm283_vm2, %v8548_v26, %v293_v8  ;;  %v296_v18 = vsel %vm283_vm2, %v241_v59, %v295_v17  ;;  %v8721_v58 = vld [vmem:[%s11840_s0 + $0x4c] sm:$0xff] }
  0xb9   :  { %338 = vst [vmem:[#allocation2 + $0xb8] sm:$0xff] %v298_v12 }
  0xba   :  { %336 = vst [vmem:[#allocation2 + $0xa8] sm:$0xff] %v294_v13  ;;  %570 = vrot.lane.b32.xlu1 %v8419_v15, %s8272_s21  ;;  %568 = vrot.lane.b32.xlu0 %v8424_v16, %s8272_s21  ;;  %v8630_v15 = vld [vmem:[%s11840_s0 + $0xc] sm:$0xff]  ;;  %v8635_v16 = vld [vmem:[%s11840_s0 + $0x4] sm:$0xff] }
  0xbb   :  { %337 = vst [vmem:[#allocation2 + $0xb0] sm:$0xff] %v296_v18  ;;  %572 = vrot.lane.b32.xlu2 %v519_v14, %s8272_s21 }
  0xbc   :  { %v249_v20 = vpop.permute.xlu1 %248  ;;  %v247_v21 = vpop.permute.xlu0 %246 }
  0xbd   :  { %v274_v22 = vrot.slane %v249_v20, 4  ;;  %v273_v23 = vrot.slane %v247_v21, 4  ;;  %v8623_v24 = vpop.permute.xlu2 %387 }
  0xbe   :  { %v421_v52 = vrot.slane %v8623_v24, 4 }
  0xbf   :  { %v301_v25 = vsel %vm126_vm0, %v274_v22, %v275_v19  ;;  %v299_v26 = vsel %vm126_vm0, %v273_v23, %v274_v22 }
  0xc0   :  { %v302_v27 = vsel %vm283_vm2, %v249_v20, %v301_v25  ;;  %v300_v28 = vsel %vm283_vm2, %v247_v21, %v299_v26  ;;  %v8745_v20 = vld [vmem:[%s11840_s0 + $0x6c] sm:$0xff]  ;;  %v8750_v21 = vld [vmem:[%s11840_s0 + $0x64] sm:$0xff]  ;;  %v8759_v26 = vld [vmem:[%s11840_s0 + $0x74] sm:$0xff] }
  0xc1   :  { %340 = vst [vmem:[#allocation2 + $0xc8] sm:$0xff] %v302_v27 }
  0xc2   :  { %339 = vst [vmem:[#allocation2 + $0xc0] sm:$0xff] %v300_v28  ;;  %727 = vrot.lane.b32.xlu1 %v8630_v15, %s8273_s9  ;;  %725 = vrot.lane.b32.xlu0 %v8635_v16, %s8273_s9 }
  0xc3   :  { %729 = vrot.lane.b32.xlu2 %v8642_v4, %s8273_s9 }
  0xc4   :  { %v255_v1 = vpop.permute.xlu1 %254  ;;  %v253_v31 = vpop.permute.xlu0 %252 }
  0xc5   :  { %v277_v0 = vrot.slane %v255_v1, 4  ;;  %v276_v32 = vrot.slane %v253_v31, 4  ;;  %v8651_v33 = vpop.permute.xlu2 %393 }
  0xc6   :  { %v424_v62 = vrot.slane %v8651_v33, 4 }
  0xc7   :  { %v307_v34 = vsel %vm126_vm0, %v277_v0, %v278_v29  ;;  %v303_v35 = vsel %vm126_vm0, %v275_v19, %v276_v32  ;;  %v305_v30 = vsel %vm126_vm0, %v276_v32, %v277_v0 }
  0xc8   :  { %v308_v39 = vsel %vm283_vm2, %v255_v1, %v307_v34  ;;  %v304_v2 = vsel %vm283_vm2, %v8579_v45, %v303_v35  ;;  %v306_v3 = vsel %vm283_vm2, %v253_v31, %v305_v30  ;;  %v8774_v35 = vld [vmem:[%s11840_s0 + $0x84] sm:$0xff]  ;;  %v8779_v30 = vld [vmem:[%s11840_s0 + $0x7c] sm:$0xff] }
  0xc9   :  { %343 = vst [vmem:[#allocation2 + $0xe0] sm:$0xff] %v308_v39 }
  0xca   :  { %341 = vst [vmem:[#allocation2 + $0xd0] sm:$0xff] %v304_v2  ;;  %733 = vrot.lane.b32.xlu1 %v8659_v36, %s8273_s9  ;;  %731 = vrot.lane.b32.xlu0 %v8664_v38, %s8273_s9 }
  0xcb   :  { %342 = vst [vmem:[#allocation2 + $0xd8] sm:$0xff] %v306_v3  ;;  %735 = vrot.lane.b32.xlu2 %v8673_v40, %s8273_s9 }
  0xcc   :  { %v261_v41 = vpop.permute.xlu1 %260  ;;  %v259_v42 = vpop.permute.xlu0 %258 }
  0xcd   :  { %v280_v43 = vrot.slane %v261_v41, 4  ;;  %v279_v37 = vrot.slane %v259_v42, 4  ;;  %v8681_v44 = vpop.permute.xlu2 %399 }
  0xce   :  { %v427_v27 = vrot.slane %v8681_v44, 4 }
  0xcf   :  { %v313_v45 = vsel %vm126_vm0, %v280_v43, %v281_v5  ;;  %v309_v46 = vsel %vm126_vm0, %v278_v29, %v279_v37  ;;  %v311_v47 = vsel %vm126_vm0, %v279_v37, %v280_v43  ;;  %v706_v5 = vld [vmem:[%s11840_s0 + $0x8c] sm:$0xf] }
  0xd0   :  { %v314_v48 = vsel %vm283_vm2, %v261_v41, %v313_v45  ;;  %v310_v49 = vsel %vm283_vm2, %v8592_v53, %v309_v46  ;;  %v312_v50 = vsel %vm283_vm2, %v259_v42, %v311_v47 }
  0xd1   :  { %346 = vst [vmem:[#allocation2 + $0xf8] sm:$0xff] %v314_v48 }
  0xd2   :  { %344 = vst [vmem:[#allocation2 + $0xe8] sm:$0xff] %v310_v49  ;;  %739 = vrot.lane.b32.xlu1 %v8689_v6, %s8273_s9  ;;  %737 = vrot.lane.b32.xlu0 %v8694_v7, %s8273_s9 }
  0xd3   :  { %345 = vst [vmem:[#allocation2 + $0xf0] sm:$0xff] %v312_v50  ;;  %741 = vrot.lane.b32.xlu2 %v697_v51, %s8273_s9 }
  0xd4   :  { %v386_v54 = vpop.permute.xlu1 %385  ;;  %v384_v55 = vpop.permute.xlu0 %383 }
  0xd5   :  { %v420_v53 = vrot.slane %v386_v54, 4  ;;  %v419_v9 = vrot.slane %v384_v55, 4  ;;  %v8709_v56 = vpop.permute.xlu2 %405 }
  0xd6   :  { %v430_v41 = vrot.slane %v8709_v56, 4 }
  0xd7   :  { %v440_v10 = vsel %vm126_vm0, %v420_v53, %v421_v52  ;;  %v437_v57 = vsel %vm126_vm0, %v419_v9, %v420_v53 }
  0xd8   :  { %v441_v59 = vsel %vm438_vm3, %v386_v54, %v440_v10  ;;  %v439_v60 = vsel %vm438_vm3, %v384_v55, %v437_v57 }
  0xd9   :  { %487 = vst [vmem:[#allocation2 + $0x108] sm:$0xff] %v441_v59 }
  0xda   :  { %486 = vst [vmem:[#allocation2 + $0x100] sm:$0xff] %v439_v60  ;;  %745 = vrot.lane.b32.xlu1 %v8716_v11, %s8273_s9  ;;  %743 = vrot.lane.b32.xlu0 %v8721_v58, %s8273_s9 }
  0xdb   :  { %747 = vrot.lane.b32.xlu2 %v8728_v61, %s8273_s9 }
  0xdc   :  { %v392_v63 = vpop.permute.xlu1 %391  ;;  %v390_v8 = vpop.permute.xlu0 %389 }
  0xdd   :  { %v423_v17 = vrot.slane %v392_v63, 4  ;;  %v422_v12 = vrot.slane %v390_v8, 4  ;;  %v8737_v13 = vpop.permute.xlu2 %411 }
  0xde   :  { %v433_v49 = vrot.slane %v8737_v13, 4 }
  0xdf   :  { %v446_v18 = vsel %vm126_vm0, %v423_v17, %v424_v62  ;;  %v442_v14 = vsel %vm126_vm0, %v421_v52, %v422_v12  ;;  %v444_v19 = vsel %vm126_vm0, %v422_v12, %v423_v17 }
  0xe0   :  { %v447_v22 = vsel %vm438_vm3, %v392_v63, %v446_v18  ;;  %v443_v23 = vsel %vm438_vm3, %v8623_v24, %v442_v14  ;;  %v445_v25 = vsel %vm438_vm3, %v390_v8, %v444_v19 }
  0xe1   :  { %490 = vst [vmem:[#allocation2 + $0x120] sm:$0xff] %v447_v22 }
  0xe2   :  { %488 = vst [vmem:[#allocation2 + $0x110] sm:$0xff] %v443_v23  ;;  %751 = vrot.lane.b32.xlu1 %v8745_v20, %s8273_s9  ;;  %749 = vrot.lane.b32.xlu0 %v8750_v21, %s8273_s9 }
  0xe3   :  { %489 = vst [vmem:[#allocation2 + $0x118] sm:$0xff] %v445_v25  ;;  %753 = vrot.lane.b32.xlu2 %v8759_v26, %s8273_s9 }
  0xe4   :  { %v398_v28 = vpop.permute.xlu1 %397  ;;  %v396_v24 = vpop.permute.xlu0 %395 }
  0xe5   :  { %v426_v29 = vrot.slane %v398_v28, 4  ;;  %v425_v1 = vrot.slane %v396_v24, 4  ;;  %v418_v31 = vpop.permute.xlu2 %417 }
  0xe7   :  { %v452_v0 = vsel %vm126_vm0, %v426_v29, %v427_v27  ;;  %v448_v32 = vsel %vm126_vm0, %v424_v62, %v425_v1  ;;  %v450_v34 = vsel %vm126_vm0, %v425_v1, %v426_v29  ;;  %v436_v62 = vrot.slane %v418_v31, 4  ;;  %v852_v27 = vld [vmem:[%s11840_s0 + $0x44] sm:$0xf] }
  0xe8   :  { %v453_v39 = vsel %vm438_vm3, %v398_v28, %v452_v0  ;;  %v449_v2 = vsel %vm438_vm3, %v8651_v33, %v448_v32  ;;  %v451_v3 = vsel %vm438_vm3, %v396_v24, %v450_v34 }
  0xe9   :  { %493 = vst [vmem:[#allocation2 + $0x138] sm:$0xff] %v453_v39 }
  0xea   :  { %491 = vst [vmem:[#allocation2 + $0x128] sm:$0xff] %v449_v2  ;;  %757 = vrot.lane.b32.xlu1 %v8774_v35, %s8273_s9  ;;  %755 = vrot.lane.b32.xlu0 %v8779_v30, %s8273_s9 }
  0xeb   :  { %492 = vst [vmem:[#allocation2 + $0x130] sm:$0xff] %v451_v3  ;;  %759 = vrot.lane.b32.xlu2 %v706_v5, %s8273_s9 }
  0xec   :  { %v404_v42 = vpop.permute.xlu1 %403  ;;  %v402_v43 = vpop.permute.xlu0 %401 }
  0xed   :  { %v429_v33 = vrot.slane %v404_v42, 4  ;;  %v428_v37 = vrot.slane %v402_v43, 4  ;;  %v8794_v44 = vpop.permute.xlu2 %542 }
  0xee   :  { %v576_v28 = vrot.slane %v8794_v44, 4 }
  0xef   :  { %v456_v45 = vsel %vm126_vm0, %v429_v33, %v430_v41  ;;  %v454_v46 = vsel %vm126_vm0, %v428_v37, %v429_v33 }
  0xf0   :  { %v457_v47 = vsel %vm438_vm3, %v404_v42, %v456_v45  ;;  %v455_v48 = vsel %vm438_vm3, %v402_v43, %v454_v46 }
  0xf1   :  { %495 = vst [vmem:[#allocation2 + $0x148] sm:$0xff] %v457_v47 }
  0xf2   :  { %494 = vst [vmem:[#allocation2 + $0x140] sm:$0xff] %v455_v48  ;;  %882 = vrot.lane.b32.xlu1 %v8630_v15, %s8274_s24  ;;  %880 = vrot.lane.b32.xlu0 %v8635_v16, %s8274_s24 }
  0xf3   :  { %884 = vrot.lane.b32.xlu2 %v8642_v4, %s8274_s24 }
  0xf4   :  { %v410_v50 = vpop.permute.xlu1 %409  ;;  %v408_v51 = vpop.permute.xlu0 %407 }
  0xf5   :  { %v432_v52 = vrot.slane %v410_v50, 4  ;;  %v431_v54 = vrot.slane %v408_v51, 4  ;;  %v8807_v55 = vpop.permute.xlu2 %548 }
  0xf6   :  { %v579_v2 = vrot.slane %v8807_v55, 4 }
  0xf7   :  { %v462_v53 = vsel %vm126_vm0, %v432_v52, %v433_v49  ;;  %v458_v9 = vsel %vm126_vm0, %v430_v41, %v431_v54  ;;  %v460_v10 = vsel %vm126_vm0, %v431_v54, %v432_v52 }
  0xf8   :  { %v463_v57 = vsel %vm438_vm3, %v410_v50, %v462_v53  ;;  %v459_v59 = vsel %vm438_vm3, %v8709_v56, %v458_v9  ;;  %v461_v60 = vsel %vm438_vm3, %v408_v51, %v460_v10 }
  0xf9   :  { %498 = vst [vmem:[#allocation2 + $0x160] sm:$0xff] %v463_v57 }
  0xfa   :  { %496 = vst [vmem:[#allocation2 + $0x150] sm:$0xff] %v459_v59  ;;  %888 = vrot.lane.b32.xlu1 %v8659_v36, %s8274_s24  ;;  %886 = vrot.lane.b32.xlu0 %v8664_v38, %s8274_s24 }
  0xfb   :  { %497 = vst [vmem:[#allocation2 + $0x158] sm:$0xff] %v461_v60  ;;  %890 = vrot.lane.b32.xlu2 %v8673_v40, %s8274_s24 }
  0xfc   :  { %v416_v63 = vpop.permute.xlu1 %415  ;;  %v414_v8 = vpop.permute.xlu0 %413 }
  0xfd   :  { %v435_v17 = vrot.slane %v416_v63, 4  ;;  %v434_v12 = vrot.slane %v414_v8, 4  ;;  %v555_v56 = vpop.permute.xlu2 %554 }
  0xff   :  { %v468_v18 = vsel %vm126_vm0, %v435_v17, %v436_v62  ;;  %v464_v14 = vsel %vm126_vm0, %v433_v49, %v434_v12  ;;  %v466_v19 = vsel %vm126_vm0, %v434_v12, %v435_v17  ;;  %v582_v49 = vrot.slane %v555_v56, 4  ;;  %v861_v62 = vld [vmem:[%s11840_s0 + $0x8c] sm:$0xf] }
 0x100   :  { %v469_v22 = vsel %vm438_vm3, %v416_v63, %v468_v18  ;;  %v465_v23 = vsel %vm438_vm3, %v8737_v13, %v464_v14  ;;  %v467_v25 = vsel %vm438_vm3, %v414_v8, %v466_v19 }
 0x101   :  { %501 = vst [vmem:[#allocation2 + $0x178] sm:$0xff] %v469_v22 }
 0x102   :  { %499 = vst [vmem:[#allocation2 + $0x168] sm:$0xff] %v465_v23  ;;  %894 = vrot.lane.b32.xlu1 %v8689_v6, %s8274_s24  ;;  %892 = vrot.lane.b32.xlu0 %v8694_v7, %s8274_s24 }
 0x103   :  { %500 = vst [vmem:[#allocation2 + $0x170] sm:$0xff] %v467_v25  ;;  %896 = vrot.lane.b32.xlu2 %v852_v27, %s8274_s24 }
 0x104   :  { %v541_v24 = vpop.permute.xlu1 %540  ;;  %v539_v29 = vpop.permute.xlu0 %538 }
 0x105   :  { %v575_v13 = vrot.slane %v541_v24, 4  ;;  %v574_v1 = vrot.slane %v539_v29, 4  ;;  %v8838_v31 = vpop.permute.xlu2 %560 }
 0x106   :  { %v585_v63 = vrot.slane %v8838_v31, 4 }
 0x107   :  { %v595_v0 = vsel %vm126_vm0, %v575_v13, %v576_v28  ;;  %v592_v32 = vsel %vm126_vm0, %v574_v1, %v575_v13 }
 0x108   :  { %v596_v34 = vsel %vm593_vm4, %v541_v24, %v595_v0  ;;  %v594_v39 = vsel %vm593_vm4, %v539_v29, %v592_v32 }
 0x109   :  { %642 = vst [vmem:[#allocation2 + $0x188] sm:$0xff] %v596_v34 }
 0x10a   :  { %641 = vst [vmem:[#allocation2 + $0x180] sm:$0xff] %v594_v39  ;;  %900 = vrot.lane.b32.xlu1 %v8716_v11, %s8274_s24  ;;  %898 = vrot.lane.b32.xlu0 %v8721_v58, %s8274_s24 }
 0x10b   :  { %902 = vrot.lane.b32.xlu2 %v8728_v61, %s8274_s24 }
 0x10c   :  { %v547_v3 = vpop.permute.xlu1 %546  ;;  %v545_v5 = vpop.permute.xlu0 %544 }
 0x10d   :  { %v578_v41 = vrot.slane %v547_v3, 4  ;;  %v577_v42 = vrot.slane %v545_v5, 4  ;;  %v8851_v43 = vpop.permute.xlu2 %566 }
 0x10e   :  { %v588_v23 = vrot.slane %v8851_v43, 4 }
 0x10f   :  { %v601_v33 = vsel %vm126_vm0, %v578_v41, %v579_v2  ;;  %v597_v37 = vsel %vm126_vm0, %v576_v28, %v577_v42  ;;  %v599_v45 = vsel %vm126_vm0, %v577_v42, %v578_v41 }
 0x110   :  { %v602_v46 = vsel %vm593_vm4, %v547_v3, %v601_v33  ;;  %v598_v47 = vsel %vm593_vm4, %v8794_v44, %v597_v37  ;;  %v600_v48 = vsel %vm593_vm4, %v545_v5, %v599_v45 }
 0x111   :  { %645 = vst [vmem:[#allocation2 + $0x1a0] sm:$0xff] %v602_v46 }
 0x112   :  { %643 = vst [vmem:[#allocation2 + $0x190] sm:$0xff] %v598_v47  ;;  %906 = vrot.lane.b32.xlu1 %v8745_v20, %s8274_s24  ;;  %904 = vrot.lane.b32.xlu0 %v8750_v21, %s8274_s24 }
 0x113   :  { %644 = vst [vmem:[#allocation2 + $0x198] sm:$0xff] %v600_v48  ;;  %908 = vrot.lane.b32.xlu2 %v8759_v26, %s8274_s24 }
 0x114   :  { %v553_v50 = vpop.permute.xlu1 %552  ;;  %v551_v51 = vpop.permute.xlu0 %550 }
 0x115   :  { %v581_v52 = vrot.slane %v553_v50, 4  ;;  %v580_v54 = vrot.slane %v551_v51, 4  ;;  %v573_v44 = vpop.permute.xlu2 %572 }
 0x117   :  { %v607_v53 = vsel %vm126_vm0, %v581_v52, %v582_v49  ;;  %v603_v9 = vsel %vm126_vm0, %v579_v2, %v580_v54  ;;  %v605_v10 = vsel %vm126_vm0, %v580_v54, %v581_v52  ;;  %v591_v2 = vrot.slane %v573_v44, 4  ;;  %v1007_v49 = vld [vmem:[%s11840_s0 + $0x44] sm:$0xf] }
 0x118   :  { %v608_v57 = vsel %vm593_vm4, %v553_v50, %v607_v53  ;;  %v604_v59 = vsel %vm593_vm4, %v8807_v55, %v603_v9  ;;  %v606_v60 = vsel %vm593_vm4, %v551_v51, %v605_v10 }
 0x119   :  { %648 = vst [vmem:[#allocation2 + $0x1b8] sm:$0xff] %v608_v57 }
 0x11a   :  { %646 = vst [vmem:[#allocation2 + $0x1a8] sm:$0xff] %v604_v59  ;;  %912 = vrot.lane.b32.xlu1 %v8774_v35, %s8274_s24  ;;  %910 = vrot.lane.b32.xlu0 %v8779_v30, %s8274_s24 }
 0x11b   :  { %647 = vst [vmem:[#allocation2 + $0x1b0] sm:$0xff] %v606_v60  ;;  %914 = vrot.lane.b32.xlu2 %v861_v62, %s8274_s24 }
 0x11c   :  { %v559_v8 = vpop.permute.xlu1 %558  ;;  %v557_v17 = vpop.permute.xlu0 %556 }
 0x11d   :  { %v584_v55 = vrot.slane %v559_v8, 4  ;;  %v583_v12 = vrot.slane %v557_v17, 4  ;;  %v8882_v56 = vpop.permute.xlu2 %729 }
 0x11e   :  { %v763_v50 = vrot.slane %v8882_v56, 4 }
 0x11f   :  { %v611_v18 = vsel %vm126_vm0, %v584_v55, %v585_v63  ;;  %v609_v14 = vsel %vm126_vm0, %v583_v12, %v584_v55 }
 0x120   :  { %v612_v19 = vsel %vm593_vm4, %v559_v8, %v611_v18  ;;  %v610_v22 = vsel %vm593_vm4, %v557_v17, %v609_v14 }
 0x121   :  { %650 = vst [vmem:[#allocation2 + $0x1c8] sm:$0xff] %v612_v19 }
 0x122   :  { %649 = vst [vmem:[#allocation2 + $0x1c0] sm:$0xff] %v610_v22  ;;  %1037 = vrot.lane.b32.xlu1 %v8630_v15, %s8275_s30  ;;  %1035 = vrot.lane.b32.xlu0 %v8635_v16, %s8275_s30 }
 0x123   :  { %1039 = vrot.lane.b32.xlu2 %v8642_v4, %s8275_s30 }
 0x124   :  { %v565_v25 = vpop.permute.xlu1 %564  ;;  %v563_v27 = vpop.permute.xlu0 %562 }
 0x125   :  { %v587_v28 = vrot.slane %v565_v25, 4  ;;  %v586_v24 = vrot.slane %v563_v27, 4  ;;  %v8895_v29 = vpop.permute.xlu2 %735 }
 0x126   :  { %v766_v59 = vrot.slane %v8895_v29, 4 }
 0x127   :  { %v617_v13 = vsel %vm126_vm0, %v587_v28, %v588_v23  ;;  %v613_v1 = vsel %vm126_vm0, %v585_v63, %v586_v24  ;;  %v615_v0 = vsel %vm126_vm0, %v586_v24, %v587_v28 }
 0x128   :  { %v618_v32 = vsel %vm593_vm4, %v565_v25, %v617_v13  ;;  %v614_v34 = vsel %vm593_vm4, %v8838_v31, %v613_v1  ;;  %v616_v39 = vsel %vm593_vm4, %v563_v27, %v615_v0 }
 0x129   :  { %653 = vst [vmem:[#allocation2 + $0x1e0] sm:$0xff] %v618_v32 }
 0x12a   :  { %651 = vst [vmem:[#allocation2 + $0x1d0] sm:$0xff] %v614_v34  ;;  %1043 = vrot.lane.b32.xlu1 %v8659_v36, %s8275_s30  ;;  %1041 = vrot.lane.b32.xlu0 %v8664_v38, %s8275_s30 }
 0x12b   :  { %652 = vst [vmem:[#allocation2 + $0x1d8] sm:$0xff] %v616_v39  ;;  %1045 = vrot.lane.b32.xlu2 %v8673_v40, %s8275_s30 }
 0x12c   :  { %v571_v3 = vpop.permute.xlu1 %570  ;;  %v569_v5 = vpop.permute.xlu0 %568 }
 0x12d   :  { %v590_v41 = vrot.slane %v571_v3, 4  ;;  %v589_v42 = vrot.slane %v569_v5, 4  ;;  %v742_v31 = vpop.permute.xlu2 %741 }
 0x12f   :  { %v623_v33 = vsel %vm126_vm0, %v590_v41, %v591_v2  ;;  %v619_v37 = vsel %vm126_vm0, %v588_v23, %v589_v42  ;;  %v621_v45 = vsel %vm126_vm0, %v589_v42, %v590_v41  ;;  %v769_v23 = vrot.slane %v742_v31, 4  ;;  %v1016_v2 = vld [vmem:[%s11840_s0 + $0x8c] sm:$0xf] }
 0x130   :  { %v624_v46 = vsel %vm593_vm4, %v571_v3, %v623_v33  ;;  %v620_v47 = vsel %vm593_vm4, %v8851_v43, %v619_v37  ;;  %v622_v48 = vsel %vm593_vm4, %v569_v5, %v621_v45 }
 0x131   :  { %656 = vst [vmem:[#allocation2 + $0x1f8] sm:$0xff] %v624_v46 }
 0x132   :  { %654 = vst [vmem:[#allocation2 + $0x1e8] sm:$0xff] %v620_v47  ;;  %1049 = vrot.lane.b32.xlu1 %v8689_v6, %s8275_s30  ;;  %1047 = vrot.lane.b32.xlu0 %v8694_v7, %s8275_s30 }
 0x133   :  { %655 = vst [vmem:[#allocation2 + $0x1f0] sm:$0xff] %v622_v48  ;;  %1051 = vrot.lane.b32.xlu2 %v1007_v49, %s8275_s30 }
 0x134   :  { %v728_v51 = vpop.permute.xlu1 %727  ;;  %v726_v52 = vpop.permute.xlu0 %725 }
 0x135   :  { %v762_v43 = vrot.slane %v728_v51, 4  ;;  %v761_v54 = vrot.slane %v726_v52, 4  ;;  %v8926_v44 = vpop.permute.xlu2 %747 }
 0x136   :  { %v772_v3 = vrot.slane %v8926_v44, 4 }
 0x137   :  { %v782_v53 = vsel %vm126_vm0, %v762_v43, %v763_v50  ;;  %v779_v9 = vsel %vm126_vm0, %v761_v54, %v762_v43 }
 0x138   :  { %v783_v10 = vsel %vm780_vm5, %v728_v51, %v782_v53  ;;  %v781_v57 = vsel %vm780_vm5, %v726_v52, %v779_v9 }
 0x139   :  { %829 = vst [vmem:[#allocation2 + $0x288] sm:$0xff] %v783_v10 }
 0x13a   :  { %828 = vst [vmem:[#allocation2 + $0x280] sm:$0xff] %v781_v57  ;;  %1055 = vrot.lane.b32.xlu1 %v8716_v11, %s8275_s30  ;;  %1053 = vrot.lane.b32.xlu0 %v8721_v58, %s8275_s30 }
 0x13b   :  { %1057 = vrot.lane.b32.xlu2 %v8728_v61, %s8275_s30 }
 0x13c   :  { %v734_v60 = vpop.permute.xlu1 %733  ;;  %v732_v62 = vpop.permute.xlu0 %731 }
 0x13d   :  { %v765_v63 = vrot.slane %v734_v60, 4  ;;  %v764_v8 = vrot.slane %v732_v62, 4  ;;  %v8939_v17 = vpop.permute.xlu2 %753 }
 0x13e   :  { %v775_v47 = vrot.slane %v8939_v17, 4 }
 0x13f   :  { %v788_v55 = vsel %vm126_vm0, %v765_v63, %v766_v59  ;;  %v784_v12 = vsel %vm126_vm0, %v763_v50, %v764_v8  ;;  %v786_v18 = vsel %vm126_vm0, %v764_v8, %v765_v63 }
 0x140   :  { %v789_v14 = vsel %vm780_vm5, %v734_v60, %v788_v55  ;;  %v785_v19 = vsel %vm780_vm5, %v8882_v56, %v784_v12  ;;  %v787_v22 = vsel %vm780_vm5, %v732_v62, %v786_v18 }
 0x141   :  { %832 = vst [vmem:[#allocation2 + $0x2a0] sm:$0xff] %v789_v14 }
 0x142   :  { %830 = vst [vmem:[#allocation2 + $0x290] sm:$0xff] %v785_v19  ;;  %1061 = vrot.lane.b32.xlu1 %v8745_v20, %s8275_s30  ;;  %1059 = vrot.lane.b32.xlu0 %v8750_v21, %s8275_s30 }
 0x143   :  { %831 = vst [vmem:[#allocation2 + $0x298] sm:$0xff] %v787_v22  ;;  %1063 = vrot.lane.b32.xlu2 %v8759_v26, %s8275_s30 }
 0x144   :  { %v740_v25 = vpop.permute.xlu1 %739  ;;  %v738_v27 = vpop.permute.xlu0 %737 }
 0x145   :  { %v768_v28 = vrot.slane %v740_v25, 4  ;;  %v767_v24 = vrot.slane %v738_v27, 4  ;;  %v760_v56 = vpop.permute.xlu2 %759 }
 0x147   :  { %v794_v13 = vsel %vm126_vm0, %v768_v28, %v769_v23  ;;  %v790_v1 = vsel %vm126_vm0, %v766_v59, %v767_v24  ;;  %v792_v0 = vsel %vm126_vm0, %v767_v24, %v768_v28 }
 0x148   :  { %v795_v32 = vsel %vm780_vm5, %v740_v25, %v794_v13  ;;  %v791_v34 = vsel %vm780_vm5, %v8895_v29, %v790_v1  ;;  %v793_v39 = vsel %vm780_vm5, %v738_v27, %v792_v0 }
 0x149   :  { %835 = vst [vmem:[#allocation2 + $0x2b8] sm:$0xff] %v795_v32 }
 0x14a   :  { %833 = vst [vmem:[#allocation2 + $0x2a8] sm:$0xff] %v791_v34  ;;  %1067 = vrot.lane.b32.xlu1 %v8774_v35, %s8275_s30  ;;  %1065 = vrot.lane.b32.xlu0 %v8779_v30, %s8275_s30 }
 0x14b   :  { %834 = vst [vmem:[#allocation2 + $0x2b0] sm:$0xff] %v793_v39  ;;  %1069 = vrot.lane.b32.xlu2 %v1016_v2, %s8275_s30 }
 0x14c   :  { %v746_v5 = vpop.permute.xlu1 %745  ;;  %v744_v41 = vpop.permute.xlu0 %743 }
 0x14d   :  { %v771_v29 = vrot.slane %v746_v5, 4  ;;  %v770_v42 = vrot.slane %v744_v41, 4  ;;  %v8970_v31 = vpop.permute.xlu2 %884 }
 0x14e   :  { %v918_v12 = vrot.slane %v8970_v31, 4 }
 0x14f   :  { %v798_v33 = vsel %vm126_vm0, %v771_v29, %v772_v3  ;;  %v796_v37 = vsel %vm126_vm0, %v770_v42, %v771_v29 }
 0x150   :  { %v799_v45 = vsel %vm780_vm5, %v746_v5, %v798_v33  ;;  %v797_v46 = vsel %vm780_vm5, %v744_v41, %v796_v37 }
 0x151   :  { %837 = vst [vmem:[#allocation2 + $0x2c8] sm:$0xff] %v799_v45 }
 0x152   :  { %836 = vst [vmem:[#allocation2 + $0x2c0] sm:$0xff] %v797_v46  ;;  %1192 = vrot.lane.b32.xlu1 %v8630_v15, %s8276_s13  ;;  %1190 = vrot.lane.b32.xlu0 %v8635_v16, %s8276_s13 }
 0x153   :  { %1194 = vrot.lane.b32.xlu2 %v8642_v4, %s8276_s13  ;;  %v778_v4 = vrot.slane %v760_v56, 4 }
 0x154   :  { %v752_v48 = vpop.permute.xlu1 %751  ;;  %v750_v49 = vpop.permute.xlu0 %749 }
 0x155   :  { %v774_v50 = vrot.slane %v752_v48, 4  ;;  %v773_v51 = vrot.slane %v750_v49, 4  ;;  %v8983_v52 = vpop.permute.xlu2 %890 }
 0x156   :  { %v921_v27 = vrot.slane %v8983_v52, 4 }
 0x157   :  { %v804_v43 = vsel %vm126_vm0, %v774_v50, %v775_v47  ;;  %v800_v54 = vsel %vm126_vm0, %v772_v3, %v773_v51  ;;  %v802_v15 = vsel %vm126_vm0, %v773_v51, %v774_v50 }
 0x158   :  { %v805_v53 = vsel %vm780_vm5, %v752_v48, %v804_v43  ;;  %v801_v16 = vsel %vm780_vm5, %v8926_v44, %v800_v54  ;;  %v803_v9 = vsel %vm780_vm5, %v750_v49, %v802_v15 }
 0x159   :  { %840 = vst [vmem:[#allocation2 + $0x2e0] sm:$0xff] %v805_v53 }
 0x15a   :  { %838 = vst [vmem:[#allocation2 + $0x2d0] sm:$0xff] %v801_v16  ;;  %1198 = vrot.lane.b32.xlu1 %v8659_v36, %s8276_s13  ;;  %1196 = vrot.lane.b32.xlu0 %v8664_v38, %s8276_s13 }
 0x15b   :  { %839 = vst [vmem:[#allocation2 + $0x2d8] sm:$0xff] %v803_v9  ;;  %1200 = vrot.lane.b32.xlu2 %v8673_v40, %s8276_s13  ;;  %v1162_v40 = vld [vmem:[%s11840_s0 + $0x44] sm:$0xf] }
 0x15c   :  { %v758_v10 = vpop.permute.xlu1 %757  ;;  %v756_v57 = vpop.permute.xlu0 %755 }
 0x15d   :  { %v777_v59 = vrot.slane %v758_v10, 4  ;;  %v776_v60 = vrot.slane %v756_v57, 4  ;;  %v897_v44 = vpop.permute.xlu2 %896 }
 0x15f   :  { %v810_v62 = vsel %vm126_vm0, %v777_v59, %v778_v4  ;;  %v806_v63 = vsel %vm126_vm0, %v775_v47, %v776_v60  ;;  %v808_v8 = vsel %vm126_vm0, %v776_v60, %v777_v59 }
 0x160   :  { %v811_v36 = vsel %vm780_vm5, %v758_v10, %v810_v62  ;;  %v807_v38 = vsel %vm780_vm5, %v8939_v17, %v806_v63  ;;  %v809_v55 = vsel %vm780_vm5, %v756_v57, %v808_v8 }
 0x161   :  { %843 = vst [vmem:[#allocation2 + $0x2f8] sm:$0xff] %v811_v36 }
 0x162   :  { %841 = vst [vmem:[#allocation2 + $0x2e8] sm:$0xff] %v807_v38  ;;  %1204 = vrot.lane.b32.xlu1 %v8689_v6, %s8276_s13  ;;  %1202 = vrot.lane.b32.xlu0 %v8694_v7, %s8276_s13 }
 0x163   :  { %842 = vst [vmem:[#allocation2 + $0x2f0] sm:$0xff] %v809_v55  ;;  %1206 = vrot.lane.b32.xlu2 %v1162_v40, %s8276_s13 }
 0x164   :  { %v883_v18 = vpop.permute.xlu1 %882  ;;  %v881_v14 = vpop.permute.xlu0 %880 }
 0x165   :  { %v917_v17 = vrot.slane %v883_v18, 4  ;;  %v916_v19 = vrot.slane %v881_v14, 4  ;;  %v9014_v22 = vpop.permute.xlu2 %902 }
 0x166   :  { %v927_v45 = vrot.slane %v9014_v22, 4 }
 0x167   :  { %v937_v23 = vsel %vm126_vm0, %v917_v17, %v918_v12  ;;  %v934_v25 = vsel %vm126_vm0, %v916_v19, %v917_v17 }
 0x168   :  { %v938_v6 = vsel %vm935_vm6, %v883_v18, %v937_v23  ;;  %v936_v7 = vsel %vm935_vm6, %v881_v14, %v934_v25 }
 0x169   :  { %984 = vst [vmem:[#allocation2 + $0x308] sm:$0xff] %v938_v6 }
 0x16a   :  { %983 = vst [vmem:[#allocation2 + $0x300] sm:$0xff] %v936_v7  ;;  %1210 = vrot.lane.b32.xlu1 %v8716_v11, %s8276_s13  ;;  %1208 = vrot.lane.b32.xlu0 %v8721_v58, %s8276_s13 }
 0x16b   :  { %1212 = vrot.lane.b32.xlu2 %v8728_v61, %s8276_s13  ;;  %v924_v61 = vrot.slane %v897_v44, 4 }
 0x16c   :  { %v889_v28 = vpop.permute.xlu1 %888  ;;  %v887_v24 = vpop.permute.xlu0 %886 }
 0x16d   :  { %v920_v56 = vrot.slane %v889_v28, 4  ;;  %v919_v13 = vrot.slane %v887_v24, 4  ;;  %v9027_v1 = vpop.permute.xlu2 %908 }
 0x16f   :  { %v943_v0 = vsel %vm126_vm0, %v920_v56, %v921_v27  ;;  %v939_v32 = vsel %vm126_vm0, %v918_v12, %v919_v13  ;;  %v941_v11 = vsel %vm126_vm0, %v919_v13, %v920_v56 }
 0x170   :  { %v944_v34 = vsel %vm935_vm6, %v889_v28, %v943_v0  ;;  %v940_v58 = vsel %vm935_vm6, %v8970_v31, %v939_v32  ;;  %v942_v39 = vsel %vm935_vm6, %v887_v24, %v941_v11 }
 0x171   :  { %987 = vst [vmem:[#allocation2 + $0x320] sm:$0xff] %v944_v34 }
 0x172   :  { %985 = vst [vmem:[#allocation2 + $0x310] sm:$0xff] %v940_v58  ;;  %1216 = vrot.lane.b32.xlu1 %v8745_v20, %s8276_s13  ;;  %1214 = vrot.lane.b32.xlu0 %v8750_v21, %s8276_s13 }
 0x173   :  { %986 = vst [vmem:[#allocation2 + $0x318] sm:$0xff] %v942_v39  ;;  %1218 = vrot.lane.b32.xlu2 %v8759_v26, %s8276_s13  ;;  %v1171_v26 = vld [vmem:[%s11840_s0 + $0x8c] sm:$0xf] }
 0x174   :  { %v895_v2 = vpop.permute.xlu1 %894  ;;  %v893_v3 = vpop.permute.xlu0 %892 }
 0x175   :  { %v923_v5 = vrot.slane %v895_v2, 4  ;;  %v922_v41 = vrot.slane %v893_v3, 4  ;;  %v915_v29 = vpop.permute.xlu2 %914 }
 0x176   :  { %v933_v62 = vrot.slane %v915_v29, 4 }
 0x177   :  { %v949_v42 = vsel %vm126_vm0, %v923_v5, %v924_v61  ;;  %v945_v31 = vsel %vm126_vm0, %v921_v27, %v922_v41  ;;  %v947_v33 = vsel %vm126_vm0, %v922_v41, %v923_v5 }
 0x178   :  { %v950_v20 = vsel %vm935_vm6, %v895_v2, %v949_v42  ;;  %v946_v21 = vsel %vm935_vm6, %v8983_v52, %v945_v31  ;;  %v948_v37 = vsel %vm935_vm6, %v893_v3, %v947_v33  ;;  %v657_v2 = vld [vmem:[%s11840_s0 + $0x4] sm:$0xff]  ;;  %v665_v42 = vld [vmem:[%s11840_s0 + $0x4c] sm:$0xff] }
 0x179   :  { %990 = vst [vmem:[#allocation2 + $0x338] sm:$0xff] %v950_v20 }
 0x17a   :  { %988 = vst [vmem:[#allocation2 + $0x328] sm:$0xff] %v946_v21  ;;  %1222 = vrot.lane.b32.xlu1 %v8774_v35, %s8276_s13  ;;  %1220 = vrot.lane.b32.xlu0 %v8779_v30, %s8276_s13  ;;  %v930_v30 = vrot.slane %v9027_v1, 4 }
 0x17b   :  { %989 = vst [vmem:[#allocation2 + $0x330] sm:$0xff] %v948_v37  ;;  %1224 = vrot.lane.b32.xlu2 %v1171_v26, %s8276_s13 }
 0x17c   :  { %v901_v46 = vpop.permute.xlu1 %900  ;;  %v899_v47 = vpop.permute.xlu0 %898  ;;  %673 = vst [vmem:[#allocation2 + $0x200] sm:$0xff] %v657_v2 }
 0x17d   :  { %v926_v48 = vrot.slane %v901_v46, 4  ;;  %v925_v49 = vrot.slane %v899_v47, 4  ;;  %v1040_v50 = vpop.permute.xlu2 %1039  ;;  %681 = vst [vmem:[#allocation2 + $0x240] sm:$0xff] %v665_v42  ;;  %v8004_v42 = vld [vmem:[#allocation2 + $0x284] sm:$0xf] }
 0x17f   :  { %v953_v51 = vsel %vm126_vm0, %v926_v48, %v927_v45  ;;  %v951_v52 = vsel %vm126_vm0, %v925_v49, %v926_v48 }
 0x180   :  { %v954_v43 = vsel %vm935_vm6, %v901_v46, %v953_v51  ;;  %v952_v35 = vsel %vm935_vm6, %v899_v47, %v951_v52 }
 0x181   :  { %992 = vst [vmem:[#allocation2 + $0x348] sm:$0xff] %v954_v43 }
 0x182   :  { %991 = vst [vmem:[#allocation2 + $0x340] sm:$0xff] %v952_v35 }
 0x184   :  { %v907_v54 = vpop.permute.xlu1 %906  ;;  %v905_v15 = vpop.permute.xlu0 %904 }
 0x185   :  { %v929_v53 = vrot.slane %v907_v54, 4  ;;  %v928_v16 = vrot.slane %v905_v15, 4  ;;  %v9063_v9 = vpop.permute.xlu2 %1045 }
 0x187   :  { %v959_v4 = vsel %vm126_vm0, %v929_v53, %v930_v30  ;;  %v955_v10 = vsel %vm126_vm0, %v927_v45, %v928_v16  ;;  %v957_v57 = vsel %vm126_vm0, %v928_v16, %v929_v53 }
 0x188   :  { %v960_v59 = vsel %vm935_vm6, %v907_v54, %v959_v4  ;;  %v956_v60 = vsel %vm935_vm6, %v9014_v22, %v955_v10  ;;  %v958_v44 = vsel %vm935_vm6, %v905_v15, %v957_v57  ;;  %v1073_v22 = vrot.slane %v1040_v50, 4 }
 0x189   :  { %995 = vst [vmem:[#allocation2 + $0x360] sm:$0xff] %v960_v59 }
 0x18a   :  { %993 = vst [vmem:[#allocation2 + $0x350] sm:$0xff] %v956_v60 }
 0x18b   :  { %994 = vst [vmem:[#allocation2 + $0x358] sm:$0xff] %v958_v44 }
 0x18c   :  { %v913_v63 = vpop.permute.xlu1 %912  ;;  %v911_v8 = vpop.permute.xlu0 %910 }
 0x18d   :  { %v932_v36 = vrot.slane %v913_v63, 4  ;;  %v931_v38 = vrot.slane %v911_v8, 4  ;;  %v1052_v55 = vpop.permute.xlu2 %1051 }
 0x18e   :  { %v1079_v31 = vrot.slane %v1052_v55, 4 }
 0x18f   :  { %v965_v40 = vsel %vm126_vm0, %v932_v36, %v933_v62  ;;  %v961_v12 = vsel %vm126_vm0, %v930_v30, %v931_v38  ;;  %v963_v18 = vsel %vm126_vm0, %v931_v38, %v932_v36 }
 0x190   :  { %v966_v14 = vsel %vm935_vm6, %v913_v63, %v965_v40  ;;  %v962_v17 = vsel %vm935_vm6, %v9027_v1, %v961_v12  ;;  %v964_v19 = vsel %vm935_vm6, %v911_v8, %v963_v18  ;;  %v1076_v1 = vrot.slane %v9063_v9, 4 }
 0x191   :  { %998 = vst [vmem:[#allocation2 + $0x378] sm:$0xff] %v966_v14 }
 0x192   :  { %996 = vst [vmem:[#allocation2 + $0x368] sm:$0xff] %v962_v17 }
 0x193   :  { %997 = vst [vmem:[#allocation2 + $0x370] sm:$0xff] %v964_v19 }
 0x194   :  { %v1038_v23 = vpop.permute.xlu1 %1037  ;;  %v1036_v25 = vpop.permute.xlu0 %1035 }
 0x195   :  { %v1072_v6 = vrot.slane %v1038_v23, 4  ;;  %v1071_v7 = vrot.slane %v1036_v25, 4  ;;  %v1058_v24 = vpop.permute.xlu2 %1057 }
 0x197   :  { %v1092_v27 = vsel %vm126_vm0, %v1072_v6, %v1073_v22  ;;  %v1089_v28 = vsel %vm126_vm0, %v1071_v7, %v1072_v6  ;;  %v7092_v7 = vld [vmem:[#allocation2 + $0x300] sm:$0xf] }
 0x198   :  { %v1093_v56 = vsel %vm1090_vm7, %v1038_v23, %v1092_v27  ;;  %v1091_v13 = vsel %vm1090_vm7, %v1036_v25, %v1089_v28  ;;  %v7094_v23 = vld [vmem:[#allocation2 + $0x340] sm:$0xf0]  ;;  %v659_v27 = vld [vmem:[%s11840_s0 + $0x14] sm:$0xff]  ;;  %v667_v28 = vld [vmem:[%s11840_s0 + $0x5c] sm:$0xff] }
 0x199   :  { %1139 = vst [vmem:[#allocation2 + $0x388] sm:$0xff] %v1093_v56 }
 0x19a   :  { %1138 = vst [vmem:[#allocation2 + $0x380] sm:$0xff] %v1091_v13  ;;  %v8020_v13 = vld [vmem:[#allocation2 + $0x304] sm:$0xf] }
 0x19b   :  { %675 = vst [vmem:[#allocation2 + $0x210] sm:$0xff] %v659_v27  ;;  %v658_v27 = vld [vmem:[%s11840_s0 + $0xc] sm:$0xff] }
 0x19c   :  { %v1044_v0 = vpop.permute.xlu1 %1043  ;;  %v1042_v32 = vpop.permute.xlu0 %1041  ;;  %683 = vst [vmem:[#allocation2 + $0x250] sm:$0xff] %v667_v28 }
 0x19d   :  { %v1075_v11 = vrot.slane %v1044_v0, 4  ;;  %v1074_v34 = vrot.slane %v1042_v32, 4  ;;  %v9093_v29 = vpop.permute.xlu2 %1063  ;;  %674 = vst [vmem:[#allocation2 + $0x208] sm:$0xff] %v658_v27  ;;  %v7982_v27 = vld [vmem:[#allocation2 + $0x1cc] sm:$0xf0] }
 0x19f   :  { %v1098_v58 = vsel %vm126_vm0, %v1075_v11, %v1076_v1  ;;  %v1094_v39 = vsel %vm126_vm0, %v1073_v22, %v1074_v34  ;;  %v1096_v61 = vsel %vm126_vm0, %v1074_v34, %v1075_v11  ;;  %v8028_v22 = vld [vmem:[#allocation2 + $0x33c] sm:$0xf0] }
 0x1a0   :  { %v1099_v3 = vsel %vm1090_vm7, %v1044_v0, %v1098_v58  ;;  %v1095_v5 = vsel %vm1090_vm7, %v1040_v50, %v1094_v39  ;;  %v1097_v41 = vsel %vm1090_vm7, %v1042_v32, %v1096_v61  ;;  %v1082_v50 = vrot.slane %v1058_v24, 4  ;;  %v7028_v58 = vld [vmem:[#allocation2 + $0x280] sm:$0xf]  ;;  %v7030_v61 = vld [vmem:[#allocation2 + $0x2c0] sm:$0xf0] }
 0x1a1   :  { %1142 = vst [vmem:[#allocation2 + $0x3a0] sm:$0xff] %v1099_v3  ;;  %v7156_v55 = vld [vmem:[#allocation2 + $0x380] sm:$0xf]  ;;  %v8036_v40 = vld [vmem:[#allocation2 + $0x384] sm:$0xf]  ;;  %v7097_v0 = vor.u32 %v8020_v13, %v7094_v23 }
 0x1a2   :  { %1140 = vst [vmem:[#allocation2 + $0x390] sm:$0xff] %v1095_v5  ;;  %v8012_v39 = vld [vmem:[#allocation2 + $0x2bc] sm:$0xf0]  ;;  %v6710_v13 = vld [vmem:[#allocation2 + $0x40] sm:$0xf0] }
 0x1a3   :  { %1141 = vst [vmem:[#allocation2 + $0x398] sm:$0xff] %v1097_v41 }
 0x1a4   :  { %v1050_v33 = vpop.permute.xlu1 %1049  ;;  %v1048_v20 = vpop.permute.xlu0 %1047 }
 0x1a5   :  { %v1078_v21 = vrot.slane %v1050_v33, 4  ;;  %v1077_v37 = vrot.slane %v1048_v20, 4  ;;  %v1070_v51 = vpop.permute.xlu2 %1069 }
 0x1a6   :  { %v1088_v19 = vrot.slane %v1070_v51, 4 }
 0x1a7   :  { %v1104_v26 = vsel %vm126_vm0, %v1078_v21, %v1079_v31  ;;  %v1100_v45 = vsel %vm126_vm0, %v1076_v1, %v1077_v37  ;;  %v1102_v46 = vsel %vm126_vm0, %v1077_v37, %v1078_v21  ;;  %v7093_v1 = vor.u32 %v8028_v22, %v7092_v7  ;;  %v6964_v31 = vld [vmem:[#allocation2 + $0x200] sm:$0xf]  ;;  %v6966_v21 = vld [vmem:[#allocation2 + $0x240] sm:$0xf0] }
 0x1a8   :  { %v1105_v47 = vsel %vm1090_vm7, %v1050_v33, %v1104_v26  ;;  %v1101_v48 = vsel %vm1090_vm7, %v9063_v9, %v1100_v45  ;;  %v1103_v49 = vsel %vm1090_vm7, %v1048_v20, %v1102_v46  ;;  %v1085_v9 = vrot.slane %v9093_v29, 4  ;;  %v7988_v33 = vld [vmem:[#allocation2 + $0x204] sm:$0xf]  ;;  %v7996_v20 = vld [vmem:[#allocation2 + $0x23c] sm:$0xf0] }
 0x1a9   :  { %1145 = vst [vmem:[#allocation2 + $0x3b8] sm:$0xff] %v1105_v47  ;;  %v7029_v37 = vor.u32 %v8012_v39, %v7028_v58  ;;  %v7033_v26 = vor.u32 %v8004_v42, %v7030_v61  ;;  %v6965_v47 = vor.u32 %v7996_v20, %v6964_v31  ;;  %v7940_v7 = vld [vmem:[#allocation2 + $0x84] sm:$0xf] }
 0x1aa   :  { %1143 = vst [vmem:[#allocation2 + $0x3a8] sm:$0xff] %v1101_v48  ;;  %v6969_v48 = vor.u32 %v7988_v33, %v6966_v21  ;;  %v8038_v33 = vld [vmem:[#allocation2 + $0x394] sm:$0xf] }
 0x1ab   :  { %1144 = vst [vmem:[#allocation2 + $0x3b0] sm:$0xff] %v1103_v49 }
 0x1ac   :  { %v1056_v52 = vpop.permute.xlu1 %1055  ;;  %v1054_v43 = vpop.permute.xlu0 %1053 }
 0x1ad   :  { %v1081_v35 = vrot.slane %v1056_v52, 4  ;;  %v1080_v30 = vrot.slane %v1054_v43, 4  ;;  %v9110_v60 = vpop.permute.xlu2 %1194 }
 0x1ae   :  { %v1228_v45 = vrot.slane %v9110_v60, 4 }
 0x1af   :  { %v1108_v54 = vsel %vm126_vm0, %v1081_v35, %v1082_v50  ;;  %v1106_v15 = vsel %vm126_vm0, %v1080_v30, %v1081_v35  ;;  %v6902_v35 = vld [vmem:[#allocation2 + $0x1c0] sm:$0xf0] }
 0x1b0   :  { %v1109_v53 = vsel %vm1090_vm7, %v1056_v52, %v1108_v54  ;;  %v1107_v16 = vsel %vm1090_vm7, %v1054_v43, %v1106_v15  ;;  %v7980_v43 = vld [vmem:[#allocation2 + $0x1bc] sm:$0xf0] }
 0x1b1   :  { %1147 = vst [vmem:[#allocation2 + $0x3c8] sm:$0xff] %v1109_v53  ;;  %v6900_v15 = vld [vmem:[#allocation2 + $0x180] sm:$0xf]  ;;  %v7972_v53 = vld [vmem:[#allocation2 + $0x184] sm:$0xf] }
 0x1b2   :  { %1146 = vst [vmem:[#allocation2 + $0x3c0] sm:$0xff] %v1107_v16 }
 0x1b4   :  { %v1062_v4 = vpop.permute.xlu1 %1061  ;;  %v1060_v10 = vpop.permute.xlu0 %1059 }
 0x1b5   :  { %v1084_v57 = vrot.slane %v1062_v4, 4  ;;  %v1083_v59 = vrot.slane %v1060_v10, 4  ;;  %v9127_v2 = vpop.permute.xlu2 %1200 }
 0x1b7   :  { %v1114_v44 = vsel %vm126_vm0, %v1084_v57, %v1085_v9  ;;  %v1110_v62 = vsel %vm126_vm0, %v1082_v50, %v1083_v59  ;;  %v1112_v63 = vsel %vm126_vm0, %v1083_v59, %v1084_v57  ;;  %v7964_v57 = vld [vmem:[#allocation2 + $0x13c] sm:$0xf0]  ;;  %v6838_v59 = vld [vmem:[#allocation2 + $0x140] sm:$0xf0] }
 0x1b8   :  { %v1115_v8 = vsel %vm1090_vm7, %v1062_v4, %v1114_v44  ;;  %v1111_v36 = vsel %vm1090_vm7, %v1058_v24, %v1110_v62  ;;  %v1113_v38 = vsel %vm1090_vm7, %v1060_v10, %v1112_v63  ;;  %v6905_v4 = vor.u32 %v7972_v53, %v6902_v35  ;;  %v8022_v35 = vld [vmem:[#allocation2 + $0x314] sm:$0xf]  ;;  %v7044_v53 = vld [vmem:[#allocation2 + $0x290] sm:$0xf] }
 0x1b9   :  { %1150 = vst [vmem:[#allocation2 + $0x3e0] sm:$0xff] %v1115_v8  ;;  %v8044_v12 = vld [vmem:[#allocation2 + $0x3bc] sm:$0xf0]  ;;  %v7158_v18 = vld [vmem:[#allocation2 + $0x3c0] sm:$0xf0]  ;;  %v1231_v10 = vrot.slane %v9127_v2, 4 }
 0x1ba   :  { %1148 = vst [vmem:[#allocation2 + $0x3d0] sm:$0xff] %v1111_v36  ;;  %v7157_v14 = vor.u32 %v8044_v12, %v7156_v55  ;;  %v7161_v17 = vor.u32 %v8036_v40, %v7158_v18  ;;  %v6836_v36 = vld [vmem:[#allocation2 + $0x100] sm:$0xf] }
 0x1bb   :  { %1149 = vst [vmem:[#allocation2 + $0x3d8] sm:$0xff] %v1113_v38  ;;  %v7956_v38 = vld [vmem:[#allocation2 + $0x104] sm:$0xf]  ;;  %v6837_v55 = vor.u32 %v7964_v57, %v6836_v36  ;;  %v6980_v57 = vld [vmem:[#allocation2 + $0x210] sm:$0xf] }
 0x1bc   :  { %2200 = vmatpush.bf16.msra.mxu0 %v7157_v14  ;;  %2228 = vmatpush.bf16.msra.mxu2 %v7161_v17  ;;  %v1068_v25 = vpop.permute.xlu1 %1067  ;;  %v1066_v6 = vpop.permute.xlu0 %1065  ;;  %v6841_v40 = vor.u32 %v7956_v38, %v6838_v59  ;;  %v7948_v17 = vld [vmem:[#allocation2 + $0xbc] sm:$0xf0]  ;;  %v661_v59 = vld [vmem:[%s11840_s0 + $0x24] sm:$0xff] }
 0x1bd   :  { %v1087_v24 = vrot.slane %v1068_v25, 4  ;;  %v1086_v56 = vrot.slane %v1066_v6, 4  ;;  %v9138_v16 = vpop.permute.xlu2 %1206  ;;  %677 = vst [vmem:[#allocation2 + $0x220] sm:$0xff] %v661_v59 }
 0x1bf   :  { %v1120_v32 = vsel %vm126_vm0, %v1087_v24, %v1088_v19  ;;  %v1116_v11 = vsel %vm126_vm0, %v1085_v9, %v1086_v56  ;;  %v1118_v34 = vsel %vm126_vm0, %v1086_v56, %v1087_v24  ;;  %v6901_v9 = vor.u32 %v7980_v43, %v6900_v15  ;;  %v6774_v19 = vld [vmem:[#allocation2 + $0xc0] sm:$0xf0]  ;;  %v7932_v56 = vld [vmem:[#allocation2 + $0x3c] sm:$0xf0]  ;;  %v7108_v43 = vld [vmem:[#allocation2 + $0x310] sm:$0xf] }
 0x1c0   :  { %v1121_v3 = vsel %vm1090_vm7, %v1068_v25, %v1120_v32  ;;  %v1117_v5 = vsel %vm1090_vm7, %v9093_v29, %v1116_v11  ;;  %v1119_v41 = vsel %vm1090_vm7, %v1066_v6, %v1118_v34  ;;  %2201 = vmatpush.bf16.msra.mxu0 %v7093_v1  ;;  %2229 = vmatpush.bf16.msra.mxu2 %v7097_v0  ;;  %v6772_v6 = vld [vmem:[#allocation2 + $0x80] sm:$0xf]  ;;  %v1234_v1 = vrot.slane %v9138_v16, 4  ;;  %v7924_v32 = vld [vmem:[#allocation2 + $0x4] sm:$0xf] }
 0x1c1   :  { %1153 = vst [vmem:[#allocation2 + $0x3f8] sm:$0xff] %v1121_v3  ;;  %v6773_v28 = vor.u32 %v7948_v17, %v6772_v6  ;;  %v6777_v24 = vor.u32 %v7940_v7, %v6774_v19  ;;  %v6708_v0 = vld [vmem:[#allocation2] sm:$0xf]  ;;  %v7172_v11 = vld [vmem:[#allocation2 + $0x390] sm:$0xf]  ;;  %v6713_v21 = vor.u32 %v7924_v32, %v6710_v13  ;;  %v8277_v17 = vmov 0  }
 0x1c2   :  { %1151 = vst [vmem:[#allocation2 + $0x3e8] sm:$0xff] %v1117_v5  ;;  %v8046_v34 = vld [vmem:[#allocation2 + $0x3cc] sm:$0xf0]  ;;  %v7174_v58 = vld [vmem:[#allocation2 + $0x3d0] sm:$0xf0]  ;;  %v6709_v20 = vor.u32 %v7932_v56, %v6708_v0  ;;  %8227 = vset.pattern.permute.xlu1 %v8277_v17  ;;  %8226 = vset.pattern.permute.xlu0 %v8277_v17  ;;  %v1455_v19 = vld [vmem:[%s11842_s3] sm:$0xff] }
 0x1c3   :  { %1152 = vst [vmem:[#allocation2 + $0x3f0] sm:$0xff] %v1119_v41  ;;  %v6700_v5 = vld [vmem:[%s11841_s2] sm:$0xf]  ;;  %v7923_v41 = vld [vmem:[%s11841_s2 + $0x4] sm:$0xf0]  ;;  %1459 = vperm.xlu0 %8226, %v1455_v19   ;;  %8248 = vset.pattern.permute.xlu2 %v8277_v17 }
 0x1c4   :  { %2202 = vmatpush.bf16.msra.mxu0 %v7029_v37  ;;  %2230 = vmatpush.bf16.msra.mxu2 %v7033_v26  ;;  %v1193_v46 = vpop.permute.xlu1 %1192  ;;  %v1191_v29 = vpop.permute.xlu0 %1190  ;;  %v7173_v37 = vor.u32 %v8046_v34, %v7172_v11  ;;  %v7177_v26 = vor.u32 %v8038_v33, %v7174_v58  ;;  %v8014_v16 = vld [vmem:[#allocation2 + $0x2cc] sm:$0xf0]  ;;  %24 = vst [vmem:[#allocation3] sm:$0xf] %v8277_v17  ;;  %v6918_v56 = vld [vmem:[#allocation2 + $0x1d0] sm:$0xf0] }
 0x1c5   :  { %v1227_v49 = vrot.slane %v1193_v46, 4  ;;  %v1226_v50 = vrot.slane %v1191_v29, 4  ;;  %v9155_v39 = vpop.permute.xlu2 %1212  ;;  %v7045_v36 = vor.u32 %v8014_v16, %v7044_v53  ;;  %25 = vst [vmem:[#allocation3 + $0x48] sm:$0xf] %v8277_v17  ;;  %v1456_v13 = vld [vmem:[%s11842_s3 + $0x8] sm:$0xff] }
 0x1c6   :  { %26 = vst [vmem:[#allocation3 + $0x44] sm:$0xf] %v8277_v17  ;;  %v6916_v0 = vld [vmem:[#allocation2 + $0x190] sm:$0xf]  ;;  %v7974_v11 = vld [vmem:[#allocation2 + $0x194] sm:$0xf]  ;;  %1464 = vperm.xlu1 %8227, %v1456_v13  }
 0x1c7   :  { %v1247_v51 = vsel %vm126_vm0, %v1227_v49, %v1228_v45  ;;  %v1244_v52 = vsel %vm126_vm0, %v1226_v50, %v1227_v49  ;;  %27 = vst [vmem:[#allocation3 + $0x8c] sm:$0xf] %v8277_v17  ;;  %v6917_v32 = vor.u32 %v7982_v27, %v6916_v0  ;;  %v8045_v34 = vld [vmem:[#allocation2 + $0x3c4] sm:$0xf0]  ;;  %v7922_v33 = vld [vmem:[%s11841_s2 + $0x4] sm:$0xf] }
 0x1c8   :  { %v1248_v30 = vsel %vm1245_vm8, %v1193_v46, %v1247_v51  ;;  %v1246_v54 = vsel %vm1245_vm8, %v1191_v29, %v1244_v52  ;;  %2203 = vmatpush.bf16.msra.mxu0 %v6965_v47  ;;  %2231 = vmatpush.bf16.msra.mxu2 %v6969_v48  ;;  %v9166_v47 = vor.u32 %v7923_v41, %v6700_v5  ;;  %v8030_v51 = vld [vmem:[#allocation2 + $0x34c] sm:$0xf0]  ;;  %v7110_v52 = vld [vmem:[#allocation2 + $0x350] sm:$0xf0]  ;;  %v7036_v13 = vld [vmem:[#allocation2 + $0x288] sm:$0xf] }
 0x1c9   :  { %1294 = vst [vmem:[#allocation2 + $0x408] sm:$0xff] %v1248_v30  ;;  %v1237_v30 = vrot.slane %v9155_v39, 4  ;;  %v7113_v15 = vor.u32 %v8022_v35, %v7110_v52  ;;  %v6921_v5 = vor.u32 %v7974_v11, %v6918_v56  ;;  %v6852_v52 = vld [vmem:[#allocation2 + $0x110] sm:$0xf]  ;;  %v8021_v56 = vld [vmem:[#allocation2 + $0x30c] sm:$0xf] }
 0x1ca   :  { %1293 = vst [vmem:[#allocation2 + $0x400] sm:$0xff] %v1246_v54  ;;  %v7109_v54 = vor.u32 %v8030_v51, %v7108_v43  ;;  %v7950_v43 = vld [vmem:[#allocation2 + $0xcc] sm:$0xf0]  ;;  %v7926_v0 = vld [vmem:[#allocation2 + $0x14] sm:$0xf] }
 0x1cb   :  { %v6972_v11 = vld [vmem:[#allocation2 + $0x208] sm:$0xf] }
 0x1cc   :  { %2204 = vmatpush.bf16.msra.mxu0 %v6901_v9  ;;  %2232 = vmatpush.bf16.msra.mxu2 %v6905_v4  ;;  %v1199_v44 = vpop.permute.xlu1 %1198  ;;  %v1197_v62 = vpop.permute.xlu0 %1196  ;;  %v8006_v4 = vld [vmem:[#allocation2 + $0x294] sm:$0xf] }
 0x1cd   :  { %v1230_v63 = vrot.slane %v1199_v44, 4  ;;  %v1229_v8 = vrot.slane %v1197_v62, 4  ;;  %v9181_v38 = vpop.permute.xlu2 %1218 }
 0x1ce   :  { %v1240_v7 = vrot.slane %v9181_v38, 4 }
 0x1cf   :  { %v1253_v12 = vsel %vm126_vm0, %v1230_v63, %v1231_v10  ;;  %v1249_v18 = vsel %vm126_vm0, %v1228_v45, %v1229_v8  ;;  %v1251_v14 = vsel %vm126_vm0, %v1229_v8, %v1230_v63  ;;  %v7990_v63 = vld [vmem:[#allocation2 + $0x214] sm:$0xf]  ;;  %v669_v8 = vld [vmem:[%s11840_s0 + $0x6c] sm:$0xff] }
 0x1d0   :  { %v1254_v22 = vsel %vm1245_vm8, %v1199_v44, %v1253_v12  ;;  %v1250_v23 = vsel %vm1245_vm8, %v9110_v60, %v1249_v18  ;;  %v1252_v25 = vsel %vm1245_vm8, %v1197_v62, %v1251_v14  ;;  %2205 = vmatpush.bf16.msra.mxu0 %v6837_v55  ;;  %2233 = vmatpush.bf16.msra.mxu2 %v6841_v40  ;;  %v666_v60 = vld [vmem:[%s11840_s0 + $0x54] sm:$0xff]  ;;  %v7998_v55 = vld [vmem:[#allocation2 + $0x24c] sm:$0xf0]  ;;  %v7228_v41 = vld [vmem:[#allocation2 + $0x408] sm:$0xf] }
 0x1d1   :  { %1297 = vst [vmem:[#allocation2 + $0x420] sm:$0xff] %v1254_v22  ;;  %v6982_v40 = vld [vmem:[#allocation2 + $0x250] sm:$0xf0] }
 0x1d2   :  { %1295 = vst [vmem:[#allocation2 + $0x410] sm:$0xff] %v1250_v23  ;;  %v6985_v6 = vor.u32 %v7990_v63, %v6982_v40 }
 0x1d3   :  { %1296 = vst [vmem:[#allocation2 + $0x418] sm:$0xff] %v1252_v25  ;;  %v6981_v25 = vor.u32 %v7998_v55, %v6980_v57  ;;  %v7100_v55 = vld [vmem:[#allocation2 + $0x308] sm:$0xf] }
 0x1d4   :  { %2206 = vmatpush.bf16.msra.mxu0 %v6773_v28  ;;  %2234 = vmatpush.bf16.msra.mxu2 %v6777_v24  ;;  %v1205_v61 = vpop.permute.xlu1 %1204  ;;  %v1203_v3 = vpop.permute.xlu0 %1202  ;;  %682 = vst [vmem:[#allocation2 + $0x248] sm:$0xff] %v666_v60 }
 0x1d5   :  { %v1233_v42 = vrot.slane %v1205_v61, 4  ;;  %v1232_v31 = vrot.slane %v1203_v3, 4  ;;  %685 = vst [vmem:[#allocation2 + $0x260] sm:$0xff] %v669_v8 }
 0x1d7   :  { %v1259_v45 = vsel %vm126_vm0, %v1233_v42, %v1234_v1  ;;  %v1255_v46 = vsel %vm126_vm0, %v1231_v10, %v1232_v31  ;;  %v1257_v29 = vsel %vm126_vm0, %v1232_v31, %v1233_v42  ;;  %v7046_v10 = vld [vmem:[#allocation2 + $0x2d0] sm:$0xf0]  ;;  %v7966_v42 = vld [vmem:[#allocation2 + $0x14c] sm:$0xf0] }
 0x1d8   :  { %v1260_v48 = vsel %vm1245_vm8, %v1205_v61, %v1259_v45  ;;  %v1256_v49 = vsel %vm1245_vm8, %v9127_v2, %v1255_v46  ;;  %v1258_v50 = vsel %vm1245_vm8, %v1203_v3, %v1257_v29  ;;  %2207 = vmatpush.bf16.msra.mxu0 %v6709_v20  ;;  %2235 = vmatpush.bf16.msra.mxu2 %v6713_v21  ;;  %v6854_v31 = vld [vmem:[#allocation2 + $0x150] sm:$0xf0]  ;;  %v6702_v20 = vld [vmem:[%s11841_s2 + $0x8] sm:$0xf0]  ;;  %v7220_v45 = vld [vmem:[#allocation2 + $0x400] sm:$0xf]  ;;  %v1225_v29 = vpop.permute.xlu2 %1224 }
 0x1d9   :  { %1300 = vst [vmem:[#allocation2 + $0x438] sm:$0xff] %v1260_v48  ;;  %v7049_v14 = vor.u32 %v8006_v4, %v7046_v10  ;;  %v8052_v46 = vld [vmem:[#allocation2 + $0x404] sm:$0xf]  ;;  %v9213_v16 = vor.u32 %v7922_v33, %v6702_v20  ;;  %v6853_v10 = vor.u32 %v7966_v42, %v6852_v52  ;;  %v660_v42 = vld [vmem:[%s11840_s0 + $0x1c] sm:$0xff] }
 0x1da   :  { %1298 = vst [vmem:[#allocation2 + $0x428] sm:$0xff] %v1256_v49 }
 0x1db   :  { %1299 = vst [vmem:[#allocation2 + $0x430] sm:$0xff] %v1258_v50  ;;  %2208 = vmatmul.bf16.vlgmr.msra.gmra.mxu0 %v9166_v47  ;;  %2236 = vmatmul.bf16.vlgmr.msra.gmra.mxu2 %v9166_v47 }
 0x1dc   :  { %2312 = vmatpush.bf16.msrb.mxu2 %v7173_v37  ;;  %2340 = vmatpush.bf16.msrb.mxu0 %v7177_v26  ;;  %v1211_v2 = vpop.permute.xlu1 %1210  ;;  %v1209_v9 = vpop.permute.xlu0 %1208  ;;  %676 = vst [vmem:[#allocation2 + $0x218] sm:$0xff] %v660_v42  ;;  %v6932_v42 = vld [vmem:[#allocation2 + $0x1a0] sm:$0xf] }
 0x1dd   :  { %v1236_v44 = vrot.slane %v1211_v2, 4  ;;  %v1235_v62 = vrot.slane %v1209_v9, 4 }
 0x1df   :  { %v1263_v12 = vsel %vm126_vm0, %v1236_v44, %v1237_v30  ;;  %v1261_v18 = vsel %vm126_vm0, %v1235_v62, %v1236_v44  ;;  %v6788_v44 = vld [vmem:[#allocation2 + $0x90] sm:$0xf]  ;;  %v6790_v62 = vld [vmem:[#allocation2 + $0xd0] sm:$0xf0] }
 0x1e0   :  { %2313 = vmatpush.bf16.msrb.mxu2 %v7109_v54  ;;  %2341 = vmatpush.bf16.msrb.mxu0 %v7113_v15  ;;  %v1264_v22 = vsel %vm1245_vm8, %v1211_v2, %v1263_v12  ;;  %v1262_v23 = vsel %vm1245_vm8, %v1209_v9, %v1261_v18  ;;  %v7164_v54 = vld [vmem:[#allocation2 + $0x388] sm:$0xf]  ;;  %v7958_v15 = vld [vmem:[#allocation2 + $0x114] sm:$0xf]  ;;  %v7166_v2 = vld [vmem:[#allocation2 + $0x3c8] sm:$0xf0]  ;;  %v6789_v18 = vor.u32 %v7950_v43, %v6788_v44 }
 0x1e1   :  { %1302 = vst [vmem:[#allocation2 + $0x448] sm:$0xff] %v1264_v22  ;;  %v7165_v53 = vor.u32 %v8045_v34, %v7164_v54  ;;  %v8029_v9 = vld [vmem:[#allocation2 + $0x344] sm:$0xf0]  ;;  %v6857_v57 = vor.u32 %v7958_v15, %v6854_v31  ;;  %v7942_v22 = vld [vmem:[#allocation2 + $0x94] sm:$0xf] }
 0x1e2   :  { %1301 = vst [vmem:[#allocation2 + $0x440] sm:$0xff] %v1262_v23  ;;  %v7101_v12 = vor.u32 %v8029_v9, %v7100_v55  ;;  %v7102_v23 = vld [vmem:[#allocation2 + $0x348] sm:$0xf0]  ;;  %v7997_v34 = vld [vmem:[#allocation2 + $0x244] sm:$0xf0] }
 0x1e3   :  { %v668_v31 = vld [vmem:[%s11840_s0 + $0x64] sm:$0xff]  ;;  %v8032_v15 = vld [vmem:[#allocation2 + $0x35c] sm:$0xf0] }
 0x1e4   :  { %2314 = vmatpush.bf16.msrb.mxu2 %v7045_v36  ;;  %2342 = vmatpush.bf16.msrb.mxu0 %v7049_v14  ;;  %v1217_v28 = vpop.permute.xlu1 %1216  ;;  %v1215_v24 = vpop.permute.xlu0 %1214  ;;  %v8037_v36 = vld [vmem:[#allocation2 + $0x38c] sm:$0xf]  ;;  %684 = vst [vmem:[#allocation2 + $0x258] sm:$0xff] %v668_v31  ;;  %v8040_v43 = vld [vmem:[#allocation2 + $0x3a4] sm:$0xf] }
 0x1e5   :  { %v1239_v60 = vrot.slane %v1217_v28, 4  ;;  %v1238_v1 = vrot.slane %v1215_v24, 4  ;;  %v7169_v40 = vor.u32 %v8037_v36, %v7166_v2  ;;  %v7124_v9 = vld [vmem:[#allocation2 + $0x320] sm:$0xf]  ;;  %v6844_v44 = vld [vmem:[#allocation2 + $0x108] sm:$0xf] }
 0x1e6   :  { %v7973_v36 = vld [vmem:[#allocation2 + $0x18c] sm:$0xf]  ;;  %v8016_v55 = vld [vmem:[#allocation2 + $0x2dc] sm:$0xf0]  ;;  %v7976_v31 = vld [vmem:[#allocation2 + $0x1a4] sm:$0xf] }
 0x1e7   :  { %v1269_v58 = vsel %vm126_vm0, %v1239_v60, %v1240_v7  ;;  %v1265_v61 = vsel %vm126_vm0, %v1237_v30, %v1238_v1  ;;  %v1267_v3 = vsel %vm126_vm0, %v1238_v1, %v1239_v60  ;;  %v8013_v60 = vld [vmem:[#allocation2 + $0x2c4] sm:$0xf0]  ;;  %v6724_v1 = vld [vmem:[#allocation2 + $0x10] sm:$0xf] }
 0x1e8   :  { %2315 = vmatpush.bf16.msrb.mxu2 %v6981_v25  ;;  %2343 = vmatpush.bf16.msrb.mxu0 %v6985_v6  ;;  %v1270_v21 = vsel %vm1245_vm8, %v1217_v28, %v1269_v58  ;;  %v1266_v37 = vsel %vm1245_vm8, %v9155_v39, %v1265_v61  ;;  %v1268_v26 = vsel %vm1245_vm8, %v1215_v24, %v1267_v3  ;;  %v8061_v48 = vld [vmem:[#allocation2 + $0x444] sm:$0xf0]  ;;  %v1243_v39 = vrot.slane %v1225_v29, 4  ;;  %v7934_v25 = vld [vmem:[#allocation2 + $0x4c] sm:$0xf0] }
 0x1e9   :  { %1305 = vst [vmem:[#allocation2 + $0x460] sm:$0xff] %v1270_v21  ;;  %v8060_v49 = vld [vmem:[#allocation2 + $0x43c] sm:$0xf0]  ;;  %v7222_v50 = vld [vmem:[#allocation2 + $0x440] sm:$0xf0]  ;;  %v7229_v51 = vor.u32 %v8061_v48, %v7228_v41  ;;  %v7105_v58 = vor.u32 %v8021_v56, %v7102_v23  ;;  %v7037_v3 = vor.u32 %v8013_v60, %v7036_v13  ;;  %v6725_v33 = vor.u32 %v7934_v25, %v6724_v1 }
 0x1ea   :  { %1303 = vst [vmem:[#allocation2 + $0x450] sm:$0xff] %v1266_v37  ;;  %v7221_v35 = vor.u32 %v8060_v49, %v7220_v45  ;;  %v7225_v30 = vor.u32 %v8052_v46, %v7222_v50  ;;  %v6726_v6 = vld [vmem:[#allocation2 + $0x50] sm:$0xf0]  ;;  %v8048_v41 = vld [vmem:[#allocation2 + $0x3dc] sm:$0xf0]  ;;  %v6973_v46 = vor.u32 %v7997_v34, %v6972_v11 }
 0x1eb   :  { %1304 = vst [vmem:[#allocation2 + $0x458] sm:$0xff] %v1268_v26  ;;  %v6729_v20 = vor.u32 %v7926_v0, %v6726_v6  ;;  %v7244_v21 = vld [vmem:[#allocation2 + $0x418] sm:$0xf]  ;;  %v8055_v37 = vld [vmem:[#allocation2 + $0x41c] sm:$0xf] }
 0x1ec   :  { %2316 = vmatpush.bf16.msrb.mxu2 %v6917_v32  ;;  %2344 = vmatpush.bf16.msrb.mxu0 %v6921_v5  ;;  %v1223_v4 = vpop.permute.xlu1 %1222  ;;  %v1221_v59 = vpop.permute.xlu0 %1220  ;;  %v7038_v32 = vld [vmem:[#allocation2 + $0x2c8] sm:$0xf0]  ;;  %v7190_v50 = vld [vmem:[#allocation2 + $0x3e0] sm:$0xf0]  ;;  %v8000_v23 = vld [vmem:[#allocation2 + $0x25c] sm:$0xf0] }
 0x1ed   :  { %2221 = vmatpush.bf16.msra.mxu1 %v7221_v35  ;;  %2249 = vmatpush.bf16.msra.mxu3 %v7225_v30  ;;  %v1242_v63 = vrot.slane %v1223_v4, 4  ;;  %v1241_v8 = vrot.slane %v1221_v59, 4  ;;  %v8005_v5 = vld [vmem:[#allocation2 + $0x28c] sm:$0xf]  ;;  %v7981_v30 = vld [vmem:[#allocation2 + $0x1c4] sm:$0xf0]  ;;  %v7193_v54 = vor.u32 %v8040_v43, %v7190_v50 }
 0x1ee   :  { %v7989_v29 = vld [vmem:[#allocation2 + $0x20c] sm:$0xf]  ;;  %v7041_v49 = vor.u32 %v8005_v5, %v7038_v32  ;;  %v8008_v6 = vld [vmem:[#allocation2 + $0x2a4] sm:$0xf]  ;;  %v6780_v13 = vld [vmem:[#allocation2 + $0x88] sm:$0xf] }
 0x1ef   :  { %v1275_v14 = vsel %vm126_vm0, %v1242_v63, %v1243_v39  ;;  %v1271_v17 = vsel %vm126_vm0, %v1240_v7, %v1241_v8  ;;  %v1273_v19 = vsel %vm126_vm0, %v1241_v8, %v1242_v63  ;;  %v6793_v7 = vor.u32 %v7942_v22, %v6790_v62  ;;  %v6974_v48 = vld [vmem:[#allocation2 + $0x248] sm:$0xf0]  ;;  %v6908_v39 = vld [vmem:[#allocation2 + $0x188] sm:$0xf]  ;;  %v663_v62 = vld [vmem:[%s11840_s0 + $0x34] sm:$0xff] }
 0x1f0   :  { %2317 = vmatpush.bf16.msrb.mxu2 %v6853_v10  ;;  %2345 = vmatpush.bf16.msrb.mxu0 %v6857_v57  ;;  %v1276_v27 = vsel %vm1245_vm8, %v1223_v4, %v1275_v14  ;;  %v1272_v28 = vsel %vm1245_vm8, %v9181_v38, %v1271_v17  ;;  %v1274_v24 = vsel %vm1245_vm8, %v1221_v59, %v1273_v19  ;;  %v6910_v4 = vld [vmem:[#allocation2 + $0x1c8] sm:$0xf0]  ;;  %v7965_v10 = vld [vmem:[#allocation2 + $0x144] sm:$0xf0]  ;;  %v8024_v59 = vld [vmem:[#allocation2 + $0x324] sm:$0xf] }
 0x1f1   :  { %2256 = vmatpush.bf16.msrb.mxu1 %v7165_v53  ;;  %2277 = vmatpush.bf16.msrb.mxu3 %v7229_v51  ;;  %1308 = vst [vmem:[#allocation2 + $0x478] sm:$0xff] %v1276_v27  ;;  %v7188_v51 = vld [vmem:[#allocation2 + $0x3a0] sm:$0xf]  ;;  %v6977_v35 = vor.u32 %v7989_v29, %v6974_v48  ;;  %v7126_v53 = vld [vmem:[#allocation2 + $0x360] sm:$0xf0]  ;;  %v6909_v2 = vor.u32 %v7981_v30, %v6908_v39 }
 0x1f2   :  { %7283 = vmatmul.msk.bf16.vlgmr.msra.gmra.mxu3 %vm283_vm2, %v9213_v16  ;;  %7282 = vmatmul.msk.bf16.vlgmr.msra.gmra.mxu1 %vm283_vm2, %v9213_v16  ;;  %1306 = vst [vmem:[#allocation2 + $0x468] sm:$0xff] %v1272_v28  ;;  %v8063_v61 = vld [vmem:[#allocation2 + $0x454] sm:$0xf0]  ;;  %v7246_v38 = vld [vmem:[#allocation2 + $0x458] sm:$0xf0]  ;;  %v7189_v52 = vor.u32 %v8048_v41, %v7188_v51  ;;  %v7125_v57 = vor.u32 %v8032_v15, %v7124_v9 }
 0x1f3   :  { %1307 = vst [vmem:[#allocation2 + $0x470] sm:$0xff] %v1274_v24  ;;  %v7245_v26 = vor.u32 %v8063_v61, %v7244_v21  ;;  %v7249_v45 = vor.u32 %v8055_v37, %v7246_v38  ;;  %v671_v63 = vld [vmem:[%s11840_s0 + $0x7c] sm:$0xff]  ;;  %v7129_v8 = vor.u32 %v8024_v59, %v7126_v53  ;;  %v7949_v14 = vld [vmem:[#allocation2 + $0xc4] sm:$0xf0]  ;;  %v6845_v17 = vor.u32 %v7965_v10, %v6844_v44  ;;  %v7992_v27 = vld [vmem:[#allocation2 + $0x224] sm:$0xf] }
 0x1f4   :  { %2318 = vmatpush.bf16.msrb.mxu2 %v6789_v18  ;;  %2346 = vmatpush.bf16.msrb.mxu0 %v6793_v7  ;;  %679 = vst [vmem:[#allocation2 + $0x230] sm:$0xff] %v663_v62  ;;  %v6846_v18 = vld [vmem:[#allocation2 + $0x148] sm:$0xf0]  ;;  %v7060_v19 = vld [vmem:[#allocation2 + $0x2a0] sm:$0xf]  ;;  %v6781_v1 = vor.u32 %v7949_v14, %v6780_v13 }
 0x1f5   :  { %2284 = vmatpush.bf16.msra.mxu3 %v7169_v40  ;;  %2257 = vmatpush.bf16.msrb.mxu1 %v7101_v12  ;;  %v6913_v40 = vor.u32 %v7973_v36, %v6910_v4  ;;  %v7062_v12 = vld [vmem:[#allocation2 + $0x2e0] sm:$0xf0]  ;;  %687 = vst [vmem:[#allocation2 + $0x270] sm:$0xff] %v671_v63  ;;  %v6996_v22 = vld [vmem:[#allocation2 + $0x220] sm:$0xf]  ;;  %v7061_v25 = vor.u32 %v8016_v55, %v7060_v19 }
 0x1f6   :  { %v6998_v28 = vld [vmem:[#allocation2 + $0x260] sm:$0xf0]  ;;  %v7065_v24 = vor.u32 %v8008_v6, %v7062_v12  ;;  %v7957_v7 = vld [vmem:[#allocation2 + $0x10c] sm:$0xf]  ;;  %v6997_v60 = vor.u32 %v8000_v23, %v6996_v22  ;;  %v7933_v11 = vld [vmem:[#allocation2 + $0x44] sm:$0xf0] }
 0x1f7   :  { %v6849_v56 = vor.u32 %v7957_v7, %v6846_v18  ;;  %v7001_v0 = vor.u32 %v7992_v27, %v6998_v28  ;;  %v6782_v32 = vld [vmem:[#allocation2 + $0xc8] sm:$0xf0]  ;;  %v6716_v38 = vld [vmem:[#allocation2 + $0x8] sm:$0xf]  ;;  %v8062_v5 = vld [vmem:[#allocation2 + $0x44c] sm:$0xf0] }
 0x1f8   :  { %2319 = vmatpush.bf16.msrb.mxu2 %v6725_v33  ;;  %2347 = vmatpush.bf16.msrb.mxu0 %v6729_v20  ;;  %v7941_v34 = vld [vmem:[#allocation2 + $0x8c] sm:$0xf]  ;;  %v6717_v41 = vor.u32 %v7933_v11, %v6716_v38  ;;  %v7236_v21 = vld [vmem:[#allocation2 + $0x410] sm:$0xf]  ;;  %v7968_v48 = vld [vmem:[#allocation2 + $0x15c] sm:$0xf0] }
 0x1f9   :  { %2285 = vmatpush.bf16.msra.mxu3 %v7105_v58  ;;  %2258 = vmatpush.bf16.msrb.mxu1 %v7037_v3  ;;  %v7984_v58 = vld [vmem:[#allocation2 + $0x1dc] sm:$0xf0]  ;;  %v6785_v61 = vor.u32 %v7941_v34, %v6782_v32  ;;  %v6934_v3 = vld [vmem:[#allocation2 + $0x1e0] sm:$0xf0]  ;;  %v6718_v33 = vld [vmem:[#allocation2 + $0x48] sm:$0xf0] }
 0x1fa   :  { %v6933_v20 = vor.u32 %v7984_v58, %v6932_v42  ;;  %v7230_v37 = vld [vmem:[#allocation2 + $0x448] sm:$0xf0]  ;;  %v8054_v51 = vld [vmem:[#allocation2 + $0x414] sm:$0xf]  ;;  %v6868_v30 = vld [vmem:[#allocation2 + $0x120] sm:$0xf] }
 0x1fb   :  { %2320 = vmatmul.bf16.vlgmr.msrb.gmra.mxu2 %v9166_v47  ;;  %2348 = vmatmul.bf16.vlgmr.msrb.gmra.mxu0 %v9166_v47  ;;  %v7925_v29 = vld [vmem:[#allocation2 + $0xc] sm:$0xf]  ;;  %v6869_v15 = vor.u32 %v7968_v48, %v6868_v30  ;;  %v7960_v39 = vld [vmem:[#allocation2 + $0x124] sm:$0xf]  ;;  %v7952_v9 = vld [vmem:[#allocation2 + $0xdc] sm:$0xf0] }
 0x1fc   :  { %2389 = vmatpush.bf16.msra.mxu2 %v7245_v26  ;;  %2417 = vmatpush.bf16.msra.mxu0 %v7249_v45  ;;  %v7238_v26 = vld [vmem:[#allocation2 + $0x450] sm:$0xf0]  ;;  %v6937_v45 = vor.u32 %v7976_v31, %v6934_v3  ;;  %v8053_v50 = vld [vmem:[#allocation2 + $0x40c] sm:$0xf]  ;;  %v6806_v10 = vld [vmem:[#allocation2 + $0xe0] sm:$0xf0] }
 0x1fd   :  { %2286 = vmatpush.bf16.msra.mxu3 %v7041_v49  ;;  %2259 = vmatpush.bf16.msrb.mxu1 %v6973_v46  ;;  %v7237_v46 = vor.u32 %v8062_v5, %v7236_v21  ;;  %v6721_v49 = vor.u32 %v7925_v29, %v6718_v33  ;;  %v7233_v43 = vor.u32 %v8053_v50, %v7230_v37  ;;  %v8031_v59 = vld [vmem:[#allocation2 + $0x354] sm:$0xf0]  ;;  %v7944_v62 = vld [vmem:[#allocation2 + $0xa4] sm:$0xf]  ;;  %v6740_v36 = vld [vmem:[#allocation2 + $0x20] sm:$0xf] }
 0x1fe   :  { %v6809_v63 = vor.u32 %v7944_v62, %v6806_v10  ;;  %v7936_v55 = vld [vmem:[#allocation2 + $0x5c] sm:$0xf0]  ;;  %v7928_v12 = vld [vmem:[#allocation2 + $0x24] sm:$0xf]  ;;  %v8065_v14 = vld [vmem:[#allocation2 + $0x464] sm:$0xf0] }
 0x1ff   :  { %v6742_v18 = vld [vmem:[#allocation2 + $0x60] sm:$0xf0]  ;;  %v7262_v19 = vld [vmem:[#allocation2 + $0x468] sm:$0xf0]  ;;  %v7052_v22 = vld [vmem:[#allocation2 + $0x298] sm:$0xf]  ;;  %v6741_v27 = vor.u32 %v7936_v55, %v6740_v36 }
 0x200   :  { %2424 = vmatpush.bf16.msrb.mxu2 %v7189_v52  ;;  %2452 = vmatpush.bf16.msrb.mxu0 %v7193_v54  ;;  %v6870_v52 = vld [vmem:[#allocation2 + $0x160] sm:$0xf0]  ;;  %v8047_v54 = vld [vmem:[#allocation2 + $0x3d4] sm:$0xf0]  ;;  %v8050_v23 = vld [vmem:[#allocation2 + $0x3ec] sm:$0xf0]  ;;  %v6745_v7 = vor.u32 %v7928_v12, %v6742_v18 }
 0x201   :  { %2287 = vmatpush.bf16.msra.mxu3 %v6977_v35  ;;  %2260 = vmatpush.bf16.msrb.mxu1 %v6909_v2  ;;  %v7241_v35 = vor.u32 %v8054_v51, %v7238_v26  ;;  %v6873_v53 = vor.u32 %v7960_v39, %v6870_v52  ;;  %v7180_v2 = vld [vmem:[#allocation2 + $0x398] sm:$0xf]  ;;  %v7260_v28 = vld [vmem:[#allocation2 + $0x428] sm:$0xf]  ;;  %v7206_v32 = vld [vmem:[#allocation2 + $0x3f0] sm:$0xf0] }
 0x202   :  { %7284 = vmatmul.msk.bf16.vlgmr.msrb.gmra.mxu3 %vm283_vm2, %v9213_v16  ;;  %v7181_v4 = vor.u32 %v8047_v54, %v7180_v2  ;;  %v670_v6 = vld [vmem:[%s11840_s0 + $0x74] sm:$0xff]  ;;  %v7204_v11 = vld [vmem:[#allocation2 + $0x3b0] sm:$0xf]  ;;  %v7182_v38 = vld [vmem:[#allocation2 + $0x3d8] sm:$0xf0] }
 0x203   :  { %v6988_v13 = vld [vmem:[#allocation2 + $0x218] sm:$0xf]  ;;  %686 = vst [vmem:[#allocation2 + $0x268] sm:$0xff] %v670_v6  ;;  %v7205_v34 = vor.u32 %v8050_v23, %v7204_v11  ;;  %v8042_v58 = vld [vmem:[#allocation2 + $0x3b4] sm:$0xf] }
 0x204   :  { %2425 = vmatpush.bf16.msrb.mxu2 %v7125_v57  ;;  %2453 = vmatpush.bf16.msrb.mxu0 %v7129_v8  ;;  %v6804_v57 = vld [vmem:[#allocation2 + $0xa0] sm:$0xf]  ;;  %v7116_v8 = vld [vmem:[#allocation2 + $0x318] sm:$0xf]  ;;  %v7209_v3 = vor.u32 %v8042_v58, %v7206_v32  ;;  %v8034_v5 = vld [vmem:[#allocation2 + $0x36c] sm:$0xf0] }
 0x205   :  { %2288 = vmatpush.bf16.msra.mxu3 %v6913_v40  ;;  %2261 = vmatpush.bf16.msrb.mxu1 %v6845_v17  ;;  %v6805_v44 = vor.u32 %v7952_v9, %v6804_v57  ;;  %v7117_v40 = vor.u32 %v8031_v59, %v7116_v8  ;;  %v8015_v17 = vld [vmem:[#allocation2 + $0x2d4] sm:$0xf0]  ;;  %v7142_v42 = vld [vmem:[#allocation2 + $0x370] sm:$0xf0]  ;;  %v7140_v33 = vld [vmem:[#allocation2 + $0x330] sm:$0xf] }
 0x206   :  { %v7141_v21 = vor.u32 %v8034_v5, %v7140_v33  ;;  %v8026_v37 = vld [vmem:[#allocation2 + $0x334] sm:$0xf]  ;;  %v7118_v26 = vld [vmem:[#allocation2 + $0x358] sm:$0xf0]  ;;  %v8018_v29 = vld [vmem:[#allocation2 + $0x2ec] sm:$0xf0] }
 0x207   :  { %v7967_v48 = vld [vmem:[#allocation2 + $0x154] sm:$0xf0]  ;;  %v8023_v50 = vld [vmem:[#allocation2 + $0x31c] sm:$0xf]  ;;  %v7076_v51 = vld [vmem:[#allocation2 + $0x2b0] sm:$0xf] }
 0x208   :  { %2426 = vmatpush.bf16.msrb.mxu2 %v7061_v25  ;;  %2454 = vmatpush.bf16.msrb.mxu0 %v7065_v24  ;;  %v662_v25 = vld [vmem:[%s11840_s0 + $0x2c] sm:$0xff]  ;;  %v7078_v52 = vld [vmem:[#allocation2 + $0x2f0] sm:$0xf0]  ;;  %v7054_v39 = vld [vmem:[#allocation2 + $0x2d8] sm:$0xf0] }
 0x209   :  { %2289 = vmatpush.bf16.msra.mxu3 %v6849_v56  ;;  %2262 = vmatpush.bf16.msrb.mxu1 %v6781_v1  ;;  %v8057_v24 = vld [vmem:[#allocation2 + $0x42c] sm:$0xf]  ;;  %678 = vst [vmem:[#allocation2 + $0x228] sm:$0xff] %v662_v25  ;;  %v7261_v56 = vor.u32 %v8065_v14, %v7260_v28  ;;  %v7012_v30 = vld [vmem:[#allocation2 + $0x230] sm:$0xf] }
 0x20a   :  { %v7265_v1 = vor.u32 %v8057_v24, %v7262_v19  ;;  %v8002_v54 = vld [vmem:[#allocation2 + $0x26c] sm:$0xf0]  ;;  %v7014_v2 = vld [vmem:[#allocation2 + $0x270] sm:$0xf0]  ;;  %v8007_v57 = vld [vmem:[#allocation2 + $0x29c] sm:$0xf] }
 0x20b   :  { %7288 = vmatmul.msk.bf16.vlgmr.msra.gmra.mxu2 %vm283_vm2, %v9213_v16  ;;  %7289 = vmatmul.msk.bf16.vlgmr.msra.gmra.mxu0 %vm283_vm2, %v9213_v16  ;;  %v7013_v59 = vor.u32 %v8002_v54, %v7012_v30  ;;  %v6990_v62 = vld [vmem:[#allocation2 + $0x258] sm:$0xf0]  ;;  %v7951_v36 = vld [vmem:[#allocation2 + $0xd4] sm:$0xf0]  ;;  %v7986_v12 = vld [vmem:[#allocation2 + $0x1ec] sm:$0xf0] }
 0x20c   :  { %2427 = vmatpush.bf16.msrb.mxu2 %v6997_v60  ;;  %2455 = vmatpush.bf16.msrb.mxu0 %v7001_v0  ;;  %v7999_v60 = vld [vmem:[#allocation2 + $0x254] sm:$0xf0]  ;;  %v7053_v0 = vor.u32 %v8015_v17, %v7052_v22  ;;  %v6950_v14 = vld [vmem:[#allocation2 + $0x1f0] sm:$0xf0]  ;;  %v6948_v17 = vld [vmem:[#allocation2 + $0x1b0] sm:$0xf] }
 0x20d   :  { %2290 = vmatpush.bf16.msra.mxu3 %v6785_v61  ;;  %2263 = vmatpush.bf16.msrb.mxu1 %v6717_v41  ;;  %v6989_v61 = vor.u32 %v7999_v60, %v6988_v13  ;;  %v8039_v41 = vld [vmem:[#allocation2 + $0x39c] sm:$0xf]  ;;  %v6796_v55 = vld [vmem:[#allocation2 + $0x98] sm:$0xf]  ;;  %v6949_v22 = vor.u32 %v7986_v12, %v6948_v17  ;;  %v7978_v23 = vld [vmem:[#allocation2 + $0x1b4] sm:$0xf] }
 0x20e   :  { %v7185_v31 = vor.u32 %v8039_v41, %v7182_v38  ;;  %v6797_v18 = vor.u32 %v7951_v36, %v6796_v55  ;;  %v7935_v19 = vld [vmem:[#allocation2 + $0x54] sm:$0xf0]  ;;  %v6926_v25 = vld [vmem:[#allocation2 + $0x1d8] sm:$0xf0]  ;;  %v8064_v6 = vld [vmem:[#allocation2 + $0x45c] sm:$0xf0] }
 0x20f   :  { %v6732_v28 = vld [vmem:[#allocation2 + $0x18] sm:$0xf]  ;;  %v7970_v24 = vld [vmem:[#allocation2 + $0x16c] sm:$0xf0]  ;;  %v7252_v13 = vld [vmem:[#allocation2 + $0x420] sm:$0xf] }
 0x210   :  { %2428 = vmatpush.bf16.msrb.mxu2 %v6933_v20  ;;  %2456 = vmatpush.bf16.msrb.mxu0 %v6937_v45  ;;  %v7983_v20 = vld [vmem:[#allocation2 + $0x1d4] sm:$0xf0]  ;;  %v7145_v45 = vor.u32 %v8026_v37, %v7142_v42  ;;  %v6886_v60 = vld [vmem:[#allocation2 + $0x170] sm:$0xf0]  ;;  %v6884_v32 = vld [vmem:[#allocation2 + $0x130] sm:$0xf] }
 0x211   :  { %2333 = vmatpush.bf16.msra.mxu1 %v7237_v46  ;;  %2291 = vmatpush.bf16.msra.mxu3 %v6721_v49  ;;  %v6924_v46 = vld [vmem:[#allocation2 + $0x198] sm:$0xf]  ;;  %v8049_v11 = vld [vmem:[#allocation2 + $0x3e4] sm:$0xf0]  ;;  %v7962_v58 = vld [vmem:[#allocation2 + $0x134] sm:$0xf] }
 0x212   :  { %2264 = vmatmul.bf16.vlgmr.msrb.gmra.mxu1 %v9166_v47  ;;  %v6925_v49 = vor.u32 %v7983_v20, %v6924_v46  ;;  %v6889_v38 = vor.u32 %v7962_v58, %v6886_v60  ;;  %v7954_v5 = vld [vmem:[#allocation2 + $0xec] sm:$0xf0]  ;;  %v7959_v41 = vld [vmem:[#allocation2 + $0x11c] sm:$0xf]  ;;  %v8067_v30 = vld [vmem:[#allocation2 + $0x474] sm:$0xf0] }
 0x213   :  { %v6820_v20 = vld [vmem:[#allocation2 + $0xb0] sm:$0xf]  ;;  %v6734_v54 = vld [vmem:[#allocation2 + $0x58] sm:$0xf0]  ;;  %v6876_v60 = vld [vmem:[#allocation2 + $0x128] sm:$0xf] }
 0x214   :  { %2429 = vmatpush.bf16.msrb.mxu2 %v6869_v15  ;;  %2457 = vmatpush.bf16.msrb.mxu0 %v6873_v53  ;;  %v7077_v15 = vor.u32 %v8018_v29, %v7076_v51  ;;  %v7994_v53 = vld [vmem:[#allocation2 + $0x234] sm:$0xf]  ;;  %v6821_v37 = vor.u32 %v7954_v5, %v6820_v20  ;;  %v7938_v46 = vld [vmem:[#allocation2 + $0x6c] sm:$0xf0]  ;;  %v7927_v55 = vld [vmem:[#allocation2 + $0x1c] sm:$0xf] }
 0x215   :  { %2305 = vmatpush.bf16.msrb.mxu3 %v7233_v43  ;;  %2361 = vmatpush.bf16.msrb.mxu1 %v7241_v35  ;;  %v7121_v43 = vor.u32 %v8023_v50, %v7118_v26  ;;  %v8010_v35 = vld [vmem:[#allocation2 + $0x2b4] sm:$0xf]  ;;  %v7017_v8 = vor.u32 %v7994_v53, %v7014_v2  ;;  %v6756_v50 = vld [vmem:[#allocation2 + $0x30] sm:$0xf]  ;;  %v7278_v53 = vld [vmem:[#allocation2 + $0x478] sm:$0xf0]  ;;  %v6737_v12 = vor.u32 %v7927_v55, %v6734_v54 }
 0x216   :  { %2292 = vmatmul.bf16.vlgmr.msra.gmra.mxu3 %v9166_v47  ;;  %v7081_v9 = vor.u32 %v8010_v35, %v7078_v52  ;;  %v7946_v26 = vld [vmem:[#allocation2 + $0xb4] sm:$0xf]  ;;  %v7276_v35 = vld [vmem:[#allocation2 + $0x438] sm:$0xf]  ;;  %v7068_v2 = vld [vmem:[#allocation2 + $0x2a8] sm:$0xf] }
 0x217   :  { %v6758_v51 = vld [vmem:[#allocation2 + $0x70] sm:$0xf0]  ;;  %v7953_v58 = vld [vmem:[#allocation2 + $0xe4] sm:$0xf0]  ;;  %v7977_v20 = vld [vmem:[#allocation2 + $0x1ac] sm:$0xf] }
 0x218   :  { %2430 = vmatpush.bf16.msrb.mxu2 %v6805_v44  ;;  %2458 = vmatpush.bf16.msrb.mxu0 %v6809_v63  ;;  %v7991_v44 = vld [vmem:[#allocation2 + $0x21c] sm:$0xf]  ;;  %v7057_v63 = vor.u32 %v8007_v57, %v7054_v39  ;;  %v7937_v5 = vld [vmem:[#allocation2 + $0x64] sm:$0xf0] }
 0x219   :  { %2368 = vmatpush.bf16.msra.mxu3 %v7181_v4  ;;  %v6860_v4 = vld [vmem:[#allocation2 + $0x118] sm:$0xf]  ;;  %v8059_v57 = vld [vmem:[#allocation2 + $0x43c] sm:$0xf] }
 0x21a   :  { %v6861_v10 = vor.u32 %v7967_v48, %v6860_v4  ;;  %v7943_v48 = vld [vmem:[#allocation2 + $0x9c] sm:$0xf]  ;;  %v672_v4 = vld [vmem:[%s11840_s0 + $0x84] sm:$0xff]  ;;  %v7281_v36 = vor.u32 %v8059_v57, %v7278_v53  ;;  %v7084_v53 = vld [vmem:[#allocation2 + $0x2b8] sm:$0xf] }
 0x21b   :  { %688 = vst [vmem:[#allocation2 + $0x278] sm:$0xff] %v672_v4 }
 0x21c   :  { %2431 = vmatpush.bf16.msrb.mxu2 %v6741_v27  ;;  %2459 = vmatpush.bf16.msrb.mxu0 %v6745_v7  ;;  %v6953_v27 = vor.u32 %v7978_v23, %v6950_v14  ;;  %v6733_v7 = vor.u32 %v7935_v19, %v6732_v28  ;;  %v7198_v19 = vld [vmem:[#allocation2 + $0x3e8] sm:$0xf0] }
 0x21d   :  { %2369 = vmatpush.bf16.msra.mxu3 %v7117_v40  ;;  %v6993_v40 = vor.u32 %v7991_v44, %v6990_v62  ;;  %v7277_v62 = vor.u32 %v8067_v30, %v7276_v35  ;;  %v7945_v35 = vld [vmem:[#allocation2 + $0xac] sm:$0xf] }
 0x21f   :  { %2432 = vmatmul.bf16.vlgmr.msrb.gmra.mxu2 %v9166_v47  ;;  %2460 = vmatmul.bf16.vlgmr.msrb.gmra.mxu0 %v9166_v47 }
 0x220   :  { %2501 = vmatpush.bf16.msra.mxu2 %v7261_v56  ;;  %2529 = vmatpush.bf16.msra.mxu0 %v7265_v1  ;;  %v7975_v56 = vld [vmem:[#allocation2 + $0x19c] sm:$0xf] }
 0x221   :  { %2370 = vmatpush.bf16.msra.mxu3 %v7053_v0  ;;  %v6929_v1 = vor.u32 %v7975_v56, %v6926_v25  ;;  %v7253_v0 = vor.u32 %v8064_v6, %v7252_v13  ;;  %v7985_v25 = vld [vmem:[#allocation2 + $0x1e4] sm:$0xf0]  ;;  %v7134_v6 = vld [vmem:[#allocation2 + $0x368] sm:$0xf0] }
 0x222   :  { %7286 = vmatmul.msk.bf16.vlgmr.msra.gmra.mxu1 %vm283_vm2, %v9213_v16  ;;  %v7969_v56 = vld [vmem:[#allocation2 + $0x164] sm:$0xf0]  ;;  %v7070_v13 = vld [vmem:[#allocation2 + $0x2e8] sm:$0xf0]  ;;  %v8003_v4 = vld [vmem:[#allocation2 + $0x274] sm:$0xf0] }
 0x223   :  { %2396 = vmatpush.bf16.msra.mxu1 %v7185_v31  ;;  %v6822_v31 = vld [vmem:[#allocation2 + $0xf0] sm:$0xf0] }
 0x224   :  { %2536 = vmatpush.bf16.msrb.mxu2 %v7205_v34  ;;  %2564 = vmatpush.bf16.msrb.mxu0 %v7209_v3  ;;  %v6885_v34 = vor.u32 %v7970_v24, %v6884_v32  ;;  %v7196_v3 = vld [vmem:[#allocation2 + $0x3a8] sm:$0xf]  ;;  %v6825_v29 = vor.u32 %v7946_v26, %v6822_v31  ;;  %v8025_v24 = vld [vmem:[#allocation2 + $0x32c] sm:$0xf] }
 0x225   :  { %2371 = vmatpush.bf16.msra.mxu3 %v6989_v61  ;;  %v6862_v61 = vld [vmem:[#allocation2 + $0x158] sm:$0xf0]  ;;  %v7197_v42 = vor.u32 %v8049_v11, %v7196_v3  ;;  %v7993_v32 = vld [vmem:[#allocation2 + $0x22c] sm:$0xf]  ;;  %v6748_v31 = vld [vmem:[#allocation2 + $0x28] sm:$0xf] }
 0x226   :  { %7285 = vmatmul.msk.bf16.vlgmr.msrb.gmra.mxu3 %vm283_vm2, %v9213_v16  ;;  %v6865_v33 = vor.u32 %v7959_v41, %v6862_v61  ;;  %v7006_v11 = vld [vmem:[#allocation2 + $0x268] sm:$0xf0]  ;;  %v6812_v61 = vld [vmem:[#allocation2 + $0xa8] sm:$0xf] }
 0x227   :  { %2397 = vmatpush.bf16.msra.mxu1 %v7121_v43  ;;  %v7930_v43 = vld [vmem:[#allocation2 + $0x34] sm:$0xf]  ;;  %v6813_v3 = vor.u32 %v7953_v58, %v6812_v61  ;;  %v6942_v41 = vld [vmem:[#allocation2 + $0x1e8] sm:$0xf0]  ;;  %v6764_v58 = vld [vmem:[#allocation2 + $0x38] sm:$0xf] }
 0x228   :  { %2537 = vmatpush.bf16.msrb.mxu2 %v7141_v21  ;;  %2565 = vmatpush.bf16.msrb.mxu0 %v7145_v45  ;;  %v8033_v21 = vld [vmem:[#allocation2 + $0x364] sm:$0xf0]  ;;  %v6798_v45 = vld [vmem:[#allocation2 + $0xd8] sm:$0xf0]  ;;  %v6761_v44 = vor.u32 %v7930_v43, %v6758_v51  ;;  %v8035_v51 = vld [vmem:[#allocation2 + $0x374] sm:$0xf0] }
 0x229   :  { %2372 = vmatpush.bf16.msra.mxu3 %v6925_v49  ;;  %v7132_v49 = vld [vmem:[#allocation2 + $0x328] sm:$0xf]  ;;  %v6801_v39 = vor.u32 %v7943_v48, %v6798_v45  ;;  %v8051_v45 = vld [vmem:[#allocation2 + $0x3f4] sm:$0xf0]  ;;  %v7961_v48 = vld [vmem:[#allocation2 + $0x12c] sm:$0xf] }
 0x22a   :  { %v7133_v52 = vor.u32 %v8033_v21, %v7132_v49  ;;  %v7268_v21 = vld [vmem:[#allocation2 + $0x430] sm:$0xf]  ;;  %v7148_v43 = vld [vmem:[#allocation2 + $0x338] sm:$0xf] }
 0x22b   :  { %2398 = vmatpush.bf16.msra.mxu1 %v7057_v63  ;;  %v7004_v63 = vld [vmem:[#allocation2 + $0x228] sm:$0xf]  ;;  %v7149_v30 = vor.u32 %v8035_v51, %v7148_v43  ;;  %v7947_v51 = vld [vmem:[#allocation2 + $0xbc] sm:$0xf] }
 0x22c   :  { %2538 = vmatpush.bf16.msrb.mxu2 %v7077_v15  ;;  %2566 = vmatpush.bf16.msrb.mxu0 %v7081_v9  ;;  %v8017_v15 = vld [vmem:[#allocation2 + $0x2e4] sm:$0xf0]  ;;  %v664_v9 = vld [vmem:[%s11840_s0 + $0x3c] sm:$0xff] }
 0x22d   :  { %2373 = vmatpush.bf16.msra.mxu3 %v6861_v10  ;;  %v6757_v10 = vor.u32 %v7938_v46, %v6756_v50  ;;  %680 = vst [vmem:[#allocation2 + $0x238] sm:$0xff] %v664_v9  ;;  %v6878_v46 = vld [vmem:[#allocation2 + $0x168] sm:$0xf0] }
 0x22e   :  { %v6881_v50 = vor.u32 %v7961_v48, %v6878_v46 }
 0x22f   :  { %2399 = vmatpush.bf16.msra.mxu1 %v6993_v40  ;;  %7292 = vmatmul.msk.bf16.vlgmr.msra.gmra.mxu2 %vm283_vm2, %v9213_v16  ;;  %v7069_v40 = vor.u32 %v8017_v15, %v7068_v2  ;;  %v8019_v15 = vld [vmem:[#allocation2 + $0x2f4] sm:$0xf0]  ;;  %v7270_v2 = vld [vmem:[#allocation2 + $0x470] sm:$0xf0] }
 0x230   :  { %2539 = vmatpush.bf16.msrb.mxu2 %v7013_v59  ;;  %2567 = vmatpush.bf16.msrb.mxu0 %v7017_v8  ;;  %v7254_v59 = vld [vmem:[#allocation2 + $0x460] sm:$0xf0]  ;;  %v8001_v8 = vld [vmem:[#allocation2 + $0x264] sm:$0xf0]  ;;  %v7085_v57 = vor.u32 %v8019_v15, %v7084_v53 }
 0x231   :  { %2374 = vmatpush.bf16.msra.mxu3 %v6797_v18  ;;  %7293 = vmatmul.msk.bf16.vlgmr.msra.gmra.mxu0 %vm283_vm2, %v9213_v16  ;;  %v8056_v18 = vld [vmem:[#allocation2 + $0x424] sm:$0xf]  ;;  %v7005_v17 = vor.u32 %v8001_v8, %v7004_v63  ;;  %v7214_v8 = vld [vmem:[#allocation2 + $0x3f8] sm:$0xf0] }
 0x232   :  { %7287 = vmatmul.msk.bf16.vlgmr.msrb.gmra.mxu1 %vm283_vm2, %v9213_v16  ;;  %v7257_v14 = vor.u32 %v8056_v18, %v7254_v59  ;;  %v6956_v18 = vld [vmem:[#allocation2 + $0x1b8] sm:$0xf] }
 0x233   :  { %2400 = vmatpush.bf16.msra.mxu1 %v6929_v1  ;;  %v6877_v1 = vor.u32 %v7969_v56, %v6876_v60  ;;  %v7955_v56 = vld [vmem:[#allocation2 + $0xf4] sm:$0xf0] }
 0x234   :  { %2540 = vmatpush.bf16.msrb.mxu2 %v6949_v22  ;;  %2568 = vmatpush.bf16.msrb.mxu0 %v6953_v27  ;;  %v8041_v22 = vld [vmem:[#allocation2 + $0x3ac] sm:$0xf]  ;;  %v6940_v27 = vld [vmem:[#allocation2 + $0x1a8] sm:$0xf]  ;;  %v7020_v9 = vld [vmem:[#allocation2 + $0x238] sm:$0xf] }
 0x235   :  { %2375 = vmatpush.bf16.msra.mxu3 %v6733_v7  ;;  %v7201_v23 = vor.u32 %v8041_v22, %v7198_v19  ;;  %v6941_v28 = vor.u32 %v7985_v25, %v6940_v27  ;;  %v7137_v7 = vor.u32 %v8025_v24, %v7134_v6  ;;  %v7021_v63 = vor.u32 %v8003_v4, %v7020_v9  ;;  %v7971_v22 = vld [vmem:[#allocation2 + $0x174] sm:$0xf0]  ;;  %v8011_v27 = vld [vmem:[#allocation2 + $0x2bc] sm:$0xf] }
 0x236   :  { %v6892_v25 = vld [vmem:[#allocation2 + $0x138] sm:$0xf]  ;;  %v7022_v24 = vld [vmem:[#allocation2 + $0x278] sm:$0xf0] }
 0x237   :  { %2401 = vmatpush.bf16.msra.mxu1 %v6865_v33  ;;  %v6749_v33 = vor.u32 %v7937_v5, %v6748_v31  ;;  %v6893_v6 = vor.u32 %v7971_v22, %v6892_v25  ;;  %v6828_v60 = vld [vmem:[#allocation2 + $0xb8] sm:$0xf]  ;;  %v7931_v9 = vld [vmem:[#allocation2 + $0x3c] sm:$0xf] }
 0x238   :  { %2541 = vmatpush.bf16.msrb.mxu2 %v6885_v34  ;;  %2569 = vmatpush.bf16.msrb.mxu0 %v6889_v38  ;;  %v7009_v38 = vor.u32 %v7993_v32, %v7006_v11  ;;  %v9290_v32 = vpop.permute.xlu0 %1459  ;;  %v7939_v11 = vld [vmem:[#allocation2 + $0x74] sm:$0xf0] }
 0x239   :  { %2445 = vmatpush.bf16.msrb.mxu3 %v7253_v0  ;;  %v8009_v0 = vld [vmem:[#allocation2 + $0x2ac] sm:$0xf] }
 0x23a   :  { %2376 = vmatmul.bf16.vlgmr.msra.gmra.mxu3 %v9166_v47  ;;  %v7073_v34 = vor.u32 %v8009_v0, %v7070_v13  ;;  %v6829_v0 = vor.u32 %v7955_v56, %v6828_v60 }
 0x23b   :  { %2402 = vmatpush.bf16.msra.mxu1 %v6801_v39  ;;  %v6750_v39 = vld [vmem:[#allocation2 + $0x68] sm:$0xf0] }
 0x23c   :  { %2542 = vmatpush.bf16.msrb.mxu2 %v6821_v37  ;;  %2570 = vmatpush.bf16.msrb.mxu0 %v6825_v29  ;;  %v6945_v37 = vor.u32 %v7977_v20, %v6942_v41  ;;  %v7212_v29 = vld [vmem:[#allocation2 + $0x3b8] sm:$0xf]  ;;  %v7963_v20 = vld [vmem:[#allocation2 + $0x13c] sm:$0xf] }
 0x23d   :  { %2480 = vmatpush.bf16.msra.mxu3 %v7197_v42  ;;  %v8066_v42 = vld [vmem:[#allocation2 + $0x46c] sm:$0xf0]  ;;  %v7213_v49 = vor.u32 %v8051_v45, %v7212_v29 }
 0x23e   :  { %v7269_v26 = vor.u32 %v8066_v42, %v7268_v21  ;;  %v6894_v42 = vld [vmem:[#allocation2 + $0x178] sm:$0xf0]  ;;  %v9295_v21 = vpop.permute.xlu1 %1464 }
 0x23f   :  { %2403 = vmatpush.bf16.msra.mxu1 %v6737_v12  ;;  %v7150_v12 = vld [vmem:[#allocation2 + $0x378] sm:$0xf0]  ;;  %v6897_v45 = vor.u32 %v7963_v20, %v6894_v42 }
 0x240   :  { %2543 = vmatpush.bf16.msrb.mxu2 %v6757_v10  ;;  %2571 = vmatpush.bf16.msrb.mxu0 %v6761_v44  ;;  %v7929_v10 = vld [vmem:[#allocation2 + $0x2c] sm:$0xf]  ;;  %v8058_v44 = vld [vmem:[#allocation2 + $0x434] sm:$0xf] }
 0x241   :  { %2481 = vmatpush.bf16.msra.mxu3 %v7133_v52  ;;  %v6814_v52 = vld [vmem:[#allocation2 + $0xe8] sm:$0xf0]  ;;  %v6753_v59 = vor.u32 %v7929_v10, %v6750_v39 }
 0x242   :  { %2404 = vmatmul.bf16.vlgmr.msra.gmra.mxu1 %v9166_v47  ;;  %v6817_v54 = vor.u32 %v7945_v35, %v6814_v52 }
 0x243   :  { %2544 = vmatmul.bf16.vlgmr.msrb.gmra.mxu2 %v9166_v47  ;;  %2473 = vmatpush.bf16.msrb.mxu1 %v7257_v14 }
 0x244   :  { %2613 = vmatpush.bf16.msra.mxu2 %v7277_v62  ;;  %2641 = vmatpush.bf16.msra.mxu0 %v7281_v36  ;;  %v7273_v62 = vor.u32 %v8058_v44, %v7270_v2  ;;  %v8043_v36 = vld [vmem:[#allocation2 + $0x3bc] sm:$0xf] }
 0x245   :  { %2482 = vmatpush.bf16.msra.mxu3 %v7069_v40  ;;  %2572 = vmatmul.bf16.vlgmr.msrb.gmra.mxu0 %v9166_v47  ;;  %v7217_v55 = vor.u32 %v8043_v36, %v7214_v8  ;;  %v7987_v40 = vld [vmem:[#allocation2 + $0x1f4] sm:$0xf0] }
 0x246   :  { %v6957_v14 = vor.u32 %v7987_v40, %v6956_v18 }
 0x247   :  { %2508 = vmatpush.bf16.msra.mxu1 %v7201_v23  ;;  %v7086_v23 = vld [vmem:[#allocation2 + $0x2f8] sm:$0xf0] }
 0x249   :  { %2483 = vmatpush.bf16.msra.mxu3 %v7005_v17  ;;  %v8027_v17 = vld [vmem:[#allocation2 + $0x33c] sm:$0xf] }
 0x24a   :  { %7290 = vmatmul.msk.bf16.vlgmr.msrb.gmra.mxu3 %vm283_vm2, %v9213_v16  ;;  %v7153_v19 = vor.u32 %v8027_v17, %v7150_v12 }
 0x24b   :  { %2509 = vmatpush.bf16.msra.mxu1 %v7137_v7  ;;  %v7089_v7 = vor.u32 %v8011_v27, %v7086_v23 }
 0x24d   :  { %2484 = vmatpush.bf16.msra.mxu3 %v6941_v28  ;;  %v7995_v28 = vld [vmem:[#allocation2 + $0x23c] sm:$0xf] }
 0x24f   :  { %2510 = vmatpush.bf16.msra.mxu1 %v7073_v34  ;;  %v6958_v34 = vld [vmem:[#allocation2 + $0x1f8] sm:$0xf0] }
 0x251   :  { %2485 = vmatpush.bf16.msra.mxu3 %v6877_v1  ;;  %v7025_v1 = vor.u32 %v7995_v28, %v7022_v24 }
 0x252   :  { %7291 = vmatmul.msk.bf16.vlgmr.msrb.gmra.mxu1 %vm283_vm2, %v9213_v16 }
 0x253   :  { %2511 = vmatpush.bf16.msra.mxu1 %v7009_v38  ;;  %7296 = vmatmul.msk.bf16.vlgmr.msra.gmra.mxu2 %vm283_vm2, %v9213_v16  ;;  %v6765_v38 = vor.u32 %v7939_v11, %v6764_v58 }
 0x255   :  { %2486 = vmatpush.bf16.msra.mxu3 %v6813_v3  ;;  %7297 = vmatmul.msk.bf16.vlgmr.msra.gmra.mxu0 %vm283_vm2, %v9213_v16  ;;  %v7979_v3 = vld [vmem:[#allocation2 + $0x1bc] sm:$0xf] }
 0x256   :  { %v6961_v41 = vor.u32 %v7979_v3, %v6958_v34 }
 0x257   :  { %2512 = vmatpush.bf16.msra.mxu1 %v6945_v37 }
 0x258   :  { %v2209_v13 = vpop.f32.mrf.mxu0 }
 0x259   :  { %2487 = vmatpush.bf16.msra.mxu3 %v6749_v33  ;;  %v2210_v61 = vadd.f32 %v2209_v13, %v9290_v32 }
 0x25b   :  { %2513 = vmatpush.bf16.msra.mxu1 %v6881_v50 }
 0x25c   :  { %2488 = vmatmul.bf16.vlgmr.msra.gmra.mxu3 %v9166_v47 }
 0x25d   :  { %2557 = vmatpush.bf16.msrb.mxu3 %v7269_v26  ;;  %v9300_v26 = vld [vmem:[%s11843_s1] sm:$0xff] }
 0x25e   :  { %v2237_v5 = vpop.f32.mrf.mxu2  ;;  %v2685_v35 = vperm.slane %v9300_v26, 1  ;;  %v2687_v3 = vperm.slane %v9300_v26, 3 }
 0x25f   :  { %2514 = vmatpush.bf16.msra.mxu1 %v6817_v54  ;;  %v2238_v46 = vadd.f32 %v2237_v5, %v9290_v32  ;;  %v6766_v54 = vld [vmem:[#allocation2 + $0x78] sm:$0xf0] }
 0x260   :  { %v2211_v37 = vpop.f32.mrf.mxu0  ;;  %v6769_v10 = vor.u32 %v7931_v9, %v6766_v54 }
 0x261   :  { %2592 = vmatpush.bf16.msra.mxu3 %v7213_v49  ;;  %v2212_v29 = vadd.f32 %v2211_v37, %v9295_v21  ;;  %v2684_v49 = vperm.slane %v9300_v26, 0  ;;  %v2688_v37 = vperm.slane %v9300_v26, 4 }
 0x263   :  { %2515 = vmatpush.bf16.msra.mxu1 %v6753_v59 }
 0x265   :  { %2593 = vmatpush.bf16.msra.mxu3 %v7149_v30 }
 0x266   :  { %2516 = vmatmul.bf16.vlgmr.msra.gmra.mxu1 %v9166_v47  ;;  %v2239_v30 = vpop.f32.mrf.mxu2 }
 0x267   :  { %2585 = vmatpush.bf16.msrb.mxu1 %v7273_v62  ;;  %v2240_v4 = vadd.f32 %v2239_v30, %v9295_v21 }
 0x269   :  { %2594 = vmatpush.bf16.msra.mxu3 %v7085_v57 }
 0x26b   :  { %2620 = vmatpush.bf16.msra.mxu1 %v7217_v55 }
 0x26c   :  { %7294 = vmatmul.msk.bf16.vlgmr.msrb.gmra.mxu3 %vm283_vm2, %v9213_v16 }
 0x26d   :  { %2595 = vmatpush.bf16.msra.mxu3 %v7021_v63 }
 0x26f   :  { %2621 = vmatpush.bf16.msra.mxu1 %v7153_v19  ;;  %v2223_v31 = vpop.f32.mrf.mxu1 }
 0x270   :  { %v2224_v33 = vadd.f32 %v2223_v31, %v2210_v61 }
 0x271   :  { %2596 = vmatpush.bf16.msra.mxu3 %v6957_v14 }
 0x272   :  { %v2648_v48 = vmax.f32 %v2224_v33, 0.0 }
 0x273   :  { %2622 = vmatpush.bf16.msra.mxu1 %v7089_v7 }
 0x274   :  { %v2716_v53 = vmul.f32 %v2684_v49, %v2648_v48 }
 0x275   :  { %2597 = vmatpush.bf16.msra.mxu3 %v6893_v6  ;;  %v2251_v50 = vpop.f32.mrf.mxu3 }
 0x276   :  { %7295 = vmatmul.msk.bf16.vlgmr.msrb.gmra.mxu1 %vm283_vm2, %v9213_v16  ;;  %v6830_v16 = vld [vmem:[#allocation2 + $0xf8] sm:$0xf0]  ;;  %v2252_v43 = vadd.f32 %v2251_v50, %v2238_v46 }
 0x277   :  { %2623 = vmatpush.bf16.msra.mxu1 %v7025_v1  ;;  %v6833_v52 = vor.u32 %v7947_v51, %v6830_v16  ;;  %v2225_v15 = vpop.f32.mrf.mxu1  ;;  %v2689_v51 = vperm.slane %v9300_v26, 5 }
 0x278   :  { %v2226_v39 = vadd.f32 %v2225_v15, %v2212_v29  ;;  %v2649_v2 = vmax.f32 %v2252_v43, 0.0 }
 0x279   :  { %2598 = vmatpush.bf16.msra.mxu3 %v6829_v0  ;;  %v2686_v0 = vperm.slane %v9300_v26, 2 }
 0x27a   :  { %v2717_v57 = vmul.f32 %v2685_v35, %v2649_v2  ;;  %v2664_v59 = vmax.f32 %v2226_v39, 0.0 }
 0x27b   :  { %2624 = vmatpush.bf16.msra.mxu1 %v6961_v41 }
 0x27c   :  { %v2748_v44 = vpack.c.bf16 %v2717_v57, %v2716_v53  ;;  %v2732_v8 = vmul.f32 %v2684_v49, %v2664_v59 }
 0x27d   :  { %2599 = vmatpush.bf16.msra.mxu3 %v6765_v38  ;;  %v2253_v62 = vpop.f32.mrf.mxu3 }
 0x27e   :  { %v2254_v63 = vadd.f32 %v2253_v62, %v2240_v4  ;;  %2764 = vst [vmem:[#allocation3 + $0x4] sm:$0xff] %v2748_v44  ;;  %v2321_v22 = vpop.f32.mrf.mxu2 }
 0x27f   :  { %2625 = vmatpush.bf16.msra.mxu1 %v6897_v45  ;;  %v2322_v11 = vadd.f32 %v2321_v22, %v9290_v32 }
 0x280   :  { %2600 = vmatmul.bf16.vlgmr.msra.gmra.mxu3 %v9166_v47  ;;  %v2665_v36 = vmax.f32 %v2254_v63, 0.0 }
 0x282   :  { %v2733_v55 = vmul.f32 %v2685_v35, %v2665_v36 }
 0x283   :  { %2626 = vmatpush.bf16.msra.mxu1 %v6833_v52 }
 0x284   :  { %v2756_v40 = vpack.c.bf16 %v2733_v55, %v2732_v8 }
 0x285   :  { %v2279_v12 = vpop.f32.mrf.mxu3  ;;  %v9309_v18 = vld [vmem:[#allocation3] sm:$0xff] }
 0x286   :  { %v3396_v14 = vld [vmem:[#allocation3 + $0x4] sm:$0xff]  ;;  %2772 = vst [vmem:[#allocation3 + $0x4c] sm:$0xff] %v2756_v40  ;;  %2816 = vrot.lane.b32.xlu2 %v9309_v18, %s8269_s25  ;;  %v2323_v6 = vpop.f32.mrf.mxu2 }
 0x287   :  { %2627 = vmatpush.bf16.msra.mxu1 %v6769_v10  ;;  %3420 = vst [vmem:[#allocation2 + $0x240] sm:$0xff] %v2756_v40  ;;  %v2324_v49 = vadd.f32 %v2323_v6, %v9295_v21 }
 0x288   :  { %3412 = vst [vmem:[#allocation2 + $0x200] sm:$0xff] %v3396_v14 }
 0x28a   :  { %2628 = vmatmul.bf16.vlgmr.msra.gmra.mxu1 %v9166_v47  ;;  %v2349_v47 = vpop.f32.mrf.mxu0 }
 0x28b   :  { %v2350_v42 = vadd.f32 %v2349_v47, %v9290_v32 }
 0x28d   :  { %v2281_v19 = vpop.f32.mrf.mxu3 }
 0x28e   :  { %v2391_v13 = vpop.f32.mrf.mxu2 }
 0x28f   :  { %v2265_v17 = vpop.f32.mrf.mxu1 }
 0x290   :  { %v2266_v24 = vadd.f32 %v2265_v17, %v9290_v32 }
 0x292   :  { %v2280_v7 = vadd.f32 %v2279_v12, %v2266_v24  ;;  %v2351_v56 = vpop.f32.mrf.mxu0 }
 0x293   :  { %v2352_v10 = vadd.f32 %v2351_v56, %v9295_v21  ;;  %v2691_v56 = vperm.slane %v9300_v26, 7 }
 0x294   :  { %v2650_v58 = vmax.f32 %v2280_v7, 0.0 }
 0x296   :  { %v2718_v31 = vmul.f32 %v2686_v0, %v2650_v58  ;;  %v2393_v43 = vpop.f32.mrf.mxu2 }
 0x297   :  { %v2267_v23 = vpop.f32.mrf.mxu1 }
 0x298   :  { %v2268_v61 = vadd.f32 %v2267_v23, %v9295_v21 }
 0x299   :  { %v2293_v25 = vpop.f32.mrf.mxu3 }
 0x29a   :  { %v2294_v60 = vadd.f32 %v2293_v25, %v9290_v32  ;;  %v2282_v33 = vadd.f32 %v2281_v19, %v2268_v61  ;;  %v2419_v29 = vpop.f32.mrf.mxu0 }
 0x29c   :  { %v2666_v35 = vmax.f32 %v2282_v33, 0.0  ;;  %v9355_v33 = vld [vmem:[%s11843_s1 + $0x8] sm:$0xff] }
 0x29e   :  { %v2734_v9 = vmul.f32 %v2686_v0, %v2666_v35 }
 0x29f   :  { %v2335_v27 = vpop.f32.mrf.mxu1 }
 0x2a0   :  { %v2336_v41 = vadd.f32 %v2335_v27, %v2322_v11  ;;  %v2690_v27 = vperm.slane %v9300_v26, 6 }
 0x2a1   :  { %v2295_v28 = vpop.f32.mrf.mxu3 }
 0x2a2   :  { %v2296_v45 = vadd.f32 %v2295_v28, %v9295_v21  ;;  %v2652_v48 = vmax.f32 %v2336_v41, 0.0  ;;  %v2421_v40 = vpop.f32.mrf.mxu0  ;;  %v2433_v14 = vpop.f32.mrf.mxu2 }
 0x2a3   :  { %v2434_v61 = vadd.f32 %v2433_v14, %v9290_v32 }
 0x2a4   :  { %v2720_v39 = vmul.f32 %v2688_v37, %v2652_v48 }
 0x2a7   :  { %v2337_v1 = vpop.f32.mrf.mxu1 }
 0x2a8   :  { %v2338_v53 = vadd.f32 %v2337_v1, %v2324_v49  ;;  %v2692_v49 = vperm.slane %v9355_v33, 0 }
 0x2a9   :  { %v2307_v34 = vpop.f32.mrf.mxu3 }
 0x2aa   :  { %v2308_v38 = vadd.f32 %v2307_v34, %v2294_v60  ;;  %v2668_v62 = vmax.f32 %v2338_v53, 0.0  ;;  %v2461_v60 = vpop.f32.mrf.mxu0  ;;  %v2435_v11 = vpop.f32.mrf.mxu2 }
 0x2ac   :  { %v2651_v5 = vmax.f32 %v2308_v38, 0.0  ;;  %v2736_v17 = vmul.f32 %v2688_v37, %v2668_v62 }
 0x2ae   :  { %v2719_v20 = vmul.f32 %v2687_v3, %v2651_v5 }
 0x2af   :  { %v2363_v16 = vpop.f32.mrf.mxu1 }
 0x2b0   :  { %v9322_v46 = vpack.c.bf16 %v2719_v20, %v2718_v31  ;;  %v2364_v50 = vadd.f32 %v2363_v16, %v2350_v42  ;;  %v2462_v20 = vadd.f32 %v2461_v60, %v9290_v32 }
 0x2b1   :  { %v2309_v52 = vpop.f32.mrf.mxu3 }
 0x2b2   :  { %2765 = vst [vmem:[#allocation3 + $0xc] sm:$0xff] %v9322_v46  ;;  %v2310_v30 = vadd.f32 %v2309_v52, %v2296_v45  ;;  %v2653_v54 = vmax.f32 %v2364_v50, 0.0  ;;  %v2463_v45 = vpop.f32.mrf.mxu0  ;;  %v2503_v50 = vpop.f32.mrf.mxu2 }
 0x2b3   :  { %3413 = vst [vmem:[#allocation2 + $0x208] sm:$0xff] %v9322_v46 }
 0x2b4   :  { %v2667_v15 = vmax.f32 %v2310_v30, 0.0  ;;  %v2721_v2 = vmul.f32 %v2689_v51, %v2653_v54  ;;  %v2693_v30 = vperm.slane %v9355_v33, 1 }
 0x2b6   :  { %v2735_v4 = vmul.f32 %v2687_v3, %v2667_v15  ;;  %v9329_v57 = vpack.c.bf16 %v2721_v2, %v2720_v39 }
 0x2b7   :  { %v2365_v44 = vpop.f32.mrf.mxu1 }
 0x2b8   :  { %v2757_v59 = vpack.c.bf16 %v2735_v4, %v2734_v9  ;;  %2766 = vst [vmem:[#allocation3 + $0x14] sm:$0xff] %v9329_v57  ;;  %v2366_v63 = vadd.f32 %v2365_v44, %v2352_v10  ;;  %v2464_v4 = vadd.f32 %v2463_v45, %v9295_v21 }
 0x2b9   :  { %v9332_v36 = vld [vmem:[#allocation3 + $0x8] sm:$0xff]  ;;  %3414 = vst [vmem:[#allocation2 + $0x210] sm:$0xff] %v9329_v57 }
 0x2ba   :  { %2818 = vrot.lane.b32.xlu1 %v9332_v36, %s8269_s25  ;;  %2773 = vst [vmem:[#allocation3 + $0x54] sm:$0xff] %v2757_v59  ;;  %v2669_v12 = vmax.f32 %v2366_v63, 0.0 }
 0x2bb   :  { %3421 = vst [vmem:[#allocation2 + $0x248] sm:$0xff] %v2757_v59  ;;  %v2531_v59 = vpop.f32.mrf.mxu0 }
 0x2bc   :  { %v2737_v19 = vmul.f32 %v2689_v51, %v2669_v12 }
 0x2bd   :  { %v2377_v8 = vpop.f32.mrf.mxu3 }
 0x2be   :  { %v2378_v55 = vadd.f32 %v2377_v8, %v9290_v32  ;;  %v2758_v23 = vpack.c.bf16 %v2737_v19, %v2736_v17 }
 0x2bf   :  { %v2405_v25 = vpop.f32.mrf.mxu1  ;;  %v9338_v47 = vld [vmem:[#allocation3 + $0x10] sm:$0xff] }
 0x2c0   :  { %v2392_v22 = vadd.f32 %v2391_v13, %v2378_v55  ;;  %2774 = vst [vmem:[#allocation3 + $0x5c] sm:$0xff] %v2758_v23  ;;  %v2406_v28 = vadd.f32 %v2405_v25, %v9290_v32  ;;  %2820 = vrot.lane.b32.xlu2 %v9338_v47, %s8269_s25  ;;  %v2505_v55 = vpop.f32.mrf.mxu2 }
 0x2c1   :  { %3422 = vst [vmem:[#allocation2 + $0x250] sm:$0xff] %v2758_v23 }
 0x2c2   :  { %v2654_v6 = vmax.f32 %v2392_v22, 0.0  ;;  %v2420_v7 = vadd.f32 %v2419_v29, %v2406_v28 }
 0x2c4   :  { %v2722_v1 = vmul.f32 %v2690_v27, %v2654_v6  ;;  %v2655_v0 = vmax.f32 %v2420_v7, 0.0  ;;  %v2533_v7 = vpop.f32.mrf.mxu0 }
 0x2c5   :  { %v2379_v24 = vpop.f32.mrf.mxu3 }
 0x2c6   :  { %v2380_v13 = vadd.f32 %v2379_v24, %v9295_v21  ;;  %v2723_v34 = vmul.f32 %v2691_v56, %v2655_v0 }
 0x2c7   :  { %v2407_v38 = vpop.f32.mrf.mxu1 }
 0x2c8   :  { %v2394_v58 = vadd.f32 %v2393_v43, %v2380_v13  ;;  %v9347_v3 = vpack.c.bf16 %v2723_v34, %v2722_v1  ;;  %v2408_v5 = vadd.f32 %v2407_v38, %v9295_v21  ;;  %v2436_v43 = vadd.f32 %v2435_v11, %v9295_v21  ;;  %v2545_v1 = vpop.f32.mrf.mxu2  ;;  %v9387_v38 = vld [vmem:[#allocation3 + $0x50] sm:$0xff] }
 0x2c9   :  { %v2695_v13 = vperm.slane %v9355_v33, 3 }
 0x2ca   :  { %2767 = vst [vmem:[#allocation3 + $0x1c] sm:$0xff] %v9347_v3  ;;  %v2670_v42 = vmax.f32 %v2394_v58, 0.0  ;;  %v2422_v26 = vadd.f32 %v2421_v40, %v2408_v5 }
 0x2cb   :  { %3415 = vst [vmem:[#allocation2 + $0x218] sm:$0xff] %v9347_v3 }
 0x2cc   :  { %v2671_v37 = vmax.f32 %v2422_v26, 0.0  ;;  %v2738_v16 = vmul.f32 %v2690_v27, %v2670_v42  ;;  %v2694_v27 = vperm.slane %v9355_v33, 2 }
 0x2cd   :  { %v2447_v41 = vpop.f32.mrf.mxu3 }
 0x2ce   :  { %v2448_v31 = vadd.f32 %v2447_v41, %v2434_v61  ;;  %v2739_v29 = vmul.f32 %v2691_v56, %v2671_v37  ;;  %v2546_v41 = vadd.f32 %v2545_v1, %v9290_v32  ;;  %v2573_v37 = vpop.f32.mrf.mxu0 }
 0x2cf   :  { %v2475_v51 = vpop.f32.mrf.mxu1 }
 0x2d0   :  { %v2656_v48 = vmax.f32 %v2448_v31, 0.0  ;;  %v9359_v52 = vpack.c.bf16 %v2739_v29, %v2738_v16  ;;  %v2476_v35 = vadd.f32 %v2475_v51, %v2462_v20  ;;  %v2547_v29 = vpop.f32.mrf.mxu2  ;;  %v2696_v51 = vperm.slane %v9355_v33, 4 }
 0x2d1   :  { %v9363_v15 = vld [vmem:[#allocation3 + $0x18] sm:$0xff] }
 0x2d2   :  { %2775 = vst [vmem:[#allocation3 + $0x64] sm:$0xff] %v9359_v52  ;;  %v2724_v39 = vmul.f32 %v2692_v49, %v2656_v48  ;;  %v2657_v53 = vmax.f32 %v2476_v35, 0.0  ;;  %2822 = vrot.lane.b32.xlu0 %v9363_v15, %s8269_s25 }
 0x2d3   :  { %3423 = vst [vmem:[#allocation2 + $0x258] sm:$0xff] %v9359_v52 }
 0x2d4   :  { %v2725_v2 = vmul.f32 %v2693_v30, %v2657_v53  ;;  %v2697_v53 = vperm.slane %v9355_v33, 5 }
 0x2d5   :  { %v2449_v54 = vpop.f32.mrf.mxu3 }
 0x2d6   :  { %v2450_v9 = vadd.f32 %v2449_v54, %v2436_v43  ;;  %v9370_v10 = vpack.c.bf16 %v2725_v2, %v2724_v39  ;;  %v2548_v43 = vadd.f32 %v2547_v29, %v9295_v21 }
 0x2d7   :  { %v2477_v44 = vpop.f32.mrf.mxu1 }
 0x2d8   :  { %2768 = vst [vmem:[#allocation3 + $0x24] sm:$0xff] %v9370_v10  ;;  %v2672_v62 = vmax.f32 %v2450_v9, 0.0  ;;  %v2478_v63 = vadd.f32 %v2477_v44, %v2464_v4 }
 0x2d9   :  { %3416 = vst [vmem:[#allocation2 + $0x220] sm:$0xff] %v9370_v10 }
 0x2da   :  { %v2673_v12 = vmax.f32 %v2478_v63, 0.0  ;;  %v2740_v14 = vmul.f32 %v2692_v49, %v2672_v62  ;;  %v2574_v49 = vadd.f32 %v2573_v37, %v9290_v32 }
 0x2dc   :  { %v2741_v17 = vmul.f32 %v2693_v30, %v2673_v12 }
 0x2de   :  { %v9375_v22 = vpack.c.bf16 %v2741_v17, %v2740_v14 }
 0x2df   :  { %v2489_v8 = vpop.f32.mrf.mxu3  ;;  %v9377_v25 = vld [vmem:[#allocation3 + $0x20] sm:$0xff] }
 0x2e0   :  { %v2490_v40 = vadd.f32 %v2489_v8, %v9290_v32  ;;  %2776 = vst [vmem:[#allocation3 + $0x6c] sm:$0xff] %v9375_v22  ;;  %2824 = vrot.lane.b32.xlu1 %v9377_v25, %s8269_s25 }
 0x2e1   :  { %3424 = vst [vmem:[#allocation2 + $0x260] sm:$0xff] %v9375_v22 }
 0x2e2   :  { %v2504_v19 = vadd.f32 %v2503_v50, %v2490_v40 }
 0x2e3   :  { %v2517_v23 = vpop.f32.mrf.mxu1 }
 0x2e4   :  { %v2658_v6 = vmax.f32 %v2504_v19, 0.0  ;;  %v2518_v28 = vadd.f32 %v2517_v23, %v9290_v32  ;;  %v2615_v19 = vpop.f32.mrf.mxu2  ;;  %v9414_v23 = vld [vmem:[#allocation3 + $0x58] sm:$0xff] }
 0x2e6   :  { %v2532_v56 = vadd.f32 %v2531_v59, %v2518_v28  ;;  %v2726_v0 = vmul.f32 %v2694_v27, %v2658_v6  ;;  %v2575_v59 = vpop.f32.mrf.mxu0 }
 0x2e7   :  { %v2491_v24 = vpop.f32.mrf.mxu3  ;;  %v2576_v8 = vadd.f32 %v2575_v59, %v9295_v21 }
 0x2e8   :  { %v2492_v60 = vadd.f32 %v2491_v24, %v9295_v21  ;;  %v2659_v11 = vmax.f32 %v2532_v56, 0.0  ;;  %2836 = vrot.lane.b32.xlu1 %v9387_v38, %s8269_s25 }
 0x2ea   :  { %v2727_v34 = vmul.f32 %v2695_v13, %v2659_v11  ;;  %v2506_v58 = vadd.f32 %v2505_v55, %v2492_v60 }
 0x2eb   :  { %v2519_v61 = vpop.f32.mrf.mxu1 }
 0x2ec   :  { %v9389_v5 = vpack.c.bf16 %v2727_v34, %v2726_v0  ;;  %v2520_v42 = vadd.f32 %v2519_v61, %v9295_v21  ;;  %v2674_v31 = vmax.f32 %v2506_v58, 0.0  ;;  %v2698_v34 = vperm.slane %v9355_v33, 6 }
 0x2ee   :  { %2769 = vst [vmem:[#allocation3 + $0x2c] sm:$0xff] %v9389_v5  ;;  %v2534_v20 = vadd.f32 %v2533_v7, %v2520_v42  ;;  %v2742_v48 = vmul.f32 %v2694_v27, %v2674_v31 }
 0x2ef   :  { %v2559_v26 = vpop.f32.mrf.mxu3  ;;  %3417 = vst [vmem:[#allocation2 + $0x228] sm:$0xff] %v9389_v5 }
 0x2f0   :  { %v2675_v45 = vmax.f32 %v2534_v20, 0.0  ;;  %v2560_v16 = vadd.f32 %v2559_v26, %v2546_v41  ;;  %v2699_v41 = vperm.slane %v9355_v33, 7  ;;  %v2617_v26 = vpop.f32.mrf.mxu2 }
 0x2f2   :  { %v2743_v50 = vmul.f32 %v2695_v13, %v2675_v45  ;;  %v2660_v54 = vmax.f32 %v2560_v16, 0.0  ;;  %v2643_v13 = vpop.f32.mrf.mxu0  ;;  %v9431_v16 = vld [vmem:[#allocation3 + $0x48] sm:$0xff] }
 0x2f3   :  { %v2587_v35 = vpop.f32.mrf.mxu1 }
 0x2f4   :  { %v9400_v30 = vpack.c.bf16 %v2743_v50, %v2742_v48  ;;  %v2588_v39 = vadd.f32 %v2587_v35, %v2574_v49  ;;  %v2728_v44 = vmul.f32 %v2696_v51, %v2660_v54  ;;  %v9440_v54 = vld [vmem:[#allocation3 + $0x60] sm:$0xff] }
 0x2f5   :  { %v9403_v9 = vld [vmem:[#allocation3 + $0x28] sm:$0xff] }
 0x2f6   :  { %2777 = vst [vmem:[#allocation3 + $0x74] sm:$0xff] %v9400_v30  ;;  %v2661_v4 = vmax.f32 %v2588_v39, 0.0  ;;  %2826 = vrot.lane.b32.xlu2 %v9403_v9, %s8269_s25 }
 0x2f7   :  { %v2561_v2 = vpop.f32.mrf.mxu3  ;;  %3425 = vst [vmem:[#allocation2 + $0x268] sm:$0xff] %v9400_v30 }
 0x2f8   :  { %v2729_v62 = vmul.f32 %v2697_v53, %v2661_v4  ;;  %v2562_v63 = vadd.f32 %v2561_v2, %v2548_v43  ;;  %v9457_v4 = vld [vmem:[#allocation3 + $0x68] sm:$0xff] }
 0x2fa   :  { %v9410_v55 = vpack.c.bf16 %v2729_v62, %v2728_v44  ;;  %v2676_v12 = vmax.f32 %v2562_v63, 0.0  ;;  %v2645_v49 = vpop.f32.mrf.mxu0  ;;  %v2817_v44 = vpop.permute.xlu2 %2816 }
 0x2fb   :  { %v2589_v40 = vpop.f32.mrf.mxu1 }
 0x2fc   :  { %2770 = vst [vmem:[#allocation3 + $0x34] sm:$0xff] %v9410_v55  ;;  %v2590_v14 = vadd.f32 %v2589_v40, %v2576_v8  ;;  %v2744_v28 = vmul.f32 %v2696_v51, %v2676_v12  ;;  %v2852_v12 = vrot.slane %v2817_v44, 4 }
 0x2fd   :  { %3418 = vst [vmem:[#allocation2 + $0x230] sm:$0xff] %v9410_v55  ;;  %v9459_v59 = vld [vmem:[#allocation3 + $0x70] sm:$0xff] }
 0x2fe   :  { %v2677_v6 = vmax.f32 %v2590_v14, 0.0  ;;  %2838 = vrot.lane.b32.xlu2 %v9414_v23, %s8269_s25 }
 0x300   :  { %v2745_v24 = vmul.f32 %v2697_v53, %v2677_v6 }
 0x302   :  { %v9419_v7 = vpack.c.bf16 %v2745_v24, %v2744_v28 }
 0x303   :  { %v2601_v17 = vpop.f32.mrf.mxu3  ;;  %v9421_v1 = vld [vmem:[#allocation3 + $0x30] sm:$0xff] }
 0x304   :  { %v2602_v27 = vadd.f32 %v2601_v17, %v9290_v32  ;;  %2778 = vst [vmem:[#allocation3 + $0x7c] sm:$0xff] %v9419_v7  ;;  %2828 = vrot.lane.b32.xlu0 %v9421_v1, %s8269_s25 }
 0x305   :  { %3426 = vst [vmem:[#allocation2 + $0x270] sm:$0xff] %v9419_v7 }
 0x306   :  { %v2616_v56 = vadd.f32 %v2615_v19, %v2602_v27 }
 0x307   :  { %v2629_v60 = vpop.f32.mrf.mxu1 }
 0x308   :  { %v2630_v0 = vadd.f32 %v2629_v60, %v9290_v32  ;;  %v2662_v58 = vmax.f32 %v2616_v56, 0.0 }
 0x30a   :  { %v2644_v61 = vadd.f32 %v2643_v13, %v2630_v0  ;;  %v2730_v20 = vmul.f32 %v2698_v34, %v2662_v58 }
 0x30b   :  { %v2603_v11 = vpop.f32.mrf.mxu3  ;;  %v9453_v2 = vld [vmem:[#allocation3 + $0x78] sm:$0xff] }
 0x30c   :  { %v2604_v42 = vadd.f32 %v2603_v11, %v9295_v21  ;;  %v2663_v31 = vmax.f32 %v2644_v61, 0.0  ;;  %2834 = vrot.lane.b32.xlu0 %v9431_v16, %s8269_s25 }
 0x30e   :  { %v2731_v37 = vmul.f32 %v2699_v41, %v2663_v31  ;;  %v2618_v45 = vadd.f32 %v2617_v26, %v2604_v42 }
 0x30f   :  { %v2631_v32 = vpop.f32.mrf.mxu1 }
 0x310   :  { %v9433_v29 = vpack.c.bf16 %v2731_v37, %v2730_v20  ;;  %v2632_v48 = vadd.f32 %v2631_v32, %v9295_v21  ;;  %v2678_v33 = vmax.f32 %v2618_v45, 0.0 }
 0x312   :  { %2771 = vst [vmem:[#allocation3 + $0x3c] sm:$0xff] %v9433_v29  ;;  %v2646_v50 = vadd.f32 %v2645_v49, %v2632_v48  ;;  %v2746_v43 = vmul.f32 %v2698_v34, %v2678_v33 }
 0x313   :  { %3419 = vst [vmem:[#allocation2 + $0x238] sm:$0xff] %v9433_v29 }
 0x314   :  { %v2679_v51 = vmax.f32 %v2646_v50, 0.0  ;;  %2840 = vrot.lane.b32.xlu0 %v9440_v54, %s8269_s25 }
 0x316   :  { %v2747_v35 = vmul.f32 %v2699_v41, %v2679_v51 }
 0x318   :  { %v9442_v39 = vpack.c.bf16 %v2747_v35, %v2746_v43 }
 0x319   :  { %v9446_v21 = vld [vmem:[#allocation3 + $0x38] sm:$0xff]  ;;  %v2788_v53 = vld [vmem:[#allocation3 + $0x40] sm:$0xf] }
 0x31a   :  { %2779 = vst [vmem:[#allocation3 + $0x84] sm:$0xff] %v9442_v39  ;;  %2830 = vrot.lane.b32.xlu1 %v9446_v21, %s8269_s25  ;;  %2832 = vrot.lane.b32.xlu2 %v2788_v53, %s8269_s25  ;;  %v2821_v8 = vpop.permute.xlu2 %2820  ;;  %v2942_v24 = vld [vmem:[#allocation3 + $0x40] sm:$0xf] }
 0x31b   :  { %3427 = vst [vmem:[#allocation2 + $0x278] sm:$0xff] %v9442_v39  ;;  %v2854_v14 = vrot.slane %v2821_v8, 4  ;;  %v3096_v50 = vld [vmem:[#allocation3 + $0x40] sm:$0xf] }
 0x31c   :  { %2846 = vrot.lane.b32.xlu0 %v9453_v2, %s8269_s25 }
 0x321   :  { %v9467_v62 = vld [vmem:[#allocation3 + $0x80] sm:$0xff]  ;;  %v2797_v63 = vld [vmem:[#allocation3 + $0x88] sm:$0xf] }
 0x322   :  { %2842 = vrot.lane.b32.xlu1 %v9457_v4, %s8269_s25  ;;  %2844 = vrot.lane.b32.xlu2 %v9459_v59, %s8269_s25  ;;  %v2951_v34 = vld [vmem:[#allocation3 + $0x88] sm:$0xf] }
 0x324   :  { %2970 = vrot.lane.b32.xlu0 %v9309_v18, %s8270_s11 }
 0x32a   :  { %2848 = vrot.lane.b32.xlu1 %v9467_v62, %s8269_s25  ;;  %2850 = vrot.lane.b32.xlu2 %v2797_v63, %s8269_s25 }
 0x32c   :  { %2976 = vrot.lane.b32.xlu0 %v9363_v15, %s8270_s11  ;;  %v2819_v40 = vpop.permute.xlu1 %2818 }
 0x32d   :  { %v2853_v17 = vrot.slane %v2819_v40, 4 }
 0x32f   :  { %v2870_v19 = vsel %vm126_vm0, %v2852_v12, %v2853_v17  ;;  %v2872_v6 = vsel %vm126_vm0, %v2853_v17, %v2854_v14 }
 0x330   :  { %v2871_v27 = vsel %vm128_vm1, %v2817_v44, %v2870_v19  ;;  %v2873_v28 = vsel %vm128_vm1, %v2819_v40, %v2872_v6  ;;  %v3105_v19 = vld [vmem:[#allocation3 + $0x88] sm:$0xf] }
 0x331   :  { %2918 = vst [vmem:[#allocation2] sm:$0xff] %v2871_v27 }
 0x332   :  { %2972 = vrot.lane.b32.xlu1 %v9332_v36, %s8270_s11  ;;  %2974 = vrot.lane.b32.xlu2 %v9338_v47, %s8270_s11  ;;  %2919 = vst [vmem:[#allocation2 + $0x8] sm:$0xff] %v2873_v28 }
 0x334   :  { %2982 = vrot.lane.b32.xlu0 %v9421_v1, %s8270_s11 }
 0x33a   :  { %2978 = vrot.lane.b32.xlu1 %v9377_v25, %s8270_s11  ;;  %2980 = vrot.lane.b32.xlu2 %v9403_v9, %s8270_s11 }
 0x33c   :  { %2988 = vrot.lane.b32.xlu0 %v9431_v16, %s8270_s11 }
 0x342   :  { %2984 = vrot.lane.b32.xlu1 %v9446_v21, %s8270_s11  ;;  %2986 = vrot.lane.b32.xlu2 %v2942_v24, %s8270_s11 }
 0x344   :  { %2994 = vrot.lane.b32.xlu0 %v9440_v54, %s8270_s11  ;;  %v2823_v56 = vpop.permute.xlu0 %2822 }
 0x345   :  { %v2855_v13 = vrot.slane %v2823_v56, 4 }
 0x347   :  { %v2874_v60 = vsel %vm126_vm0, %v2854_v14, %v2855_v13 }
 0x348   :  { %v2875_v0 = vsel %vm128_vm1, %v2821_v8, %v2874_v60 }
 0x349   :  { %2920 = vst [vmem:[#allocation2 + $0x10] sm:$0xff] %v2875_v0 }
 0x34a   :  { %2990 = vrot.lane.b32.xlu1 %v9387_v38, %s8270_s11  ;;  %2992 = vrot.lane.b32.xlu2 %v9414_v23, %s8270_s11 }
 0x34c   :  { %3000 = vrot.lane.b32.xlu0 %v9453_v2, %s8270_s11 }
 0x350   :  { %v2827_v11 = vpop.permute.xlu2 %2826 }
 0x351   :  { %v2857_v61 = vrot.slane %v2827_v11, 4 }
 0x352   :  { %2996 = vrot.lane.b32.xlu1 %v9457_v4, %s8270_s11  ;;  %2998 = vrot.lane.b32.xlu2 %v9459_v59, %s8270_s11  ;;  %v2825_v58 = vpop.permute.xlu1 %2824 }
 0x353   :  { %v2856_v41 = vrot.slane %v2825_v58, 4 }
 0x354   :  { %3124 = vrot.lane.b32.xlu0 %v9309_v18, %s8271_s16 }
 0x355   :  { %v2876_v42 = vsel %vm126_vm0, %v2855_v13, %v2856_v41  ;;  %v2878_v26 = vsel %vm126_vm0, %v2856_v41, %v2857_v61 }
 0x356   :  { %v2877_v31 = vsel %vm128_vm1, %v2823_v56, %v2876_v42  ;;  %v2879_v20 = vsel %vm128_vm1, %v2825_v58, %v2878_v26 }
 0x357   :  { %2921 = vst [vmem:[#allocation2 + $0x18] sm:$0xff] %v2877_v31 }
 0x358   :  { %2922 = vst [vmem:[#allocation2 + $0x20] sm:$0xff] %v2879_v20  ;;  %v2839_v37 = vpop.permute.xlu2 %2838 }
 0x359   :  { %v2863_v32 = vrot.slane %v2839_v37, 4 }
 0x35a   :  { %3002 = vrot.lane.b32.xlu1 %v9467_v62, %s8270_s11  ;;  %3004 = vrot.lane.b32.xlu2 %v2951_v34, %s8270_s11  ;;  %v2837_v45 = vpop.permute.xlu1 %2836 }
 0x35b   :  { %v2862_v48 = vrot.slane %v2837_v45, 4 }
 0x35c   :  { %3130 = vrot.lane.b32.xlu0 %v9363_v15, %s8271_s16 }
 0x35d   :  { %v2888_v49 = vsel %vm126_vm0, %v2862_v48, %v2863_v32 }
 0x35e   :  { %v2889_v33 = vsel %vm128_vm1, %v2837_v45, %v2888_v49 }
 0x35f   :  { %2927 = vst [vmem:[#allocation2 + $0x48] sm:$0xff] %v2889_v33 }
 0x362   :  { %3126 = vrot.lane.b32.xlu1 %v9332_v36, %s8271_s16  ;;  %3128 = vrot.lane.b32.xlu2 %v9338_v47, %s8271_s16 }
 0x364   :  { %3136 = vrot.lane.b32.xlu0 %v9421_v1, %s8271_s16 }
 0x36a   :  { %3132 = vrot.lane.b32.xlu1 %v9377_v25, %s8271_s16  ;;  %3134 = vrot.lane.b32.xlu2 %v9403_v9, %s8271_s16 }
 0x36c   :  { %3142 = vrot.lane.b32.xlu0 %v9431_v16, %s8271_s16 }
 0x372   :  { %3138 = vrot.lane.b32.xlu1 %v9446_v21, %s8271_s16  ;;  %3140 = vrot.lane.b32.xlu2 %v3096_v50, %s8271_s16 }
 0x374   :  { %v2833_v51 = vpop.permute.xlu2 %2832  ;;  %3148 = vrot.lane.b32.xlu0 %v9440_v54, %s8271_s16 }
 0x375   :  { %v2860_v56 = vrot.slane %v2833_v51, 4 }
 0x376   :  { %v2829_v43 = vpop.permute.xlu0 %2828 }
 0x377   :  { %v2858_v35 = vrot.slane %v2829_v43, 4 }
 0x379   :  { %v2880_v44 = vsel %vm126_vm0, %v2857_v61, %v2858_v35 }
 0x37a   :  { %3144 = vrot.lane.b32.xlu1 %v9387_v38, %s8271_s16  ;;  %3146 = vrot.lane.b32.xlu2 %v9414_v23, %s8271_s16  ;;  %v2881_v63 = vsel %vm128_vm1, %v2827_v11, %v2880_v44 }
 0x37b   :  { %2923 = vst [vmem:[#allocation2 + $0x28] sm:$0xff] %v2881_v63 }
 0x37c   :  { %v2845_v53 = vpop.permute.xlu2 %2844  ;;  %3154 = vrot.lane.b32.xlu0 %v9453_v2, %s8271_s16 }
 0x37d   :  { %v2866_v41 = vrot.slane %v2845_v53, 4 }
 0x37e   :  { %v2835_v8 = vpop.permute.xlu0 %2834 }
 0x37f   :  { %v2861_v40 = vrot.slane %v2835_v8, 4 }
 0x381   :  { %v2886_v14 = vsel %vm126_vm0, %v2861_v40, %v2862_v48 }
 0x382   :  { %3150 = vrot.lane.b32.xlu1 %v9457_v4, %s8271_s16  ;;  %3152 = vrot.lane.b32.xlu2 %v9459_v59, %s8271_s16  ;;  %v2887_v17 = vsel %vm128_vm1, %v2835_v8, %v2886_v14 }
 0x383   :  { %2926 = vst [vmem:[#allocation2 + $0x40] sm:$0xff] %v2887_v17 }
 0x384   :  { %v2851_v12 = vpop.permute.xlu2 %2850  ;;  %3278 = vrot.lane.b32.xlu0 %v9309_v18, %s8272_s21 }
 0x385   :  { %v2869_v50 = vrot.slane %v2851_v12, 4 }
 0x386   :  { %v2841_v6 = vpop.permute.xlu0 %2840 }
 0x387   :  { %v2864_v27 = vrot.slane %v2841_v6, 4 }
 0x389   :  { %v2890_v13 = vsel %vm126_vm0, %v2863_v32, %v2864_v27 }
 0x38a   :  { %3156 = vrot.lane.b32.xlu1 %v9467_v62, %s8271_s16  ;;  %3158 = vrot.lane.b32.xlu2 %v3105_v19, %s8271_s16  ;;  %v2891_v0 = vsel %vm128_vm1, %v2839_v37, %v2890_v13 }
 0x38b   :  { %2928 = vst [vmem:[#allocation2 + $0x50] sm:$0xff] %v2891_v0 }
 0x38c   :  { %v2831_v28 = vpop.permute.xlu1 %2830  ;;  %v2975_v24 = vpop.permute.xlu2 %2974  ;;  %3284 = vrot.lane.b32.xlu0 %v9363_v15, %s8272_s21 }
 0x38d   :  { %v2859_v60 = vrot.slane %v2831_v28, 4 }
 0x38e   :  { %v2847_v61 = vpop.permute.xlu0 %2846 }
 0x38f   :  { %v2882_v11 = vsel %vm126_vm0, %v2858_v35, %v2859_v60  ;;  %v2884_v18 = vsel %vm126_vm0, %v2859_v60, %v2860_v56  ;;  %v2867_v42 = vrot.slane %v2847_v61, 4 }
 0x390   :  { %v2883_v34 = vsel %vm128_vm1, %v2829_v43, %v2882_v11  ;;  %v2885_v58 = vsel %vm128_vm1, %v2831_v28, %v2884_v18 }
 0x391   :  { %2924 = vst [vmem:[#allocation2 + $0x30] sm:$0xff] %v2883_v34  ;;  %v2896_v20 = vsel %vm126_vm0, %v2866_v41, %v2867_v42 }
 0x392   :  { %2925 = vst [vmem:[#allocation2 + $0x38] sm:$0xff] %v2885_v58  ;;  %3280 = vrot.lane.b32.xlu1 %v9332_v36, %s8272_s21  ;;  %3282 = vrot.lane.b32.xlu2 %v9338_v47, %s8272_s21  ;;  %v2897_v45 = vsel %vm128_vm1, %v2845_v53, %v2896_v20 }
 0x393   :  { %2931 = vst [vmem:[#allocation2 + $0x68] sm:$0xff] %v2897_v45 }
 0x394   :  { %v2843_v26 = vpop.permute.xlu1 %2842  ;;  %v2981_v31 = vpop.permute.xlu2 %2980  ;;  %3290 = vrot.lane.b32.xlu0 %v9421_v1, %s8272_s21 }
 0x395   :  { %v2865_v37 = vrot.slane %v2843_v26, 4 }
 0x396   :  { %v2971_v47 = vpop.permute.xlu0 %2970 }
 0x397   :  { %v2892_v15 = vsel %vm126_vm0, %v2864_v27, %v2865_v37  ;;  %v2894_v32 = vsel %vm126_vm0, %v2865_v37, %v2866_v41  ;;  %v3006_v12 = vrot.slane %v2971_v47, 4  ;;  %v9615_v37 = vld [vmem:[#allocation3 + $0x4] sm:$0xff] }
 0x398   :  { %v2893_v48 = vsel %vm128_vm1, %v2841_v6, %v2892_v15  ;;  %v2895_v36 = vsel %vm128_vm1, %v2843_v26, %v2894_v32 }
 0x399   :  { %2929 = vst [vmem:[#allocation2 + $0x58] sm:$0xff] %v2893_v48 }
 0x39a   :  { %2930 = vst [vmem:[#allocation2 + $0x60] sm:$0xff] %v2895_v36  ;;  %3286 = vrot.lane.b32.xlu1 %v9377_v25, %s8272_s21  ;;  %3288 = vrot.lane.b32.xlu2 %v9403_v9, %s8272_s21  ;;  %v3250_v25 = vld [vmem:[#allocation3 + $0x40] sm:$0xf]  ;;  %v3008_v9 = vrot.slane %v2975_v24, 4 }
 0x39c   :  { %v2849_v49 = vpop.permute.xlu1 %2848  ;;  %v2987_v33 = vpop.permute.xlu2 %2986  ;;  %3296 = vrot.lane.b32.xlu0 %v9431_v16, %s8272_s21 }
 0x39d   :  { %v2868_v51 = vrot.slane %v2849_v49, 4 }
 0x39e   :  { %v2977_v44 = vpop.permute.xlu0 %2976 }
 0x39f   :  { %v2898_v43 = vsel %vm126_vm0, %v2867_v42, %v2868_v51  ;;  %v2900_v35 = vsel %vm126_vm0, %v2868_v51, %v2869_v50  ;;  %v3009_v63 = vrot.slane %v2977_v44, 4  ;;  %v3014_v42 = vrot.slane %v2987_v33, 4 }
 0x3a0   :  { %v2899_v53 = vsel %vm128_vm1, %v2847_v61, %v2898_v43  ;;  %v2901_v1 = vsel %vm128_vm1, %v2849_v49, %v2900_v35 }
 0x3a1   :  { %2932 = vst [vmem:[#allocation2 + $0x70] sm:$0xff] %v2899_v53  ;;  %v3028_v14 = vsel %vm126_vm0, %v3008_v9, %v3009_v63 }
 0x3a2   :  { %2933 = vst [vmem:[#allocation2 + $0x78] sm:$0xff] %v2901_v1  ;;  %3292 = vrot.lane.b32.xlu1 %v9446_v21, %s8272_s21  ;;  %3294 = vrot.lane.b32.xlu2 %v3250_v25, %s8272_s21  ;;  %v3029_v19 = vsel %vm283_vm2, %v2975_v24, %v3028_v14  ;;  %v3011_v24 = vrot.slane %v2981_v31, 4 }
 0x3a3   :  { %3074 = vst [vmem:[#allocation2 + $0x90] sm:$0xff] %v3029_v19  ;;  %v3445_v19 = vld [vmem:[#allocation3 + $0x8c] sm:$0xf] }
 0x3a4   :  { %v2973_v8 = vpop.permute.xlu1 %2972  ;;  %v2993_v40 = vpop.permute.xlu2 %2992  ;;  %3302 = vrot.lane.b32.xlu0 %v9440_v54, %s8272_s21 }
 0x3a5   :  { %v3007_v17 = vrot.slane %v2973_v8, 4  ;;  %v3017_v15 = vrot.slane %v2993_v40, 4 }
 0x3a6   :  { %v2983_v28 = vpop.permute.xlu0 %2982 }
 0x3a7   :  { %v3024_v16 = vsel %vm126_vm0, %v3006_v12, %v3007_v17  ;;  %v3026_v6 = vsel %vm126_vm0, %v3007_v17, %v3008_v9  ;;  %v3012_v56 = vrot.slane %v2983_v28, 4  ;;  %v3436_v17 = vld [vmem:[#allocation3 + $0x44] sm:$0xf] }
 0x3a8   :  { %v3025_v27 = vsel %vm283_vm2, %v2971_v47, %v3024_v16  ;;  %v3027_v21 = vsel %vm283_vm2, %v2973_v8, %v3026_v6 }
 0x3a9   :  { %3072 = vst [vmem:[#allocation2 + $0x80] sm:$0xff] %v3025_v27  ;;  %v3034_v0 = vsel %vm126_vm0, %v3011_v24, %v3012_v56 }
 0x3aa   :  { %3073 = vst [vmem:[#allocation2 + $0x88] sm:$0xff] %v3027_v21  ;;  %3298 = vrot.lane.b32.xlu1 %v9387_v38, %s8272_s21  ;;  %3300 = vrot.lane.b32.xlu2 %v9414_v23, %s8272_s21  ;;  %v3035_v18 = vsel %vm283_vm2, %v2981_v31, %v3034_v0 }
 0x3ab   :  { %3077 = vst [vmem:[#allocation2 + $0xa8] sm:$0xff] %v3035_v18 }
 0x3ac   :  { %v2979_v13 = vpop.permute.xlu1 %2978  ;;  %v2999_v60 = vpop.permute.xlu2 %2998  ;;  %3308 = vrot.lane.b32.xlu0 %v9453_v2, %s8272_s21 }
 0x3ad   :  { %v3010_v11 = vrot.slane %v2979_v13, 4  ;;  %v3020_v1 = vrot.slane %v2999_v60, 4 }
 0x3ae   :  { %v2989_v23 = vpop.permute.xlu0 %2988 }
 0x3af   :  { %v3030_v54 = vsel %vm126_vm0, %v3009_v63, %v3010_v11  ;;  %v3032_v34 = vsel %vm126_vm0, %v3010_v11, %v3011_v24  ;;  %v3015_v47 = vrot.slane %v2989_v23, 4 }
 0x3b0   :  { %v3031_v58 = vsel %vm283_vm2, %v2977_v44, %v3030_v54  ;;  %v3033_v38 = vsel %vm283_vm2, %v2979_v13, %v3032_v34  ;;  %v9654_v13 = vld [vmem:[#allocation3 + $0x4c] sm:$0xff] }
 0x3b1   :  { %3075 = vst [vmem:[#allocation2 + $0x98] sm:$0xff] %v3031_v58 }
 0x3b2   :  { %3076 = vst [vmem:[#allocation2 + $0xa0] sm:$0xff] %v3033_v38  ;;  %3304 = vrot.lane.b32.xlu1 %v9457_v4, %s8272_s21  ;;  %3306 = vrot.lane.b32.xlu2 %v9459_v59, %s8272_s21  ;;  %v3259_v4 = vld [vmem:[#allocation3 + $0x88] sm:$0xf] }
 0x3b4   :  { %v2985_v61 = vpop.permute.xlu1 %2984  ;;  %v3005_v41 = vpop.permute.xlu2 %3004  ;;  %3464 = vrot.lane.b32.xlu0 %v9615_v37, %s8273_s9 }
 0x3b5   :  { %v3013_v26 = vrot.slane %v2985_v61, 4  ;;  %v3023_v27 = vrot.slane %v3005_v41, 4 }
 0x3b6   :  { %v2995_v59 = vpop.permute.xlu0 %2994 }
 0x3b7   :  { %v3036_v31 = vsel %vm126_vm0, %v3012_v56, %v3013_v26  ;;  %v3038_v20 = vsel %vm126_vm0, %v3013_v26, %v3014_v42  ;;  %v3018_v32 = vrot.slane %v2995_v59, 4 }
 0x3b8   :  { %v3037_v2 = vsel %vm283_vm2, %v2983_v28, %v3036_v31  ;;  %v3039_v45 = vsel %vm283_vm2, %v2985_v61, %v3038_v20  ;;  %v8228_v28 = vpack.i.bf16 %v3445_v19, %v3436_v17  ;;  %v9675_v31 = vld [vmem:[#allocation3 + $0x54] sm:$0xff]  ;;  %v9677_v20 = vld [vmem:[#allocation3 + $0x5c] sm:$0xff] }
 0x3b9   :  { %3078 = vst [vmem:[#allocation2 + $0xb0] sm:$0xff] %v3037_v2  ;;  %v3044_v49 = vsel %vm126_vm0, %v3017_v15, %v3018_v32 }
 0x3ba   :  { %3079 = vst [vmem:[#allocation2 + $0xb8] sm:$0xff] %v3039_v45  ;;  %3310 = vrot.lane.b32.xlu1 %v9467_v62, %s8272_s21  ;;  %3312 = vrot.lane.b32.xlu2 %v3259_v4, %s8272_s21  ;;  %v3045_v50 = vsel %vm283_vm2, %v2993_v40, %v3044_v49 }
 0x3bb   :  { %3082 = vst [vmem:[#allocation2 + $0xd0] sm:$0xff] %v3045_v50 }
 0x3bc   :  { %v2991_v48 = vpop.permute.xlu1 %2990  ;;  %v9624_v36 = vpop.permute.xlu2 %3128  ;;  %3470 = vrot.lane.b32.xlu0 %v9347_v3, %s8273_s9 }
 0x3bd   :  { %v3016_v33 = vrot.slane %v2991_v48, 4  ;;  %v3162_v0 = vrot.slane %v9624_v36, 4 }
 0x3be   :  { %v3001_v53 = vpop.permute.xlu0 %3000 }
 0x3bf   :  { %v3040_v51 = vsel %vm126_vm0, %v3015_v47, %v3016_v33  ;;  %v3042_v43 = vsel %vm126_vm0, %v3016_v33, %v3017_v15  ;;  %v3021_v25 = vrot.slane %v3001_v53, 4 }
 0x3c0   :  { %v3041_v62 = vsel %vm283_vm2, %v2989_v23, %v3040_v51  ;;  %v3043_v35 = vsel %vm283_vm2, %v2991_v48, %v3042_v43 }
 0x3c1   :  { %3080 = vst [vmem:[#allocation2 + $0xc0] sm:$0xff] %v3041_v62  ;;  %v3050_v63 = vsel %vm126_vm0, %v3020_v1, %v3021_v25 }
 0x3c2   :  { %3081 = vst [vmem:[#allocation2 + $0xc8] sm:$0xff] %v3043_v35  ;;  %3466 = vrot.lane.b32.xlu1 %v9322_v46, %s8273_s9  ;;  %3468 = vrot.lane.b32.xlu2 %v9329_v57, %s8273_s9  ;;  %v3051_v40 = vsel %vm283_vm2, %v2999_v60, %v3050_v63 }
 0x3c3   :  { %3085 = vst [vmem:[#allocation2 + $0xe8] sm:$0xff] %v3051_v40 }
 0x3c4   :  { %v2997_v44 = vpop.permute.xlu1 %2996  ;;  %v9638_v9 = vpop.permute.xlu2 %3134  ;;  %3476 = vrot.lane.b32.xlu0 %v9410_v55, %s8273_s9 }
 0x3c5   :  { %v3019_v8 = vrot.slane %v2997_v44, 4  ;;  %v3165_v45 = vrot.slane %v9638_v9, 4 }
 0x3c6   :  { %v3125_v57 = vpop.permute.xlu0 %3124 }
 0x3c7   :  { %v3046_v3 = vsel %vm126_vm0, %v3018_v32, %v3019_v8  ;;  %v3048_v12 = vsel %vm126_vm0, %v3019_v8, %v3020_v1  ;;  %v3160_v34 = vrot.slane %v3125_v57, 4 }
 0x3c8   :  { %v3047_v46 = vsel %vm283_vm2, %v2995_v59, %v3046_v3  ;;  %v3049_v14 = vsel %vm283_vm2, %v2997_v44, %v3048_v12 }
 0x3c9   :  { %3083 = vst [vmem:[#allocation2 + $0xd8] sm:$0xff] %v3047_v46 }
 0x3ca   :  { %3084 = vst [vmem:[#allocation2 + $0xe0] sm:$0xff] %v3049_v14  ;;  %3472 = vrot.lane.b32.xlu1 %v9370_v10, %s8273_s9  ;;  %3474 = vrot.lane.b32.xlu2 %v9389_v5, %s8273_s9 }
 0x3cc   :  { %v3003_v16 = vpop.permute.xlu1 %3002  ;;  %v3141_v6 = vpop.permute.xlu2 %3140  ;;  %3482 = vrot.lane.b32.xlu0 %v9654_v13, %s8273_s9 }
 0x3cd   :  { %v3022_v21 = vrot.slane %v3003_v16, 4  ;;  %v3168_v62 = vrot.slane %v3141_v6, 4  ;;  %v9729_v6 = vld [vmem:[#allocation3 + $0x1c] sm:$0xff] }
 0x3ce   :  { %v3131_v5 = vpop.permute.xlu0 %3130 }
 0x3cf   :  { %v3052_v24 = vsel %vm126_vm0, %v3021_v25, %v3022_v21  ;;  %v3054_v56 = vsel %vm126_vm0, %v3022_v21, %v3023_v27  ;;  %v3163_v11 = vrot.slane %v3131_v5, 4  ;;  %v9703_v25 = vld [vmem:[#allocation3 + $0xc] sm:$0xff] }
 0x3d0   :  { %v3053_v60 = vsel %vm283_vm2, %v3001_v53, %v3052_v24  ;;  %v3055_v10 = vsel %vm283_vm2, %v3003_v16, %v3054_v56  ;;  %v9727_v16 = vld [vmem:[#allocation3 + $0x14] sm:$0xff] }
 0x3d1   :  { %3086 = vst [vmem:[#allocation2 + $0xf0] sm:$0xff] %v3053_v60  ;;  %v3182_v58 = vsel %vm126_vm0, %v3162_v0, %v3163_v11 }
 0x3d2   :  { %3087 = vst [vmem:[#allocation2 + $0xf8] sm:$0xff] %v3055_v10  ;;  %3478 = vrot.lane.b32.xlu1 %v9433_v29, %s8273_s9  ;;  %8229 = vrot.lane.b32.xlu2 %v8228_v28, %s8273_s9  ;;  %v3183_v23 = vsel %vm438_vm3, %v9624_v36, %v3182_v58 }
 0x3d3   :  { %3228 = vst [vmem:[#allocation2 + $0x110] sm:$0xff] %v3183_v23  ;;  %v3599_v23 = vld [vmem:[#allocation3 + $0x8c] sm:$0xf] }
 0x3d4   :  { %v3127_v18 = vpop.permute.xlu1 %3126  ;;  %v9664_v54 = vpop.permute.xlu2 %3146  ;;  %3488 = vrot.lane.b32.xlu0 %v9359_v52, %s8273_s9 }
 0x3d5   :  { %v3161_v38 = vrot.slane %v3127_v18, 4 }
 0x3d6   :  { %v3137_v2 = vpop.permute.xlu0 %3136 }
 0x3d7   :  { %v3178_v61 = vsel %vm126_vm0, %v3160_v34, %v3161_v38  ;;  %v3180_v41 = vsel %vm126_vm0, %v3161_v38, %v3162_v0  ;;  %v3166_v4 = vrot.slane %v3137_v2, 4  ;;  %v9747_v34 = vld [vmem:[#allocation3 + $0x2c] sm:$0xff]  ;;  %v3590_v38 = vld [vmem:[#allocation3 + $0x44] sm:$0xf] }
 0x3d8   :  { %v3179_v42 = vsel %vm438_vm3, %v3125_v57, %v3178_v61  ;;  %v3181_v26 = vsel %vm438_vm3, %v3127_v18, %v3180_v41  ;;  %v9721_v57 = vld [vmem:[#allocation3 + $0x24] sm:$0xff] }
 0x3d9   :  { %3226 = vst [vmem:[#allocation2 + $0x100] sm:$0xff] %v3179_v42  ;;  %v3188_v52 = vsel %vm126_vm0, %v3165_v45, %v3166_v4 }
 0x3da   :  { %3227 = vst [vmem:[#allocation2 + $0x108] sm:$0xff] %v3181_v26  ;;  %3484 = vrot.lane.b32.xlu1 %v9675_v31, %s8273_s9  ;;  %3486 = vrot.lane.b32.xlu2 %v9677_v20, %s8273_s9  ;;  %v3189_v48 = vsel %vm438_vm3, %v9638_v9, %v3188_v52 }
 0x3db   :  { %3231 = vst [vmem:[#allocation2 + $0x128] sm:$0xff] %v3189_v48 }
 0x3dc   :  { %v3133_v59 = vpop.permute.xlu1 %3132  ;;  %v9684_v15 = vpop.permute.xlu2 %3152  ;;  %3494 = vrot.lane.b32.xlu0 %v9419_v7, %s8273_s9 }
 0x3dd   :  { %v3164_v32 = vrot.slane %v3133_v59, 4  ;;  %v3174_v21 = vrot.slane %v9684_v15, 4 }
 0x3de   :  { %v3143_v50 = vpop.permute.xlu0 %3142 }
 0x3df   :  { %v3184_v36 = vsel %vm126_vm0, %v3163_v11, %v3164_v32  ;;  %v3186_v47 = vsel %vm126_vm0, %v3164_v32, %v3165_v45  ;;  %v3169_v40 = vrot.slane %v3143_v50, 4 }
 0x3e0   :  { %v3185_v49 = vsel %vm438_vm3, %v3131_v5, %v3184_v36  ;;  %v3187_v33 = vsel %vm438_vm3, %v3133_v59, %v3186_v47 }
 0x3e1   :  { %3229 = vst [vmem:[#allocation2 + $0x118] sm:$0xff] %v3185_v49 }
 0x3e2   :  { %3230 = vst [vmem:[#allocation2 + $0x120] sm:$0xff] %v3187_v33  ;;  %3490 = vrot.lane.b32.xlu1 %v9375_v22, %s8273_s9  ;;  %3492 = vrot.lane.b32.xlu2 %v9400_v30, %s8273_s9  ;;  %v3171_v30 = vrot.slane %v9664_v54, 4 }
 0x3e4   :  { %v3139_v51 = vpop.permute.xlu1 %3138  ;;  %v9699_v43 = vpop.permute.xlu2 %3158  ;;  %3620 = vrot.lane.b32.xlu0 %v9703_v25, %s8274_s24 }
 0x3e5   :  { %v3167_v35 = vrot.slane %v3139_v51, 4  ;;  %v3177_v42 = vrot.slane %v9699_v43, 4  ;;  %v9771_v43 = vld [vmem:[#allocation3 + $0x6c] sm:$0xff] }
 0x3e6   :  { %v3149_v22 = vpop.permute.xlu0 %3148 }
 0x3e7   :  { %v3190_v53 = vsel %vm126_vm0, %v3166_v4, %v3167_v35  ;;  %v3192_v1 = vsel %vm126_vm0, %v3167_v35, %v3168_v62  ;;  %v3172_v9 = vrot.slane %v3149_v22, 4 }
 0x3e8   :  { %v3191_v7 = vsel %vm438_vm3, %v3137_v2, %v3190_v53  ;;  %v3193_v44 = vsel %vm438_vm3, %v3139_v51, %v3192_v1  ;;  %v8233_v2 = vpack.i.bf16 %v3599_v23, %v3590_v38  ;;  %v9777_v53 = vld [vmem:[#allocation3 + $0x64] sm:$0xff] }
 0x3e9   :  { %3232 = vst [vmem:[#allocation2 + $0x130] sm:$0xff] %v3191_v7  ;;  %v3198_v3 = vsel %vm126_vm0, %v3171_v30, %v3172_v9 }
 0x3ea   :  { %3233 = vst [vmem:[#allocation2 + $0x138] sm:$0xff] %v3193_v44  ;;  %3496 = vrot.lane.b32.xlu1 %v9442_v39, %s8273_s9  ;;  %3618 = vrot.lane.b32.xlu2 %v9615_v37, %s8274_s24  ;;  %v3199_v46 = vsel %vm438_vm3, %v9664_v54, %v3198_v3 }
 0x3eb   :  { %3236 = vst [vmem:[#allocation2 + $0x150] sm:$0xff] %v3199_v46 }
 0x3ec   :  { %v3145_v63 = vpop.permute.xlu1 %3144  ;;  %v9714_v8 = vpop.permute.xlu2 %3282  ;;  %3626 = vrot.lane.b32.xlu0 %v9721_v57, %s8274_s24 }
 0x3ed   :  { %v3170_v12 = vrot.slane %v3145_v63, 4 }
 0x3ee   :  { %v3155_v27 = vpop.permute.xlu0 %3154 }
 0x3ef   :  { %v3194_v14 = vsel %vm126_vm0, %v3169_v40, %v3170_v12  ;;  %v3196_v39 = vsel %vm126_vm0, %v3170_v12, %v3171_v30  ;;  %v3175_v28 = vrot.slane %v3155_v27, 4 }
 0x3f0   :  { %v3195_v17 = vsel %vm438_vm3, %v3143_v50, %v3194_v14  ;;  %v3197_v19 = vsel %vm438_vm3, %v3145_v63, %v3196_v39 }
 0x3f1   :  { %3234 = vst [vmem:[#allocation2 + $0x140] sm:$0xff] %v3195_v17  ;;  %v3204_v60 = vsel %vm126_vm0, %v3174_v21, %v3175_v28 }
 0x3f2   :  { %3235 = vst [vmem:[#allocation2 + $0x148] sm:$0xff] %v3197_v19  ;;  %3622 = vrot.lane.b32.xlu1 %v9727_v16, %s8274_s24  ;;  %3624 = vrot.lane.b32.xlu2 %v9729_v6, %s8274_s24  ;;  %v3205_v5 = vsel %vm438_vm3, %v9684_v15, %v3204_v60  ;;  %v3316_v15 = vrot.slane %v9714_v8, 4 }
 0x3f3   :  { %3239 = vst [vmem:[#allocation2 + $0x168] sm:$0xff] %v3205_v5 }
 0x3f4   :  { %v3151_v24 = vpop.permute.xlu1 %3150  ;;  %v9736_v56 = vpop.permute.xlu2 %3288  ;;  %3632 = vrot.lane.b32.xlu0 %v9433_v29, %s8274_s24 }
 0x3f5   :  { %v3173_v10 = vrot.slane %v3151_v24, 4  ;;  %v3319_v7 = vrot.slane %v9736_v56, 4 }
 0x3f6   :  { %v3279_v58 = vpop.permute.xlu0 %3278 }
 0x3f7   :  { %v3200_v0 = vsel %vm126_vm0, %v3172_v9, %v3173_v10  ;;  %v3202_v11 = vsel %vm126_vm0, %v3173_v10, %v3174_v21  ;;  %v3314_v36 = vrot.slane %v3279_v58, 4  ;;  %v9805_v10 = vld [vmem:[#allocation3 + $0x74] sm:$0xff] }
 0x3f8   :  { %v3201_v18 = vsel %vm438_vm3, %v3149_v22, %v3200_v0  ;;  %v3203_v54 = vsel %vm438_vm3, %v3151_v24, %v3202_v11  ;;  %v9799_v24 = vld [vmem:[#allocation3 + $0x7c] sm:$0xff] }
 0x3f9   :  { %3237 = vst [vmem:[#allocation2 + $0x158] sm:$0xff] %v3201_v18 }
 0x3fa   :  { %3238 = vst [vmem:[#allocation2 + $0x160] sm:$0xff] %v3203_v54  ;;  %3628 = vrot.lane.b32.xlu1 %v9747_v34, %s8274_s24  ;;  %3630 = vrot.lane.b32.xlu2 %v9410_v55, %s8274_s24 }
 0x3fc   :  { %v3157_v61 = vpop.permute.xlu1 %3156  ;;  %v3295_v41 = vpop.permute.xlu2 %3294  ;;  %3638 = vrot.lane.b32.xlu0 %v9675_v31, %s8274_s24 }
 0x3fd   :  { %v3176_v26 = vrot.slane %v3157_v61, 4  ;;  %v3322_v19 = vrot.slane %v3295_v41, 4 }
 0x3fe   :  { %v3285_v55 = vpop.permute.xlu0 %3284 }
 0x3ff   :  { %v3206_v29 = vsel %vm126_vm0, %v3175_v28, %v3176_v26  ;;  %v3208_v45 = vsel %vm126_vm0, %v3176_v26, %v3177_v42  ;;  %v3317_v52 = vrot.slane %v3285_v55, 4 }
 0x400   :  { %v3207_v4 = vsel %vm438_vm3, %v3155_v27, %v3206_v29  ;;  %v3209_v59 = vsel %vm438_vm3, %v3157_v61, %v3208_v45  ;;  %v9821_v29 = vld [vmem:[#allocation3 + $0x84] sm:$0xff] }
 0x401   :  { %3240 = vst [vmem:[#allocation2 + $0x170] sm:$0xff] %v3207_v4  ;;  %v3336_v47 = vsel %vm126_vm0, %v3316_v15, %v3317_v52 }
 0x402   :  { %3241 = vst [vmem:[#allocation2 + $0x178] sm:$0xff] %v3209_v59  ;;  %8234 = vrot.lane.b32.xlu1 %v8233_v2, %s8274_s24  ;;  %3636 = vrot.lane.b32.xlu2 %v9654_v13, %s8274_s24  ;;  %v3337_v33 = vsel %vm593_vm4, %v9714_v8, %v3336_v47 }
 0x403   :  { %3382 = vst [vmem:[#allocation2 + $0x190] sm:$0xff] %v3337_v33 }
 0x404   :  { %v3281_v32 = vpop.permute.xlu1 %3280  ;;  %v9764_v48 = vpop.permute.xlu2 %3300  ;;  %3644 = vrot.lane.b32.xlu0 %v9771_v43, %s8274_s24 }
 0x405   :  { %v3315_v49 = vrot.slane %v3281_v32, 4  ;;  %v3325_v0 = vrot.slane %v9764_v48, 4 }
 0x406   :  { %v3291_v1 = vpop.permute.xlu0 %3290 }
 0x407   :  { %v3332_v50 = vsel %vm126_vm0, %v3314_v36, %v3315_v49  ;;  %v3334_v51 = vsel %vm126_vm0, %v3315_v49, %v3316_v15  ;;  %v3320_v44 = vrot.slane %v3291_v1, 4 }
 0x408   :  { %v3333_v62 = vsel %vm593_vm4, %v3279_v58, %v3332_v50  ;;  %v3335_v35 = vsel %vm593_vm4, %v3281_v32, %v3334_v51 }
 0x409   :  { %3380 = vst [vmem:[#allocation2 + $0x180] sm:$0xff] %v3333_v62  ;;  %v3342_v9 = vsel %vm126_vm0, %v3319_v7, %v3320_v44 }
 0x40a   :  { %3381 = vst [vmem:[#allocation2 + $0x188] sm:$0xff] %v3335_v35  ;;  %3640 = vrot.lane.b32.xlu1 %v9677_v20, %s8274_s24  ;;  %3642 = vrot.lane.b32.xlu2 %v9777_v53, %s8274_s24  ;;  %v3343_v8 = vsel %vm593_vm4, %v9736_v56, %v3342_v9 }
 0x40b   :  { %3385 = vst [vmem:[#allocation2 + $0x1a8] sm:$0xff] %v3343_v8 }
 0x40c   :  { %v3287_v22 = vpop.permute.xlu1 %3286  ;;  %v3307_v30 = vpop.permute.xlu2 %3306  ;;  %3790 = vrot.lane.b32.xlu0 %v9654_v13, %s8275_s30 }
 0x40d   :  { %v3318_v63 = vrot.slane %v3287_v22, 4  ;;  %v3328_v4 = vrot.slane %v3307_v30, 4 }
 0x40e   :  { %v3297_v14 = vpop.permute.xlu0 %3296 }
 0x40f   :  { %v3338_v40 = vsel %vm126_vm0, %v3317_v52, %v3318_v63  ;;  %v3340_v3 = vsel %vm126_vm0, %v3318_v63, %v3319_v7  ;;  %v3323_v58 = vrot.slane %v3297_v14, 4 }
 0x410   :  { %v3339_v12 = vsel %vm593_vm4, %v3285_v55, %v3338_v40  ;;  %v3341_v46 = vsel %vm593_vm4, %v3287_v22, %v3340_v3 }
 0x411   :  { %3383 = vst [vmem:[#allocation2 + $0x198] sm:$0xff] %v3339_v12 }
 0x412   :  { %3384 = vst [vmem:[#allocation2 + $0x1a0] sm:$0xff] %v3341_v46  ;;  %3772 = vrot.lane.b32.xlu1 %v9615_v37, %s8275_s30  ;;  %3774 = vrot.lane.b32.xlu2 %v9703_v25, %s8275_s30 }
 0x414   :  { %v3293_v39 = vpop.permute.xlu1 %3292  ;;  %v3313_v17 = vpop.permute.xlu2 %3312  ;;  %3648 = vrot.lane.b32.xlu0 %v9799_v24, %s8274_s24 }
 0x415   :  { %v3321_v27 = vrot.slane %v3293_v39, 4  ;;  %v3331_v62 = vrot.slane %v3313_v17, 4 }
 0x416   :  { %v3303_v5 = vpop.permute.xlu0 %3302 }
 0x417   :  { %v3344_v21 = vsel %vm126_vm0, %v3320_v44, %v3321_v27  ;;  %v3346_v28 = vsel %vm126_vm0, %v3321_v27, %v3322_v19  ;;  %v3326_v11 = vrot.slane %v3303_v5, 4  ;;  %v9865_v19 = vld [vmem:[#allocation3 + $0x34] sm:$0xff] }
 0x418   :  { %v3345_v56 = vsel %vm593_vm4, %v3291_v1, %v3344_v21  ;;  %v3347_v60 = vsel %vm593_vm4, %v3293_v39, %v3346_v28 }
 0x419   :  { %3386 = vst [vmem:[#allocation2 + $0x1b0] sm:$0xff] %v3345_v56  ;;  %v3352_v38 = vsel %vm126_vm0, %v3325_v0, %v3326_v11  ;;  %v3744_v56 = vld [vmem:[#allocation3 + $0x44] sm:$0xf] }
 0x41a   :  { %3387 = vst [vmem:[#allocation2 + $0x1b8] sm:$0xff] %v3347_v60  ;;  %3792 = vrot.lane.b32.xlu1 %v9675_v31, %s8275_s30  ;;  %3646 = vrot.lane.b32.xlu2 %v9805_v10, %s8274_s24  ;;  %v3353_v61 = vsel %vm593_vm4, %v9764_v48, %v3352_v38  ;;  %v3753_v60 = vld [vmem:[#allocation3 + $0x8c] sm:$0xf] }
 0x41b   :  { %3390 = vst [vmem:[#allocation2 + $0x1d0] sm:$0xff] %v3353_v61 }
 0x41c   :  { %v3299_v18 = vpop.permute.xlu1 %3298  ;;  %v3469_v54 = vpop.permute.xlu2 %3468  ;;  %3926 = vrot.lane.b32.xlu0 %v9615_v37, %s8276_s13 }
 0x41d   :  { %v3324_v23 = vrot.slane %v3299_v18, 4 }
 0x41e   :  { %v3309_v45 = vpop.permute.xlu0 %3308 }
 0x41f   :  { %v3348_v41 = vsel %vm126_vm0, %v3323_v58, %v3324_v23  ;;  %v3350_v42 = vsel %vm126_vm0, %v3324_v23, %v3325_v0  ;;  %v3329_v59 = vrot.slane %v3309_v45, 4  ;;  %v8238_v58 = vpack.i.bf16 %v3753_v60, %v3744_v56 }
 0x420   :  { %v3349_v26 = vsel %vm593_vm4, %v3297_v14, %v3348_v41  ;;  %v3351_v2 = vsel %vm593_vm4, %v3299_v18, %v3350_v42  ;;  %v9859_v14 = vld [vmem:[#allocation3 + $0x3c] sm:$0xff] }
 0x421   :  { %3388 = vst [vmem:[#allocation2 + $0x1c0] sm:$0xff] %v3349_v26  ;;  %v3358_v52 = vsel %vm126_vm0, %v3328_v4, %v3329_v59 }
 0x422   :  { %3389 = vst [vmem:[#allocation2 + $0x1c8] sm:$0xff] %v3351_v2  ;;  %3650 = vrot.lane.b32.xlu1 %v9821_v29, %s8274_s24  ;;  %3776 = vrot.lane.b32.xlu2 %v9727_v16, %s8275_s30  ;;  %v3359_v37 = vsel %vm593_vm4, %v3307_v30, %v3358_v52 }
 0x423   :  { %3393 = vst [vmem:[#allocation2 + $0x1e8] sm:$0xff] %v3359_v37 }
 0x424   :  { %v3305_v55 = vpop.permute.xlu1 %3304  ;;  %v9827_v15 = vpop.permute.xlu2 %3474  ;;  %3946 = vrot.lane.b32.xlu0 %v9675_v31, %s8276_s13 }
 0x425   :  { %v3327_v32 = vrot.slane %v3305_v55, 4  ;;  %v3505_v21 = vrot.slane %v9827_v15, 4 }
 0x426   :  { %v3465_v33 = vpop.permute.xlu0 %3464 }
 0x427   :  { %v3354_v48 = vsel %vm126_vm0, %v3326_v11, %v3327_v32  ;;  %v3356_v36 = vsel %vm126_vm0, %v3327_v32, %v3328_v4  ;;  %v3500_v63 = vrot.slane %v3465_v33, 4 }
 0x428   :  { %v3355_v47 = vsel %vm593_vm4, %v3303_v5, %v3354_v48  ;;  %v3357_v49 = vsel %vm593_vm4, %v3305_v55, %v3356_v36 }
 0x429   :  { %3391 = vst [vmem:[#allocation2 + $0x1d8] sm:$0xff] %v3355_v47 }
 0x42a   :  { %3392 = vst [vmem:[#allocation2 + $0x1e0] sm:$0xff] %v3357_v49  ;;  %3928 = vrot.lane.b32.xlu1 %v9703_v25, %s8276_s13  ;;  %3944 = vrot.lane.b32.xlu2 %v9654_v13, %s8276_s13  ;;  %v3502_v13 = vrot.slane %v3469_v54, 4 }
 0x42c   :  { %v3311_v50 = vpop.permute.xlu1 %3310  ;;  %v9841_v51 = vpop.permute.xlu2 %8229  ;;  %3780 = vrot.lane.b32.xlu0 %v9721_v57, %s8275_s30 }
 0x42d   :  { %v3330_v35 = vrot.slane %v3311_v50, 4  ;;  %v8231_v38 = vunpack.i.l.bf16 %v9841_v51 }
 0x42e   :  { %v3471_v25 = vpop.permute.xlu0 %3470 }
 0x42f   :  { %v3360_v1 = vsel %vm126_vm0, %v3329_v59, %v3330_v35  ;;  %v3362_v7 = vsel %vm126_vm0, %v3330_v35, %v3331_v62  ;;  %v3503_v22 = vrot.slane %v3471_v25, 4  ;;  %v3508_v2 = vrot.slane %v8231_v38, 4 }
 0x430   :  { %v3361_v31 = vsel %vm593_vm4, %v3309_v45, %v3360_v1  ;;  %v3363_v44 = vsel %vm593_vm4, %v3311_v50, %v3362_v7 }
 0x431   :  { %3394 = vst [vmem:[#allocation2 + $0x1f0] sm:$0xff] %v3361_v31  ;;  %v3522_v8 = vsel %vm126_vm0, %v3502_v13, %v3503_v22 }
 0x432   :  { %3395 = vst [vmem:[#allocation2 + $0x1f8] sm:$0xff] %v3363_v44  ;;  %3794 = vrot.lane.b32.xlu1 %v9677_v20, %s8275_s30  ;;  %3778 = vrot.lane.b32.xlu2 %v9729_v6, %s8275_s30  ;;  %v3523_v3 = vsel %vm780_vm5, %v3469_v54, %v3522_v8 }
 0x433   :  { %3568 = vst [vmem:[#allocation2 + $0x290] sm:$0xff] %v3523_v3 }
 0x434   :  { %v3467_v30 = vpop.permute.xlu1 %3466  ;;  %v9853_v9 = vpop.permute.xlu2 %3486  ;;  %3786 = vrot.lane.b32.xlu0 %v9859_v14, %s8275_s30 }
 0x435   :  { %v3501_v40 = vrot.slane %v3467_v30, 4 }
 0x436   :  { %v3477_v27 = vpop.permute.xlu0 %3476 }
 0x437   :  { %v3518_v12 = vsel %vm126_vm0, %v3500_v63, %v3501_v40  ;;  %v3520_v46 = vsel %vm126_vm0, %v3501_v40, %v3502_v13  ;;  %v3506_v28 = vrot.slane %v3477_v27, 4 }
 0x438   :  { %v3519_v39 = vsel %vm780_vm5, %v3465_v33, %v3518_v12  ;;  %v3521_v17 = vsel %vm780_vm5, %v3467_v30, %v3520_v46  ;;  %v8232_v12 = vunpack.i.h.bf16 %v9841_v51  ;;  %v3898_v46 = vld [vmem:[#allocation3 + $0x44] sm:$0xf] }
 0x439   :  { %3566 = vst [vmem:[#allocation2 + $0x280] sm:$0xff] %v3519_v39  ;;  %v3528_v11 = vsel %vm126_vm0, %v3505_v21, %v3506_v28  ;;  %v3907_v39 = vld [vmem:[#allocation3 + $0x8c] sm:$0xf] }
 0x43a   :  { %3567 = vst [vmem:[#allocation2 + $0x288] sm:$0xff] %v3521_v17  ;;  %3782 = vrot.lane.b32.xlu1 %v9747_v34, %s8275_s30  ;;  %3784 = vrot.lane.b32.xlu2 %v9865_v19, %s8275_s30  ;;  %v3529_v54 = vsel %vm780_vm5, %v9827_v15, %v3528_v11  ;;  %v8243_v60 = vpack.i.bf16 %v3907_v39, %v3898_v46 }
 0x43b   :  { %3571 = vst [vmem:[#allocation2 + $0x2a8] sm:$0xff] %v3529_v54 }
 0x43c   :  { %v3473_v5 = vpop.permute.xlu1 %3472  ;;  %v3493_v0 = vpop.permute.xlu2 %3492  ;;  %3948 = vrot.lane.b32.xlu0 %v9677_v20, %s8276_s13 }
 0x43d   :  { %v3504_v18 = vrot.slane %v3473_v5, 4  ;;  %v3514_v44 = vrot.slane %v3493_v0, 4 }
 0x43e   :  { %v3483_v26 = vpop.permute.xlu0 %3482 }
 0x43f   :  { %v3524_v23 = vsel %vm126_vm0, %v3503_v22, %v3504_v18  ;;  %v3526_v61 = vsel %vm126_vm0, %v3504_v18, %v3505_v21  ;;  %v3509_v47 = vrot.slane %v3483_v26, 4 }
 0x440   :  { %v3525_v41 = vsel %vm780_vm5, %v3471_v25, %v3524_v23  ;;  %v3527_v42 = vsel %vm780_vm5, %v3473_v5, %v3526_v61  ;;  %v3517_v5 = vrot.slane %v8232_v12, 4 }
 0x441   :  { %3569 = vst [vmem:[#allocation2 + $0x298] sm:$0xff] %v3525_v41 }
 0x442   :  { %3570 = vst [vmem:[#allocation2 + $0x2a0] sm:$0xff] %v3527_v42  ;;  %8239 = vrot.lane.b32.xlu1 %v8238_v58, %s8275_s30  ;;  %3930 = vrot.lane.b32.xlu2 %v9727_v16, %s8276_s13  ;;  %v3511_v16 = vrot.slane %v9853_v9, 4 }
 0x444   :  { %v3479_v45 = vpop.permute.xlu1 %3478  ;;  %v3619_v4 = vpop.permute.xlu2 %3618  ;;  %3800 = vrot.lane.b32.xlu0 %v9805_v10, %s8275_s30 }
 0x445   :  { %v3507_v59 = vrot.slane %v3479_v45, 4 }
 0x446   :  { %v3489_v32 = vpop.permute.xlu0 %3488 }
 0x447   :  { %v3530_v55 = vsel %vm126_vm0, %v3506_v28, %v3507_v59  ;;  %v3532_v15 = vsel %vm126_vm0, %v3507_v59, %v3508_v2  ;;  %v3512_v37 = vrot.slane %v3489_v32, 4 }
 0x448   :  { %v3531_v52 = vsel %vm780_vm5, %v3477_v27, %v3530_v55  ;;  %v3533_v20 = vsel %vm780_vm5, %v3479_v45, %v3532_v15  ;;  %v3654_v27 = vrot.slane %v3619_v4, 4 }
 0x449   :  { %3572 = vst [vmem:[#allocation2 + $0x2b0] sm:$0xff] %v3531_v52  ;;  %v3538_v49 = vsel %vm126_vm0, %v3511_v16, %v3512_v37 }
 0x44a   :  { %3573 = vst [vmem:[#allocation2 + $0x2b8] sm:$0xff] %v3533_v20  ;;  %3796 = vrot.lane.b32.xlu1 %v9777_v53, %s8275_s30  ;;  %3798 = vrot.lane.b32.xlu2 %v9771_v43, %s8275_s30  ;;  %v3539_v50 = vsel %vm780_vm5, %v9853_v9, %v3538_v49 }
 0x44b   :  { %3576 = vst [vmem:[#allocation2 + $0x2d0] sm:$0xff] %v3539_v50 }
 0x44c   :  { %v3485_v48 = vpop.permute.xlu1 %3484  ;;  %v9896_v36 = vpop.permute.xlu2 %3624  ;;  %3932 = vrot.lane.b32.xlu0 %v9729_v6, %s8276_s13 }
 0x44d   :  { %v3510_v33 = vrot.slane %v3485_v48, 4  ;;  %v3657_v58 = vrot.slane %v9896_v36, 4 }
 0x44e   :  { %v3495_v31 = vpop.permute.xlu0 %3494 }
 0x44f   :  { %v3534_v62 = vsel %vm126_vm0, %v3509_v47, %v3510_v33  ;;  %v3536_v35 = vsel %vm126_vm0, %v3510_v33, %v3511_v16  ;;  %v3515_v25 = vrot.slane %v3495_v31, 4 }
 0x450   :  { %v3535_v1 = vsel %vm780_vm5, %v3483_v26, %v3534_v62  ;;  %v3537_v7 = vsel %vm780_vm5, %v3485_v48, %v3536_v35 }
 0x451   :  { %3574 = vst [vmem:[#allocation2 + $0x2c0] sm:$0xff] %v3535_v1  ;;  %v3544_v30 = vsel %vm126_vm0, %v3514_v44, %v3515_v25 }
 0x452   :  { %3575 = vst [vmem:[#allocation2 + $0x2c8] sm:$0xff] %v3537_v7  ;;  %3802 = vrot.lane.b32.xlu1 %v9799_v24, %s8275_s30  ;;  %3804 = vrot.lane.b32.xlu2 %v9821_v29, %s8275_s30  ;;  %v3545_v63 = vsel %vm780_vm5, %v3493_v0, %v3544_v30 }
 0x453   :  { %3579 = vst [vmem:[#allocation2 + $0x2e8] sm:$0xff] %v3545_v63 }
 0x454   :  { %v3491_v13 = vpop.permute.xlu1 %3490  ;;  %v9911_v22 = vpop.permute.xlu2 %3630  ;;  %3950 = vrot.lane.b32.xlu0 %v9777_v53, %s8276_s13 }
 0x455   :  { %v3513_v9 = vrot.slane %v3491_v13, 4  ;;  %v3660_v59 = vrot.slane %v9911_v22, 4 }
 0x456   :  { %v3621_v17 = vpop.permute.xlu0 %3620 }
 0x457   :  { %v3540_v6 = vsel %vm126_vm0, %v3512_v37, %v3513_v9  ;;  %v3542_v8 = vsel %vm126_vm0, %v3513_v9, %v3514_v44  ;;  %v3655_v21 = vrot.slane %v3621_v17, 4 }
 0x458   :  { %v3541_v40 = vsel %vm780_vm5, %v3489_v32, %v3540_v6  ;;  %v3543_v3 = vsel %vm780_vm5, %v3491_v13, %v3542_v8 }
 0x459   :  { %3577 = vst [vmem:[#allocation2 + $0x2d8] sm:$0xff] %v3541_v40  ;;  %v3672_v53 = vsel %vm126_vm0, %v3654_v27, %v3655_v21 }
 0x45a   :  { %3578 = vst [vmem:[#allocation2 + $0x2e0] sm:$0xff] %v3543_v3  ;;  %3934 = vrot.lane.b32.xlu1 %v9721_v57, %s8276_s13  ;;  %3936 = vrot.lane.b32.xlu2 %v9747_v34, %s8276_s13  ;;  %v3673_v0 = vsel %vm935_vm6, %v3619_v4, %v3672_v53 }
 0x45b   :  { %3720 = vst [vmem:[#allocation2 + $0x300] sm:$0xff] %v3673_v0 }
 0x45c   :  { %v3497_v28 = vpop.permute.xlu1 %3496  ;;  %v3637_v56 = vpop.permute.xlu2 %3636  ;;  %8244 = vrot.lane.b32.xlu0 %v8243_v60, %s8276_s13 }
 0x45d   :  { %v3516_v51 = vrot.slane %v3497_v28, 4  ;;  %v3663_v47 = vrot.slane %v3637_v56, 4 }
 0x45e   :  { %v3627_v54 = vpop.permute.xlu0 %3626 }
 0x45f   :  { %v3546_v11 = vsel %vm126_vm0, %v3515_v25, %v3516_v51  ;;  %v3548_v18 = vsel %vm126_vm0, %v3516_v51, %v3517_v5  ;;  %v3658_v38 = vrot.slane %v3627_v54, 4 }
 0x460   :  { %v3547_v57 = vsel %vm780_vm5, %v3495_v31, %v3546_v11  ;;  %v3549_v34 = vsel %vm780_vm5, %v3497_v28, %v3548_v18  ;;  %v4194_v31 = vld [vmem:[%s11844_s5 + $0x10] sm:$0xff] }
 0x461   :  { %3580 = vst [vmem:[#allocation2 + $0x2f0] sm:$0xff] %v3547_v57  ;;  %v3678_v41 = vsel %vm126_vm0, %v3657_v58, %v3658_v38 }
 0x462   :  { %3581 = vst [vmem:[#allocation2 + $0x2f8] sm:$0xff] %v3549_v34  ;;  %3938 = vrot.lane.b32.xlu1 %v9865_v19, %s8276_s13  ;;  %3940 = vrot.lane.b32.xlu2 %v9859_v14, %s8276_s13  ;;  %v3679_v26 = vsel %vm935_vm6, %v9896_v36, %v3678_v41 }
 0x463   :  { %3723 = vst [vmem:[#allocation2 + $0x318] sm:$0xff] %v3679_v26 }
 0x464   :  { %v3623_v23 = vpop.permute.xlu1 %3622  ;;  %v9938_v61 = vpop.permute.xlu2 %3642  ;;  %3956 = vrot.lane.b32.xlu0 %v9799_v24, %s8276_s13  ;;  %v4193_v24 = vld [vmem:[%s11844_s5 + $0x8] sm:$0xff] }
 0x465   :  { %v3656_v42 = vrot.slane %v3623_v23, 4  ;;  %v3666_v13 = vrot.slane %v9938_v61, 4 }
 0x466   :  { %v3633_v4 = vpop.permute.xlu0 %3632 }
 0x467   :  { %v3674_v2 = vsel %vm126_vm0, %v3655_v21, %v3656_v42  ;;  %v3676_v19 = vsel %vm126_vm0, %v3656_v42, %v3657_v58  ;;  %v3661_v55 = vrot.slane %v3633_v4, 4 }
 0x468   :  { %v3675_v45 = vsel %vm935_vm6, %v3621_v17, %v3674_v2  ;;  %v3677_v14 = vsel %vm935_vm6, %v3623_v23, %v3676_v19 }
 0x469   :  { %3721 = vst [vmem:[#allocation2 + $0x308] sm:$0xff] %v3675_v45  ;;  %v3684_v20 = vsel %vm126_vm0, %v3660_v59, %v3661_v55 }
 0x46a   :  { %3722 = vst [vmem:[#allocation2 + $0x310] sm:$0xff] %v3677_v14  ;;  %3952 = vrot.lane.b32.xlu1 %v9771_v43, %s8276_s13  ;;  %3954 = vrot.lane.b32.xlu2 %v9805_v10, %s8276_s13  ;;  %v3685_v16 = vsel %vm935_vm6, %v9911_v22, %v3684_v20 }
 0x46b   :  { %3726 = vst [vmem:[#allocation2 + $0x330] sm:$0xff] %v3685_v16 }
 0x46c   :  { %v3629_v15 = vpop.permute.xlu1 %3628  ;;  %v3775_v52 = vpop.permute.xlu2 %3774  ;;  %4203 = vperm.xlu0 %8226, %v4193_v24  }
 0x46d   :  { %v3659_v32 = vrot.slane %v3629_v15, 4  ;;  %v3809_v9 = vrot.slane %v3775_v52, 4 }
 0x46e   :  { %v3639_v36 = vpop.permute.xlu0 %3638 }
 0x46f   :  { %v3680_v43 = vsel %vm126_vm0, %v3658_v38, %v3659_v32  ;;  %v3682_v10 = vsel %vm126_vm0, %v3659_v32, %v3660_v59  ;;  %v3664_v49 = vrot.slane %v3639_v36, 4 }
 0x470   :  { %v3681_v37 = vsel %vm935_vm6, %v3627_v54, %v3680_v43  ;;  %v3683_v48 = vsel %vm935_vm6, %v3629_v15, %v3682_v10 }
 0x471   :  { %3724 = vst [vmem:[#allocation2 + $0x320] sm:$0xff] %v3681_v37  ;;  %v3688_v62 = vsel %vm126_vm0, %v3663_v47, %v3664_v49 }
 0x472   :  { %3725 = vst [vmem:[#allocation2 + $0x328] sm:$0xff] %v3683_v48  ;;  %3958 = vrot.lane.b32.xlu1 %v9821_v29, %s8276_s13  ;;  %v3689_v1 = vsel %vm935_vm6, %v3637_v56, %v3688_v62 }
 0x473   :  { %3728 = vst [vmem:[#allocation2 + $0x340] sm:$0xff] %v3689_v1  ;;  %v7700_v1 = vld [vmem:[#allocation2 + $0x300] sm:$0xf] }
 0x474   :  { %v9966_v33 = vpop.permute.xlu1 %8234  ;;  %v3647_v50 = vpop.permute.xlu2 %3646 }
 0x475   :  { %v8236_v35 = vunpack.i.l.bf16 %v9966_v33  ;;  %v3668_v22 = vrot.slane %v3647_v50, 4  ;;  %v8237_v14 = vunpack.i.h.bf16 %v9966_v33 }
 0x476   :  { %v3645_v25 = vpop.permute.xlu0 %3644 }
 0x477   :  { %v3662_v7 = vrot.slane %v8236_v35, 4  ;;  %v3667_v30 = vrot.slane %v3645_v25, 4  ;;  %v3671_v15 = vrot.slane %v8237_v14, 4 }
 0x479   :  { %v3686_v44 = vsel %vm126_vm0, %v3661_v55, %v3662_v7  ;;  %v3694_v8 = vsel %vm126_vm0, %v3666_v13, %v3667_v30  ;;  %v3696_v40 = vsel %vm126_vm0, %v3667_v30, %v3668_v22  ;;  %v8168_v7 = vld [vmem:[#allocation2 + $0x304] sm:$0xf] }
 0x47a   :  { %v3687_v29 = vsel %vm935_vm6, %v3633_v4, %v3686_v44  ;;  %4208 = vperm.xlu1 %8227, %v4194_v31   ;;  %v3695_v46 = vsel %vm935_vm6, %v9938_v61, %v3694_v8  ;;  %v3697_v39 = vsel %vm935_vm6, %v3645_v25, %v3696_v40  ;;  %v7702_v33 = vld [vmem:[#allocation2 + $0x340] sm:$0xf0] }
 0x47b   :  { %3727 = vst [vmem:[#allocation2 + $0x338] sm:$0xff] %v3687_v29  ;;  %v7705_v25 = vor.u32 %v8168_v7, %v7702_v33  ;;  %v7638_v8 = vld [vmem:[#allocation2 + $0x2c0] sm:$0xf0] }
 0x47c   :  { %v3641_v63 = vpop.permute.xlu1 %3640  ;;  %v3777_v6 = vpop.permute.xlu2 %3776  ;;  %3731 = vst [vmem:[#allocation2 + $0x358] sm:$0xff] %v3695_v46 }
 0x47d   :  { %v3665_v3 = vrot.slane %v3641_v63, 4  ;;  %v3810_v12 = vrot.slane %v3777_v6, 4  ;;  %3732 = vst [vmem:[#allocation2 + $0x360] sm:$0xff] %v3697_v39  ;;  %v7636_v39 = vld [vmem:[#allocation2 + $0x280] sm:$0xf] }
 0x47e   :  { %v3791_v5 = vpop.permute.xlu0 %3790 }
 0x47f   :  { %v3690_v17 = vsel %vm126_vm0, %v3664_v49, %v3665_v3  ;;  %v3692_v27 = vsel %vm126_vm0, %v3665_v3, %v3666_v13  ;;  %v3828_v21 = vsel %vm126_vm0, %v3809_v9, %v3810_v12  ;;  %v3817_v38 = vrot.slane %v3791_v5, 4  ;;  %v8176_v49 = vld [vmem:[#allocation2 + $0x33c] sm:$0xf0] }
 0x480   :  { %v3691_v28 = vsel %vm935_vm6, %v3639_v36, %v3690_v17  ;;  %v3693_v56 = vsel %vm935_vm6, %v3641_v63, %v3692_v27  ;;  %v3829_v60 = vsel %vm1090_vm7, %v3775_v52, %v3828_v21  ;;  %v7701_v29 = vor.u32 %v8176_v49, %v7700_v1  ;;  %v8152_v17 = vld [vmem:[#allocation2 + $0x284] sm:$0xf] }
 0x481   :  { %3729 = vst [vmem:[#allocation2 + $0x348] sm:$0xff] %v3691_v28  ;;  %v7641_v21 = vor.u32 %v8152_v17, %v7638_v8  ;;  %v8144_v28 = vld [vmem:[#allocation2 + $0x23c] sm:$0xf0]  ;;  %v8104_v1 = vld [vmem:[#allocation2 + $0x104] sm:$0xf] }
 0x482   :  { %3730 = vst [vmem:[#allocation2 + $0x350] sm:$0xff] %v3693_v56  ;;  %v7574_v56 = vld [vmem:[#allocation2 + $0x240] sm:$0xf0] }
 0x483   :  { %3875 = vst [vmem:[#allocation2 + $0x388] sm:$0xff] %v3829_v60 }
 0x484   :  { %v3773_v53 = vpop.permute.xlu1 %3772  ;;  %v3945_v51 = vpop.permute.xlu2 %3944 }
 0x485   :  { %v3808_v0 = vrot.slane %v3773_v53, 4  ;;  %v3971_v62 = vrot.slane %v3945_v51, 4 }
 0x486   :  { %v3649_v57 = vpop.permute.xlu0 %3648 }
 0x487   :  { %v3826_v11 = vsel %vm126_vm0, %v3808_v0, %v3809_v9  ;;  %v3669_v34 = vrot.slane %v3649_v57, 4 }
 0x488   :  { %v3827_v18 = vsel %vm1090_vm7, %v3773_v53, %v3826_v11  ;;  %v8136_v53 = vld [vmem:[#allocation2 + $0x204] sm:$0xf] }
 0x489   :  { %3874 = vst [vmem:[#allocation2 + $0x380] sm:$0xff] %v3827_v18  ;;  %v3698_v23 = vsel %vm126_vm0, %v3668_v22, %v3669_v34 }
 0x48a   :  { %v3699_v42 = vsel %vm935_vm6, %v3647_v50, %v3698_v23  ;;  %v7508_v23 = vld [vmem:[#allocation2 + $0x180] sm:$0xf] }
 0x48b   :  { %3733 = vst [vmem:[#allocation2 + $0x368] sm:$0xff] %v3699_v42  ;;  %v8128_v42 = vld [vmem:[#allocation2 + $0x1bc] sm:$0xf0] }
 0x48c   :  { %v9990_v54 = vpop.permute.xlu1 %3792  ;;  %v9992_v58 = vpop.permute.xlu2 %3778 }
 0x48d   :  { %v3818_v61 = vrot.slane %v9990_v54, 4  ;;  %v3811_v41 = vrot.slane %v9992_v58, 4 }
 0x48e   :  { %v3927_v4 = vpop.permute.xlu0 %3926 }
 0x48f   :  { %v3842_v26 = vsel %vm126_vm0, %v3817_v38, %v3818_v61  ;;  %v3830_v2 = vsel %vm126_vm0, %v3810_v12, %v3811_v41  ;;  %v3962_v13 = vrot.slane %v3927_v4, 4 }
 0x490   :  { %v3843_v19 = vsel %vm1090_vm7, %v3791_v5, %v3842_v26  ;;  %v3831_v45 = vsel %vm1090_vm7, %v3777_v6, %v3830_v2  ;;  %v7764_v24 = vld [vmem:[#allocation2 + $0x380] sm:$0xf]  ;;  %v8184_v37 = vld [vmem:[#allocation2 + $0x384] sm:$0xf] }
 0x491   :  { %3882 = vst [vmem:[#allocation2 + $0x3c0] sm:$0xff] %v3843_v19  ;;  %v8160_v6 = vld [vmem:[#allocation2 + $0x2bc] sm:$0xf0]  ;;  %v7510_v26 = vld [vmem:[#allocation2 + $0x1c0] sm:$0xf0] }
 0x492   :  { %3876 = vst [vmem:[#allocation2 + $0x390] sm:$0xff] %v3831_v45  ;;  %v7637_v27 = vor.u32 %v8160_v6, %v7636_v39  ;;  %v7572_v5 = vld [vmem:[#allocation2 + $0x200] sm:$0xf]  ;;  %v8068_v2 = vld [vmem:[%s11845_s4 + $0x4] sm:$0xf] }
 0x493   :  { %v8080_v6 = vld [vmem:[#allocation2 + $0x3c] sm:$0xf0]  ;;  %v8088_v39 = vld [vmem:[#allocation2 + $0x84] sm:$0xf] }
 0x494   :  { %v3651_v59 = vpop.permute.xlu1 %3650  ;;  %v10007_v55 = vpop.permute.xlu2 %3784 }
 0x495   :  { %v3670_v52 = vrot.slane %v3651_v59, 4 }
 0x496   :  { %v10013_v50 = vpop.permute.xlu0 %3946 }
 0x497   :  { %v3700_v20 = vsel %vm126_vm0, %v3669_v34, %v3670_v52  ;;  %v3702_v32 = vsel %vm126_vm0, %v3670_v52, %v3671_v15  ;;  %v3972_v35 = vrot.slane %v10013_v50, 4  ;;  %v7577_v34 = vor.u32 %v8136_v53, %v7574_v56  ;;  %v8177_v53 = vld [vmem:[#allocation2 + $0x344] sm:$0xf0] }
 0x498   :  { %v3701_v16 = vsel %vm935_vm6, %v3649_v57, %v3700_v20  ;;  %v3703_v43 = vsel %vm935_vm6, %v3651_v59, %v3702_v32  ;;  %v8192_v10 = vld [vmem:[#allocation2 + $0x3bc] sm:$0xf0]  ;;  %v7766_v48 = vld [vmem:[#allocation2 + $0x3c0] sm:$0xf0]  ;;  %v7573_v57 = vor.u32 %v8144_v28, %v7572_v5  ;;  %v7509_v15 = vor.u32 %v8128_v42, %v7508_v23  ;;  %v7708_v42 = vld [vmem:[#allocation2 + $0x308] sm:$0xf] }
 0x499   :  { %3734 = vst [vmem:[#allocation2 + $0x370] sm:$0xff] %v3701_v16  ;;  %v7765_v36 = vor.u32 %v8192_v10, %v7764_v24  ;;  %v7769_v47 = vor.u32 %v8184_v37, %v7766_v48  ;;  %v3996_v22 = vsel %vm126_vm0, %v3971_v62, %v3972_v35  ;;  %v8120_v20 = vld [vmem:[#allocation2 + $0x184] sm:$0xf]  ;;  %v3814_v10 = vrot.slane %v10007_v55, 4 }
 0x49a   :  { %3735 = vst [vmem:[#allocation2 + $0x378] sm:$0xff] %v3703_v43  ;;  %v3997_v63 = vsel %vm1245_vm8, %v3945_v51, %v3996_v22  ;;  %v7513_v16 = vor.u32 %v8120_v20, %v7510_v26  ;;  %v8112_v43 = vld [vmem:[#allocation2 + $0x13c] sm:$0xf0]  ;;  %v7318_v28 = vld [vmem:[#allocation2 + $0x40] sm:$0xf0] }
 0x49b   :  { %4960 = vmatpush.bf16.msrb.mxu2 %v7765_v36  ;;  %4998 = vmatpush.bf16.msrb.mxu0 %v7769_v47  ;;  %4036 = vst [vmem:[#allocation2 + $0x440] sm:$0xff] %v3997_v63  ;;  %v7444_v47 = vld [vmem:[#allocation2 + $0x100] sm:$0xf]  ;;  %v7772_v63 = vld [vmem:[#allocation2 + $0x388] sm:$0xf] }
 0x49c   :  { %v3929_v31 = vpop.permute.xlu1 %3928  ;;  %v10016_v44 = vpop.permute.xlu2 %3930  ;;  %v7445_v62 = vor.u32 %v8112_v43, %v7444_v47  ;;  %v7644_v43 = vld [vmem:[#allocation2 + $0x288] sm:$0xf] }
 0x49d   :  { %v3963_v30 = vrot.slane %v3929_v31, 4  ;;  %v3964_v9 = vrot.slane %v10016_v44, 4 }
 0x49e   :  { %v10029_v60 = vpop.permute.xlu0 %3780 }
 0x49f   :  { %v3980_v40 = vsel %vm126_vm0, %v3962_v13, %v3963_v30  ;;  %v3982_v3 = vsel %vm126_vm0, %v3963_v30, %v3964_v9  ;;  %4961 = vmatpush.bf16.msrb.mxu2 %v7701_v29  ;;  %4999 = vmatpush.bf16.msrb.mxu0 %v7705_v25  ;;  %v3812_v51 = vrot.slane %v10029_v60, 4  ;;  %v7380_v29 = vld [vmem:[#allocation2 + $0x80] sm:$0xf]  ;;  %v7382_v30 = vld [vmem:[#allocation2 + $0xc0] sm:$0xf0] }
 0x4a0   :  { %v3981_v12 = vsel %vm1245_vm8, %v3927_v4, %v3980_v40  ;;  %v3983_v46 = vsel %vm1245_vm8, %v3929_v31, %v3982_v3  ;;  %v8096_v25 = vld [vmem:[#allocation2 + $0xbc] sm:$0xf0]  ;;  %v8185_v3 = vld [vmem:[#allocation2 + $0x38c] sm:$0xf]  ;;  %v7385_v5 = vor.u32 %v8088_v39, %v7382_v30 }
 0x4a1   :  { %4028 = vst [vmem:[#allocation2 + $0x400] sm:$0xff] %v3981_v12  ;;  %v3832_v11 = vsel %vm126_vm0, %v3811_v41, %v3812_v51  ;;  %v8137_v30 = vld [vmem:[#allocation2 + $0x20c] sm:$0xf] }
 0x4a2   :  { %4029 = vst [vmem:[#allocation2 + $0x408] sm:$0xff] %v3983_v46  ;;  %v3833_v38 = vsel %vm1090_vm7, %v9992_v58, %v3832_v11  ;;  %v8208_v19 = vld [vmem:[#allocation2 + $0x43c] sm:$0xf0]  ;;  %v7302_v58 = vld [vmem:[%s11845_s4 + $0x8] sm:$0xf0]  ;;  %v7381_v46 = vor.u32 %v8096_v25, %v7380_v29 }
 0x4a3   :  { %4962 = vmatpush.bf16.msrb.mxu2 %v7637_v27  ;;  %5000 = vmatpush.bf16.msrb.mxu0 %v7641_v21  ;;  %3877 = vst [vmem:[#allocation2 + $0x398] sm:$0xff] %v3833_v38  ;;  %v7830_v59 = vld [vmem:[#allocation2 + $0x440] sm:$0xf0]  ;;  %v10059_v48 = vor.u32 %v8068_v2, %v7302_v58  ;;  %v7316_v21 = vld [vmem:[#allocation2] sm:$0xf]  ;;  %v7709_v58 = vor.u32 %v8177_v53, %v7708_v42 }
 0x4a4   :  { %v10032_v0 = vpop.permute.xlu1 %3794  ;;  %v10053_v24 = vpop.permute.xlu2 %3798  ;;  %v7300_v11 = vld [vmem:[%s11845_s4] sm:$0xf]  ;;  %v7317_v23 = vor.u32 %v8080_v6, %v7316_v21  ;;  %v7582_v25 = vld [vmem:[#allocation2 + $0x248] sm:$0xf0] }
 0x4a5   :  { %v3819_v18 = vrot.slane %v10032_v0, 4 }
 0x4a7   :  { %v3844_v41 = vsel %vm126_vm0, %v3818_v61, %v3819_v18  ;;  %4963 = vmatpush.bf16.msrb.mxu2 %v7573_v57  ;;  %5001 = vmatpush.bf16.msrb.mxu0 %v7577_v34  ;;  %v10055_v61 = vpop.permute.xlu0 %3786  ;;  %v8069_v57 = vld [vmem:[%s11845_s4 + $0x4] sm:$0xf0] }
 0x4a8   :  { %v3845_v45 = vsel %vm1090_vm7, %v9990_v54, %v3844_v41  ;;  %v7828_v14 = vld [vmem:[#allocation2 + $0x400] sm:$0xf]  ;;  %v8200_v4 = vld [vmem:[#allocation2 + $0x404] sm:$0xf]  ;;  %v3815_v37 = vrot.slane %v10055_v61, 4 }
 0x4a9   :  { %3883 = vst [vmem:[#allocation2 + $0x3c8] sm:$0xff] %v3845_v45  ;;  %v7829_v52 = vor.u32 %v8208_v19, %v7828_v14  ;;  %v7833_v32 = vor.u32 %v8200_v4, %v7830_v59  ;;  %v7446_v54 = vld [vmem:[#allocation2 + $0x140] sm:$0xf0]  ;;  %v8169_v45 = vld [vmem:[#allocation2 + $0x30c] sm:$0xf] }
 0x4aa   :  { %v3838_v49 = vsel %vm126_vm0, %v3814_v10, %v3815_v37  ;;  %v7449_v31 = vor.u32 %v8104_v1, %v7446_v54  ;;  %v8072_v19 = vld [vmem:[#allocation2 + $0x4] sm:$0xf] }
 0x4ab   :  { %4964 = vmatpush.bf16.msrb.mxu2 %v7509_v15  ;;  %4986 = vmatpush.bf16.msrb.mxu3 %v7829_v52  ;;  %v3839_v7 = vsel %vm1090_vm7, %v10007_v55, %v3838_v49  ;;  %v7321_v4 = vor.u32 %v8072_v19, %v7318_v28  ;;  %v10093_v15 = vor.u32 %v8069_v57, %v7300_v11  ;;  %v8161_v52 = vld [vmem:[#allocation2 + $0x2c4] sm:$0xf0]  ;;  %v8153_v49 = vld [vmem:[#allocation2 + $0x28c] sm:$0xf]  ;;  %v8071_v19 = vld [vmem:[%s11845_s4 + $0x14] sm:$0xf0] }
 0x4ac   :  { %5002 = vmatpush.bf16.msrb.mxu0 %v7513_v16  ;;  %5024 = vmatpush.bf16.msrb.mxu1 %v7833_v32  ;;  %v3783_v36 = vpop.permute.xlu1 %3782  ;;  %3880 = vst [vmem:[#allocation2 + $0x3b0] sm:$0xff] %v3839_v7  ;;  %v10084_v34 = vpop.permute.xlu2 %3804  ;;  %v7645_v47 = vor.u32 %v8161_v52, %v7644_v43  ;;  %v7516_v57 = vld [vmem:[#allocation2 + $0x188] sm:$0xf] }
 0x4ad   :  { %v3813_v33 = vrot.slane %v3783_v36, 4  ;;  %v3824_v20 = vrot.slane %v10084_v34, 4 }
 0x4ae   :  { %7890 = vmatmul.msk.bf16.vlgmr.msrb.gmra.mxu3 %vm283_vm2, %v10059_v48 }
 0x4af   :  { %v3834_v13 = vsel %vm126_vm0, %v3812_v51, %v3813_v33  ;;  %v3836_v22 = vsel %vm126_vm0, %v3813_v33, %v3814_v10  ;;  %4965 = vmatpush.bf16.msrb.mxu2 %v7445_v62  ;;  %7892 = vmatmul.msk.bf16.vlgmr.msrb.gmra.mxu1 %vm283_vm2, %v10059_v48  ;;  %v10075_v56 = vpop.permute.xlu0 %3948  ;;  %v7710_v51 = vld [vmem:[#allocation2 + $0x348] sm:$0xf0]  ;;  %v7310_v10 = vld [vmem:[%s11845_s4 + $0x18] sm:$0xf0] }
 0x4b0   :  { %v3835_v55 = vsel %vm1090_vm7, %v10029_v60, %v3834_v13  ;;  %v3837_v8 = vsel %vm1090_vm7, %v3783_v36, %v3836_v22  ;;  %5003 = vmatpush.bf16.msrb.mxu0 %v7449_v31  ;;  %v8193_v40 = vld [vmem:[#allocation2 + $0x3c4] sm:$0xf0]  ;;  %v7774_v12 = vld [vmem:[#allocation2 + $0x3c8] sm:$0xf0]  ;;  %v3973_v60 = vrot.slane %v10075_v56, 4  ;;  %v7713_v59 = vor.u32 %v8169_v45, %v7710_v51 }
 0x4b1   :  { %3878 = vst [vmem:[#allocation2 + $0x3a0] sm:$0xff] %v3835_v55  ;;  %v7773_v17 = vor.u32 %v8193_v40, %v7772_v63  ;;  %v7777_v27 = vor.u32 %v8185_v3, %v7774_v12  ;;  %v8145_v31 = vld [vmem:[#allocation2 + $0x244] sm:$0xf0]  ;;  %v7585_v12 = vor.u32 %v8137_v30, %v7582_v25 }
 0x4b2   :  { %3879 = vst [vmem:[#allocation2 + $0x3a8] sm:$0xff] %v3837_v8  ;;  %v3998_v26 = vsel %vm126_vm0, %v3972_v35, %v3973_v60  ;;  %v7646_v35 = vld [vmem:[#allocation2 + $0x2c8] sm:$0xf0]  ;;  %v7580_v22 = vld [vmem:[#allocation2 + $0x208] sm:$0xf] }
 0x4b3   :  { %4966 = vmatpush.bf16.msrb.mxu2 %v7381_v46  ;;  %5036 = vmatpush.bf16.msra.mxu3 %v7773_v17  ;;  %v3999_v14 = vsel %vm1245_vm8, %v10013_v50, %v3998_v26  ;;  %v8070_v50 = vld [vmem:[%s11845_s4 + $0x14] sm:$0xf]  ;;  %v7649_v7 = vor.u32 %v8153_v49, %v7646_v35  ;;  %v7581_v55 = vor.u32 %v8145_v31, %v7580_v22  ;;  %v7836_v8 = vld [vmem:[#allocation2 + $0x408] sm:$0xf]  ;;  %v4192_v17 = vld [vmem:[%s11844_s5] sm:$0xff] }
 0x4b4   :  { %5004 = vmatpush.bf16.msrb.mxu0 %v7385_v5  ;;  %5074 = vmatpush.bf16.msra.mxu1 %v7777_v27  ;;  %v8240_v38 = vpop.permute.xlu1 %8239  ;;  %4037 = vst [vmem:[#allocation2 + $0x448] sm:$0xff] %v3999_v14  ;;  %v10118_v13 = vor.u32 %v8070_v50, %v7310_v10  ;;  %v8129_v40 = vld [vmem:[#allocation2 + $0x1c4] sm:$0xf0]  ;;  %v7518_v5 = vld [vmem:[#allocation2 + $0x1c8] sm:$0xf0] }
 0x4b5   :  { %v8242_v2 = vunpack.i.h.bf16 %v8240_v38  ;;  %v8241_v41 = vunpack.i.l.bf16 %v8240_v38  ;;  %4198 = vperm.xlu2 %8248, %v4192_v17   ;;  %v8121_v38 = vld [vmem:[#allocation2 + $0x18c] sm:$0xf]  ;;  %v8113_v26 = vld [vmem:[#allocation2 + $0x144] sm:$0xf0] }
 0x4b6   :  { %v7521_v42 = vor.u32 %v8121_v38, %v7518_v5  ;;  %v7452_v14 = vld [vmem:[#allocation2 + $0x108] sm:$0xf]  ;;  %v7654_v38 = vld [vmem:[#allocation2 + $0x2d0] sm:$0xf0] }
 0x4b7   :  { %v3825_v32 = vrot.slane %v8242_v2, 4  ;;  %v3816_v16 = vrot.slane %v8241_v41, 4  ;;  %4967 = vmatpush.bf16.msrb.mxu2 %v7317_v23  ;;  %5037 = vmatpush.bf16.msra.mxu3 %v7709_v58  ;;  %v10112_v1 = vpop.permute.xlu0 %3800  ;;  %v7454_v2 = vld [vmem:[#allocation2 + $0x148] sm:$0xf0]  ;;  %v10148_v58 = vpop.permute.xlu2 %3936  ;;  %v7453_v52 = vor.u32 %v8113_v26, %v7452_v14  ;;  %v8097_v50 = vld [vmem:[#allocation2 + $0xc4] sm:$0xf0] }
 0x4b8   :  { %5005 = vmatpush.bf16.msrb.mxu0 %v7321_v4  ;;  %5075 = vmatpush.bf16.msra.mxu1 %v7713_v59  ;;  %v3822_v29 = vrot.slane %v10112_v1, 4  ;;  %v7652_v26 = vld [vmem:[#allocation2 + $0x290] sm:$0xf] }
 0x4b9   :  { %v3840_v54 = vsel %vm126_vm0, %v3815_v37, %v3816_v16  ;;  %v3856_v36 = vsel %vm126_vm0, %v3824_v20, %v3825_v32  ;;  %v3821_v37 = vrot.slane %v10053_v24, 4  ;;  %v8105_v32 = vld [vmem:[#allocation2 + $0x10c] sm:$0xf] }
 0x4ba   :  { %v3841_v33 = vsel %vm1090_vm7, %v10055_v61, %v3840_v54  ;;  %v3857_v62 = vsel %vm1090_vm7, %v10084_v34, %v3856_v36  ;;  %4968 = vmatmul.bf16.vlgmr.msrb.gmra.mxu2 %v10093_v15  ;;  %v7457_v35 = vor.u32 %v8105_v32, %v7454_v2 }
 0x4bb   :  { %3881 = vst [vmem:[#allocation2 + $0x3b8] sm:$0xff] %v3841_v33  ;;  %5006 = vmatmul.bf16.vlgmr.msrb.gmra.mxu0 %v10093_v15  ;;  %5038 = vmatpush.bf16.msra.mxu3 %v7645_v47  ;;  %v3850_v63 = vsel %vm126_vm0, %v3821_v37, %v3822_v29  ;;  %v8209_v46 = vld [vmem:[#allocation2 + $0x444] sm:$0xf0]  ;;  %v7838_v39 = vld [vmem:[#allocation2 + $0x448] sm:$0xf0] }
 0x4bc   :  { %3889 = vst [vmem:[#allocation2 + $0x3f8] sm:$0xff] %v3857_v62  ;;  %5076 = vmatpush.bf16.msra.mxu1 %v7649_v7  ;;  %v3797_v61 = vpop.permute.xlu1 %3796  ;;  %v3851_v3 = vsel %vm1090_vm7, %v10053_v24, %v3850_v63  ;;  %v7837_v28 = vor.u32 %v8209_v46, %v7836_v8  ;;  %v8201_v24 = vld [vmem:[#allocation2 + $0x40c] sm:$0xf]  ;;  %v7388_v47 = vld [vmem:[#allocation2 + $0x88] sm:$0xf] }
 0x4bd   :  { %v3820_v6 = vrot.slane %v3797_v61, 4  ;;  %3886 = vst [vmem:[#allocation2 + $0x3e0] sm:$0xff] %v3851_v3  ;;  %v7841_v11 = vor.u32 %v8201_v24, %v7838_v39  ;;  %v7389_v49 = vor.u32 %v8097_v50, %v7388_v47  ;;  %v8089_v33 = vld [vmem:[#allocation2 + $0x8c] sm:$0xf]  ;;  %v8081_v7 = vld [vmem:[#allocation2 + $0x44] sm:$0xf0] }
 0x4be   :  { %7891 = vmatmul.msk.bf16.gmra.mxu3 %vm283_vm2, %v10118_v13  ;;  %5062 = vmatpush.bf16.msra.mxu2 %v7837_v28  ;;  %v8186_v46 = vld [vmem:[#allocation2 + $0x394] sm:$0xf] }
 0x4bf   :  { %v3846_v27 = vsel %vm126_vm0, %v3819_v18, %v3820_v6  ;;  %v3848_v21 = vsel %vm126_vm0, %v3820_v6, %v3821_v37  ;;  %5039 = vmatpush.bf16.msra.mxu3 %v7581_v55  ;;  %7893 = vmatmul.msk.bf16.gmra.mxu1 %vm283_vm2, %v10118_v13  ;;  %v7517_v18 = vor.u32 %v8129_v40, %v7516_v57  ;;  %v10139_v23 = vpop.permute.xlu0 %3932  ;;  %v8073_v6 = vld [vmem:[#allocation2 + $0xc] sm:$0xf]  ;;  %v7780_v55 = vld [vmem:[#allocation2 + $0x390] sm:$0xf]  ;;  %v3941_v8 = vpop.permute.xlu2 %3940  ;;  %v7718_v24 = vld [vmem:[#allocation2 + $0x350] sm:$0xf0] }
 0x4c0   :  { %v3847_v53 = vsel %vm1090_vm7, %v10032_v0, %v3846_v27  ;;  %v3849_v51 = vsel %vm1090_vm7, %v3797_v61, %v3848_v21  ;;  %5077 = vmatpush.bf16.msra.mxu1 %v7585_v12  ;;  %5100 = vmatpush.bf16.msra.mxu0 %v7841_v11  ;;  %v3965_v41 = vrot.slane %v10139_v23, 4  ;;  %v7308_v0 = vld [vmem:[%s11845_s4 + $0x10] sm:$0xf]  ;;  %v3967_v61 = vrot.slane %v10148_v58, 4 }
 0x4c1   :  { %3884 = vst [vmem:[#allocation2 + $0x3d0] sm:$0xff] %v3847_v53  ;;  %v10155_v43 = vor.u32 %v8071_v19, %v7308_v0  ;;  %v8178_v21 = vld [vmem:[#allocation2 + $0x34c] sm:$0xf0]  ;;  %v3969_v2 = vrot.slane %v3941_v8, 4  ;;  %v8154_v19 = vld [vmem:[#allocation2 + $0x294] sm:$0xf] }
 0x4c2   :  { %3885 = vst [vmem:[#allocation2 + $0x3d8] sm:$0xff] %v3849_v51  ;;  %v3984_v4 = vsel %vm126_vm0, %v3964_v9, %v3965_v41  ;;  %v7390_v9 = vld [vmem:[#allocation2 + $0xc8] sm:$0xf0]  ;;  %v8170_v51 = vld [vmem:[#allocation2 + $0x314] sm:$0xf]  ;;  %v7657_v14 = vor.u32 %v8154_v19, %v7654_v38 }
 0x4c3   :  { %5040 = vmatpush.bf16.msra.mxu3 %v7517_v18  ;;  %v3985_v16 = vsel %vm1245_vm8, %v10016_v44, %v3984_v4  ;;  %v7393_v34 = vor.u32 %v8089_v33, %v7390_v9  ;;  %v7721_v57 = vor.u32 %v8170_v51, %v7718_v24  ;;  %v8162_v18 = vld [vmem:[#allocation2 + $0x2cc] sm:$0xf0]  ;;  %v7590_v33 = vld [vmem:[#allocation2 + $0x250] sm:$0xf0] }
 0x4c4   :  { %5078 = vmatpush.bf16.msra.mxu1 %v7521_v42  ;;  %v3803_v45 = vpop.permute.xlu1 %3802  ;;  %4030 = vst [vmem:[#allocation2 + $0x410] sm:$0xff] %v3985_v16  ;;  %v8090_v38 = vld [vmem:[#allocation2 + $0x94] sm:$0xf] }
 0x4c5   :  { %v3823_v59 = vrot.slane %v3803_v45, 4 }
 0x4c7   :  { %v3852_v10 = vsel %vm126_vm0, %v3822_v29, %v3823_v59  ;;  %v3854_v54 = vsel %vm126_vm0, %v3823_v59, %v3824_v20  ;;  %5041 = vmatpush.bf16.msra.mxu3 %v7453_v52  ;;  %v10166_v62 = vpop.permute.xlu0 %3950  ;;  %v7324_v29 = vld [vmem:[#allocation2 + $0x8] sm:$0xf]  ;;  %v3955_v9 = vpop.permute.xlu2 %3954 }
 0x4c8   :  { %v3853_v36 = vsel %vm1090_vm7, %v10112_v1, %v3852_v10  ;;  %v3855_v44 = vsel %vm1090_vm7, %v3803_v45, %v3854_v54  ;;  %5079 = vmatpush.bf16.msra.mxu1 %v7457_v35  ;;  %v3974_v20 = vrot.slane %v10166_v62, 4  ;;  %v7326_v1 = vld [vmem:[#allocation2 + $0x48] sm:$0xf0]  ;;  %v8194_v31 = vld [vmem:[#allocation2 + $0x3cc] sm:$0xf0]  ;;  %v7325_v63 = vor.u32 %v8081_v7, %v7324_v29 }
 0x4c9   :  { %3887 = vst [vmem:[#allocation2 + $0x3e8] sm:$0xff] %v3853_v36  ;;  %v7782_v25 = vld [vmem:[#allocation2 + $0x3d0] sm:$0xf0]  ;;  %v7329_v3 = vor.u32 %v8073_v6, %v7326_v1  ;;  %v7781_v12 = vor.u32 %v8194_v31, %v7780_v55  ;;  %v7653_v45 = vor.u32 %v8162_v18, %v7652_v26  ;;  %v8146_v54 = vld [vmem:[#allocation2 + $0x24c] sm:$0xf0] }
 0x4ca   :  { %3888 = vst [vmem:[#allocation2 + $0x3f0] sm:$0xff] %v3855_v44  ;;  %4973 = vmatmul.bf16.gmra.mxu2 %v10155_v43  ;;  %v4000_v22 = vsel %vm126_vm0, %v3973_v60, %v3974_v20  ;;  %v7785_v27 = vor.u32 %v8186_v46, %v7782_v25  ;;  %v8138_v31 = vld [vmem:[#allocation2 + $0x214] sm:$0xf]  ;;  %v8130_v25 = vld [vmem:[#allocation2 + $0x1cc] sm:$0xf0] }
 0x4cb   :  { %5011 = vmatmul.bf16.gmra.mxu0 %v10155_v43  ;;  %5042 = vmatpush.bf16.msra.mxu3 %v7389_v49  ;;  %v4001_v40 = vsel %vm1245_vm8, %v10075_v56, %v4000_v22  ;;  %v7716_v56 = vld [vmem:[#allocation2 + $0x310] sm:$0xf]  ;;  %v8202_v10 = vld [vmem:[#allocation2 + $0x414] sm:$0xf]  ;;  %v7593_v29 = vor.u32 %v8138_v31, %v7590_v33  ;;  %v8195_v19 = vld [vmem:[#allocation2 + $0x3d4] sm:$0xf0] }
 0x4cc   :  { %5080 = vmatpush.bf16.msra.mxu1 %v7393_v34  ;;  %v3935_v37 = vpop.permute.xlu1 %3934  ;;  %4038 = vst [vmem:[#allocation2 + $0x450] sm:$0xff] %v4001_v40  ;;  %v7717_v53 = vor.u32 %v8178_v21, %v7716_v56  ;;  %v7844_v4 = vld [vmem:[#allocation2 + $0x410] sm:$0xf]  ;;  %v7526_v22 = vld [vmem:[#allocation2 + $0x1d0] sm:$0xf0] }
 0x4cd   :  { %v3966_v30 = vrot.slane %v3935_v37, 4  ;;  %v7588_v34 = vld [vmem:[#allocation2 + $0x210] sm:$0xf]  ;;  %v8122_v40 = vld [vmem:[#allocation2 + $0x194] sm:$0xf] }
 0x4ce   :  { %v7589_v1 = vor.u32 %v8146_v54, %v7588_v34  ;;  %v7524_v6 = vld [vmem:[#allocation2 + $0x190] sm:$0xf]  ;;  %v8106_v56 = vld [vmem:[#allocation2 + $0x114] sm:$0xf]  ;;  %v8179_v33 = vld [vmem:[#allocation2 + $0x354] sm:$0xf0] }
 0x4cf   :  { %v3986_v39 = vsel %vm126_vm0, %v3965_v41, %v3966_v30  ;;  %v3988_v17 = vsel %vm126_vm0, %v3966_v30, %v3967_v61  ;;  %5043 = vmatpush.bf16.msra.mxu3 %v7325_v63  ;;  %v10184_v5 = vpop.permute.xlu0 %8244  ;;  %v8074_v54 = vld [vmem:[#allocation2 + $0x14] sm:$0xf]  ;;  %v7726_v34 = vld [vmem:[#allocation2 + $0x358] sm:$0xf0] }
 0x4d0   :  { %v3987_v60 = vsel %vm1245_vm8, %v10139_v23, %v3986_v39  ;;  %v3989_v28 = vsel %vm1245_vm8, %v3935_v37, %v3988_v17  ;;  %5081 = vmatpush.bf16.msra.mxu1 %v7329_v3  ;;  %v8246_v11 = vunpack.i.l.bf16 %v10184_v5  ;;  %v4195_v23 = vld [vmem:[%s11844_s5 + $0x18] sm:$0xff]  ;;  %v3976_v37 = vrot.slane %v3955_v9, 4  ;;  %v8114_v17 = vld [vmem:[#allocation2 + $0x14c] sm:$0xf0] }
 0x4d1   :  { %4031 = vst [vmem:[#allocation2 + $0x418] sm:$0xff] %v3987_v60  ;;  %4213 = vperm.xlu2 %8248, %v4195_v23   ;;  %v8247_v3 = vunpack.i.h.bf16 %v10184_v5  ;;  %v7529_v39 = vor.u32 %v8122_v40, %v7526_v22  ;;  %v7462_v60 = vld [vmem:[#allocation2 + $0x150] sm:$0xf0]  ;;  %v8082_v23 = vld [vmem:[#allocation2 + $0x4c] sm:$0xf0] }
 0x4d2   :  { %4032 = vst [vmem:[#allocation2 + $0x420] sm:$0xff] %v3989_v28  ;;  %5044 = vmatmul.bf16.vlgmr.msra.gmra.mxu3 %v10093_v15  ;;  %v3970_v41 = vrot.slane %v8246_v11, 4  ;;  %v7460_v28 = vld [vmem:[#allocation2 + $0x110] sm:$0xf]  ;;  %v7465_v5 = vor.u32 %v8106_v56, %v7462_v60  ;;  %v8171_v31 = vld [vmem:[#allocation2 + $0x31c] sm:$0xf] }
 0x4d3   :  { %5112 = vmatpush.bf16.msrb.mxu3 %v7781_v12  ;;  %5082 = vmatmul.bf16.vlgmr.msra.gmra.mxu1 %v10093_v15  ;;  %v8210_v59 = vld [vmem:[#allocation2 + $0x44c] sm:$0xf0]  ;;  %v7846_v52 = vld [vmem:[#allocation2 + $0x450] sm:$0xf0]  ;;  %v7461_v24 = vor.u32 %v8114_v17, %v7460_v28  ;;  %v8155_v22 = vld [vmem:[#allocation2 + $0x29c] sm:$0xf] }
 0x4d4   :  { %5150 = vmatpush.bf16.msrb.mxu1 %v7785_v27  ;;  %v3939_v42 = vpop.permute.xlu1 %3938  ;;  %v3994_v32 = vsel %vm126_vm0, %v3969_v2, %v3970_v41  ;;  %v7845_v50 = vor.u32 %v8210_v59, %v7844_v4  ;;  %v7849_v49 = vor.u32 %v8202_v10, %v7846_v52  ;;  %v8131_v17 = vld [vmem:[#allocation2 + $0x1d4] sm:$0xf0]  ;;  %v7534_v60 = vld [vmem:[#allocation2 + $0x1d8] sm:$0xf0] }
 0x4d5   :  { %v3968_v0 = vrot.slane %v3939_v42, 4  ;;  %v3995_v36 = vsel %vm1245_vm8, %v3941_v8, %v3994_v32  ;;  %v7525_v8 = vor.u32 %v8130_v25, %v7524_v6  ;;  %v7660_v25 = vld [vmem:[#allocation2 + $0x298] sm:$0xf]  ;;  %v7598_v6 = vld [vmem:[#allocation2 + $0x258] sm:$0xf0] }
 0x4d6   :  { %4035 = vst [vmem:[#allocation2 + $0x438] sm:$0xff] %v3995_v36  ;;  %5138 = vmatpush.bf16.msrb.mxu2 %v7845_v50  ;;  %5176 = vmatpush.bf16.msrb.mxu0 %v7849_v49  ;;  %v7790_v50 = vld [vmem:[#allocation2 + $0x3d8] sm:$0xf0] }
 0x4d7   :  { %5113 = vmatpush.bf16.msrb.mxu3 %v7717_v53  ;;  %v3990_v16 = vsel %vm126_vm0, %v3967_v61, %v3968_v0  ;;  %v3992_v35 = vsel %vm126_vm0, %v3968_v0, %v3969_v2  ;;  %v3957_v7 = vpop.permute.xlu0 %3956  ;;  %v8098_v53 = vld [vmem:[#allocation2 + $0xcc] sm:$0xf0]  ;;  %v7334_v0 = vld [vmem:[#allocation2 + $0x50] sm:$0xf0] }
 0x4d8   :  { %5151 = vmatpush.bf16.msrb.mxu1 %v7721_v57  ;;  %v3991_v44 = vsel %vm1245_vm8, %v10148_v58, %v3990_v16  ;;  %v3993_v47 = vsel %vm1245_vm8, %v3939_v42, %v3992_v35  ;;  %v3977_v58 = vrot.slane %v3957_v7, 4  ;;  %v7396_v57 = vld [vmem:[#allocation2 + $0x90] sm:$0xf]  ;;  %v7852_v41 = vld [vmem:[#allocation2 + $0x418] sm:$0xf]  ;;  %v7337_v36 = vor.u32 %v8074_v54, %v7334_v0 }
 0x4d9   :  { %4033 = vst [vmem:[#allocation2 + $0x428] sm:$0xff] %v3991_v44  ;;  %v7397_v18 = vor.u32 %v8098_v53, %v7396_v57  ;;  %v8203_v59 = vld [vmem:[#allocation2 + $0x41c] sm:$0xf]  ;;  %v7332_v35 = vld [vmem:[#allocation2 + $0x10] sm:$0xf] }
 0x4da   :  { %7894 = vmatmul.msk.bf16.vlgmr.msra.gmra.mxu2 %vm283_vm2, %v10059_v48  ;;  %4034 = vst [vmem:[#allocation2 + $0x430] sm:$0xff] %v3993_v47  ;;  %v4006_v30 = vsel %vm126_vm0, %v3976_v37, %v3977_v58  ;;  %v7333_v10 = vor.u32 %v8082_v23, %v7332_v35  ;;  %v8187_v47 = vld [vmem:[#allocation2 + $0x39c] sm:$0xf]  ;;  %v8115_v53 = vld [vmem:[#allocation2 + $0x154] sm:$0xf0] }
 0x4db   :  { %5114 = vmatpush.bf16.msrb.mxu3 %v7653_v45  ;;  %7896 = vmatmul.msk.bf16.vlgmr.msra.gmra.mxu0 %vm283_vm2, %v10059_v48  ;;  %v4007_v55 = vsel %vm1245_vm8, %v3955_v9, %v4006_v30  ;;  %v7788_v9 = vld [vmem:[#allocation2 + $0x398] sm:$0xf]  ;;  %v7793_v49 = vor.u32 %v8187_v47, %v7790_v50  ;;  %v8107_v57 = vld [vmem:[#allocation2 + $0x11c] sm:$0xf]  ;;  %v8188_v50 = vld [vmem:[#allocation2 + $0x3a4] sm:$0xf] }
 0x4dc   :  { %5152 = vmatpush.bf16.msrb.mxu1 %v7657_v14  ;;  %v3953_v61 = vpop.permute.xlu1 %3952  ;;  %4041 = vst [vmem:[#allocation2 + $0x468] sm:$0xff] %v4007_v55  ;;  %v7789_v44 = vor.u32 %v8195_v19, %v7788_v9  ;;  %v7596_v55 = vld [vmem:[#allocation2 + $0x218] sm:$0xf]  ;;  %v7406_v23 = vld [vmem:[#allocation2 + $0xd8] sm:$0xf0] }
 0x4dd   :  { %v3975_v63 = vrot.slane %v3953_v61, 4  ;;  %v8083_v0 = vld [vmem:[#allocation2 + $0x54] sm:$0xf0]  ;;  %v7342_v19 = vld [vmem:[#allocation2 + $0x58] sm:$0xf0] }
 0x4de   :  { %v8180_v54 = vld [vmem:[#allocation2 + $0x35c] sm:$0xf0]  ;;  %v7734_v9 = vld [vmem:[#allocation2 + $0x360] sm:$0xf0] }
 0x4df   :  { %5115 = vmatpush.bf16.msrb.mxu3 %v7589_v1  ;;  %v4002_v12 = vsel %vm126_vm0, %v3974_v20, %v3975_v63  ;;  %v4004_v46 = vsel %vm126_vm0, %v3975_v63, %v3976_v37  ;;  %v3979_v20 = vrot.slane %v8247_v3, 4  ;;  %v7729_v37 = vor.u32 %v8171_v31, %v7726_v34  ;;  %v8147_v63 = vld [vmem:[#allocation2 + $0x254] sm:$0xf0]  ;;  %v8139_v3 = vld [vmem:[#allocation2 + $0x21c] sm:$0xf] }
 0x4e0   :  { %5153 = vmatpush.bf16.msrb.mxu1 %v7593_v29  ;;  %v4003_v27 = vsel %vm1245_vm8, %v10166_v62, %v4002_v12  ;;  %v4005_v21 = vsel %vm1245_vm8, %v3953_v61, %v4004_v46  ;;  %v7398_v62 = vld [vmem:[#allocation2 + $0xd0] sm:$0xf0]  ;;  %v7662_v29 = vld [vmem:[#allocation2 + $0x2d8] sm:$0xf0]  ;;  %v7597_v40 = vor.u32 %v8147_v63, %v7596_v55  ;;  %v7601_v46 = vor.u32 %v8139_v3, %v7598_v6  ;;  %v8172_v47 = vld [vmem:[#allocation2 + $0x324] sm:$0xf] }
 0x4e1   :  { %4039 = vst [vmem:[#allocation2 + $0x458] sm:$0xff] %v4003_v27  ;;  %v7401_v2 = vor.u32 %v8090_v38, %v7398_v62  ;;  %v7665_v30 = vor.u32 %v8155_v22, %v7662_v29  ;;  %v7468_v62 = vld [vmem:[#allocation2 + $0x118] sm:$0xf]  ;;  %v7670_v34 = vld [vmem:[#allocation2 + $0x2e0] sm:$0xf0] }
 0x4e2   :  { %4040 = vst [vmem:[#allocation2 + $0x460] sm:$0xff] %v4005_v21  ;;  %5049 = vmatmul.bf16.gmra.mxu3 %v10155_v43  ;;  %v8204_v21 = vld [vmem:[#allocation2 + $0x424] sm:$0xf]  ;;  %v8099_v38 = vld [vmem:[#allocation2 + $0xd4] sm:$0xf0] }
 0x4e3   :  { %5116 = vmatpush.bf16.msrb.mxu3 %v7525_v8  ;;  %5087 = vmatmul.bf16.gmra.mxu1 %v10155_v43  ;;  %v8156_v31 = vld [vmem:[#allocation2 + $0x2a4] sm:$0xf]  ;;  %v8132_v63 = vld [vmem:[#allocation2 + $0x1dc] sm:$0xf0]  ;;  %v8213_v55 = vld [vmem:[#allocation2 + $0x464] sm:$0xf0] }
 0x4e4   :  { %5154 = vmatpush.bf16.msrb.mxu1 %v7529_v39  ;;  %v3959_v51 = vpop.permute.xlu1 %3958  ;;  %v7860_v39 = vld [vmem:[#allocation2 + $0x420] sm:$0xf]  ;;  %v7606_v29 = vld [vmem:[#allocation2 + $0x260] sm:$0xf0] }
 0x4e5   :  { %v3978_v11 = vrot.slane %v3959_v51, 4  ;;  %v8140_v22 = vld [vmem:[#allocation2 + $0x224] sm:$0xf] }
 0x4e6   :  { %v7542_v6 = vld [vmem:[#allocation2 + $0x1e0] sm:$0xf0] }
 0x4e7   :  { %5117 = vmatpush.bf16.msrb.mxu3 %v7461_v24  ;;  %v4008_v42 = vsel %vm126_vm0, %v3977_v58, %v3978_v11  ;;  %v4010_v26 = vsel %vm126_vm0, %v3978_v11, %v3979_v20  ;;  %v8163_v58 = vld [vmem:[#allocation2 + $0x2d4] sm:$0xf0]  ;;  %v8123_v20 = vld [vmem:[#allocation2 + $0x19c] sm:$0xf]  ;;  %v7469_v11 = vor.u32 %v8115_v53, %v7468_v62  ;;  %v8100_v53 = vld [vmem:[#allocation2 + $0xdc] sm:$0xf0] }
 0x4e8   :  { %5155 = vmatpush.bf16.msrb.mxu1 %v7465_v5  ;;  %v4009_v45 = vsel %vm1245_vm8, %v3957_v7, %v4008_v42  ;;  %v4011_v14 = vsel %vm1245_vm8, %v3959_v51, %v4010_v26  ;;  %v8211_v4 = vld [vmem:[#allocation2 + $0x454] sm:$0xf0]  ;;  %v7854_v52 = vld [vmem:[#allocation2 + $0x458] sm:$0xf0]  ;;  %v7661_v61 = vor.u32 %v8163_v58, %v7660_v25  ;;  %v7537_v5 = vor.u32 %v8123_v20, %v7534_v60  ;;  %v8148_v58 = vld [vmem:[#allocation2 + $0x25c] sm:$0xf0] }
 0x4e9   :  { %4042 = vst [vmem:[#allocation2 + $0x470] sm:$0xff] %v4009_v45  ;;  %v7853_v32 = vor.u32 %v8211_v4, %v7852_v41  ;;  %v7857_v16 = vor.u32 %v8203_v59, %v7854_v52  ;;  %v7724_v7 = vld [vmem:[#allocation2 + $0x318] sm:$0xf]  ;;  %v8212_v8 = vld [vmem:[#allocation2 + $0x45c] sm:$0xf0] }
 0x4ea   :  { %4043 = vst [vmem:[#allocation2 + $0x478] sm:$0xff] %v4011_v14  ;;  %7895 = vmatmul.msk.bf16.gmra.mxu2 %vm283_vm2, %v10118_v13  ;;  %v7725_v1 = vor.u32 %v8179_v33, %v7724_v7  ;;  %v7862_v12 = vld [vmem:[#allocation2 + $0x460] sm:$0xf0]  ;;  %v7861_v27 = vor.u32 %v8212_v8, %v7860_v39  ;;  %v7532_v24 = vld [vmem:[#allocation2 + $0x198] sm:$0xf] }
 0x4eb   :  { %5118 = vmatpush.bf16.msrb.mxu3 %v7397_v18  ;;  %7897 = vmatmul.msk.bf16.gmra.mxu0 %vm283_vm2, %v10118_v13  ;;  %v7865_v28 = vor.u32 %v8204_v21, %v7862_v12  ;;  %v7533_v56 = vor.u32 %v8131_v17, %v7532_v24  ;;  %v7470_v51 = vld [vmem:[#allocation2 + $0x158] sm:$0xf0]  ;;  %v7404_v42 = vld [vmem:[#allocation2 + $0x98] sm:$0xf]  ;;  %v8196_v14 = vld [vmem:[#allocation2 + $0x3dc] sm:$0xf0] }
 0x4ec   :  { %5156 = vmatpush.bf16.msrb.mxu1 %v7401_v2  ;;  %5214 = vmatpush.bf16.msra.mxu2 %v7853_v32  ;;  %v7473_v18 = vor.u32 %v8107_v57, %v7470_v51  ;;  %v7405_v26 = vor.u32 %v8099_v38, %v7404_v42  ;;  %v8091_v2 = vld [vmem:[#allocation2 + $0x9c] sm:$0xf]  ;;  %v7340_v45 = vld [vmem:[#allocation2 + $0x18] sm:$0xf]  ;;  %v7798_v52 = vld [vmem:[#allocation2 + $0x3e0] sm:$0xf0] }
 0x4ed   :  { %5252 = vmatpush.bf16.msra.mxu0 %v7857_v16  ;;  %v7409_v41 = vor.u32 %v8091_v2, %v7406_v23  ;;  %v7341_v4 = vor.u32 %v8083_v0, %v7340_v45  ;;  %v8075_v59 = vld [vmem:[#allocation2 + $0x1c] sm:$0xf]  ;;  %v7796_v16 = vld [vmem:[#allocation2 + $0x3a0] sm:$0xf]  ;;  %v8124_v12 = vld [vmem:[#allocation2 + $0x1a4] sm:$0xf] }
 0x4ee   :  { %v7345_v32 = vor.u32 %v8075_v59, %v7342_v19  ;;  %v7797_v35 = vor.u32 %v8196_v14, %v7796_v16  ;;  %v8164_v33 = vld [vmem:[#allocation2 + $0x2dc] sm:$0xf0]  ;;  %v7545_v39 = vor.u32 %v8124_v12, %v7542_v6  ;;  %v8108_v20 = vld [vmem:[#allocation2 + $0x124] sm:$0xf]  ;;  %v8197_v42 = vld [vmem:[#allocation2 + $0x3e4] sm:$0xf0] }
 0x4ef   :  { %5119 = vmatpush.bf16.msrb.mxu3 %v7333_v10  ;;  %v7801_v10 = vor.u32 %v8188_v50, %v7798_v52  ;;  %v7668_v7 = vld [vmem:[#allocation2 + $0x2a0] sm:$0xf]  ;;  %v7414_v51 = vld [vmem:[#allocation2 + $0xe0] sm:$0xf0]  ;;  %v7806_v2 = vld [vmem:[#allocation2 + $0x3e8] sm:$0xf0] }
 0x4f0   :  { %5157 = vmatpush.bf16.msrb.mxu1 %v7337_v36  ;;  %v7732_v36 = vld [vmem:[#allocation2 + $0x320] sm:$0xf]  ;;  %v8092_v57 = vld [vmem:[#allocation2 + $0xa4] sm:$0xf]  ;;  %v7804_v19 = vld [vmem:[#allocation2 + $0x3a8] sm:$0xf] }
 0x4f1   :  { %v7604_v25 = vld [vmem:[#allocation2 + $0x220] sm:$0xf]  ;;  %v7350_v23 = vld [vmem:[#allocation2 + $0x60] sm:$0xf0]  ;;  %v7805_v14 = vor.u32 %v8197_v42, %v7804_v19  ;;  %v8181_v52 = vld [vmem:[#allocation2 + $0x364] sm:$0xf0]  ;;  %v10263_v19 = vpop.permute.xlu0 %4203 }
 0x4f2   :  { %5120 = vmatmul.bf16.vlgmr.msrb.gmra.mxu3 %v10093_v15  ;;  %v7540_v8 = vld [vmem:[#allocation2 + $0x1a0] sm:$0xf]  ;;  %v8076_v0 = vld [vmem:[#allocation2 + $0x24] sm:$0xf]  ;;  %v7740_v16 = vld [vmem:[#allocation2 + $0x328] sm:$0xf] }
 0x4f3   :  { %5188 = vmatpush.bf16.msra.mxu3 %v7789_v44  ;;  %5158 = vmatmul.bf16.vlgmr.msrb.gmra.mxu1 %v10093_v15  ;;  %v7733_v44 = vor.u32 %v8180_v54, %v7732_v36  ;;  %v7541_v3 = vor.u32 %v8132_v63, %v7540_v8  ;;  %v8116_v21 = vld [vmem:[#allocation2 + $0x15c] sm:$0xf0]  ;;  %v7353_v45 = vor.u32 %v8076_v0, %v7350_v23  ;;  %v8173_v50 = vld [vmem:[#allocation2 + $0x32c] sm:$0xf]  ;;  %v8165_v54 = vld [vmem:[#allocation2 + $0x2e4] sm:$0xf0] }
 0x4f4   :  { %5226 = vmatpush.bf16.msra.mxu1 %v7793_v49  ;;  %v7737_v49 = vor.u32 %v8172_v47, %v7734_v9  ;;  %v7476_v24 = vld [vmem:[#allocation2 + $0x120] sm:$0xf]  ;;  %v7678_v36 = vld [vmem:[#allocation2 + $0x2e8] sm:$0xf0]  ;;  %v8117_v12 = vld [vmem:[#allocation2 + $0x164] sm:$0xf0] }
 0x4f5   :  { %v7412_v62 = vld [vmem:[#allocation2 + $0xa0] sm:$0xf]  ;;  %v8125_v6 = vld [vmem:[#allocation2 + $0x1ac] sm:$0xf]  ;;  %v8085_v0 = vld [vmem:[#allocation2 + $0x64] sm:$0xf0] }
 0x4f6   :  { %v8084_v38 = vld [vmem:[#allocation2 + $0x5c] sm:$0xf0] }
 0x4f7   :  { %5189 = vmatpush.bf16.msra.mxu3 %v7725_v1  ;;  %v7669_v1 = vor.u32 %v8164_v33, %v7668_v7  ;;  %v7614_v7 = vld [vmem:[#allocation2 + $0x268] sm:$0xf0] }
 0x4f8   :  { %5227 = vmatpush.bf16.msra.mxu1 %v7729_v37  ;;  %v7673_v37 = vor.u32 %v8156_v31, %v7670_v34  ;;  %v8149_v34 = vld [vmem:[#allocation2 + $0x264] sm:$0xf0] }
 0x4fa   :  { %7898 = vmatmul.msk.bf16.vlgmr.msrb.gmra.mxu2 %vm283_vm2, %v10059_v48 }
 0x4fb   :  { %5190 = vmatpush.bf16.msra.mxu3 %v7661_v61  ;;  %7900 = vmatmul.msk.bf16.vlgmr.msrb.gmra.mxu0 %vm283_vm2, %v10059_v48  ;;  %v7605_v61 = vor.u32 %v8148_v58, %v7604_v25  ;;  %v8141_v58 = vld [vmem:[#allocation2 + $0x22c] sm:$0xf]  ;;  %v8133_v25 = vld [vmem:[#allocation2 + $0x1e4] sm:$0xf0] }
 0x4fc   :  { %5228 = vmatpush.bf16.msra.mxu1 %v7665_v30  ;;  %5290 = vmatpush.bf16.msrb.mxu2 %v7861_v27  ;;  %v7609_v30 = vor.u32 %v8140_v22, %v7606_v29  ;;  %v8205_v27 = vld [vmem:[#allocation2 + $0x42c] sm:$0xf]  ;;  %v7617_v29 = vor.u32 %v8141_v58, %v7614_v7  ;;  %v10277_v58 = vpop.permute.xlu1 %4208 }
 0x4fd   :  { %5328 = vmatpush.bf16.msrb.mxu0 %v7865_v28  ;;  %v7478_v28 = vld [vmem:[#allocation2 + $0x160] sm:$0xf0]  ;;  %v7550_v22 = vld [vmem:[#allocation2 + $0x1e8] sm:$0xf0] }
 0x4ff   :  { %5191 = vmatpush.bf16.msra.mxu3 %v7597_v40  ;;  %v7870_v40 = vld [vmem:[#allocation2 + $0x468] sm:$0xf0] }
 0x500   :  { %5229 = vmatpush.bf16.msra.mxu1 %v7601_v46  ;;  %v7868_v46 = vld [vmem:[#allocation2 + $0x428] sm:$0xf]  ;;  %v7873_v60 = vor.u32 %v8205_v27, %v7870_v40  ;;  %v7553_v40 = vor.u32 %v8125_v6, %v7550_v22  ;;  %v8166_v6 = vld [vmem:[#allocation2 + $0x2ec] sm:$0xf0] }
 0x501   :  { %v7869_v17 = vor.u32 %v8213_v55, %v7868_v46  ;;  %v8214_v55 = vld [vmem:[#allocation2 + $0x46c] sm:$0xf0] }
 0x502   :  { %5125 = vmatmul.bf16.gmra.mxu3 %v10155_v43 }
 0x503   :  { %5192 = vmatpush.bf16.msra.mxu3 %v7533_v56  ;;  %5163 = vmatmul.bf16.gmra.mxu1 %v10155_v43  ;;  %v7477_v56 = vor.u32 %v8116_v21, %v7476_v24  ;;  %v8206_v21 = vld [vmem:[#allocation2 + $0x434] sm:$0xf] }
 0x504   :  { %5230 = vmatpush.bf16.msra.mxu1 %v7537_v5  ;;  %v7481_v5 = vor.u32 %v8108_v20, %v7478_v28 }
 0x507   :  { %5193 = vmatpush.bf16.msra.mxu3 %v7469_v11  ;;  %v7413_v11 = vor.u32 %v8100_v53, %v7412_v62 }
 0x508   :  { %5231 = vmatpush.bf16.msra.mxu1 %v7473_v18  ;;  %v7417_v18 = vor.u32 %v8092_v57, %v7414_v51  ;;  %v8101_v51 = vld [vmem:[#allocation2 + $0xe4] sm:$0xf0] }
 0x50a   :  { %7899 = vmatmul.msk.bf16.gmra.mxu2 %vm283_vm2, %v10118_v13 }
 0x50b   :  { %5194 = vmatpush.bf16.msra.mxu3 %v7405_v26  ;;  %7901 = vmatmul.msk.bf16.gmra.mxu0 %vm283_vm2, %v10118_v13  ;;  %v7348_v26 = vld [vmem:[#allocation2 + $0x20] sm:$0xf] }
 0x50c   :  { %5232 = vmatpush.bf16.msra.mxu1 %v7409_v41  ;;  %v7349_v41 = vor.u32 %v8084_v38, %v7348_v26 }
 0x50f   :  { %5195 = vmatpush.bf16.msra.mxu3 %v7341_v4  ;;  %v8189_v4 = vld [vmem:[#allocation2 + $0x3ac] sm:$0xf]  ;;  %v10249_v8 = vpop.permute.xlu2 %4198 }
 0x510   :  { %5233 = vmatpush.bf16.msra.mxu1 %v7345_v32  ;;  %v7809_v59 = vor.u32 %v8189_v4, %v7806_v2  ;;  %v7742_v32 = vld [vmem:[#allocation2 + $0x368] sm:$0xf0] }
 0x511   :  { %v8093_v2 = vld [vmem:[#allocation2 + $0xac] sm:$0xf] }
 0x512   :  { %5196 = vmatmul.bf16.vlgmr.msra.gmra.mxu3 %v10093_v15  ;;  %v7358_v4 = vld [vmem:[#allocation2 + $0x68] sm:$0xf0] }
 0x513   :  { %5264 = vmatpush.bf16.msrb.mxu3 %v7797_v35  ;;  %5234 = vmatmul.bf16.vlgmr.msra.gmra.mxu1 %v10093_v15  ;;  %v7741_v35 = vor.u32 %v8181_v52, %v7740_v16  ;;  %v7814_v16 = vld [vmem:[#allocation2 + $0x3f0] sm:$0xf0] }
 0x514   :  { %5302 = vmatpush.bf16.msrb.mxu1 %v7801_v10  ;;  %v7745_v10 = vor.u32 %v8173_v50, %v7742_v32  ;;  %v7356_v32 = vld [vmem:[#allocation2 + $0x28] sm:$0xf] }
 0x517   :  { %5265 = vmatpush.bf16.msrb.mxu3 %v7733_v44  ;;  %v7676_v44 = vld [vmem:[#allocation2 + $0x2a8] sm:$0xf] }
 0x518   :  { %5303 = vmatpush.bf16.msrb.mxu1 %v7737_v49  ;;  %v7677_v47 = vor.u32 %v8165_v54, %v7676_v44  ;;  %v8157_v49 = vld [vmem:[#allocation2 + $0x2ac] sm:$0xf] }
 0x519   :  { %v7681_v33 = vor.u32 %v8157_v49, %v7678_v36  ;;  %v8077_v54 = vld [vmem:[#allocation2 + $0x2c] sm:$0xf]  ;;  %v8190_v49 = vld [vmem:[#allocation2 + $0x3b4] sm:$0xf] }
 0x51a   :  { %7902 = vmatmul.msk.bf16.vlgmr.msra.gmra.mxu2 %vm283_vm2, %v10059_v48  ;;  %v7361_v44 = vor.u32 %v8077_v54, %v7358_v4  ;;  %v7492_v54 = vld [vmem:[#allocation2 + $0x130] sm:$0xf] }
 0x51b   :  { %5266 = vmatpush.bf16.msrb.mxu3 %v7669_v1  ;;  %7904 = vmatmul.msk.bf16.vlgmr.msra.gmra.mxu0 %vm283_vm2, %v10059_v48  ;;  %v7612_v1 = vld [vmem:[#allocation2 + $0x228] sm:$0xf] }
 0x51c   :  { %5304 = vmatpush.bf16.msrb.mxu1 %v7673_v37  ;;  %5366 = vmatpush.bf16.msra.mxu2 %v7869_v17  ;;  %v7613_v37 = vor.u32 %v8149_v34, %v7612_v1  ;;  %v7486_v17 = vld [vmem:[#allocation2 + $0x168] sm:$0xf0]  ;;  %v8182_v34 = vld [vmem:[#allocation2 + $0x36c] sm:$0xf0]  ;;  %v7750_v1 = vld [vmem:[#allocation2 + $0x370] sm:$0xf0] }
 0x51d   :  { %5404 = vmatpush.bf16.msra.mxu0 %v7873_v60  ;;  %v7484_v60 = vld [vmem:[#allocation2 + $0x128] sm:$0xf] }
 0x51e   :  { %v7485_v20 = vor.u32 %v8117_v12, %v7484_v60 }
 0x51f   :  { %5267 = vmatpush.bf16.msrb.mxu3 %v7605_v61 }
 0x520   :  { %5305 = vmatpush.bf16.msrb.mxu1 %v7609_v30  ;;  %v7548_v30 = vld [vmem:[#allocation2 + $0x1a8] sm:$0xf] }
 0x521   :  { %v7549_v63 = vor.u32 %v8133_v25, %v7548_v30  ;;  %v8174_v25 = vld [vmem:[#allocation2 + $0x334] sm:$0xf] }
 0x522   :  { %5201 = vmatmul.bf16.gmra.mxu3 %v10155_v43 }
 0x523   :  { %5268 = vmatpush.bf16.msrb.mxu3 %v7541_v3  ;;  %5239 = vmatmul.bf16.gmra.mxu1 %v10155_v43  ;;  %v7878_v3 = vld [vmem:[#allocation2 + $0x470] sm:$0xf0] }
 0x524   :  { %5306 = vmatpush.bf16.msrb.mxu1 %v7545_v39  ;;  %v7876_v39 = vld [vmem:[#allocation2 + $0x430] sm:$0xf] }
 0x525   :  { %v7877_v27 = vor.u32 %v8214_v55, %v7876_v39  ;;  %v8158_v39 = vld [vmem:[#allocation2 + $0x2b4] sm:$0xf] }
 0x527   :  { %5269 = vmatpush.bf16.msrb.mxu3 %v7477_v56  ;;  %v7881_v56 = vor.u32 %v8206_v21, %v7878_v3  ;;  %v7684_v3 = vld [vmem:[#allocation2 + $0x2b0] sm:$0xf] }
 0x528   :  { %5307 = vmatpush.bf16.msrb.mxu1 %v7481_v5  ;;  %v8109_v5 = vld [vmem:[#allocation2 + $0x12c] sm:$0xf]  ;;  %v8150_v21 = vld [vmem:[#allocation2 + $0x26c] sm:$0xf0] }
 0x529   :  { %v7489_v53 = vor.u32 %v8109_v5, %v7486_v17 }
 0x52a   :  { %7903 = vmatmul.msk.bf16.gmra.mxu2 %vm283_vm2, %v10118_v13 }
 0x52b   :  { %5270 = vmatpush.bf16.msrb.mxu3 %v7413_v11  ;;  %7905 = vmatmul.msk.bf16.gmra.mxu0 %vm283_vm2, %v10118_v13  ;;  %v7422_v11 = vld [vmem:[#allocation2 + $0xe8] sm:$0xf0] }
 0x52c   :  { %5308 = vmatpush.bf16.msrb.mxu1 %v7417_v18  ;;  %v5026_v9 = vpop.f32.mrf.mxu1  ;;  %v7420_v18 = vld [vmem:[#allocation2 + $0xa8] sm:$0xf] }
 0x52d   :  { %v7421_v26 = vor.u32 %v8101_v51, %v7420_v18 }
 0x52f   :  { %5271 = vmatpush.bf16.msrb.mxu3 %v7349_v41  ;;  %v7425_v41 = vor.u32 %v8093_v2, %v7422_v11  ;;  %v7556_v2 = vld [vmem:[#allocation2 + $0x1b0] sm:$0xf] }
 0x530   :  { %5309 = vmatpush.bf16.msrb.mxu1 %v7353_v45 }
 0x531   :  { %v4988_v31 = vpop.f32.mrf.mxu3 }
 0x532   :  { %5272 = vmatmul.bf16.vlgmr.msrb.gmra.mxu3 %v10093_v15 }
 0x533   :  { %5340 = vmatpush.bf16.msra.mxu3 %v7805_v14  ;;  %5310 = vmatmul.bf16.vlgmr.msrb.gmra.mxu1 %v10093_v15 }
 0x534   :  { %5378 = vmatpush.bf16.msra.mxu1 %v7809_v59  ;;  %v5028_v61 = vpop.f32.mrf.mxu1  ;;  %v8198_v59 = vld [vmem:[#allocation2 + $0x3ec] sm:$0xf0] }
 0x537   :  { %5341 = vmatpush.bf16.msra.mxu3 %v7741_v35 }
 0x538   :  { %5379 = vmatpush.bf16.msra.mxu1 %v7745_v10  ;;  %v5007_v46 = vpop.f32.mrf.mxu0  ;;  %v7357_v10 = vor.u32 %v8085_v0, %v7356_v32  ;;  %v8126_v0 = vld [vmem:[#allocation2 + $0x1b4] sm:$0xf] }
 0x539   :  { %v4990_v28 = vpop.f32.mrf.mxu3  ;;  %v5008_v24 = vadd.f32 %v5007_v46, %v10249_v8  ;;  %v7685_v46 = vor.u32 %v8166_v6, %v7684_v3 }
 0x53a   :  { %7906 = vmatmul.msk.bf16.vlgmr.msrb.gmra.mxu2 %vm283_vm2, %v10059_v48 }
 0x53b   :  { %5342 = vmatpush.bf16.msra.mxu3 %v7677_v47  ;;  %7908 = vmatmul.msk.bf16.vlgmr.msrb.gmra.mxu0 %vm283_vm2, %v10059_v48  ;;  %v10256_v62 = vadd.f32 %v5026_v9, %v5008_v24  ;;  %v7812_v9 = vld [vmem:[#allocation2 + $0x3b0] sm:$0xf] }
 0x53c   :  { %5380 = vmatpush.bf16.msra.mxu1 %v7681_v33  ;;  %5442 = vmatpush.bf16.msrb.mxu2 %v7877_v27  ;;  %v5031_v42 = vpop.f32.mrf.mxu1  ;;  %v7813_v47 = vor.u32 %v8198_v59, %v7812_v9  ;;  %v7817_v33 = vor.u32 %v8190_v49, %v7814_v16  ;;  %v8118_v59 = vld [vmem:[#allocation2 + $0x16c] sm:$0xf0]  ;;  %v8215_v9 = vld [vmem:[#allocation2 + $0x474] sm:$0xf0]  ;;  %v7886_v49 = vld [vmem:[#allocation2 + $0x478] sm:$0xf0] }
 0x53d   :  { %5480 = vmatpush.bf16.msrb.mxu0 %v7881_v56  ;;  %v4969_v57 = vpop.f32.mrf.mxu2  ;;  %v11860_v38 = vmax.f32 %v10256_v62, 0.0  ;;  %v10289_v56 = vpop.permute.xlu2 %4213 }
 0x53e   :  { %v4970_v23 = vadd.f32 %v4969_v57, %v10249_v8 }
 0x53f   :  { %5343 = vmatpush.bf16.msra.mxu3 %v7613_v37  ;;  %5834 = vrot.lane.b32.xlu1 %v11860_v38, %s8273_s9  ;;  %v7748_v37 = vld [vmem:[#allocation2 + $0x330] sm:$0xf] }
 0x540   :  { %5381 = vmatpush.bf16.msra.mxu1 %v7617_v29  ;;  %v10265_v45 = vadd.f32 %v4988_v31, %v4970_v23  ;;  %v5009_v14 = vpop.f32.mrf.mxu0  ;;  %v7749_v29 = vor.u32 %v8182_v34, %v7748_v37  ;;  %v8134_v23 = vld [vmem:[#allocation2 + $0x1ec] sm:$0xf0] }
 0x541   :  { %v5010_v52 = vadd.f32 %v5009_v14, %v10263_v19  ;;  %v4993_v35 = vpop.f32.mrf.mxu3  ;;  %v8102_v37 = vld [vmem:[#allocation2 + $0xec] sm:$0xf0] }
 0x542   :  { %v11861_v50 = vmax.f32 %v10265_v45, 0.0  ;;  %5277 = vmatmul.bf16.gmra.mxu3 %v10155_v43 }
 0x543   :  { %5344 = vmatpush.bf16.msra.mxu3 %v7549_v63  ;;  %v10270_v36 = vadd.f32 %v5028_v61, %v5010_v52  ;;  %5315 = vmatmul.bf16.gmra.mxu1 %v10155_v43  ;;  %v7753_v63 = vor.u32 %v8174_v25, %v7750_v1 }
 0x544   :  { %5382 = vmatpush.bf16.msra.mxu1 %v7553_v40  ;;  %5832 = vrot.lane.b32.xlu0 %v11861_v50, %s8273_s9  ;;  %v5033_v30 = vpop.f32.mrf.mxu1  ;;  %v7686_v40 = vld [vmem:[#allocation2 + $0x2f0] sm:$0xf0] }
 0x545   :  { %11973 = vst [vmem:[#allocation5_spill] sm:$0xff] %v10270_v36  ;;  %v4971_v7 = vpop.f32.mrf.mxu2  ;;  %v7689_v27 = vor.u32 %v8158_v39, %v7686_v40 }
 0x546   :  { %v4972_v31 = vadd.f32 %v4971_v7, %v10263_v19 }
 0x547   :  { %5345 = vmatpush.bf16.msra.mxu3 %v7485_v20  ;;  %v7620_v20 = vld [vmem:[#allocation2 + $0x230] sm:$0xf] }
 0x548   :  { %5383 = vmatpush.bf16.msra.mxu1 %v7489_v53  ;;  %v10279_v61 = vadd.f32 %v4990_v28, %v4972_v31  ;;  %v5012_v22 = vpop.f32.mrf.mxu0  ;;  %v7622_v28 = vld [vmem:[#allocation2 + $0x270] sm:$0xf0]  ;;  %v7621_v5 = vor.u32 %v8150_v21, %v7620_v20  ;;  %v7884_v31 = vld [vmem:[#allocation2 + $0x438] sm:$0xf] }
 0x549   :  { %v5013_v55 = vadd.f32 %v5012_v22, %v10277_v58  ;;  %v4995_v17 = vpop.f32.mrf.mxu3  ;;  %v8142_v53 = vld [vmem:[#allocation2 + $0x234] sm:$0xf]  ;;  %v7885_v25 = vor.u32 %v8215_v9, %v7884_v31  ;;  %v8207_v22 = vld [vmem:[#allocation2 + $0x43c] sm:$0xf]  ;;  %v7692_v31 = vld [vmem:[#allocation2 + $0x2b8] sm:$0xf] }
 0x54a   :  { %11974 = vst [vmem:[#allocation6_spill] sm:$0xff] %v10279_v61  ;;  %7907 = vmatmul.msk.bf16.gmra.mxu2 %vm283_vm2, %v10118_v13  ;;  %v7625_v18 = vor.u32 %v8142_v53, %v7622_v28  ;;  %v7889_v6 = vor.u32 %v8207_v22, %v7886_v49  ;;  %v7820_v28 = vld [vmem:[#allocation2 + $0x3b8] sm:$0xf]  ;;  %v8191_v53 = vld [vmem:[#allocation2 + $0x3bc] sm:$0xf] }
 0x54b   :  { %5346 = vmatpush.bf16.msra.mxu3 %v7421_v26  ;;  %v10284_v12 = vadd.f32 %v5031_v42, %v5013_v55  ;;  %7909 = vmatmul.msk.bf16.gmra.mxu0 %vm283_vm2, %v10118_v13  ;;  %v7558_v42 = vld [vmem:[#allocation2 + $0x1f0] sm:$0xf0]  ;;  %v7428_v55 = vld [vmem:[#allocation2 + $0xb0] sm:$0xf]  ;;  %v8167_v49 = vld [vmem:[#allocation2 + $0x2f4] sm:$0xf0] }
 0x54c   :  { %5384 = vmatpush.bf16.msra.mxu1 %v7425_v41  ;;  %v7557_v41 = vor.u32 %v8134_v23, %v7556_v2  ;;  %v7561_v4 = vor.u32 %v8126_v0, %v7558_v42  ;;  %v7429_v3 = vor.u32 %v8102_v37, %v7428_v55  ;;  %v8078_v23 = vld [vmem:[#allocation2 + $0x34] sm:$0xf]  ;;  %v7693_v22 = vor.u32 %v8167_v49, %v7692_v31  ;;  %v8151_v55 = vld [vmem:[#allocation2 + $0x274] sm:$0xf0] }
 0x54d   :  { %11975 = vst [vmem:[#allocation7_spill] sm:$0xff] %v10284_v12  ;;  %v4974_v60 = vpop.f32.mrf.mxu2  ;;  %v8103_v49 = vld [vmem:[#allocation2 + $0xf4] sm:$0xf0] }
 0x54e   :  { %v4975_v24 = vadd.f32 %v4974_v60, %v10277_v58  ;;  %v7366_v60 = vld [vmem:[#allocation2 + $0x70] sm:$0xf0]  ;;  %v7436_v31 = vld [vmem:[#allocation2 + $0xb8] sm:$0xf] }
 0x54f   :  { %5347 = vmatpush.bf16.msra.mxu3 %v7357_v10 }
 0x550   :  { %5385 = vmatpush.bf16.msra.mxu1 %v7361_v44  ;;  %v10291_v51 = vadd.f32 %v4993_v35, %v4975_v24  ;;  %v5014_v11 = vpop.f32.mrf.mxu0  ;;  %v5083_v57 = vpop.f32.mrf.mxu1  ;;  %v7494_v35 = vld [vmem:[#allocation2 + $0x170] sm:$0xf0]  ;;  %v7493_v44 = vor.u32 %v8118_v59, %v7492_v54  ;;  %v8199_v24 = vld [vmem:[#allocation2 + $0x3f4] sm:$0xf0]  ;;  %v8175_v54 = vld [vmem:[#allocation2 + $0x33c] sm:$0xf] }
 0x551   :  { %v5015_v26 = vadd.f32 %v5014_v11, %v10289_v56  ;;  %v5084_v52 = vadd.f32 %v5083_v57, %v10249_v8  ;;  %v7822_v11 = vld [vmem:[#allocation2 + $0x3f8] sm:$0xf0]  ;;  %v7821_v0 = vor.u32 %v8199_v24, %v7820_v28  ;;  %v8135_v24 = vld [vmem:[#allocation2 + $0x1f4] sm:$0xf0] }
 0x552   :  { %11976 = vst [vmem:[#allocation8_spill] sm:$0xff] %v10291_v51  ;;  %5348 = vmatmul.bf16.vlgmr.msra.gmra.mxu3 %v10093_v15  ;;  %v7825_v59 = vor.u32 %v8191_v53, %v7822_v11  ;;  %v7566_v53 = vld [vmem:[#allocation2 + $0x1f8] sm:$0xf0] }
 0x553   :  { %5416 = vmatpush.bf16.msrb.mxu3 %v7813_v47  ;;  %5386 = vmatmul.bf16.vlgmr.msra.gmra.mxu1 %v10093_v15  ;;  %v10296_v14 = vadd.f32 %v5033_v30, %v5015_v26  ;;  %v8110_v47 = vld [vmem:[#allocation2 + $0x134] sm:$0xf] }
 0x554   :  { %5454 = vmatpush.bf16.msrb.mxu1 %v7817_v33  ;;  %v7497_v1 = vor.u32 %v8110_v47, %v7494_v35  ;;  %v7430_v30 = vld [vmem:[#allocation2 + $0xf0] sm:$0xf0] }
 0x555   :  { %11977 = vst [vmem:[#allocation9_spill] sm:$0xff] %v10296_v14  ;;  %v4976_v32 = vpop.f32.mrf.mxu2  ;;  %v5045_v16 = vpop.f32.mrf.mxu3 }
 0x556   :  { %v4977_v10 = vadd.f32 %v4976_v32, %v10289_v56  ;;  %v7758_v32 = vld [vmem:[#allocation2 + $0x378] sm:$0xf0] }
 0x557   :  { %5417 = vmatpush.bf16.msrb.mxu3 %v7749_v29  ;;  %v7761_v47 = vor.u32 %v8175_v54, %v7758_v32  ;;  %v7500_v32 = vld [vmem:[#allocation2 + $0x138] sm:$0xf] }
 0x558   :  { %5455 = vmatpush.bf16.msrb.mxu1 %v7753_v63  ;;  %v10300_v33 = vadd.f32 %v4995_v17, %v4977_v10  ;;  %v5085_v34 = vpop.f32.mrf.mxu1  ;;  %v5102_v7 = vpop.f32.mrf.mxu0  ;;  %v5046_v63 = vadd.f32 %v5045_v16, %v10249_v8  ;;  %v8086_v17 = vld [vmem:[#allocation2 + $0x6c] sm:$0xf0]  ;;  %v7756_v16 = vld [vmem:[#allocation2 + $0x338] sm:$0xf] }
 0x559   :  { %v10302_v29 = vadd.f32 %v5102_v7, %v5084_v52  ;;  %v5086_v57 = vadd.f32 %v5085_v34, %v10263_v19  ;;  %v8183_v52 = vld [vmem:[#allocation2 + $0x374] sm:$0xf0]  ;;  %v7694_v7 = vld [vmem:[#allocation2 + $0x2f8] sm:$0xf0] }
 0x55a   :  { %11978 = vst [vmem:[#allocation10_spill] sm:$0xff] %v10300_v33  ;;  %7910 = vmatmul.msk.bf16.vlgmr.msra.gmra.mxu2 %vm283_vm2, %v10059_v48  ;;  %v7757_v10 = vor.u32 %v8183_v52, %v7756_v16  ;;  %v7502_v52 = vld [vmem:[#allocation2 + $0x178] sm:$0xf0] }
 0x55b   :  { %5418 = vmatpush.bf16.msrb.mxu3 %v7685_v46  ;;  %v11857_v40 = vmax.f32 %v10302_v29, 0.0  ;;  %7912 = vmatmul.msk.bf16.vlgmr.msra.gmra.mxu0 %vm283_vm2, %v10059_v48  ;;  %v8094_v46 = vld [vmem:[#allocation2 + $0xb4] sm:$0xf] }
 0x55c   :  { %5456 = vmatpush.bf16.msrb.mxu1 %v7689_v27  ;;  %5518 = vmatpush.bf16.msra.mxu2 %v7885_v25  ;;  %v7433_v39 = vor.u32 %v8094_v46, %v7430_v30  ;;  %v8159_v30 = vld [vmem:[#allocation2 + $0x2bc] sm:$0xf]  ;;  %v7628_v46 = vld [vmem:[#allocation2 + $0x238] sm:$0xf] }
 0x55d   :  { %5556 = vmatpush.bf16.msra.mxu0 %v7889_v6  ;;  %5838 = vrot.lane.b32.xlu0 %v11857_v40, %s8273_s9  ;;  %v5047_v27 = vpop.f32.mrf.mxu3  ;;  %v5064_v21 = vpop.f32.mrf.mxu2  ;;  %v7697_v6 = vor.u32 %v8159_v30, %v7694_v7  ;;  %v8095_v30 = vld [vmem:[#allocation2 + $0xbc] sm:$0xf] }
 0x55e   :  { %v10313_v20 = vadd.f32 %v5064_v21, %v5046_v63  ;;  %v5048_v35 = vadd.f32 %v5047_v27, %v10263_v19  ;;  %v8143_v27 = vld [vmem:[#allocation2 + $0x23c] sm:$0xf] }
 0x55f   :  { %5419 = vmatpush.bf16.msrb.mxu3 %v7621_v5  ;;  %v7364_v5 = vld [vmem:[#allocation2 + $0x30] sm:$0xf] }
 0x560   :  { %5457 = vmatpush.bf16.msrb.mxu1 %v7625_v18  ;;  %v7365_v18 = vor.u32 %v8086_v17, %v7364_v5  ;;  %v11859_v42 = vmax.f32 %v10313_v20, 0.0  ;;  %v5088_v26 = vpop.f32.mrf.mxu1  ;;  %v5104_v2 = vpop.f32.mrf.mxu0  ;;  %v7629_v17 = vor.u32 %v8151_v55, %v7628_v46 }
 0x562   :  { %5353 = vmatmul.bf16.gmra.mxu3 %v10155_v43  ;;  %5836 = vrot.lane.b32.xlu2 %v11859_v42, %s8273_s9 }
 0x563   :  { %5420 = vmatpush.bf16.msrb.mxu3 %v7557_v41  ;;  %v7369_v41 = vor.u32 %v8078_v23, %v7366_v60  ;;  %5391 = vmatmul.bf16.gmra.mxu1 %v10155_v43 }
 0x564   :  { %5458 = vmatpush.bf16.msrb.mxu1 %v7561_v4  ;;  %v10317_v4 = vadd.f32 %v5104_v2, %v5086_v57  ;;  %v7564_v57 = vld [vmem:[#allocation2 + $0x1b8] sm:$0xf]  ;;  %v8127_v2 = vld [vmem:[#allocation2 + $0x1bc] sm:$0xf] }
 0x565   :  { %v5050_v9 = vpop.f32.mrf.mxu3 }
 0x566   :  { %11979 = vst [vmem:[#allocation11_spill] sm:$0xff] %v10317_v4 }
 0x567   :  { %5421 = vmatpush.bf16.msrb.mxu3 %v7493_v44  ;;  %v5066_v44 = vpop.f32.mrf.mxu2 }
 0x568   :  { %5459 = vmatpush.bf16.msrb.mxu1 %v7497_v1  ;;  %v10325_v34 = vadd.f32 %v5066_v44, %v5048_v35  ;;  %v5089_v1 = vadd.f32 %v5088_v26, %v10277_v58  ;;  %v5090_v37 = vpop.f32.mrf.mxu1  ;;  %v5107_v25 = vpop.f32.mrf.mxu0  ;;  %v7565_v26 = vor.u32 %v8135_v24, %v7564_v57 }
 0x569   :  { %v5091_v11 = vadd.f32 %v5090_v37, %v10289_v56 }
 0x56a   :  { %v10328_v63 = vadd.f32 %v5107_v25, %v5089_v1  ;;  %7911 = vmatmul.msk.bf16.gmra.mxu2 %vm283_vm2, %v10118_v13  ;;  %v7438_v1 = vld [vmem:[#allocation2 + $0xf8] sm:$0xf0] }
 0x56b   :  { %5422 = vmatpush.bf16.msrb.mxu3 %v7429_v3  ;;  %v7630_v3 = vld [vmem:[#allocation2 + $0x278] sm:$0xf0]  ;;  %7913 = vmatmul.msk.bf16.gmra.mxu0 %vm283_vm2, %v10118_v13  ;;  %v7441_v55 = vor.u32 %v8095_v30, %v7438_v1 }
 0x56c   :  { %5460 = vmatpush.bf16.msrb.mxu1 %v7433_v39  ;;  %11980 = vst [vmem:[#allocation12_spill] sm:$0xff] %v10328_v63  ;;  %v5051_v39 = vadd.f32 %v5050_v9, %v10277_v58  ;;  %v7633_v28 = vor.u32 %v8143_v27, %v7630_v3  ;;  %v8087_v3 = vld [vmem:[#allocation2 + $0x74] sm:$0xf0] }
 0x56d   :  { %v5052_v21 = vpop.f32.mrf.mxu3  ;;  %v7372_v27 = vld [vmem:[#allocation2 + $0x38] sm:$0xf] }
 0x56e   :  { %v5053_v16 = vadd.f32 %v5052_v21, %v10289_v56  ;;  %v7373_v21 = vor.u32 %v8087_v3, %v7372_v27 }
 0x56f   :  { %5423 = vmatpush.bf16.msrb.mxu3 %v7365_v18  ;;  %v5069_v60 = vpop.f32.mrf.mxu2 }
 0x570   :  { %5461 = vmatpush.bf16.msrb.mxu1 %v7369_v41  ;;  %v10335_v5 = vadd.f32 %v5069_v60, %v5051_v39  ;;  %v5109_v18 = vpop.f32.mrf.mxu0  ;;  %v5159_v23 = vpop.f32.mrf.mxu1  ;;  %v7374_v39 = vld [vmem:[#allocation2 + $0x78] sm:$0xf0] }
 0x571   :  { %v10338_v41 = vadd.f32 %v5109_v18, %v5091_v11  ;;  %v5160_v54 = vadd.f32 %v5159_v23, %v10249_v8  ;;  %v8079_v60 = vld [vmem:[#allocation2 + $0x3c] sm:$0xf] }
 0x572   :  { %11981 = vst [vmem:[#allocation13_spill] sm:$0xff] %v10335_v5  ;;  %5424 = vmatmul.bf16.vlgmr.msrb.gmra.mxu3 %v10093_v15 }
 0x573   :  { %5492 = vmatpush.bf16.msra.mxu3 %v7821_v0  ;;  %11982 = vst [vmem:[#allocation14_spill] sm:$0xff] %v10338_v41  ;;  %v7569_v0 = vor.u32 %v8127_v2, %v7566_v53  ;;  %5462 = vmatmul.bf16.vlgmr.msrb.gmra.mxu1 %v10093_v15  ;;  %v7377_v53 = vor.u32 %v8079_v60, %v7374_v39 }
 0x574   :  { %5530 = vmatpush.bf16.msra.mxu1 %v7825_v59  ;;  %v8119_v59 = vld [vmem:[#allocation2 + $0x174] sm:$0xf0] }
 0x575   :  { %v7501_v35 = vor.u32 %v8119_v59, %v7500_v32  ;;  %v5121_v44 = vpop.f32.mrf.mxu3 }
 0x576   :  { %v5122_v46 = vadd.f32 %v5121_v44, %v10249_v8 }
 0x577   :  { %5493 = vmatpush.bf16.msra.mxu3 %v7757_v10  ;;  %v8111_v10 = vld [vmem:[#allocation2 + $0x13c] sm:$0xf]  ;;  %v5071_v9 = vpop.f32.mrf.mxu2 }
 0x578   :  { %5531 = vmatpush.bf16.msra.mxu1 %v7761_v47  ;;  %v7505_v47 = vor.u32 %v8111_v10, %v7502_v52  ;;  %v10344_v7 = vadd.f32 %v5071_v9, %v5053_v16  ;;  %v5161_v37 = vpop.f32.mrf.mxu1  ;;  %v5178_v25 = vpop.f32.mrf.mxu0 }
 0x579   :  { %v5162_v57 = vadd.f32 %v5161_v37, %v10263_v19 }
 0x57a   :  { %11983 = vst [vmem:[#allocation15_spill] sm:$0xff] %v10344_v7  ;;  %7914 = vmatmul.msk.bf16.vlgmr.msrb.gmra.mxu2 %vm283_vm2, %v10059_v48 }
 0x57b   :  { %5494 = vmatpush.bf16.msra.mxu3 %v7693_v22  ;;  %v7437_v22 = vor.u32 %v8103_v49, %v7436_v31  ;;  %7916 = vmatmul.msk.bf16.vlgmr.msrb.gmra.mxu0 %vm283_vm2, %v10059_v48 }
 0x57c   :  { %5532 = vmatpush.bf16.msra.mxu1 %v7697_v6  ;;  %v10346_v6 = vadd.f32 %v5178_v25, %v5160_v54 }
 0x57f   :  { %5495 = vmatpush.bf16.msra.mxu3 %v7629_v17  ;;  %v11853_v17 = vmax.f32 %v10346_v6, 0.0  ;;  %v5140_v24 = vpop.f32.mrf.mxu2 }
 0x580   :  { %5533 = vmatpush.bf16.msra.mxu1 %v7633_v28  ;;  %v5123_v28 = vpop.f32.mrf.mxu3  ;;  %v10357_v11 = vadd.f32 %v5140_v24, %v5122_v46  ;;  %v5164_v23 = vpop.f32.mrf.mxu1 }
 0x581   :  { %5842 = vrot.lane.b32.xlu2 %v11853_v17, %s8273_s9  ;;  %v5165_v16 = vadd.f32 %v5164_v23, %v10277_v58 }
 0x582   :  { %v11855_v18 = vmax.f32 %v10357_v11, 0.0  ;;  %5429 = vmatmul.bf16.gmra.mxu3 %v10155_v43 }
 0x583   :  { %5496 = vmatpush.bf16.msra.mxu3 %v7565_v26  ;;  %v5180_v26 = vpop.f32.mrf.mxu0  ;;  %5467 = vmatmul.bf16.gmra.mxu1 %v10155_v43 }
 0x584   :  { %5534 = vmatpush.bf16.msra.mxu1 %v7569_v0  ;;  %v10361_v2 = vadd.f32 %v5180_v26, %v5162_v57  ;;  %5840 = vrot.lane.b32.xlu1 %v11855_v18, %s8273_s9  ;;  %v5124_v0 = vadd.f32 %v5123_v28, %v10263_v19  ;;  %v11862_v18 = vmov 0.0  }
 0x586   :  { %11984 = vst [vmem:[#allocation16_spill] sm:$0xff] %v10361_v2 }
 0x587   :  { %5497 = vmatpush.bf16.msra.mxu3 %v7501_v35  ;;  %v5142_v52 = vpop.f32.mrf.mxu2 }
 0x588   :  { %5535 = vmatpush.bf16.msra.mxu1 %v7505_v47  ;;  %v5126_v59 = vpop.f32.mrf.mxu3  ;;  %v10369_v32 = vadd.f32 %v5142_v52, %v5124_v0  ;;  %v5166_v35 = vpop.f32.mrf.mxu1 }
 0x589   :  { %v5127_v9 = vadd.f32 %v5126_v59, %v10277_v58  ;;  %v5167_v1 = vadd.f32 %v5166_v35, %v10289_v56 }
 0x58a   :  { %11985 = vst [vmem:[#allocation17_spill] sm:$0xff] %v10369_v32  ;;  %7915 = vmatmul.msk.bf16.gmra.mxu2 %vm283_vm2, %v10118_v13 }
 0x58b   :  { %5498 = vmatpush.bf16.msra.mxu3 %v7437_v22  ;;  %v5183_v10 = vpop.f32.mrf.mxu0  ;;  %7917 = vmatmul.msk.bf16.gmra.mxu0 %vm283_vm2, %v10118_v13 }
 0x58c   :  { %5536 = vmatpush.bf16.msra.mxu1 %v7441_v55  ;;  %v10372_v54 = vadd.f32 %v5183_v10, %v5165_v16 }
 0x58e   :  { %11986 = vst [vmem:[#allocation18_spill] sm:$0xff] %v10372_v54 }
 0x58f   :  { %5499 = vmatpush.bf16.msra.mxu3 %v7373_v21  ;;  %v5145_v47 = vpop.f32.mrf.mxu2 }
 0x590   :  { %5537 = vmatpush.bf16.msra.mxu1 %v7377_v53  ;;  %v5128_v44 = vpop.f32.mrf.mxu3  ;;  %v10379_v49 = vadd.f32 %v5145_v47, %v5127_v9  ;;  %v5235_v37 = vpop.f32.mrf.mxu1 }
 0x591   :  { %v5129_v22 = vadd.f32 %v5128_v44, %v10289_v56  ;;  %v5236_v30 = vadd.f32 %v5235_v37, %v10249_v8 }
 0x592   :  { %11987 = vst [vmem:[#allocation19_spill] sm:$0xff] %v10379_v49  ;;  %5500 = vmatmul.bf16.vlgmr.msra.gmra.mxu3 %v10093_v15 }
 0x593   :  { %v5185_v31 = vpop.f32.mrf.mxu0  ;;  %5538 = vmatmul.bf16.vlgmr.msra.gmra.mxu1 %v10093_v15 }
 0x594   :  { %v10382_v25 = vadd.f32 %v5185_v31, %v5167_v1 }
 0x596   :  { %11988 = vst [vmem:[#allocation20_spill] sm:$0xff] %v10382_v25 }
 0x597   :  { %v5147_v55 = vpop.f32.mrf.mxu2 }
 0x598   :  { %v5197_v3 = vpop.f32.mrf.mxu3  ;;  %v10388_v46 = vadd.f32 %v5147_v55, %v5129_v22  ;;  %v5237_v39 = vpop.f32.mrf.mxu1 }
 0x599   :  { %v5198_v60 = vadd.f32 %v5197_v3, %v10249_v8  ;;  %v5238_v57 = vadd.f32 %v5237_v39, %v10263_v19 }
 0x59a   :  { %11989 = vst [vmem:[#allocation21_spill] sm:$0xff] %v10388_v46  ;;  %7918 = vmatmul.msk.bf16.vlgmr.msra.gmra.mxu2 %vm283_vm2, %v10059_v48 }
 0x59b   :  { %v5254_v27 = vpop.f32.mrf.mxu0  ;;  %7920 = vmatmul.msk.bf16.vlgmr.msra.gmra.mxu0 %vm283_vm2, %v10059_v48 }
 0x59c   :  { %v10390_v21 = vadd.f32 %v5254_v27, %v5236_v30 }
 0x59e   :  { %v11850_v28 = vmax.f32 %v10390_v21, 0.0 }
 0x59f   :  { %v5216_v24 = vpop.f32.mrf.mxu2 }
 0x5a0   :  { %v5199_v15 = vpop.f32.mrf.mxu3  ;;  %5846 = vrot.lane.b32.xlu1 %v11850_v28, %s8273_s9  ;;  %v10401_v53 = vadd.f32 %v5216_v24, %v5198_v60  ;;  %v5240_v26 = vpop.f32.mrf.mxu1 }
 0x5a1   :  { %v5200_v48 = vadd.f32 %v5199_v15, %v10263_v19  ;;  %v5241_v10 = vadd.f32 %v5240_v26, %v10277_v58 }
 0x5a2   :  { %v11851_v23 = vmax.f32 %v10401_v53, 0.0  ;;  %5505 = vmatmul.bf16.gmra.mxu3 %v10155_v43 }
 0x5a3   :  { %v5256_v0 = vpop.f32.mrf.mxu0  ;;  %5543 = vmatmul.bf16.gmra.mxu1 %v10155_v43 }
 0x5a4   :  { %v10405_v59 = vadd.f32 %v5256_v0, %v5238_v57  ;;  %5844 = vrot.lane.b32.xlu0 %v11851_v23, %s8273_s9 }
 0x5a6   :  { %11990 = vst [vmem:[#allocation22_spill] sm:$0xff] %v10405_v59 }
 0x5a7   :  { %v5218_v16 = vpop.f32.mrf.mxu2 }
 0x5a8   :  { %v5202_v52 = vpop.f32.mrf.mxu3  ;;  %v10413_v35 = vadd.f32 %v5218_v16, %v5200_v48  ;;  %v5242_v9 = vpop.f32.mrf.mxu1 }
 0x5a9   :  { %v5203_v1 = vadd.f32 %v5202_v52, %v10277_v58  ;;  %v5243_v22 = vadd.f32 %v5242_v9, %v10289_v56 }
 0x5aa   :  { %11991 = vst [vmem:[#allocation23_spill] sm:$0xff] %v10413_v35  ;;  %7919 = vmatmul.msk.bf16.gmra.mxu2 %vm283_vm2, %v10118_v13 }
 0x5ab   :  { %v5259_v44 = vpop.f32.mrf.mxu0  ;;  %7921 = vmatmul.msk.bf16.gmra.mxu0 %vm283_vm2, %v10118_v13 }
 0x5ac   :  { %v10416_v47 = vadd.f32 %v5259_v44, %v5241_v10 }
 0x5ae   :  { %11992 = vst [vmem:[#allocation24_spill] sm:$0xff] %v10416_v47 }
 0x5af   :  { %v5221_v43 = vpop.f32.mrf.mxu2 }
 0x5b0   :  { %v5204_v31 = vpop.f32.mrf.mxu3  ;;  %v10423_v37 = vadd.f32 %v5221_v43, %v5203_v1  ;;  %v5311_v55 = vpop.f32.mrf.mxu1 }
 0x5b1   :  { %v5205_v39 = vadd.f32 %v5204_v31, %v10289_v56  ;;  %v5312_v27 = vadd.f32 %v5311_v55, %v10249_v8  ;;  %v11847_v31 = vmax.f32 %v10270_v36, 0.0 }
 0x5b2   :  { %11993 = vst [vmem:[#allocation25_spill] sm:$0xff] %v10423_v37 }
 0x5b3   :  { %v5261_v30 = vpop.f32.mrf.mxu0 }
 0x5b4   :  { %v10426_v3 = vadd.f32 %v5261_v30, %v5243_v22 }
 0x5b6   :  { %11994 = vst [vmem:[#allocation26_spill] sm:$0xff] %v10426_v3 }
 0x5b7   :  { %v5223_v60 = vpop.f32.mrf.mxu2 }
 0x5b8   :  { %v5273_v15 = vpop.f32.mrf.mxu3  ;;  %v10430_v24 = vadd.f32 %v5223_v60, %v5205_v39  ;;  %v10432_v13 = vpop.f32.mrf.mxu1 }
 0x5b9   :  { %v5274_v0 = vadd.f32 %v5273_v15, %v10249_v8 }
 0x5ba   :  { %11995 = vst [vmem:[#allocation27_spill] sm:$0xff] %v10430_v24 }
 0x5bb   :  { %v5330_v57 = vpop.f32.mrf.mxu0 }
 0x5bc   :  { %v10434_v26 = vadd.f32 %v5330_v57, %v5312_v27  ;;  %v11852_v57 = vmax.f32 %v10369_v32, 0.0 }
 0x5be   :  { %v11848_v48 = vmax.f32 %v10434_v26, 0.0 }
 0x5bf   :  { %v5292_v16 = vpop.f32.mrf.mxu2 }
 0x5c0   :  { %5850 = vrot.lane.b32.xlu0 %v11848_v48, %s8273_s9  ;;  %v5275_v52 = vpop.f32.mrf.mxu3  ;;  %v10441_v10 = vadd.f32 %v5292_v16, %v5274_v0  ;;  %v5316_v44 = vpop.f32.mrf.mxu1 }
 0x5c1   :  { %v5276_v43 = vadd.f32 %v5275_v52, %v10263_v19  ;;  %v5317_v39 = vadd.f32 %v5316_v44, %v10277_v58 }
 0x5c2   :  { %v11849_v9 = vmax.f32 %v10441_v10, 0.0 }
 0x5c3   :  { %v10444_v1 = vpop.f32.mrf.mxu0 }
 0x5c4   :  { %5848 = vrot.lane.b32.xlu2 %v11849_v9, %s8273_s9 }
 0x5c7   :  { %v5294_v30 = vpop.f32.mrf.mxu2 }
 0x5c8   :  { %5868 = vrot.lane.b32.xlu0 %v11847_v31, %s8273_s9  ;;  %v5278_v22 = vpop.f32.mrf.mxu3  ;;  %v10454_v55 = vadd.f32 %v5294_v30, %v5276_v43  ;;  %v5318_v27 = vpop.f32.mrf.mxu1 }
 0x5c9   :  { %v5279_v0 = vadd.f32 %v5278_v22, %v10277_v58  ;;  %v5319_v43 = vadd.f32 %v5318_v27, %v10289_v56 }
 0x5cb   :  { %v5335_v60 = vpop.f32.mrf.mxu0 }
 0x5cc   :  { %v10457_v15 = vadd.f32 %v5335_v60, %v5317_v39 }
 0x5ce   :  { %11996 = vst [vmem:[#allocation28_spill] sm:$0xff] %v10457_v15 }
 0x5cf   :  { %v5297_v16 = vpop.f32.mrf.mxu2 }
 0x5d0   :  { %5874 = vrot.lane.b32.xlu0 %v11852_v57, %s8273_s9  ;;  %v5280_v52 = vpop.f32.mrf.mxu3  ;;  %v10464_v31 = vadd.f32 %v5297_v16, %v5279_v0  ;;  %v5387_v44 = vpop.f32.mrf.mxu1 }
 0x5d1   :  { %v5281_v39 = vadd.f32 %v5280_v52, %v10289_v56  ;;  %v5388_v22 = vadd.f32 %v5387_v44, %v10249_v8 }
 0x5d2   :  { %11997 = vst [vmem:[#allocation29_spill] sm:$0xff] %v10464_v31 }
 0x5d3   :  { %v5337_v30 = vpop.f32.mrf.mxu0 }
 0x5d4   :  { %v10467_v48 = vadd.f32 %v5337_v30, %v5319_v43 }
 0x5d6   :  { %11998 = vst [vmem:[#allocation30_spill] sm:$0xff] %v10467_v48 }
 0x5d7   :  { %v5299_v60 = vpop.f32.mrf.mxu2 }
 0x5d8   :  { %v5349_v9 = vpop.f32.mrf.mxu3  ;;  %v10470_v28 = vadd.f32 %v5299_v60, %v5281_v39  ;;  %v10473_v23 = vpop.f32.mrf.mxu1 }
 0x5d9   :  { %v5350_v27 = vadd.f32 %v5349_v9, %v10249_v8 }
 0x5da   :  { %11999 = vst [vmem:[#allocation31_spill] sm:$0xff] %v10470_v28 }
 0x5db   :  { %v5406_v57 = vpop.f32.mrf.mxu0 }
 0x5dc   :  { %v10475_v17 = vadd.f32 %v5406_v57, %v5388_v22  ;;  %v11858_v57 = vmax.f32 %v10279_v61, 0.0 }
 0x5de   :  { %v11854_v0 = vmax.f32 %v10475_v17, 0.0 }
 0x5df   :  { %v5368_v16 = vpop.f32.mrf.mxu2 }
 0x5e0   :  { %5854 = vrot.lane.b32.xlu2 %v11854_v0, %s8273_s9  ;;  %v5351_v52 = vpop.f32.mrf.mxu3  ;;  %v10482_v43 = vadd.f32 %v5368_v16, %v5350_v27  ;;  %v5392_v39 = vpop.f32.mrf.mxu1 }
 0x5e1   :  { %v5393_v22 = vadd.f32 %v5392_v39, %v10277_v58 }
 0x5e2   :  { %v11856_v30 = vmax.f32 %v10482_v43, 0.0 }
 0x5e3   :  { %v10485_v44 = vpop.f32.mrf.mxu0 }
 0x5e4   :  { %5852 = vrot.lane.b32.xlu1 %v11856_v30, %s8273_s9  ;;  %v11864_v30 = vmax.f32 %v10317_v4, 0.0 }
 0x5e7   :  { %v5370_v9 = vpop.f32.mrf.mxu2 }
 0x5e8   :  { %5866 = vrot.lane.b32.xlu2 %v11858_v57, %s8273_s9  ;;  %v5354_v60 = vpop.f32.mrf.mxu3  ;;  %v5394_v16 = vpop.f32.mrf.mxu1 }
 0x5e9   :  { %v5355_v40 = vadd.f32 %v5354_v60, %v10277_v58  ;;  %v5395_v39 = vadd.f32 %v5394_v16, %v10289_v56  ;;  %v5314_v60 = vadd.f32 %v10432_v13, %v10263_v19 }
 0x5eb   :  { %v5411_v27 = vpop.f32.mrf.mxu0  ;;  %v10519_v16 = vadd.f32 %v10444_v1, %v5314_v60 }
 0x5ec   :  { %v10495_v0 = vadd.f32 %v5411_v27, %v5393_v22  ;;  %8250 = vrot.lane.b32.xlu1 %v11862_v18, %s8273_s9  ;;  %v11869_v18 = vmax.f32 %v10413_v35, 0.0 }
 0x5ed   :  { %12003 = vst [vmem:[#allocation35_spill] sm:$0xff] %v10519_v16 }
 0x5ef   :  { %v5373_v57 = vpop.f32.mrf.mxu2 }
 0x5f0   :  { %5872 = vrot.lane.b32.xlu2 %v11864_v30, %s8273_s9  ;;  %v5356_v42 = vpop.f32.mrf.mxu3  ;;  %v10504_v38 = vadd.f32 %v5373_v57, %v5355_v40  ;;  %v5463_v50 = vpop.f32.mrf.mxu1 }
 0x5f1   :  { %v5357_v32 = vadd.f32 %v5356_v42, %v10289_v56  ;;  %v11868_v42 = vmax.f32 %v10519_v16, 0.0 }
 0x5f2   :  { %12000 = vst [vmem:[#allocation32_spill] sm:$0xff] %v10504_v38 }
 0x5f3   :  { %v5413_v22 = vpop.f32.mrf.mxu0 }
 0x5f4   :  { %v10507_v27 = vadd.f32 %v5413_v22, %v5395_v39  ;;  %v5464_v39 = vadd.f32 %v5463_v50, %v10249_v8 }
 0x5f6   :  { %12001 = vst [vmem:[#allocation33_spill] sm:$0xff] %v10507_v27 }
 0x5f7   :  { %v5375_v30 = vpop.f32.mrf.mxu2 }
 0x5f8   :  { %5878 = vrot.lane.b32.xlu2 %v11869_v18, %s8273_s9  ;;  %v10516_v40 = vadd.f32 %v5375_v30, %v5357_v32  ;;  %v5425_v57 = vpop.f32.mrf.mxu3  ;;  %v5465_v4 = vpop.f32.mrf.mxu1 }
 0x5f9   :  { %v5426_v35 = vadd.f32 %v5425_v57, %v10249_v8  ;;  %v11876_v57 = vmax.f32 %v10325_v34, 0.0 }
 0x5fa   :  { %12002 = vst [vmem:[#allocation34_spill] sm:$0xff] %v10516_v40 }
 0x5fb   :  { %v5482_v22 = vpop.f32.mrf.mxu0 }
 0x5fc   :  { %v10522_v36 = vadd.f32 %v5482_v22, %v5464_v39 }
 0x5fe   :  { %12004 = vst [vmem:[#allocation36_spill] sm:$0xff] %v10522_v36  ;;  %v11870_v13 = vmax.f32 %v10522_v36, 0.0 }
 0x5ff   :  { %v5444_v32 = vpop.f32.mrf.mxu2 }
 0x600   :  { %5884 = vrot.lane.b32.xlu2 %v11868_v42, %s8273_s9  ;;  %5858 = vrot.lane.b32.xlu1 %v11870_v13, %s8273_s9  ;;  %v5427_v50 = vpop.f32.mrf.mxu3  ;;  %v10533_v1 = vadd.f32 %v5444_v32, %v5426_v35  ;;  %v5468_v39 = vpop.f32.mrf.mxu1  ;;  %v11877_v13 = vmax.f32 %v10405_v59, 0.0 }
 0x601   :  { %v5428_v22 = vadd.f32 %v5427_v50, %v10263_v19  ;;  %v5469_v32 = vadd.f32 %v5468_v39, %v10277_v58  ;;  %v5352_v50 = vadd.f32 %v5351_v52, %v10263_v19 }
 0x602   :  { %v11872_v30 = vmax.f32 %v10533_v1, 0.0 }
 0x603   :  { %v5484_v60 = vpop.f32.mrf.mxu0  ;;  %v10561_v39 = vadd.f32 %v5370_v9, %v5352_v50  ;;  %v11884_v9 = vmax.f32 %v10454_v55, 0.0 }
 0x604   :  { %5856 = vrot.lane.b32.xlu0 %v11872_v30, %s8273_s9 }
 0x605   :  { %12006 = vst [vmem:[#allocation38_spill] sm:$0xff] %v10561_v39 }
 0x607   :  { %v5446_v42 = vpop.f32.mrf.mxu2 }
 0x608   :  { %5870 = vrot.lane.b32.xlu1 %v11876_v57, %s8273_s9  ;;  %v10544_v18 = vpop.f32.mrf.mxu3  ;;  %v10546_v35 = vadd.f32 %v5446_v42, %v5428_v22  ;;  %v5470_v36 = vpop.f32.mrf.mxu1  ;;  %v11878_v42 = vmax.f32 %v10361_v2, 0.0 }
 0x609   :  { %v5471_v22 = vadd.f32 %v5470_v36, %v10289_v56 }
 0x60a   :  { %12005 = vst [vmem:[#allocation37_spill] sm:$0xff] %v10546_v35  ;;  %v11875_v16 = vmax.f32 %v10546_v35, 0.0 }
 0x60b   :  { %v5487_v30 = vpop.f32.mrf.mxu0 }
 0x60c   :  { %v10551_v61 = vadd.f32 %v5487_v30, %v5469_v32  ;;  %5890 = vrot.lane.b32.xlu2 %v11875_v16, %s8273_s9  ;;  %5880 = vrot.lane.b32.xlu0 %v11877_v13, %s8273_s9  ;;  %v11880_v32 = vmax.f32 %v10561_v39, 0.0 }
 0x60f   :  { %v10566_v30 = vpop.f32.mrf.mxu2 }
 0x610   :  { %5876 = vrot.lane.b32.xlu1 %v11878_v42, %s8273_s9  ;;  %v5432_v52 = vpop.f32.mrf.mxu3  ;;  %v5539_v13 = vpop.f32.mrf.mxu1  ;;  %v5390_v42 = vadd.f32 %v10473_v23, %v10263_v19 }
 0x611   :  { %v5433_v50 = vadd.f32 %v5432_v52, %v10289_v56  ;;  %v10590_v52 = vpop.permute.xlu0 %5832 }
 0x613   :  { %v5489_v16 = vpop.f32.mrf.mxu0 }
 0x614   :  { %v10570_v57 = vadd.f32 %v5489_v16, %v5471_v22  ;;  %5886 = vrot.lane.b32.xlu0 %v11880_v32, %s8273_s9  ;;  %v10585_v16 = vadd.f32 %v10485_v44, %v5390_v42  ;;  %v5540_v22 = vadd.f32 %v5539_v13, %v10249_v8  ;;  %v10604_v42 = vpop.permute.xlu2 %5836 }
 0x616   :  { %12007 = vst [vmem:[#allocation39_spill] sm:$0xff] %v10570_v57  ;;  %v11885_v23 = vmax.f32 %v10585_v16, 0.0 }
 0x617   :  { %v5451_v36 = vpop.f32.mrf.mxu2  ;;  %12009 = vst [vmem:[#allocation41_spill] sm:$0xff] %v10585_v16 }
 0x618   :  { %5882 = vrot.lane.b32.xlu1 %v11884_v9, %s8273_s9  ;;  %v10582_v35 = vadd.f32 %v5451_v36, %v5433_v50  ;;  %v5501_v32 = vpop.f32.mrf.mxu3  ;;  %v5466_v50 = vadd.f32 %v5465_v4, %v10263_v19  ;;  %v5541_v36 = vpop.f32.mrf.mxu1 }
 0x619   :  { %v5502_v9 = vadd.f32 %v5501_v32, %v10249_v8  ;;  %v5542_v4 = vadd.f32 %v5541_v36, %v10263_v19 }
 0x61a   :  { %12008 = vst [vmem:[#allocation40_spill] sm:$0xff] %v10582_v35 }
 0x61b   :  { %v5558_v39 = vpop.f32.mrf.mxu0 }
 0x61c   :  { %v10588_v59 = vadd.f32 %v5558_v39, %v5540_v22  ;;  %v10606_v39 = vadd.f32 %v5484_v60, %v5466_v50  ;;  %v10626_v36 = vpop.permute.xlu2 %5842 }
 0x61e   :  { %v11886_v2 = vmax.f32 %v10588_v59, 0.0 }
 0x61f   :  { %v5520_v44 = vpop.f32.mrf.mxu2 }
 0x620   :  { %5888 = vrot.lane.b32.xlu1 %v11885_v23, %s8273_s9  ;;  %5862 = vrot.lane.b32.xlu0 %v11886_v2, %s8273_s9  ;;  %v10602_v13 = vadd.f32 %v5520_v44, %v5502_v9  ;;  %v5503_v22 = vpop.f32.mrf.mxu3  ;;  %v11889_v23 = vmax.f32 %v10284_v12, 0.0  ;;  %v10614_v2 = vpop.permute.xlu0 %5838  ;;  %v11894_v9 = vmax.f32 %v10606_v39, 0.0 }
 0x621   :  { %v5504_v60 = vadd.f32 %v5503_v22, %v10263_v19  ;;  %v11891_v19 = vmax.f32 %v10291_v51, 0.0 }
 0x622   :  { %v11887_v8 = vmax.f32 %v10602_v13, 0.0 }
 0x623   :  { %v5560_v32 = vpop.f32.mrf.mxu0 }
 0x624   :  { %5860 = vrot.lane.b32.xlu2 %v11887_v8, %s8273_s9  ;;  %v10617_v44 = vadd.f32 %v5560_v32, %v5542_v4  ;;  %v10644_v22 = vpop.permute.xlu2 %5848 }
 0x626   :  { %v11890_v16 = vmax.f32 %v10617_v44, 0.0 }
 0x627   :  { %v5522_v50 = vpop.f32.mrf.mxu2 }
 0x628   :  { %5902 = vrot.lane.b32.xlu1 %v11889_v23, %s8273_s9  ;;  %5892 = vrot.lane.b32.xlu0 %v11894_v9, %s8273_s9  ;;  %v10628_v8 = vadd.f32 %v5522_v50, %v5504_v60  ;;  %v10635_v32 = vpop.permute.xlu0 %5844  ;;  %v11893_v60 = vmax.f32 %v10335_v5, 0.0  ;;  %v11896_v50 = vmax.f32 %v10328_v63, 0.0  ;;  %v11897_v23 = vmax.f32 %v10379_v49, 0.0 }
 0x629   :  { %v11902_v9 = vmax.f32 %v10423_v37, 0.0  ;;  %v11914_v63 = vmax.f32 %v10495_v0, 0.0 }
 0x62a   :  { %v11892_v4 = vmax.f32 %v10628_v8, 0.0 }
 0x62c   :  { %5896 = vrot.lane.b32.xlu2 %v11890_v16, %s8273_s9 }
 0x630   :  { %5894 = vrot.lane.b32.xlu1 %v11892_v4, %s8273_s9  ;;  %5900 = vrot.lane.b32.xlu0 %v11891_v19, %s8273_s9  ;;  %v11898_v4 = vmax.f32 %v10372_v54, 0.0  ;;  %v11910_v54 = vmax.f32 %v10457_v15, 0.0 }
 0x632   :  { %v10652_v16 = vpop.permute.xlu0 %5850 }
 0x634   :  { %5904 = vrot.lane.b32.xlu2 %v11893_v60, %s8273_s9  ;;  %v11901_v60 = vmax.f32 %v10416_v47, 0.0  ;;  %v11907_v47 = vmax.f32 %v10504_v38, 0.0  ;;  %v5544_v38 = vpop.f32.mrf.mxu1 }
 0x635   :  { %v5545_v12 = vadd.f32 %v5544_v38, %v10277_v58  ;;  %v12010_v38 = vmov 0.0  }
 0x638   :  { %5908 = vrot.lane.b32.xlu1 %v11897_v23, %s8273_s9  ;;  %5906 = vrot.lane.b32.xlu0 %v11896_v50, %s8273_s9  ;;  %v11903_v23 = vmax.f32 %v10464_v31, 0.0 }
 0x63a   :  { %v10660_v19 = vpop.permute.xlu2 %5854  ;;  %v10668_v5 = vpop.permute.xlu0 %5868 }
 0x63c   :  { %5910 = vrot.lane.b32.xlu2 %v11898_v4, %s8273_s9 }
 0x640   :  { %5914 = vrot.lane.b32.xlu1 %v11901_v60, %s8273_s9  ;;  %5912 = vrot.lane.b32.xlu0 %v11902_v9, %s8273_s9  ;;  %v10686_v60 = vpop.permute.xlu1 %5834  ;;  %v5431_v9 = vadd.f32 %v10544_v18, %v10277_v58 }
 0x642   :  { %v5867_v50 = vpop.permute.xlu2 %5866  ;;  %v10699_v31 = vpop.permute.xlu0 %5874 }
 0x643   :  { %v10679_v4 = vsel %vm780_vm5, %v5867_v50, %v10668_v5  ;;  %v5506_v50 = vpop.f32.mrf.mxu3 }
 0x644   :  { %5916 = vrot.lane.b32.xlu2 %v11903_v23, %s8273_s9  ;;  %v10697_v23 = vadd.f32 %v10566_v30, %v5431_v9  ;;  %v5507_v15 = vadd.f32 %v5506_v50, %v10277_v58  ;;  %v11922_v30 = vmax.f32 %v10551_v61, 0.0  ;;  %v11917_v58 = vmax.f32 %v10300_v33, 0.0 }
 0x646   :  { %v11918_v9 = vmax.f32 %v10697_v23, 0.0 }
 0x648   :  { %5920 = vrot.lane.b32.xlu1 %v11907_v47, %s8273_s9  ;;  %5918 = vrot.lane.b32.xlu0 %v11910_v54, %s8273_s9  ;;  %v5525_v47 = vpop.f32.mrf.mxu2  ;;  %v5563_v54 = vpop.f32.mrf.mxu0 }
 0x649   :  { %v10715_v49 = vadd.f32 %v5525_v47, %v5507_v15  ;;  %v10717_v51 = vpop.permute.xlu1 %5840  ;;  %v10726_v50 = vadd.f32 %v5563_v54, %v5545_v12  ;;  %v11920_v12 = vmax.f32 %v10344_v7, 0.0  ;;  %v11919_v54 = vmax.f32 %v10296_v14, 0.0 }
 0x64a   :  { %v10701_v37 = vpop.permute.xlu2 %5872  ;;  %v11944_v14 = vmax.f32 %v10582_v35, 0.0 }
 0x64b   :  { %v10707_v18 = vsel %vm780_vm5, %v10701_v37, %v10699_v31  ;;  %v11916_v47 = vmax.f32 %v10726_v50, 0.0 }
 0x64c   :  { %5922 = vrot.lane.b32.xlu2 %v11914_v63, %s8273_s9  ;;  %v11915_v63 = vmax.f32 %v10715_v49, 0.0 }
 0x650   :  { %5926 = vrot.lane.b32.xlu1 %v11922_v30, %s8273_s9  ;;  %5924 = vrot.lane.b32.xlu0 %v11918_v9, %s8273_s9  ;;  %v11924_v9 = vmax.f32 %v10388_v46, 0.0  ;;  %v11931_v30 = vmax.f32 %v10470_v28, 0.0  ;;  %v11941_v46 = vmax.f32 %v10516_v40, 0.0  ;;  %v5565_v7 = vpop.f32.mrf.mxu0 }
 0x651   :  { %v10733_v15 = vpop.permute.xlu1 %5846 }
 0x654   :  { %5928 = vrot.lane.b32.xlu2 %v11915_v63, %s8273_s9 }
 0x658   :  { %8255 = vrot.lane.b32.xlu1 %v12010_v38, %s8273_s9  ;;  %5930 = vrot.lane.b32.xlu0 %v11916_v47, %s8273_s9  ;;  %v11921_v38 = vmax.f32 %v10338_v41, 0.0  ;;  %v10755_v47 = vpop.permute.xlu2 %5878 }
 0x659   :  { %v10746_v63 = vpop.permute.xlu1 %5852 }
 0x65c   :  { %5934 = vrot.lane.b32.xlu2 %v11917_v58, %s8273_s9  ;;  %v11925_v58 = vmax.f32 %v10382_v25, 0.0  ;;  %v5527_v25 = vpop.f32.mrf.mxu2 }
 0x660   :  { %5938 = vrot.lane.b32.xlu1 %v11920_v12, %s8273_s9  ;;  %5936 = vrot.lane.b32.xlu0 %v11919_v54, %s8273_s9  ;;  %v11927_v12 = vmax.f32 %v10430_v24, 0.0  ;;  %v10776_v41 = vpop.permute.xlu2 %5884  ;;  %v5508_v24 = vpop.f32.mrf.mxu3 }
 0x661   :  { %v10768_v54 = vpop.permute.xlu1 %8250 }
 0x664   :  { %5940 = vrot.lane.b32.xlu2 %v11921_v38, %s8273_s9  ;;  %v11932_v38 = vmax.f32 %v10426_v3, 0.0 }
 0x668   :  { %5944 = vrot.lane.b32.xlu1 %v11925_v58, %s8273_s9  ;;  %5942 = vrot.lane.b32.xlu0 %v11924_v9, %s8273_s9  ;;  %v11933_v58 = vmax.f32 %v10467_v48, 0.0  ;;  %v10792_v28 = vpop.permute.xlu2 %5890 }
 0x66c   :  { %5946 = vrot.lane.b32.xlu2 %v11927_v12, %s8273_s9  ;;  %v11939_v12 = vmax.f32 %v10507_v27, 0.0  ;;  %v12030_v27 = vmax.f32 %v10588_v59, 0.0 }
 0x670   :  { %5950 = vrot.lane.b32.xlu1 %v11931_v30, %s8273_s9  ;;  %5948 = vrot.lane.b32.xlu0 %v11932_v38, %s8273_s9  ;;  %v5509_v38 = vadd.f32 %v5508_v24, %v10289_v56  ;;  %v11943_v24 = vmax.f32 %v10570_v57, 0.0 }
 0x672   :  { %v10784_v9 = vpop.permute.xlu1 %5858  ;;  %v10803_v48 = vadd.f32 %v5527_v25, %v5509_v38  ;;  %v12013_v38 = vmax.f32 %v10265_v45, 0.0 }
 0x674   :  { %5952 = vrot.lane.b32.xlu2 %v11933_v58, %s8273_s9  ;;  %v5546_v58 = vpop.f32.mrf.mxu1  ;;  %12011 = vst [vmem:[#allocation42_spill] sm:$0xff] %v10803_v48 }
 0x675   :  { %v5547_v33 = vadd.f32 %v5546_v58, %v10289_v56  ;;  %v5969_v58 = vsel %vm780_vm5, %v10590_v52, %v10686_v60  ;;  %v5971_v52 = vsel %vm780_vm5, %v10604_v42, %v10614_v2 }
 0x676   :  { %v10794_v30 = vpop.permute.xlu0 %5856 }
 0x677   :  { %v10814_v40 = vadd.f32 %v5565_v7, %v5547_v33  ;;  %v5970_v33 = vsel %vm780_vm5, %v10686_v60, %v10604_v42  ;;  %v5973_v42 = vsel %vm780_vm5, %v10717_v51, %v10626_v36 }
 0x678   :  { %5956 = vrot.lane.b32.xlu1 %v11939_v12, %s8273_s9  ;;  %5954 = vrot.lane.b32.xlu0 %v11941_v46, %s8273_s9  ;;  %v11942_v12 = vmax.f32 %v10803_v48, 0.0 }
 0x679   :  { %12012 = vst [vmem:[#allocation43_spill] sm:$0xff] %v10814_v40  ;;  %v11946_v7 = vmax.f32 %v10814_v40, 0.0 }
 0x67a   :  { %v10805_v3 = vpop.permute.xlu1 %5870 }
 0x67b   :  { %v5986_v59 = vsel %vm780_vm5, %v10668_v5, %v10805_v3 }
 0x67c   :  { %5958 = vrot.lane.b32.xlu2 %v11944_v14, %s8273_s9 }
 0x67e   :  { %v10816_v46 = vpop.permute.xlu2 %5860  ;;  %v10818_v25 = vpop.permute.xlu0 %5880 }
 0x680   :  { %5962 = vrot.lane.b32.xlu1 %v11942_v12, %s8273_s9  ;;  %5960 = vrot.lane.b32.xlu0 %v11943_v24, %s8273_s9  ;;  %v10840_v12 = vmax.f32 %v12013_v38, %v5969_v58  ;;  %v12014_v24 = vmax.f32 %v10256_v62, 0.0  ;;  %v12015_v62 = vmax.f32 %v10313_v20, 0.0  ;;  %v5972_v58 = vsel %vm780_vm5, %v10614_v2, %v10717_v51 }
 0x681   :  { %v5974_v2 = vsel %vm780_vm5, %v10626_v36, %v10635_v32  ;;  %v5976_v36 = vsel %vm780_vm5, %v10733_v15, %v10644_v22 }
 0x682   :  { %v10826_v56 = vpop.permute.xlu1 %5876  ;;  %v10844_v14 = vmax.f32 %v12014_v24, %v5970_v33  ;;  %v10861_v24 = vmax.f32 %v12015_v62, %v5971_v52  ;;  %v12016_v33 = vmax.f32 %v10302_v29, 0.0 }
 0x684   :  { %5964 = vrot.lane.b32.xlu2 %v11946_v7, %s8273_s9  ;;  %v10873_v38 = vmax.f32 %v12016_v33, %v5972_v58  ;;  %v12017_v7 = vmax.f32 %v10357_v11, 0.0  ;;  %v5975_v11 = vsel %vm780_vm5, %v10635_v32, %v10733_v15  ;;  %v12019_v58 = vmax.f32 %v10401_v53, 0.0 }
 0x685   :  { %v12020_v33 = vmax.f32 %v10390_v21, 0.0  ;;  %v12021_v21 = vmax.f32 %v10441_v10, 0.0  ;;  %v12022_v10 = vmax.f32 %v10434_v26, 0.0 }
 0x686   :  { %v10846_v57 = vpop.permute.xlu2 %5896  ;;  %v10855_v60 = vpop.permute.xlu0 %5886  ;;  %v10877_v20 = vmax.f32 %v12017_v7, %v5973_v42  ;;  %v12018_v7 = vmax.f32 %v10346_v6, 0.0  ;;  %v10904_v42 = vmax.f32 %v12019_v58, %v5975_v11  ;;  %v5977_v6 = vsel %vm780_vm5, %v10644_v22, %v10652_v16 }
 0x687   :  { %v10908_v40 = vmax.f32 %v12020_v33, %v5976_v36  ;;  %v5978_v11 = vsel %vm780_vm5, %v10652_v16, %v10746_v63  ;;  %v5979_v22 = vsel %vm780_vm5, %v10746_v63, %v10660_v19  ;;  %v12023_v58 = vmax.f32 %v10482_v43, 0.0 }
 0x688   :  { %6303 = vrot.lane.b32.xlu1 %v10844_v14, %s8275_s30  ;;  %6301 = vrot.lane.b32.xlu0 %v10840_v12, %s8275_s30  ;;  %v10895_v62 = vmax.f32 %v12018_v7, %v5974_v2  ;;  %v10925_v2 = vmax.f32 %v12021_v21, %v5977_v6  ;;  %v10942_v36 = vmax.f32 %v12022_v10, %v5978_v11  ;;  %v12024_v21 = vmax.f32 %v10475_v17, 0.0 }
 0x689   :  { %v10946_v33 = vmax.f32 %v12023_v58, %v5979_v22  ;;  %v5980_v63 = vsel %vm780_vm5, %v10660_v19, %v10794_v30  ;;  %v5981_v43 = vsel %vm780_vm5, %v10794_v30, %v10784_v9  ;;  %v5982_v19 = vsel %vm780_vm5, %v10784_v9, %v10816_v46  ;;  %v12027_v30 = vld [vmem:[#allocation36_spill] sm:$0xff] }
 0x68a   :  { %v10857_v45 = vpop.permute.xlu1 %5882  ;;  %v10966_v11 = vmax.f32 %v12024_v21, %v5980_v63  ;;  %v11952_v22 = vunpack.i.h.bf16 %v10768_v54  ;;  %v8252_v10 = vunpack.i.l.bf16 %v10768_v54  ;;  %v12025_v58 = vmax.f32 %v10533_v1, 0.0 }
 0x68b   :  { %v12028_v35 = vmax.f32 %v12027_v30, 0.0 }
 0x68c   :  { %6305 = vrot.lane.b32.xlu2 %v10861_v24, %s8275_s30  ;;  %v10977_v48 = vmax.f32 %v12025_v58, %v5981_v43  ;;  %v6198_v1 = vmax.f32 %v11952_v22, 0.0  ;;  %v6181_v43 = vmax.f32 %v8252_v10, 0.0 }
 0x68d   :  { %v10981_v17 = vmax.f32 %v12028_v35, %v5982_v19  ;;  %v12029_v19 = vmax.f32 %v10602_v13, 0.0 }
 0x68e   :  { %v10879_v52 = vpop.permute.xlu2 %5904  ;;  %12026 = vst [vmem:[#allocation44_spill] sm:$0xff] %v10977_v48 }
 0x690   :  { %6309 = vrot.lane.b32.xlu1 %v10877_v20, %s8275_s30  ;;  %6307 = vrot.lane.b32.xlu0 %v10873_v38, %s8275_s30 }
 0x692   :  { %v10888_v51 = vpop.permute.xlu1 %5888  ;;  %v5863_v29 = vpop.permute.xlu0 %5862 }
 0x693   :  { %v5983_v9 = vsel %vm780_vm5, %v10816_v46, %v5863_v29  ;;  %v5984_v35 = vsel %vm780_vm5, %v5863_v29, %v8252_v10  ;;  %v8259_v46 = vpack.i.bf16 %v6198_v1, %v6181_v43  ;;  %v12031_v10 = vld [vmem:[#allocation6_spill] sm:$0xff]  ;;  %v12034_v1 = vld [vmem:[#allocation5_spill] sm:$0xff] }
 0x694   :  { %6311 = vrot.lane.b32.xlu2 %v10895_v62, %s8275_s30  ;;  %v11000_v30 = vmax.f32 %v12029_v19, %v5983_v9  ;;  %v12032_v9 = vmax.f32 %v12031_v10, 0.0  ;;  %v12035_v43 = vmax.f32 %v12034_v1, 0.0  ;;  %v12041_v1 = vld [vmem:[#allocation17_spill] sm:$0xff] }
 0x696   :  { %v10910_v32 = vpop.permute.xlu2 %5910  ;;  %v11020_v19 = vmax.f32 %v12032_v9, %v10679_v4 }
 0x698   :  { %6315 = vrot.lane.b32.xlu1 %v10908_v40, %s8275_s30  ;;  %6313 = vrot.lane.b32.xlu0 %v10904_v42, %s8275_s30  ;;  %12033 = vst [vmem:[#allocation36_spill] sm:$0xff] %v11020_v19 }
 0x69a   :  { %v10919_v15 = vpop.permute.xlu1 %5902  ;;  %v10921_v53 = vpop.permute.xlu0 %5892 }
 0x69b   :  { %v10936_v7 = vsel %vm780_vm5, %v10919_v15, %v10879_v52 }
 0x69c   :  { %6317 = vrot.lane.b32.xlu2 %v10925_v2, %s8275_s30 }
 0x69e   :  { %v10948_v16 = vpop.permute.xlu2 %5916 }
 0x6a0   :  { %6321 = vrot.lane.b32.xlu1 %v10946_v33, %s8275_s30  ;;  %6319 = vrot.lane.b32.xlu0 %v10942_v36, %s8275_s30 }
 0x6a2   :  { %v10957_v6 = vpop.permute.xlu1 %5894  ;;  %v10959_v26 = vpop.permute.xlu0 %5900 }
 0x6a4   :  { %6323 = vrot.lane.b32.xlu2 %v10966_v11, %s8275_s30 }
 0x6a6   :  { %v10983_v63 = vpop.permute.xlu2 %5922 }
 0x6a8   :  { %6327 = vrot.lane.b32.xlu1 %v10981_v17, %s8275_s30  ;;  %6325 = vrot.lane.b32.xlu0 %v10977_v48, %s8275_s30  ;;  %v11006_v48 = vmax.f32 %v12030_v27, %v5984_v35  ;;  %v5987_v27 = vsel %vm780_vm5, %v10805_v3, %v10701_v37  ;;  %v11032_v35 = vmax.f32 %v12035_v43, %v5986_v59  ;;  %v12038_v3 = vld [vmem:[#allocation11_spill] sm:$0xff]  ;;  %v12042_v43 = vmax.f32 %v12041_v1, 0.0  ;;  %v12049_v1 = vld [vmem:[#allocation22_spill] sm:$0xff] }
 0x6a9   :  { %v12039_v9 = vmax.f32 %v12038_v3, 0.0 }
 0x6aa   :  { %v10993_v21 = vpop.permute.xlu1 %5908  ;;  %v10995_v58 = vpop.permute.xlu0 %5906  ;;  %12036 = vst [vmem:[#allocation6_spill] sm:$0xff] %v11032_v35 }
 0x6ab   :  { %v11051_v59 = vmax.f32 %v12039_v9, %v10707_v18 }
 0x6ac   :  { %6329 = vrot.lane.b32.xlu2 %v11000_v30, %s8275_s30 }
 0x6ad   :  { %12040 = vst [vmem:[#allocation5_spill] sm:$0xff] %v11051_v59 }
 0x6ae   :  { %v11008_v22 = vpop.permute.xlu2 %5928 }
 0x6b0   :  { %8260 = vrot.lane.b32.xlu1 %v8259_v46, %s8275_s30  ;;  %6331 = vrot.lane.b32.xlu0 %v11006_v48, %s8275_s30  ;;  %v12037_v46 = vmax.f32 %v10325_v34, 0.0  ;;  %v5989_v34 = vsel %vm780_vm5, %v10699_v31, %v10826_v56  ;;  %v5991_v31 = vsel %vm780_vm5, %v10755_v47, %v10818_v25 }
 0x6b2   :  { %v11013_v29 = vpop.permute.xlu1 %5914  ;;  %v11015_v13 = vpop.permute.xlu0 %5912  ;;  %v11036_v10 = vmax.f32 %v12037_v46, %v5987_v27  ;;  %v5990_v27 = vsel %vm780_vm5, %v10826_v56, %v10755_v47  ;;  %v11063_v46 = vmax.f32 %v12042_v43, %v5989_v34  ;;  %v12046_v34 = vld [vmem:[#allocation23_spill] sm:$0xff]  ;;  %v5993_v47 = vsel %vm780_vm5, %v10857_v45, %v10776_v41 }
 0x6b3   :  { %v12050_v43 = vmax.f32 %v12049_v1, 0.0  ;;  %v12056_v1 = vld [vmem:[#allocation38_spill] sm:$0xff] }
 0x6b4   :  { %6335 = vrot.lane.b32.xlu2 %v11020_v19, %s8275_s30  ;;  %12043 = vst [vmem:[#allocation11_spill] sm:$0xff] %v11063_v46 }
 0x6b6   :  { %v11038_v4 = vpop.permute.xlu2 %5934 }
 0x6b8   :  { %6339 = vrot.lane.b32.xlu1 %v11036_v10, %s8275_s30  ;;  %6337 = vrot.lane.b32.xlu0 %v11032_v35, %s8275_s30  ;;  %v12044_v35 = vld [vmem:[#allocation16_spill] sm:$0xff] }
 0x6b9   :  { %v12045_v19 = vmax.f32 %v12044_v35, 0.0  ;;  %v12047_v35 = vmax.f32 %v12046_v34, 0.0 }
 0x6ba   :  { %v11044_v5 = vpop.permute.xlu1 %5920  ;;  %v11046_v37 = vpop.permute.xlu0 %5918 }
 0x6bb   :  { %v11067_v3 = vmax.f32 %v12045_v19, %v5990_v27  ;;  %v11084_v19 = vmax.f32 %v12047_v35, %v5991_v31  ;;  %v5992_v27 = vsel %vm780_vm5, %v10818_v25, %v10857_v45  ;;  %v5994_v25 = vsel %vm780_vm5, %v10776_v41, %v10855_v60 }
 0x6bc   :  { %6341 = vrot.lane.b32.xlu2 %v11051_v59, %s8275_s30  ;;  %v12052_v59 = vmax.f32 %v10454_v55, 0.0  ;;  %v5996_v41 = vsel %vm780_vm5, %v10888_v51, %v10792_v28 }
 0x6bd   :  { %12048 = vst [vmem:[#allocation17_spill] sm:$0xff] %v11084_v19 }
 0x6be   :  { %v11069_v18 = vpop.permute.xlu2 %5940  ;;  %v11100_v34 = vmax.f32 %v12052_v59, %v5993_v47  ;;  %v5995_v47 = vsel %vm780_vm5, %v10855_v60, %v10888_v51  ;;  %v5997_v60 = vsel %vm780_vm5, %v10792_v28, %v10921_v53  ;;  %v5999_v28 = vsel %vm780_vm5, %v10957_v6, %v10846_v57 }
 0x6c0   :  { %6345 = vrot.lane.b32.xlu1 %v11067_v3, %s8275_s30  ;;  %6343 = vrot.lane.b32.xlu0 %v11063_v46, %s8275_s30  ;;  %v11096_v46 = vmax.f32 %v12050_v43, %v5992_v27  ;;  %12053 = vst [vmem:[#allocation23_spill] sm:$0xff] %v11100_v34  ;;  %v12054_v27 = vld [vmem:[#allocation35_spill] sm:$0xff]  ;;  %v12057_v43 = vmax.f32 %v12056_v1, 0.0  ;;  %v12064_v1 = vmax.f32 %v10606_v39, 0.0 }
 0x6c1   :  { %v12055_v55 = vmax.f32 %v12054_v27, 0.0 }
 0x6c2   :  { %v11078_v56 = vpop.permute.xlu1 %5926  ;;  %v11080_v9 = vpop.permute.xlu0 %5924  ;;  %12051 = vst [vmem:[#allocation16_spill] sm:$0xff] %v11096_v46 }
 0x6c3   :  { %v11117_v59 = vmax.f32 %v12055_v55, %v5994_v25 }
 0x6c4   :  { %6347 = vrot.lane.b32.xlu2 %v11084_v19, %s8275_s30  ;;  %v12059_v19 = vld [vmem:[#allocation41_spill] sm:$0xff] }
 0x6c6   :  { %v11102_v31 = vpop.permute.xlu2 %5946 }
 0x6c8   :  { %6351 = vrot.lane.b32.xlu1 %v11100_v34, %s8275_s30  ;;  %6349 = vrot.lane.b32.xlu0 %v11096_v46, %s8275_s30  ;;  %v11129_v46 = vmax.f32 %v12057_v43, %v5995_v47  ;;  %v12060_v34 = vmax.f32 %v12059_v19, 0.0  ;;  %v12061_v47 = vld [vmem:[#allocation37_spill] sm:$0xff] }
 0x6c9   :  { %v12062_v19 = vmax.f32 %v12061_v47, 0.0 }
 0x6ca   :  { %v11111_v45 = vpop.permute.xlu1 %8255  ;;  %v11113_v35 = vpop.permute.xlu0 %5930  ;;  %12058 = vst [vmem:[#allocation22_spill] sm:$0xff] %v11129_v46  ;;  %v11133_v27 = vmax.f32 %v12060_v34, %v5996_v41  ;;  %v5998_v41 = vsel %vm780_vm5, %v10921_v53, %v10957_v6 }
 0x6cb   :  { %v11150_v34 = vmax.f32 %v12062_v19, %v5997_v60  ;;  %v11162_v43 = vmax.f32 %v12064_v1, %v5998_v41  ;;  %v12068_v19 = vunpack.i.h.bf16 %v10768_v54  ;;  %v6001_v54 = vsel %vm780_vm5, %v10959_v26, %v10919_v15  ;;  %v12073_v1 = vld [vmem:[#allocation8_spill] sm:$0xff] }
 0x6cc   :  { %6353 = vrot.lane.b32.xlu2 %v11117_v59, %s8275_s30  ;;  %v6005_v26 = vsel %vm780_vm5, %v10993_v21, %v10910_v32 }
 0x6cd   :  { %12063 = vst [vmem:[#allocation35_spill] sm:$0xff] %v11150_v34  ;;  %v6000_v53 = vsel %vm780_vm5, %v10846_v57, %v12068_v19  ;;  %v12070_v57 = vld [vmem:[#allocation7_spill] sm:$0xff]  ;;  %v12074_v19 = vmax.f32 %v12073_v1, 0.0 }
 0x6ce   :  { %v11135_v25 = vpop.permute.xlu2 %5952  ;;  %12065 = vst [vmem:[#allocation38_spill] sm:$0xff] %v11162_v43  ;;  %v12071_v41 = vmax.f32 %v12070_v57, 0.0  ;;  %v12079_v57 = vld [vmem:[#allocation19_spill] sm:$0xff] }
 0x6d0   :  { %6357 = vrot.lane.b32.xlu1 %v11133_v27, %s8275_s30  ;;  %6355 = vrot.lane.b32.xlu0 %v11129_v46, %s8275_s30  ;;  %v12066_v46 = vmax.f32 %v10628_v8, 0.0  ;;  %v12069_v8 = vmax.f32 %v10617_v44, 0.0  ;;  %v6003_v44 = vsel %vm780_vm5, %v10879_v52, %v10995_v58 }
 0x6d2   :  { %v11144_v51 = vpop.permute.xlu1 %5938  ;;  %v11146_v55 = vpop.permute.xlu0 %5936  ;;  %v11166_v47 = vmax.f32 %v12066_v46, %v5999_v28  ;;  %v11184_v46 = vmax.f32 %v12069_v8, %v6000_v53  ;;  %v11194_v28 = vmax.f32 %v12071_v41, %v10936_v7  ;;  %v6004_v53 = vsel %vm780_vm5, %v10995_v58, %v10993_v21  ;;  %v12076_v8 = vld [vmem:[#allocation13_spill] sm:$0xff] }
 0x6d3   :  { %v12077_v52 = vmax.f32 %v12076_v8, 0.0  ;;  %v12080_v41 = vmax.f32 %v12079_v57, 0.0  ;;  %v6006_v21 = vsel %vm780_vm5, %v10910_v32, %v11015_v13 }
 0x6d4   :  { %6359 = vrot.lane.b32.xlu2 %v11150_v34, %s8275_s30  ;;  %12067 = vst [vmem:[#allocation41_spill] sm:$0xff] %v11166_v47 }
 0x6d5   :  { %12072 = vst [vmem:[#allocation37_spill] sm:$0xff] %v11194_v28  ;;  %v11227_v1 = vmax.f32 %v12080_v41, %v6005_v26  ;;  %v6007_v26 = vsel %vm780_vm5, %v11015_v13, %v11013_v29 }
 0x6d6   :  { %v11168_v60 = vpop.permute.xlu2 %5958 }
 0x6d7   :  { %12081 = vst [vmem:[#allocation13_spill] sm:$0xff] %v11227_v1 }
 0x6d8   :  { %6363 = vrot.lane.b32.xlu1 %v11166_v47, %s8275_s30  ;;  %6361 = vrot.lane.b32.xlu0 %v11162_v43, %s8275_s30  ;;  %v11198_v43 = vmax.f32 %v12074_v19, %v6001_v54  ;;  %v11221_v54 = vmax.f32 %v12077_v52, %v6003_v44  ;;  %v12082_v19 = vld [vmem:[#allocation12_spill] sm:$0xff] }
 0x6d9   :  { %v12088_v52 = vld [vmem:[#allocation24_spill] sm:$0xff] }
 0x6da   :  { %v11178_v39 = vpop.permute.xlu1 %5944  ;;  %v11180_v6 = vpop.permute.xlu0 %5942  ;;  %12075 = vst [vmem:[#allocation7_spill] sm:$0xff] %v11198_v43  ;;  %v12089_v57 = vmax.f32 %v12088_v52, 0.0 }
 0x6db   :  { %12078 = vst [vmem:[#allocation8_spill] sm:$0xff] %v11221_v54 }
 0x6dc   :  { %6365 = vrot.lane.b32.xlu2 %v11184_v46, %s8275_s30 }
 0x6de   :  { %v11200_v34 = vpop.permute.xlu2 %5964 }
 0x6e0   :  { %6371 = vrot.lane.b32.xlu1 %v11194_v28, %s8275_s30  ;;  %6369 = vrot.lane.b32.xlu0 %v11198_v43, %s8275_s30  ;;  %v12083_v43 = vmax.f32 %v12082_v19, 0.0  ;;  %v12091_v19 = vld [vmem:[#allocation25_spill] sm:$0xff] }
 0x6e2   :  { %v11209_v15 = vpop.permute.xlu1 %5950  ;;  %v11211_v7 = vpop.permute.xlu0 %5948  ;;  %v11231_v28 = vmax.f32 %v12083_v43, %v6004_v53  ;;  %v6008_v43 = vsel %vm780_vm5, %v11013_v29, %v10948_v16  ;;  %v12085_v53 = vld [vmem:[#allocation18_spill] sm:$0xff]  ;;  %v6009_v29 = vsel %vm780_vm5, %v10948_v16, %v11046_v37 }
 0x6e3   :  { %v12086_v32 = vmax.f32 %v12085_v53, 0.0  ;;  %v11258_v41 = vmax.f32 %v12089_v57, %v6008_v43  ;;  %v6010_v43 = vsel %vm780_vm5, %v11046_v37, %v11044_v5  ;;  %v6014_v37 = vsel %vm780_vm5, %v11078_v56, %v11008_v22 }
 0x6e4   :  { %6373 = vrot.lane.b32.xlu2 %v11221_v54, %s8275_s30  ;;  %12084 = vst [vmem:[#allocation19_spill] sm:$0xff] %v11231_v28 }
 0x6e5   :  { %v11252_v8 = vmax.f32 %v12086_v32, %v6006_v21  ;;  %12090 = vst [vmem:[#allocation18_spill] sm:$0xff] %v11258_v41  ;;  %v12096_v32 = vld [vmem:[#allocation32_spill] sm:$0xff] }
 0x6e6   :  { %v6306_v47 = vpop.permute.xlu2 %6305  ;;  %v12097_v52 = vmax.f32 %v12096_v32, 0.0 }
 0x6e7   :  { %12087 = vst [vmem:[#allocation12_spill] sm:$0xff] %v11252_v8 }
 0x6e8   :  { %6377 = vrot.lane.b32.xlu1 %v11227_v1, %s8275_s30  ;;  %6375 = vrot.lane.b32.xlu0 %v11231_v28, %s8275_s30  ;;  %v12092_v28 = vmax.f32 %v12091_v19, 0.0  ;;  %v12098_v19 = vld [vmem:[#allocation28_spill] sm:$0xff] }
 0x6ea   :  { %v11240_v58 = vpop.permute.xlu1 %5956  ;;  %v11242_v44 = vpop.permute.xlu0 %5954  ;;  %v11262_v54 = vmax.f32 %v12092_v28, %v6007_v26  ;;  %v6011_v28 = vsel %vm780_vm5, %v11044_v5, %v10983_v63  ;;  %v12094_v26 = vld [vmem:[#allocation29_spill] sm:$0xff]  ;;  %v6012_v5 = vsel %vm780_vm5, %v10983_v63, %v11080_v9 }
 0x6eb   :  { %v12095_v16 = vmax.f32 %v12094_v26, 0.0  ;;  %v11291_v57 = vmax.f32 %v12097_v52, %v6011_v28 }
 0x6ec   :  { %6379 = vrot.lane.b32.xlu2 %v11252_v8, %s8275_s30  ;;  %12093 = vst [vmem:[#allocation24_spill] sm:$0xff] %v11262_v54 }
 0x6ed   :  { %v11285_v53 = vmax.f32 %v12095_v16, %v6009_v29 }
 0x6ee   :  { %v11264_v1 = vpop.permute.xlu2 %6311 }
 0x6f0   :  { %6383 = vrot.lane.b32.xlu1 %v11258_v41, %s8275_s30  ;;  %6381 = vrot.lane.b32.xlu0 %v11262_v54, %s8275_s30  ;;  %v12099_v54 = vmax.f32 %v12098_v19, 0.0  ;;  %v12102_v19 = vmax.f32 %v10551_v61, 0.0 }
 0x6f2   :  { %v11273_v13 = vpop.permute.xlu1 %5962  ;;  %v11275_v21 = vpop.permute.xlu0 %5960  ;;  %v11295_v8 = vmax.f32 %v12099_v54, %v6010_v43  ;;  %v6013_v54 = vsel %vm780_vm5, %v11080_v9, %v11078_v56  ;;  %v12101_v43 = vmax.f32 %v10495_v0, 0.0  ;;  %v12103_v56 = vmax.f32 %v10697_v23, 0.0 }
 0x6f3   :  { %v8258_v9 = vunpack.i.h.bf16 %v11111_v45 }
 0x6f4   :  { %6385 = vrot.lane.b32.xlu2 %v11285_v53, %s8275_s30  ;;  %12100 = vst [vmem:[#allocation25_spill] sm:$0xff] %v11295_v8  ;;  %v11314_v26 = vmax.f32 %v12101_v43, %v6012_v5  ;;  %v11328_v0 = vmax.f32 %v12103_v56, %v6013_v54  ;;  %v8257_v5 = vunpack.i.l.bf16 %v11111_v45  ;;  %v12105_v56 = vmax.f32 %v10726_v50, 0.0 }
 0x6f5   :  { %v6232_v23 = vmax.f32 %v8258_v9, 0.0  ;;  %v6019_v50 = vsel %vm780_vm5, %v11144_v51, %v11069_v18 }
 0x6f6   :  { %v11297_v41 = vpop.permute.xlu2 %6317  ;;  %v6016_v54 = vsel %vm780_vm5, %v11113_v35, %v8257_v5 }
 0x6f8   :  { %6389 = vrot.lane.b32.xlu1 %v11291_v57, %s8275_s30  ;;  %6387 = vrot.lane.b32.xlu0 %v11295_v8, %s8275_s30  ;;  %v11324_v8 = vmax.f32 %v12102_v19, %v6014_v37  ;;  %v12104_v37 = vmax.f32 %v10715_v49, 0.0 }
 0x6fa   :  { %v6304_v29 = vpop.permute.xlu1 %6303  ;;  %v6302_v28 = vpop.permute.xlu0 %6301 }
 0x6fb   :  { %v6439_v63 = vsel %vm1090_vm7, %v6304_v29, %v6306_v47  ;;  %v6438_v16 = vsel %vm1090_vm7, %v6302_v28, %v6304_v29 }
 0x6fc   :  { %v6567_v32 = vmax.f32 %v10844_v14, %v6439_v63  ;;  %v6566_v52 = vmax.f32 %v10840_v12, %v6438_v16  ;;  %6391 = vrot.lane.b32.xlu2 %v11314_v26, %s8275_s30  ;;  %v6015_v14 = vsel %vm780_vm5, %v11008_v22, %v11113_v35  ;;  %v6215_v12 = vmax.f32 %v8257_v5, 0.0 }
 0x6fd   :  { %v11351_v29 = vmax.f32 %v12104_v37, %v6015_v14  ;;  %v11366_v35 = vmax.f32 %v12105_v56, %v6016_v54 }
 0x6fe   :  { %6631 = vst [vmem:[%s11846_s6 + $0x8] sm:$0xff] %v6567_v32  ;;  %v11341_v61 = vpop.permute.xlu2 %6323  ;;  %v8264_v19 = vpack.i.bf16 %v6232_v23, %v6215_v12 }
 0x6ff   :  { %6630 = vst [vmem:[%s11846_s6] sm:$0xff] %v6566_v52 }
 0x700   :  { %6395 = vrot.lane.b32.xlu1 %v11324_v8, %s8275_s30  ;;  %6393 = vrot.lane.b32.xlu0 %v11328_v0, %s8275_s30 }
 0x702   :  { %v6310_v22 = vpop.permute.xlu1 %6309  ;;  %v6308_v28 = vpop.permute.xlu0 %6307 }
 0x703   :  { %v6442_v43 = vsel %vm1090_vm7, %v6310_v22, %v11264_v1  ;;  %v6440_v63 = vsel %vm1090_vm7, %v6306_v47, %v6308_v28  ;;  %v6441_v16 = vsel %vm1090_vm7, %v6308_v28, %v6310_v22 }
 0x704   :  { %v6570_v32 = vmax.f32 %v10877_v20, %v6442_v43  ;;  %v6568_v52 = vmax.f32 %v10861_v24, %v6440_v63  ;;  %v6569_v49 = vmax.f32 %v10873_v38, %v6441_v16  ;;  %6397 = vrot.lane.b32.xlu2 %v11351_v29, %s8275_s30  ;;  %v6017_v24 = vsel %vm780_vm5, %v11038_v4, %v11146_v55  ;;  %v12106_v4 = vld [vmem:[#allocation10_spill] sm:$0xff]  ;;  %v12110_v16 = vld [vmem:[#allocation9_spill] sm:$0xff] }
 0x705   :  { %v6018_v38 = vsel %vm780_vm5, %v11146_v55, %v11144_v51  ;;  %v12107_v14 = vmax.f32 %v12106_v4, 0.0  ;;  %v12108_v55 = vld [vmem:[#allocation15_spill] sm:$0xff] }
 0x706   :  { %6634 = vst [vmem:[%s11846_s6 + $0x20] sm:$0xff] %v6570_v32  ;;  %v11374_v20 = vpop.permute.xlu2 %6329  ;;  %v12109_v43 = vmax.f32 %v12108_v55, 0.0  ;;  %v12111_v32 = vmax.f32 %v12110_v16, 0.0 }
 0x707   :  { %6632 = vst [vmem:[%s11846_s6 + $0x10] sm:$0xff] %v6568_v52  ;;  %v11393_v23 = vmax.f32 %v12107_v14, %v6017_v24 }
 0x708   :  { %6633 = vst [vmem:[%s11846_s6 + $0x18] sm:$0xff] %v6569_v49  ;;  %8265 = vrot.lane.b32.xlu1 %v8264_v19, %s8275_s30  ;;  %6399 = vrot.lane.b32.xlu0 %v11366_v35, %s8275_s30  ;;  %v11407_v63 = vmax.f32 %v12109_v43, %v6019_v50  ;;  %v11411_v52 = vmax.f32 %v12111_v32, %v6018_v38  ;;  %v12112_v19 = vld [vmem:[#allocation14_spill] sm:$0xff] }
 0x709   :  { %v12113_v56 = vmax.f32 %v12112_v19, 0.0 }
 0x70a   :  { %v6316_v47 = vpop.permute.xlu1 %6315  ;;  %v6314_v5 = vpop.permute.xlu0 %6313 }
 0x70b   :  { %v6445_v12 = vsel %vm1090_vm7, %v6316_v47, %v11297_v41  ;;  %v6443_v37 = vsel %vm1090_vm7, %v11264_v1, %v6314_v5  ;;  %v6444_v22 = vsel %vm1090_vm7, %v6314_v5, %v6316_v47  ;;  %v6021_v1 = vsel %vm780_vm5, %v11180_v6, %v11178_v39 }
 0x70c   :  { %v6573_v28 = vmax.f32 %v10908_v40, %v6445_v12  ;;  %v6571_v54 = vmax.f32 %v10895_v62, %v6443_v37  ;;  %v6572_v51 = vmax.f32 %v10904_v42, %v6444_v22  ;;  %6403 = vrot.lane.b32.xlu2 %v11393_v23, %s8275_s30  ;;  %v6020_v62 = vsel %vm780_vm5, %v11069_v18, %v11180_v6  ;;  %v12114_v6 = vld [vmem:[#allocation20_spill] sm:$0xff]  ;;  %v12116_v37 = vld [vmem:[#allocation21_spill] sm:$0xff] }
 0x70d   :  { %v6022_v42 = vsel %vm780_vm5, %v11178_v39, %v11102_v31  ;;  %v11439_v24 = vmax.f32 %v12113_v56, %v6020_v62  ;;  %v12115_v14 = vmax.f32 %v12114_v6, 0.0  ;;  %v12117_v22 = vmax.f32 %v12116_v37, 0.0  ;;  %v12123_v56 = vld [vmem:[#allocation26_spill] sm:$0xff] }
 0x70e   :  { %6637 = vst [vmem:[%s11846_s6 + $0x38] sm:$0xff] %v6573_v28  ;;  %v11419_v40 = vpop.permute.xlu2 %6335 }
 0x70f   :  { %6635 = vst [vmem:[%s11846_s6 + $0x28] sm:$0xff] %v6571_v54  ;;  %v11453_v12 = vmax.f32 %v12115_v14, %v6022_v42  ;;  %v11457_v28 = vmax.f32 %v12117_v22, %v6021_v1 }
 0x710   :  { %6636 = vst [vmem:[%s11846_s6 + $0x30] sm:$0xff] %v6572_v51  ;;  %6407 = vrot.lane.b32.xlu1 %v11407_v63, %s8275_s30  ;;  %6405 = vrot.lane.b32.xlu0 %v11411_v52, %s8275_s30  ;;  %v12118_v51 = vld [vmem:[#allocation27_spill] sm:$0xff] }
 0x711   :  { %v12119_v55 = vmax.f32 %v12118_v51, 0.0 }
 0x712   :  { %v6322_v49 = vpop.permute.xlu1 %6321  ;;  %v6320_v18 = vpop.permute.xlu0 %6319 }
 0x713   :  { %v6448_v50 = vsel %vm1090_vm7, %v6322_v49, %v11341_v61  ;;  %v6446_v38 = vsel %vm1090_vm7, %v11297_v41, %v6320_v18  ;;  %v6447_v47 = vsel %vm1090_vm7, %v6320_v18, %v6322_v49  ;;  %v6024_v41 = vsel %vm780_vm5, %v11211_v7, %v11209_v15  ;;  %v12120_v49 = vld [vmem:[#allocation44_spill] sm:$0xff] }
 0x714   :  { %v6576_v5 = vmax.f32 %v10946_v33, %v6448_v50  ;;  %v6574_v4 = vmax.f32 %v10925_v2, %v6446_v38  ;;  %v6575_v39 = vmax.f32 %v10942_v36, %v6447_v47  ;;  %6409 = vrot.lane.b32.xlu2 %v11439_v24, %s8275_s30  ;;  %v6023_v36 = vsel %vm780_vm5, %v11102_v31, %v11211_v7  ;;  %v12121_v7 = vld [vmem:[#allocation31_spill] sm:$0xff] }
 0x715   :  { %v6025_v33 = vsel %vm780_vm5, %v11209_v15, %v11135_v25  ;;  %v11485_v43 = vmax.f32 %v12119_v55, %v6023_v36  ;;  %v12122_v18 = vmax.f32 %v12121_v7, 0.0  ;;  %v12124_v50 = vmax.f32 %v12123_v56, 0.0 }
 0x716   :  { %6640 = vst [vmem:[%s11846_s6 + $0x50] sm:$0xff] %v6576_v5  ;;  %v11465_v2 = vpop.permute.xlu2 %6341  ;;  %v6030_v55 = vsel %vm780_vm5, %v11275_v21, %v11273_v13 }
 0x717   :  { %6638 = vst [vmem:[%s11846_s6 + $0x40] sm:$0xff] %v6574_v4  ;;  %v11499_v19 = vmax.f32 %v12122_v18, %v6025_v33  ;;  %v11503_v38 = vmax.f32 %v12124_v50, %v6024_v41  ;;  %v12125_v4 = vld [vmem:[#allocation30_spill] sm:$0xff]  ;;  %v12127_v33 = vld [vmem:[#allocation33_spill] sm:$0xff]  ;;  %v12133_v18 = vld [vmem:[#allocation36_spill] sm:$0xff] }
 0x718   :  { %6639 = vst [vmem:[%s11846_s6 + $0x48] sm:$0xff] %v6575_v39  ;;  %6413 = vrot.lane.b32.xlu1 %v11453_v12, %s8275_s30  ;;  %6411 = vrot.lane.b32.xlu0 %v11457_v28, %s8275_s30  ;;  %v12126_v39 = vmax.f32 %v12125_v4, 0.0  ;;  %v12128_v41 = vmax.f32 %v12127_v33, 0.0  ;;  %v12134_v50 = vld [vmem:[#allocation6_spill] sm:$0xff] }
 0x71a   :  { %v6328_v54 = vpop.permute.xlu1 %6327  ;;  %v6326_v31 = vpop.permute.xlu0 %6325 }
 0x71b   :  { %v6451_v16 = vsel %vm1090_vm7, %v6328_v54, %v11374_v20  ;;  %v6449_v32 = vsel %vm1090_vm7, %v11341_v61, %v6326_v31  ;;  %v6450_v62 = vsel %vm1090_vm7, %v6326_v31, %v6328_v54  ;;  %v6028_v61 = vsel %vm780_vm5, %v11240_v58, %v11168_v60 }
 0x71c   :  { %v6579_v42 = vmax.f32 %v10981_v17, %v6451_v16  ;;  %v6577_v1 = vmax.f32 %v10966_v11, %v6449_v32  ;;  %v6578_v15 = vmax.f32 %v12120_v49, %v6450_v62  ;;  %6415 = vrot.lane.b32.xlu2 %v11485_v43, %s8275_s30  ;;  %v6026_v17 = vsel %vm780_vm5, %v11135_v25, %v11242_v44  ;;  %v12131_v32 = vld [vmem:[#allocation40_spill] sm:$0xff] }
 0x71d   :  { %v6027_v25 = vsel %vm780_vm5, %v11242_v44, %v11240_v58  ;;  %v11531_v6 = vmax.f32 %v12126_v39, %v6026_v17  ;;  %v11541_v54 = vmax.f32 %v12128_v41, %v6028_v61  ;;  %v12129_v58 = vld [vmem:[#allocation34_spill] sm:$0xff]  ;;  %v12132_v62 = vmax.f32 %v12131_v32, 0.0  ;;  %v12141_v41 = vld [vmem:[#allocation5_spill] sm:$0xff] }
 0x71e   :  { %6643 = vst [vmem:[%s11846_s6 + $0x68] sm:$0xff] %v6579_v42  ;;  %v11511_v11 = vpop.permute.xlu2 %6347  ;;  %v12130_v44 = vmax.f32 %v12129_v58, 0.0 }
 0x71f   :  { %6641 = vst [vmem:[%s11846_s6 + $0x58] sm:$0xff] %v6577_v1 }
 0x720   :  { %6642 = vst [vmem:[%s11846_s6 + $0x60] sm:$0xff] %v6578_v15  ;;  %6419 = vrot.lane.b32.xlu1 %v11499_v19, %s8275_s30  ;;  %6417 = vrot.lane.b32.xlu0 %v11503_v38, %s8275_s30  ;;  %v11545_v31 = vmax.f32 %v12130_v44, %v6027_v25  ;;  %v12142_v44 = vld [vmem:[#allocation11_spill] sm:$0xff] }
 0x722   :  { %v8261_v47 = vpop.permute.xlu1 %8260  ;;  %v6332_v5 = vpop.permute.xlu0 %6331 }
 0x723   :  { %v8262_v14 = vunpack.i.l.bf16 %v8261_v47  ;;  %v6452_v37 = vsel %vm1090_vm7, %v11374_v20, %v6332_v5  ;;  %v6029_v20 = vsel %vm780_vm5, %v11168_v60, %v11275_v21  ;;  %v12135_v21 = vld [vmem:[#allocation42_spill] sm:$0xff] }
 0x724   :  { %v6580_v22 = vmax.f32 %v11000_v30, %v6452_v37  ;;  %6421 = vrot.lane.b32.xlu2 %v11531_v6, %s8275_s30  ;;  %v11569_v42 = vmax.f32 %v12132_v62, %v6029_v20  ;;  %v12136_v17 = vmax.f32 %v12135_v21, 0.0  ;;  %v12139_v37 = vld [vmem:[#allocation43_spill] sm:$0xff]  ;;  %v8263_v20 = vunpack.i.h.bf16 %v8261_v47 }
 0x725   :  { %v6453_v36 = vsel %vm1090_vm7, %v6332_v5, %v8262_v14  ;;  %v12137_v5 = vld [vmem:[#allocation39_spill] sm:$0xff] }
 0x726   :  { %v6581_v51 = vmax.f32 %v11006_v48, %v6453_v36  ;;  %6644 = vst [vmem:[%s11846_s6 + $0x70] sm:$0xff] %v6580_v22  ;;  %v6354_v30 = vpop.permute.xlu2 %6353  ;;  %v6031_v48 = vsel %vm780_vm5, %v11273_v13, %v11200_v34  ;;  %v12138_v25 = vmax.f32 %v12137_v5, 0.0  ;;  %v12140_v22 = vmax.f32 %v12139_v37, 0.0  ;;  %v12143_v62 = vld [vmem:[#allocation23_spill] sm:$0xff] }
 0x727   :  { %v11583_v61 = vmax.f32 %v12136_v17, %v6031_v48 }
 0x728   :  { %6645 = vst [vmem:[%s11846_s6 + $0x78] sm:$0xff] %v6581_v51  ;;  %6425 = vrot.lane.b32.xlu1 %v11541_v54, %s8275_s30  ;;  %6423 = vrot.lane.b32.xlu0 %v11545_v31, %s8275_s30  ;;  %v11587_v4 = vmax.f32 %v12138_v25, %v6030_v55  ;;  %v12146_v25 = vld [vmem:[#allocation22_spill] sm:$0xff] }
 0x72a   :  { %v6340_v16 = vpop.permute.xlu1 %6339  ;;  %v6338_v60 = vpop.permute.xlu0 %6337 }
 0x72b   :  { %v6456_v1 = vsel %vm1090_vm7, %v6340_v16, %v11465_v2  ;;  %v6454_v49 = vsel %vm1090_vm7, %v11419_v40, %v6338_v60  ;;  %v6455_v15 = vsel %vm1090_vm7, %v6338_v60, %v6340_v16  ;;  %v6032_v40 = vsel %vm780_vm5, %v11200_v34, %v8258_v9 }
 0x72c   :  { %v6584_v7 = vmax.f32 %v11036_v10, %v6456_v1  ;;  %v6582_v56 = vmax.f32 %v12133_v18, %v6454_v49  ;;  %v6583_v13 = vmax.f32 %v12134_v50, %v6455_v15  ;;  %6427 = vrot.lane.b32.xlu2 %v11569_v42, %s8275_s30  ;;  %v11608_v36 = vmax.f32 %v12140_v22, %v6032_v40  ;;  %v12144_v49 = vld [vmem:[#allocation17_spill] sm:$0xff] }
 0x72d   :  { %v12147_v22 = vld [vmem:[#allocation41_spill] sm:$0xff] }
 0x72e   :  { %6648 = vst [vmem:[%s11846_s6 + $0x90] sm:$0xff] %v6584_v7  ;;  %v6360_v10 = vpop.permute.xlu2 %6359  ;;  %v12145_v7 = vld [vmem:[#allocation16_spill] sm:$0xff] }
 0x72f   :  { %6646 = vst [vmem:[%s11846_s6 + $0x80] sm:$0xff] %v6582_v56 }
 0x730   :  { %6647 = vst [vmem:[%s11846_s6 + $0x88] sm:$0xff] %v6583_v13  ;;  %6431 = vrot.lane.b32.xlu1 %v11583_v61, %s8275_s30  ;;  %6429 = vrot.lane.b32.xlu0 %v11587_v4, %s8275_s30 }
 0x732   :  { %v6346_v39 = vpop.permute.xlu1 %6345  ;;  %v6344_v14 = vpop.permute.xlu0 %6343 }
 0x733   :  { %v6459_v45 = vsel %vm1090_vm7, %v6346_v39, %v11511_v11  ;;  %v6457_v34 = vsel %vm1090_vm7, %v11465_v2, %v6344_v14  ;;  %v6458_v9 = vsel %vm1090_vm7, %v6344_v14, %v6346_v39 }
 0x734   :  { %v6587_v33 = vmax.f32 %v11067_v3, %v6459_v45  ;;  %v6585_v58 = vmax.f32 %v12141_v41, %v6457_v34  ;;  %v6586_v51 = vmax.f32 %v12142_v44, %v6458_v9  ;;  %6433 = vrot.lane.b32.xlu2 %v11608_v36, %s8275_s30  ;;  %v12148_v34 = vld [vmem:[#allocation35_spill] sm:$0xff] }
 0x736   :  { %6651 = vst [vmem:[%s11846_s6 + $0xa8] sm:$0xff] %v6587_v33  ;;  %v6366_v2 = vpop.permute.xlu2 %6365  ;;  %v12149_v33 = vld [vmem:[#allocation38_spill] sm:$0xff] }
 0x737   :  { %6649 = vst [vmem:[%s11846_s6 + $0x98] sm:$0xff] %v6585_v58  ;;  %v6469_v3 = vsel %vm1090_vm7, %v6366_v2, %v8263_v20 }
 0x738   :  { %6650 = vst [vmem:[%s11846_s6 + $0xa0] sm:$0xff] %v6586_v51  ;;  %v6597_v48 = vmax.f32 %v11184_v46, %v6469_v3 }
 0x73a   :  { %v6352_v55 = vpop.permute.xlu1 %6351  ;;  %v6350_v16 = vpop.permute.xlu0 %6349  ;;  %6661 = vst [vmem:[%s11846_s6 + $0xf8] sm:$0xff] %v6597_v48  ;;  %v12151_v48 = vld [vmem:[#allocation7_spill] sm:$0xff] }
 0x73b   :  { %v6462_v47 = vsel %vm1090_vm7, %v6352_v55, %v6354_v30  ;;  %v6460_v60 = vsel %vm1090_vm7, %v11511_v11, %v6350_v16  ;;  %v6461_v32 = vsel %vm1090_vm7, %v6350_v16, %v6352_v55 }
 0x73c   :  { %v6590_v1 = vmax.f32 %v12143_v62, %v6462_v47  ;;  %v6588_v15 = vmax.f32 %v12144_v49, %v6460_v60  ;;  %v6589_v18 = vmax.f32 %v12145_v7, %v6461_v32  ;;  %v12152_v49 = vld [vmem:[#allocation13_spill] sm:$0xff]  ;;  %v12153_v7 = vld [vmem:[#allocation8_spill] sm:$0xff] }
 0x73e   :  { %6654 = vst [vmem:[%s11846_s6 + $0xc0] sm:$0xff] %v6590_v1  ;;  %v6374_v46 = vpop.permute.xlu2 %6373 }
 0x73f   :  { %6652 = vst [vmem:[%s11846_s6 + $0xb0] sm:$0xff] %v6588_v15 }
 0x740   :  { %6653 = vst [vmem:[%s11846_s6 + $0xb8] sm:$0xff] %v6589_v18 }
 0x742   :  { %v6358_v11 = vpop.permute.xlu1 %6357  ;;  %v6356_v56 = vpop.permute.xlu0 %6355 }
 0x743   :  { %v6465_v50 = vsel %vm1090_vm7, %v6358_v11, %v6360_v10  ;;  %v6463_v13 = vsel %vm1090_vm7, %v6354_v30, %v6356_v56  ;;  %v6464_v21 = vsel %vm1090_vm7, %v6356_v56, %v6358_v11  ;;  %v12154_v11 = vld [vmem:[#allocation19_spill] sm:$0xff] }
 0x744   :  { %v6593_v17 = vmax.f32 %v11133_v27, %v6465_v50  ;;  %v6591_v5 = vmax.f32 %v11117_v59, %v6463_v13  ;;  %v6592_v40 = vmax.f32 %v12146_v25, %v6464_v21  ;;  %v12155_v25 = vld [vmem:[#allocation18_spill] sm:$0xff] }
 0x746   :  { %6657 = vst [vmem:[%s11846_s6 + $0xd8] sm:$0xff] %v6593_v17  ;;  %v6380_v39 = vpop.permute.xlu2 %6379 }
 0x747   :  { %6655 = vst [vmem:[%s11846_s6 + $0xc8] sm:$0xff] %v6591_v5 }
 0x748   :  { %6656 = vst [vmem:[%s11846_s6 + $0xd0] sm:$0xff] %v6592_v40 }
 0x74a   :  { %v6364_v30 = vpop.permute.xlu1 %6363  ;;  %v6362_v14 = vpop.permute.xlu0 %6361 }
 0x74b   :  { %v6468_v27 = vsel %vm1090_vm7, %v6364_v30, %v6366_v2  ;;  %v6466_v59 = vsel %vm1090_vm7, %v6360_v10, %v6362_v14  ;;  %v6467_v37 = vsel %vm1090_vm7, %v6362_v14, %v6364_v30  ;;  %v12150_v2 = vld [vmem:[#allocation37_spill] sm:$0xff]  ;;  %v12156_v30 = vld [vmem:[#allocation12_spill] sm:$0xff] }
 0x74c   :  { %v6596_v45 = vmax.f32 %v12147_v22, %v6468_v27  ;;  %v6594_v9 = vmax.f32 %v12148_v34, %v6466_v59  ;;  %v6595_v41 = vmax.f32 %v12149_v33, %v6467_v37  ;;  %v12157_v27 = vld [vmem:[#allocation24_spill] sm:$0xff] }
 0x74e   :  { %6660 = vst [vmem:[%s11846_s6 + $0xf0] sm:$0xff] %v6596_v45  ;;  %v6386_v58 = vpop.permute.xlu2 %6385 }
 0x74f   :  { %6658 = vst [vmem:[%s11846_s6 + $0xe0] sm:$0xff] %v6594_v9 }
 0x750   :  { %6659 = vst [vmem:[%s11846_s6 + $0xe8] sm:$0xff] %v6595_v41 }
 0x752   :  { %v6372_v10 = vpop.permute.xlu1 %6371  ;;  %v6370_v44 = vpop.permute.xlu0 %6369 }
 0x753   :  { %v6471_v51 = vsel %vm1090_vm7, %v6372_v10, %v6374_v46  ;;  %v6470_v20 = vsel %vm1090_vm7, %v6370_v44, %v6372_v10  ;;  %v12158_v10 = vld [vmem:[#allocation25_spill] sm:$0xff] }
 0x754   :  { %v6599_v3 = vmax.f32 %v12150_v2, %v6471_v51  ;;  %v6598_v55 = vmax.f32 %v12151_v48, %v6470_v20 }
 0x756   :  { %6663 = vst [vmem:[%s11846_s6 + $0x108] sm:$0xff] %v6599_v3  ;;  %v6392_v16 = vpop.permute.xlu2 %6391 }
 0x757   :  { %6662 = vst [vmem:[%s11846_s6 + $0x100] sm:$0xff] %v6598_v55 }
 0x75a   :  { %v6378_v47 = vpop.permute.xlu1 %6377  ;;  %v6376_v60 = vpop.permute.xlu0 %6375 }
 0x75b   :  { %v6474_v32 = vsel %vm1090_vm7, %v6378_v47, %v6380_v39  ;;  %v6472_v62 = vsel %vm1090_vm7, %v6374_v46, %v6376_v60  ;;  %v6473_v1 = vsel %vm1090_vm7, %v6376_v60, %v6378_v47 }
 0x75c   :  { %v6602_v15 = vmax.f32 %v12152_v49, %v6474_v32  ;;  %v6600_v18 = vmax.f32 %v12153_v7, %v6472_v62  ;;  %v6601_v56 = vmax.f32 %v12154_v11, %v6473_v1 }
 0x75e   :  { %6666 = vst [vmem:[%s11846_s6 + $0x120] sm:$0xff] %v6602_v15  ;;  %v6398_v50 = vpop.permute.xlu2 %6397 }
 0x75f   :  { %6664 = vst [vmem:[%s11846_s6 + $0x110] sm:$0xff] %v6600_v18 }
 0x760   :  { %6665 = vst [vmem:[%s11846_s6 + $0x118] sm:$0xff] %v6601_v56 }
 0x762   :  { %v6384_v46 = vpop.permute.xlu1 %6383  ;;  %v6382_v13 = vpop.permute.xlu0 %6381 }
 0x763   :  { %v6477_v21 = vsel %vm1090_vm7, %v6384_v46, %v6386_v58  ;;  %v6475_v17 = vsel %vm1090_vm7, %v6380_v39, %v6382_v13  ;;  %v6476_v5 = vsel %vm1090_vm7, %v6382_v13, %v6384_v46 }
 0x764   :  { %v6605_v40 = vmax.f32 %v12155_v25, %v6477_v21  ;;  %v6603_v14 = vmax.f32 %v12156_v30, %v6475_v17  ;;  %v6604_v59 = vmax.f32 %v12157_v27, %v6476_v5 }
 0x766   :  { %6669 = vst [vmem:[%s11846_s6 + $0x138] sm:$0xff] %v6605_v40  ;;  %v6404_v37 = vpop.permute.xlu2 %6403 }
 0x767   :  { %6667 = vst [vmem:[%s11846_s6 + $0x128] sm:$0xff] %v6603_v14 }
 0x768   :  { %6668 = vst [vmem:[%s11846_s6 + $0x130] sm:$0xff] %v6604_v59 }
 0x76a   :  { %v6390_v39 = vpop.permute.xlu1 %6389  ;;  %v6388_v22 = vpop.permute.xlu0 %6387 }
 0x76b   :  { %v6480_v45 = vsel %vm1090_vm7, %v6390_v39, %v6392_v16  ;;  %v6478_v34 = vsel %vm1090_vm7, %v6386_v58, %v6388_v22  ;;  %v6479_v9 = vsel %vm1090_vm7, %v6388_v22, %v6390_v39 }
 0x76c   :  { %v6608_v33 = vmax.f32 %v11291_v57, %v6480_v45  ;;  %v6606_v41 = vmax.f32 %v11285_v53, %v6478_v34  ;;  %v6607_v44 = vmax.f32 %v12158_v10, %v6479_v9 }
 0x76e   :  { %6672 = vst [vmem:[%s11846_s6 + $0x150] sm:$0xff] %v6608_v33  ;;  %v6410_v51 = vpop.permute.xlu2 %6409 }
 0x76f   :  { %6670 = vst [vmem:[%s11846_s6 + $0x140] sm:$0xff] %v6606_v41 }
 0x770   :  { %6671 = vst [vmem:[%s11846_s6 + $0x148] sm:$0xff] %v6607_v44 }
 0x772   :  { %v6396_v58 = vpop.permute.xlu1 %6395  ;;  %v6394_v20 = vpop.permute.xlu0 %6393 }
 0x773   :  { %v6483_v57 = vsel %vm1090_vm7, %v6396_v58, %v6398_v50  ;;  %v6481_v53 = vsel %vm1090_vm7, %v6392_v16, %v6394_v20  ;;  %v6482_v2 = vsel %vm1090_vm7, %v6394_v20, %v6396_v58 }
 0x774   :  { %v6611_v3 = vmax.f32 %v11324_v8, %v6483_v57  ;;  %v6609_v48 = vmax.f32 %v11314_v26, %v6481_v53  ;;  %v6610_v55 = vmax.f32 %v11328_v0, %v6482_v2 }
 0x776   :  { %6675 = vst [vmem:[%s11846_s6 + $0x168] sm:$0xff] %v6611_v3  ;;  %v6416_v47 = vpop.permute.xlu2 %6415 }
 0x777   :  { %6673 = vst [vmem:[%s11846_s6 + $0x158] sm:$0xff] %v6609_v48 }
 0x778   :  { %6674 = vst [vmem:[%s11846_s6 + $0x160] sm:$0xff] %v6610_v55 }
 0x77a   :  { %v8266_v16 = vpop.permute.xlu1 %8265  ;;  %v6400_v60 = vpop.permute.xlu0 %6399 }
 0x77b   :  { %v8267_v8 = vunpack.i.l.bf16 %v8266_v16  ;;  %v6484_v26 = vsel %vm1090_vm7, %v6398_v50, %v6400_v60  ;;  %v8268_v25 = vunpack.i.h.bf16 %v8266_v16 }
 0x77c   :  { %v6612_v0 = vmax.f32 %v11351_v29, %v6484_v26 }
 0x77d   :  { %v6485_v32 = vsel %vm1090_vm7, %v6400_v60, %v8267_v8 }
 0x77e   :  { %v6613_v62 = vmax.f32 %v11366_v35, %v6485_v32  ;;  %6676 = vst [vmem:[%s11846_s6 + $0x170] sm:$0xff] %v6612_v0  ;;  %v6422_v1 = vpop.permute.xlu2 %6421 }
 0x780   :  { %6677 = vst [vmem:[%s11846_s6 + $0x178] sm:$0xff] %v6613_v62 }
 0x782   :  { %v6408_v49 = vpop.permute.xlu1 %6407  ;;  %v6406_v15 = vpop.permute.xlu0 %6405 }
 0x783   :  { %v6488_v7 = vsel %vm1090_vm7, %v6408_v49, %v6410_v51  ;;  %v6486_v18 = vsel %vm1090_vm7, %v6404_v37, %v6406_v15  ;;  %v6487_v29 = vsel %vm1090_vm7, %v6406_v15, %v6408_v49 }
 0x784   :  { %v6616_v11 = vmax.f32 %v11407_v63, %v6488_v7  ;;  %v6614_v35 = vmax.f32 %v11393_v23, %v6486_v18  ;;  %v6615_v56 = vmax.f32 %v11411_v52, %v6487_v29 }
 0x786   :  { %6680 = vst [vmem:[%s11846_s6 + $0x190] sm:$0xff] %v6616_v11  ;;  %v6428_v50 = vpop.permute.xlu2 %6427 }
 0x787   :  { %6678 = vst [vmem:[%s11846_s6 + $0x180] sm:$0xff] %v6614_v35 }
 0x788   :  { %6679 = vst [vmem:[%s11846_s6 + $0x188] sm:$0xff] %v6615_v56 }
 0x78a   :  { %v6414_v46 = vpop.permute.xlu1 %6413  ;;  %v6412_v13 = vpop.permute.xlu0 %6411 }
 0x78b   :  { %v6491_v63 = vsel %vm1090_vm7, %v6414_v46, %v6416_v47  ;;  %v6489_v23 = vsel %vm1090_vm7, %v6410_v51, %v6412_v13  ;;  %v6490_v52 = vsel %vm1090_vm7, %v6412_v13, %v6414_v46 }
 0x78c   :  { %v6619_v21 = vmax.f32 %v11453_v12, %v6491_v63  ;;  %v6617_v17 = vmax.f32 %v11439_v24, %v6489_v23  ;;  %v6618_v5 = vmax.f32 %v11457_v28, %v6490_v52 }
 0x78e   :  { %6683 = vst [vmem:[%s11846_s6 + $0x1a8] sm:$0xff] %v6619_v21  ;;  %v6434_v40 = vpop.permute.xlu2 %6433 }
 0x78f   :  { %6681 = vst [vmem:[%s11846_s6 + $0x198] sm:$0xff] %v6617_v17  ;;  %v6501_v12 = vsel %vm1090_vm7, %v6434_v40, %v8268_v25 }
 0x790   :  { %6682 = vst [vmem:[%s11846_s6 + $0x1a0] sm:$0xff] %v6618_v5  ;;  %v6629_v24 = vmax.f32 %v11608_v36, %v6501_v12 }
 0x792   :  { %v6420_v30 = vpop.permute.xlu1 %6419  ;;  %v6418_v28 = vpop.permute.xlu0 %6417  ;;  %6693 = vst [vmem:[%s11846_s6 + $0x1f8] sm:$0xff] %v6629_v24 }
 0x793   :  { %v6494_v14 = vsel %vm1090_vm7, %v6420_v30, %v6422_v1  ;;  %v6492_v27 = vsel %vm1090_vm7, %v6416_v47, %v6418_v28  ;;  %v6493_v59 = vsel %vm1090_vm7, %v6418_v28, %v6420_v30 }
 0x794   :  { %v6622_v37 = vmax.f32 %v11499_v19, %v6494_v14  ;;  %v6620_v39 = vmax.f32 %v11485_v43, %v6492_v27  ;;  %v6621_v22 = vmax.f32 %v11503_v38, %v6493_v59 }
 0x796   :  { %6686 = vst [vmem:[%s11846_s6 + $0x1c0] sm:$0xff] %v6622_v37 }
 0x797   :  { %6684 = vst [vmem:[%s11846_s6 + $0x1b0] sm:$0xff] %v6620_v39 }
 0x798   :  { %6685 = vst [vmem:[%s11846_s6 + $0x1b8] sm:$0xff] %v6621_v22 }
 0x79a   :  { %v6426_v36 = vpop.permute.xlu1 %6425  ;;  %v6424_v45 = vpop.permute.xlu0 %6423 }
 0x79b   :  { %v6497_v19 = vsel %vm1090_vm7, %v6426_v36, %v6428_v50  ;;  %v6495_v43 = vsel %vm1090_vm7, %v6422_v1, %v6424_v45  ;;  %v6496_v38 = vsel %vm1090_vm7, %v6424_v45, %v6426_v36 }
 0x79c   :  { %v6625_v34 = vmax.f32 %v11541_v54, %v6497_v19  ;;  %v6623_v9 = vmax.f32 %v11531_v6, %v6495_v43  ;;  %v6624_v33 = vmax.f32 %v11545_v31, %v6496_v38 }
 0x79e   :  { %6689 = vst [vmem:[%s11846_s6 + $0x1d8] sm:$0xff] %v6625_v34 }
 0x79f   :  { %6687 = vst [vmem:[%s11846_s6 + $0x1c8] sm:$0xff] %v6623_v9 }
 0x7a0   :  { %6688 = vst [vmem:[%s11846_s6 + $0x1d0] sm:$0xff] %v6624_v33 }
 0x7a2   :  { %v6432_v41 = vpop.permute.xlu1 %6431  ;;  %v6430_v10 = vpop.permute.xlu0 %6429 }
 0x7a3   :  { %v6500_v54 = vsel %vm1090_vm7, %v6432_v41, %v6434_v40  ;;  %v6498_v6 = vsel %vm1090_vm7, %v6428_v50, %v6430_v10  ;;  %v6499_v31 = vsel %vm1090_vm7, %v6430_v10, %v6432_v41 }
 0x7a4   :  { %v6628_v44 = vmax.f32 %v11583_v61, %v6500_v54  ;;  %v6626_v51 = vmax.f32 %v11569_v42, %v6498_v6  ;;  %v6627_v58 = vmax.f32 %v11587_v4, %v6499_v31 }
 0x7a6   :  { %6692 = vst [vmem:[%s11846_s6 + $0x1f0] sm:$0xff] %v6628_v44 }
 0x7a7   :  { %6690 = vst [vmem:[%s11846_s6 + $0x1e0] sm:$0xff] %v6626_v51 }
 0x7a8   :  { %6691 = vst [vmem:[%s11846_s6 + $0x1e8] sm:$0xff] %v6627_v58 }

</bundles_post_ra>
